<compile_context>
chip_gen: v5e
topology: v5e:2x2
jax: 0.10.0
libtpu: 0.0.40
codegen_flags: <defaults>
</compile_context>

<pallas_src>
import math
from functools import partial

import jax
import jax.numpy as jnp
from jax.experimental import pallas as pl
from jax.experimental.pallas import tpu as pltpu

# ----------------------------- model hyperparameters -------------------------
NUM_LAYERS = 2            # encoder layers == decoder layers
D_MODEL = 32
NHEAD = 4
HEAD_DIM = D_MODEL // NHEAD
DIM_FF = 32
VEC_DIM = 16              # dataconfig.vec_dim
OUTPUT_START = 2          # dataconfig.output_start
NUM_CARDS = 4             # dataconfig.num_cards
BATCH = 2
ACT_SEQ_LEN = 8
OBS_SEQ_LEN = 10
LN_EPS = 1e-5
ATTN_SCALE = 1.0 / math.sqrt(HEAD_DIM)

# ----------------------------- packed-parameter layout -----------------------
ATTN_NAMES = ("enc0_sa", "enc1_sa", "dec0_sa", "dec0_ca", "dec1_sa", "dec1_ca")
FFN_NAMES = ("enc0", "enc1", "dec0", "dec1")
LN_NAMES = ("enc0_ln1", "enc0_ln2", "enc1_ln1", "enc1_ln2", "enc_norm",
            "dec0_ln1", "dec0_ln2", "dec0_ln3", "dec1_ln1", "dec1_ln2", "dec1_ln3",
            "dec_norm")

# W slab: every (E, E) matrix, stacked on a leading index axis (static int indexing).
W_IDX = {}
for _bi, _n in enumerate(ATTN_NAMES):
    for _h in range(NHEAD):
        W_IDX[f"{_n}_m{_h}"] = _bi * 2 * NHEAD + _h             # scale * Wq_h @ Wk_h.T
        W_IDX[f"{_n}_vo{_h}"] = _bi * 2 * NHEAD + NHEAD + _h    # Wv_h @ Wo_h
_FFN_BASE = len(ATTN_NAMES) * 2 * NHEAD
for _li, _n in enumerate(FFN_NAMES):
    W_IDX[f"{_n}_w1"] = _FFN_BASE + 2 * _li
    W_IDX[f"{_n}_w2"] = _FFN_BASE + 2 * _li + 1
W_IDX["out_w"] = _FFN_BASE + 2 * len(FFN_NAMES)
N_W = len(W_IDX)                                                # 57


def _v_entries(batch_tile):
    """Ordered (name, n_rows) entries of the (N_rows, D_MODEL) vector slab."""
    ents = [("pe_src", batch_tile * ACT_SEQ_LEN),
            ("pe_tgt", batch_tile * ACT_SEQ_LEN),
            ("fc_w", VEC_DIM),
            ("out_b", 1)]
    for n in ATTN_NAMES:
        ents += [(f"{n}_c", NHEAD), (f"{n}_b", 1)]
    for n in FFN_NAMES:
        ents += [(f"{n}_b1", 1), (f"{n}_b2", 1)]
    for n in LN_NAMES:
        ents += [(f"{n}_g", 1), (f"{n}_b", 1)]
    return ents


def _v_offsets(batch_tile):
    offs, off = {}, 0
    for name, n in _v_entries(batch_tile):
        offs[name] = (off, n)
        off += n
    return offs, off


def _round_up(x, m):
    return (x + m - 1) // m * m


# ----------------------------- the fused forward-pass kernel -----------------
def _make_kernel(batch_tile):
    voffs, _ = _v_offsets(batch_tile)
    L = ACT_SEQ_LEN
    pad_rows = _round_up(batch_tile * NUM_CARDS, 8)   # keep the output block 8-aligned

    def kernel(act_ref, w_ref, v_ref, out_ref):
        def vrow(name):
            off, n = voffs[name]
            return v_ref[off:off + n, :]

        def wmat(name):
            return w_ref[W_IDX[name]]

        def layer_norm(x, name):
            # one-pass: independent reductions so the two XLU reduces can overlap
            mu = jnp.mean(x, axis=-1, keepdims=True)
            ms = jnp.mean(x * x, axis=-1, keepdims=True)
            var = ms - mu * mu
            return ((x - mu) * jax.lax.rsqrt(var + LN_EPS)
                    * vrow(f"{name}_g") + vrow(f"{name}_b"))

        def softmax(s):
            m = jnp.max(s, axis=-1, keepdims=True)
            e = jnp.exp(s - m)
            return e / jnp.sum(e, axis=-1, keepdims=True)   # exact divide (parity)

        def attention(xq, xkv, name):
            """Multi-head attention with folded QK / VO weights; no lane slicing.

            xq, xkv: (batch_tile*L, E) stacked over the batch tile.  The lane-dense
            per-head projections are computed on the stacked rows (shared weights);
            only the tiny (L,L) score / P@VO matmuls are done per batch element.
            """
            c = vrow(f"{name}_c")                                      # (NHEAD, E)
            qm = [jnp.dot(xq, wmat(f"{name}_m{h}"),
                          preferred_element_type=jnp.float32) + c[h:h + 1, :]
                  for h in range(NHEAD)]                               # (bt*L, E) each
            vo = [jnp.dot(xkv, wmat(f"{name}_vo{h}"),
                          preferred_element_type=jnp.float32)
                  for h in range(NHEAD)]                               # (bt*L, E) each
            outs = []
            for b in range(batch_tile):
                rows = slice(b * L, (b + 1) * L)                       # 8-aligned
                kv_b = xkv[rows, :]
                acc = None
                for h in range(NHEAD):
                    s = jax.lax.dot_general(qm[h][rows, :], kv_b,
                                            (((1,), (1,)), ((), ())),
                                            preferred_element_type=jnp.float32)
                    o = jnp.dot(softmax(s), vo[h][rows, :],
                                preferred_element_type=jnp.float32)
                    acc = o if acc is None else acc + o
                outs.append(acc)
            out = outs[0] if batch_tile == 1 else jnp.concatenate(outs, axis=0)
            return out + vrow(f"{name}_b")

        def ffn(x, name):
            h = jnp.maximum(
                jnp.dot(x, wmat(f"{name}_w1"), preferred_element_type=jnp.float32)
                + vrow(f"{name}_b1"), 0.0)
            return (jnp.dot(h, wmat(f"{name}_w2"), preferred_element_type=jnp.float32)
                    + vrow(f"{name}_b2"))

        # ---- fc_card + positional encodings (fc bias pre-folded into pe tables) ----
        x0 = jnp.dot(act_ref[...], vrow("fc_w"), preferred_element_type=jnp.float32)
        src = x0 + vrow("pe_src")     # encoder input:  fc_card(act) + pe1
        tgt = x0 + vrow("pe_tgt")     # decoder input:  fc_card(act) + pe1 + pe2
                                      # (reference bug reproduced: obs is discarded)

        # ------------------------------ encoder (post-norm) ----------------------
        mem = src
        for l in range(NUM_LAYERS):
            mem = layer_norm(mem + attention(mem, mem, f"enc{l}_sa"), f"enc{l}_ln1")
            mem = layer_norm(mem + ffn(mem, f"enc{l}"), f"enc{l}_ln2")
        mem = layer_norm(mem, "enc_norm")

        # ------------------------------ decoder ----------------------------------
        y = tgt
        for l in range(NUM_LAYERS):
            y = layer_norm(y + attention(y, y, f"dec{l}_sa"), f"dec{l}_ln1")
            y = layer_norm(y + attention(y, mem, f"dec{l}_ca"), f"dec{l}_ln2")
            y = layer_norm(y + ffn(y, f"dec{l}"), f"dec{l}_ln3")
        y = layer_norm(y, "dec_norm")

        # ---- output_card on the selected card rows (lane-padded to 32 cols) -----
        card_rows = [y[b * L + OUTPUT_START:b * L + OUTPUT_START + NUM_CARDS, :]
                     for b in range(batch_tile)]
        cards = card_rows[0] if batch_tile == 1 else jnp.concatenate(card_rows, axis=0)
        out = jnp.dot(cards, wmat("out_w"),
                      preferred_element_type=jnp.float32) + vrow("out_b")
        if pad_rows > batch_tile * NUM_CARDS:
            out = jnp.concatenate(
                [out, jnp.zeros((pad_rows - batch_tile * NUM_CARDS, D_MODEL),
                                jnp.float32)], axis=0)
        out_ref[...] = out

    return kernel


# ----------------------------- wrapper ----------------------------------------
@partial(jax.jit, static_argnames=("batch_tile",))
def tom_forward(packed, act_seq, obs, *, batch_tile):
    """act_seq: (B, Sa, vec_dim); obs: (B, So, vec_dim).

    `obs` only feeds a discarded fc_card projection in the reference forward, so
    (matching those semantics) it never influences the output.
    """
    del obs
    w_slab, v_slab = packed
    B, Sa, _ = act_seq.shape
    assert Sa == ACT_SEQ_LEN and B % batch_tile == 0
    steps = B // batch_tile
    rows_in = batch_tile * Sa
    rows_out = _round_up(batch_tile * NUM_CARDS, 8)

    act_flat = act_seq.reshape(B * Sa, VEC_DIM)
    out = pl.pallas_call(
        _make_kernel(batch_tile),
        out_shape=jax.ShapeDtypeStruct((steps * rows_out, D_MODEL), jnp.float32),
        grid=(steps,),
        in_specs=[
            pl.BlockSpec((rows_in, VEC_DIM), lambda i: (i, 0)),
            pl.BlockSpec(w_slab.shape, lambda i: (0, 0, 0)),   # full slab, fetched once
            pl.BlockSpec(v_slab.shape, lambda i: (0, 0)),      # full slab, fetched once
        ],
        out_specs=pl.BlockSpec((rows_out, D_MODEL), lambda i: (i, 0)),
        compiler_params=pltpu.CompilerParams(
            dimension_semantics=("parallel",)),
    )(act_flat, w_slab, v_slab)

    out = out.reshape(steps, rows_out, D_MODEL)[:, :batch_tile * NUM_CARDS, :]
    return out.reshape(B, NUM_CARDS, D_MODEL)[:, :, :VEC_DIM]


# ----------------------------- parameter init + packing ----------------------
class KeyGen:
    def __init__(self, key):
        self.key = key

    def __call__(self):
        self.key, sub = jax.random.split(self.key)
        return sub


def positional_encoding_table(max_len, d_model):
    position = jnp.arange(max_len, dtype=jnp.float32)[:, None]
    div_term = jnp.exp(jnp.arange(0, d_model, 2, dtype=jnp.float32)
                       * (-math.log(10000.0) / d_model))
    pe = jnp.zeros((max_len, d_model), jnp.float32)
    pe = pe.at[:, 0::2].set(jnp.sin(position * div_term))
    pe = pe.at[:, 1::2].set(jnp.cos(position * div_term))
    return pe


def init_params(key):
    """PyTorch-equivalent parameterisation (per-block Wq/Wk/Wv/Wo + biases, FFN,
    LayerNorms, fc_card / output_card), later folded + packed by pack_params."""
    kg = KeyGen(key)
    E, FF = D_MODEL, DIM_FF

    def nrm(shape, scale=0.05):
        return scale * jax.random.normal(kg(), shape, jnp.float32)

    def ln():
        return {"g": jnp.ones((1, E), jnp.float32),
                "b": jnp.zeros((1, E), jnp.float32)}

    def attn():
        return {"wq": nrm((E, E)), "wk": nrm((E, E)), "wv": nrm((E, E)),
                "bq": nrm((1, E)), "bk": nrm((1, E)), "bv": nrm((1, E)),
                "wo": nrm((E, E)), "bo": nrm((1, E))}

    def enc_layer():
        return {"sa": attn(), "w1": nrm((E, FF)), "b1": nrm((1, FF)),
                "w2": nrm((FF, E)), "b2": nrm((1, E)), "ln1": ln(), "ln2": ln()}

    def dec_layer():
        return {"sa": attn(), "ca": attn(), "w1": nrm((E, FF)), "b1": nrm((1, FF)),
                "w2": nrm((FF, E)), "b2": nrm((1, E)),
                "ln1": ln(), "ln2": ln(), "ln3": ln()}

    return {
        "fc_card_w": nrm((VEC_DIM, E)), "fc_card_b": nrm((1, E)),
        "output_card_w": nrm((E, VEC_DIM)), "output_card_b": nrm((1, VEC_DIM)),
        "enc": [enc_layer() for _ in range(NUM_LAYERS)],
        "dec": [dec_layer() for _ in range(NUM_LAYERS)],
        "enc_norm": ln(), "dec_norm": ln(),
    }


def pack_params(params, batch_tile):
    """Fold + pack the parameters into two VMEM slabs (exact transforms):
       M_h = scale*Wq_h@Wk_h.T, c_h = scale*bq_h@Wk_h.T  (softmax drops the rest),
       VO_h = Wv_h@Wo_h, attention out-bias = bv@Wo + bo (softmax rows sum to 1),
       fc_card bias folded into the pos-enc tables, output_card lane-padded to 32."""
    E = D_MODEL
    attn_blocks = {
        "enc0_sa": params["enc"][0]["sa"], "enc1_sa": params["enc"][1]["sa"],
        "dec0_sa": params["dec"][0]["sa"], "dec0_ca": params["dec"][0]["ca"],
        "dec1_sa": params["dec"][1]["sa"], "dec1_ca": params["dec"][1]["ca"],
    }
    ffn_layers = {"enc0": params["enc"][0], "enc1": params["enc"][1],
                  "dec0": params["dec"][0], "dec1": params["dec"][1]}

    mats = [None] * N_W
    vvals = {}

    for name, blk in attn_blocks.items():
        c_rows = []
        for h in range(NHEAD):
            lo, hi = h * HEAD_DIM, (h + 1) * HEAD_DIM
            wq_h, wk_h = blk["wq"][:, lo:hi], blk["wk"][:, lo:hi]
            wv_h, wo_h = blk["wv"][:, lo:hi], blk["wo"][lo:hi, :]
            mats[W_IDX[f"{name}_m{h}"]] = ATTN_SCALE * (wq_h @ wk_h.T)
            mats[W_IDX[f"{name}_vo{h}"]] = wv_h @ wo_h
            c_rows.append(ATTN_SCALE * (blk["bq"][:, lo:hi] @ wk_h.T))
        vvals[f"{name}_c"] = jnp.concatenate(c_rows, axis=0)
        vvals[f"{name}_b"] = blk["bv"] @ blk["wo"] + blk["bo"]

    for name, lyr in ffn_layers.items():
        mats[W_IDX[f"{name}_w1"]] = lyr["w1"]
        mats[W_IDX[f"{name}_w2"]] = lyr["w2"]
        vvals[f"{name}_b1"] = lyr["b1"]
        vvals[f"{name}_b2"] = lyr["b2"]

    mats[W_IDX["out_w"]] = jnp.zeros((E, E), jnp.float32).at[:, :VEC_DIM].set(
        params["output_card_w"])
    w_slab = jnp.stack(mats, axis=0)                       # (57, 32, 32)

    lns = {"enc_norm": params["enc_norm"], "dec_norm": params["dec_norm"]}
    for l in range(NUM_LAYERS):
        lns[f"enc{l}_ln1"] = params["enc"][l]["ln1"]
        lns[f"enc{l}_ln2"] = params["enc"][l]["ln2"]
        lns[f"dec{l}_ln1"] = params["dec"][l]["ln1"]
        lns[f"dec{l}_ln2"] = params["dec"][l]["ln2"]
        lns[f"dec{l}_ln3"] = params["dec"][l]["ln3"]
    for name, p in lns.items():
        vvals[f"{name}_g"] = p["g"]
        vvals[f"{name}_b"] = p["b"]

    pe1 = positional_encoding_table(20, E)[:ACT_SEQ_LEN]
    pe2 = positional_encoding_table(100, E)[:ACT_SEQ_LEN]
    # decoder target in the reference = pos_enc_2(pos_enc_1(fc_card(act_seq)))
    vvals["pe_src"] = jnp.tile(pe1 + params["fc_card_b"], (batch_tile, 1))
    vvals["pe_tgt"] = jnp.tile(pe1 + pe2 + params["fc_card_b"], (batch_tile, 1))
    vvals["fc_w"] = params["fc_card_w"]
    vvals["out_b"] = jnp.zeros((1, E), jnp.float32).at[:, :VEC_DIM].set(
        params["output_card_b"])

    pieces = []
    for name, n in _v_entries(batch_tile):
        arr = vvals[name]
        assert arr.shape == (n, E), (name, arr.shape, n)
        pieces.append(arr)
    v_slab = jnp.concatenate(pieces, axis=0)               # (~111, 32)
    return w_slab.astype(jnp.float32), v_slab.astype(jnp.float32)


def _default_batch_tile(batch):
    """Full-batch fusion on single-TensorCore chips (v5e/v6e); split the batch across
    the two TensorCores (parallel grid) on v7x."""
    try:
        kind = jax.devices()[0].device_kind.lower()
    except Exception:
        kind = ""
    if "v7" in kind and batch % 2 == 0:
        return batch // 2
    return batch


# ----------------------------- main -------------------------------------------
if __name__ == "__main__":
    key = jax.random.PRNGKey(0)
    k_param, k_act, k_obs = jax.random.split(key, 3)

    params = init_params(k_param)
    bt = _default_batch_tile(BATCH)
    packed = pack_params(params, bt)

    act_seq = jax.random.normal(k_act, (BATCH, ACT_SEQ_LEN, VEC_DIM), jnp.float32)
    obs = jax.random.normal(k_obs, (BATCH, OBS_SEQ_LEN, VEC_DIM), jnp.float32)

    out = tom_forward(packed, act_seq, obs, batch_tile=bt)
    out = jax.block_until_ready(out)

    assert out.shape == (BATCH, NUM_CARDS, VEC_DIM), out.shape
    assert bool(jnp.all(jnp.isfinite(out)))
    print("KERNEL_OK")
</pallas_src>

<mosaic_0001>
module attributes {stable_mosaic.version = 11 : i64} {
  func.func @kernel(%arg0: i32, %arg1: memref<16x16xf32, #tpu.memory_space<vmem>>, %arg2: memref<57x32x32xf32, #tpu.memory_space<vmem>>, %arg3: memref<111x32xf32, #tpu.memory_space<vmem>>, %arg4: memref<8x32xf32, #tpu.memory_space<vmem>>) attributes {dimension_semantics = [#tpu.dimension_semantics<parallel>], iteration_bounds = array<i64: 1>, scalar_prefetch = 0 : i64, scratch_operands = 0 : i64, tpu.core_type = #tpu.core_type<tc>, window_params = [{transform_indices = @transform_0, window_bounds = array<i64: 16, 16>}, {pipeline_mode = #tpu.pipeline_mode<synchronous>, transform_indices = @transform_1, window_bounds = array<i64: 57, 32, 32>}, {pipeline_mode = #tpu.pipeline_mode<synchronous>, transform_indices = @transform_2, window_bounds = array<i64: 111, 32>}, {transform_indices = @transform_3, window_bounds = array<i64: 8, 32>}]} {
    %c0 = arith.constant 0 : index
    %c0_0 = arith.constant 0 : index
    %0 = vector.load %arg1[%c0, %c0_0] : memref<16x16xf32, #tpu.memory_space<vmem>>, vector<16x16xf32>
    %c32 = arith.constant 32 : index
    %c0_1 = arith.constant 0 : index
    %1 = vector.load %arg3[%c32, %c0_1] : memref<111x32xf32, #tpu.memory_space<vmem>>, vector<16x32xf32>
    %cst = arith.constant dense<0.000000e+00> : vector<16x32xf32>
    %2 = tpu.matmul %0, %1, %cst {dimension_numbers = #tpu.dot_dimension_numbers<[1], [0], [0], [1], [0, 0, 1, 1], [], []>} : vector<16x16xf32>, vector<16x32xf32>, vector<16x32xf32> -> vector<16x32xf32>
    %c0_2 = arith.constant 0 : index
    %c0_3 = arith.constant 0 : index
    %3 = vector.load %arg3[%c0_2, %c0_3] : memref<111x32xf32, #tpu.memory_space<vmem>>, vector<16x32xf32>
    %4 = arith.addf %2, %3 : vector<16x32xf32>
    %c16 = arith.constant 16 : index
    %c0_4 = arith.constant 0 : index
    %5 = vector.load %arg3[%c16, %c0_4] : memref<111x32xf32, #tpu.memory_space<vmem>>, vector<16x32xf32>
    %6 = arith.addf %2, %5 : vector<16x32xf32>
    %c49 = arith.constant 49 : index
    %c0_5 = arith.constant 0 : index
    %7 = vector.load %arg3[%c49, %c0_5] : memref<111x32xf32, #tpu.memory_space<vmem>>, vector<4x32xf32>
    %c0_6 = arith.constant 0 : index
    %c0_7 = arith.constant 0 : index
    %c0_8 = arith.constant 0 : index
    %8 = vector.load %arg2[%c0_6, %c0_7, %c0_8] : memref<57x32x32xf32, #tpu.memory_space<vmem>>, vector<1x32x32xf32>
    %9 = vector.shape_cast %8 : vector<1x32x32xf32> to vector<32x32xf32>
    %cst_9 = arith.constant dense<0.000000e+00> : vector<16x32xf32>
    %10 = tpu.matmul %4, %9, %cst_9 {dimension_numbers = #tpu.dot_dimension_numbers<[1], [0], [0], [1], [0, 0, 1, 1], [], []>} : vector<16x32xf32>, vector<32x32xf32>, vector<16x32xf32> -> vector<16x32xf32>
    %11 = vector.extract_strided_slice %7 {offsets = [0, 0], sizes = [1, 32], strides = [1, 1]} : vector<4x32xf32> to vector<1x32xf32>
    %12 = vector.broadcast %11 : vector<1x32xf32> to vector<16x32xf32>
    %13 = arith.addf %10, %12 : vector<16x32xf32>
    %c1 = arith.constant 1 : index
    %c0_10 = arith.constant 0 : index
    %c0_11 = arith.constant 0 : index
    %14 = vector.load %arg2[%c1, %c0_10, %c0_11] : memref<57x32x32xf32, #tpu.memory_space<vmem>>, vector<1x32x32xf32>
    %15 = vector.shape_cast %14 : vector<1x32x32xf32> to vector<32x32xf32>
    %cst_12 = arith.constant dense<0.000000e+00> : vector<16x32xf32>
    %16 = tpu.matmul %4, %15, %cst_12 {dimension_numbers = #tpu.dot_dimension_numbers<[1], [0], [0], [1], [0, 0, 1, 1], [], []>} : vector<16x32xf32>, vector<32x32xf32>, vector<16x32xf32> -> vector<16x32xf32>
    %17 = vector.extract_strided_slice %7 {offsets = [1, 0], sizes = [1, 32], strides = [1, 1]} : vector<4x32xf32> to vector<1x32xf32>
    %18 = vector.broadcast %17 : vector<1x32xf32> to vector<16x32xf32>
    %19 = arith.addf %16, %18 : vector<16x32xf32>
    %c2 = arith.constant 2 : index
    %c0_13 = arith.constant 0 : index
    %c0_14 = arith.constant 0 : index
    %20 = vector.load %arg2[%c2, %c0_13, %c0_14] : memref<57x32x32xf32, #tpu.memory_space<vmem>>, vector<1x32x32xf32>
    %21 = vector.shape_cast %20 : vector<1x32x32xf32> to vector<32x32xf32>
    %cst_15 = arith.constant dense<0.000000e+00> : vector<16x32xf32>
    %22 = tpu.matmul %4, %21, %cst_15 {dimension_numbers = #tpu.dot_dimension_numbers<[1], [0], [0], [1], [0, 0, 1, 1], [], []>} : vector<16x32xf32>, vector<32x32xf32>, vector<16x32xf32> -> vector<16x32xf32>
    %23 = vector.extract_strided_slice %7 {offsets = [2, 0], sizes = [1, 32], strides = [1, 1]} : vector<4x32xf32> to vector<1x32xf32>
    %24 = vector.broadcast %23 : vector<1x32xf32> to vector<16x32xf32>
    %25 = arith.addf %22, %24 : vector<16x32xf32>
    %c3 = arith.constant 3 : index
    %c0_16 = arith.constant 0 : index
    %c0_17 = arith.constant 0 : index
    %26 = vector.load %arg2[%c3, %c0_16, %c0_17] : memref<57x32x32xf32, #tpu.memory_space<vmem>>, vector<1x32x32xf32>
    %27 = vector.shape_cast %26 : vector<1x32x32xf32> to vector<32x32xf32>
    %cst_18 = arith.constant dense<0.000000e+00> : vector<16x32xf32>
    %28 = tpu.matmul %4, %27, %cst_18 {dimension_numbers = #tpu.dot_dimension_numbers<[1], [0], [0], [1], [0, 0, 1, 1], [], []>} : vector<16x32xf32>, vector<32x32xf32>, vector<16x32xf32> -> vector<16x32xf32>
    %29 = vector.extract_strided_slice %7 {offsets = [3, 0], sizes = [1, 32], strides = [1, 1]} : vector<4x32xf32> to vector<1x32xf32>
    %30 = vector.broadcast %29 : vector<1x32xf32> to vector<16x32xf32>
    %31 = arith.addf %28, %30 : vector<16x32xf32>
    %c4 = arith.constant 4 : index
    %c0_19 = arith.constant 0 : index
    %c0_20 = arith.constant 0 : index
    %32 = vector.load %arg2[%c4, %c0_19, %c0_20] : memref<57x32x32xf32, #tpu.memory_space<vmem>>, vector<1x32x32xf32>
    %33 = vector.shape_cast %32 : vector<1x32x32xf32> to vector<32x32xf32>
    %cst_21 = arith.constant dense<0.000000e+00> : vector<16x32xf32>
    %34 = tpu.matmul %4, %33, %cst_21 {dimension_numbers = #tpu.dot_dimension_numbers<[1], [0], [0], [1], [0, 0, 1, 1], [], []>} : vector<16x32xf32>, vector<32x32xf32>, vector<16x32xf32> -> vector<16x32xf32>
    %c5 = arith.constant 5 : index
    %c0_22 = arith.constant 0 : index
    %c0_23 = arith.constant 0 : index
    %35 = vector.load %arg2[%c5, %c0_22, %c0_23] : memref<57x32x32xf32, #tpu.memory_space<vmem>>, vector<1x32x32xf32>
    %36 = vector.shape_cast %35 : vector<1x32x32xf32> to vector<32x32xf32>
    %cst_24 = arith.constant dense<0.000000e+00> : vector<16x32xf32>
    %37 = tpu.matmul %4, %36, %cst_24 {dimension_numbers = #tpu.dot_dimension_numbers<[1], [0], [0], [1], [0, 0, 1, 1], [], []>} : vector<16x32xf32>, vector<32x32xf32>, vector<16x32xf32> -> vector<16x32xf32>
    %c6 = arith.constant 6 : index
    %c0_25 = arith.constant 0 : index
    %c0_26 = arith.constant 0 : index
    %38 = vector.load %arg2[%c6, %c0_25, %c0_26] : memref<57x32x32xf32, #tpu.memory_space<vmem>>, vector<1x32x32xf32>
    %39 = vector.shape_cast %38 : vector<1x32x32xf32> to vector<32x32xf32>
    %cst_27 = arith.constant dense<0.000000e+00> : vector<16x32xf32>
    %40 = tpu.matmul %4, %39, %cst_27 {dimension_numbers = #tpu.dot_dimension_numbers<[1], [0], [0], [1], [0, 0, 1, 1], [], []>} : vector<16x32xf32>, vector<32x32xf32>, vector<16x32xf32> -> vector<16x32xf32>
    %c7 = arith.constant 7 : index
    %c0_28 = arith.constant 0 : index
    %c0_29 = arith.constant 0 : index
    %41 = vector.load %arg2[%c7, %c0_28, %c0_29] : memref<57x32x32xf32, #tpu.memory_space<vmem>>, vector<1x32x32xf32>
    %42 = vector.shape_cast %41 : vector<1x32x32xf32> to vector<32x32xf32>
    %cst_30 = arith.constant dense<0.000000e+00> : vector<16x32xf32>
    %43 = tpu.matmul %4, %42, %cst_30 {dimension_numbers = #tpu.dot_dimension_numbers<[1], [0], [0], [1], [0, 0, 1, 1], [], []>} : vector<16x32xf32>, vector<32x32xf32>, vector<16x32xf32> -> vector<16x32xf32>
    %44 = vector.extract_strided_slice %4 {offsets = [0, 0], sizes = [8, 32], strides = [1, 1]} : vector<16x32xf32> to vector<8x32xf32>
    %45 = vector.extract_strided_slice %13 {offsets = [0, 0], sizes = [8, 32], strides = [1, 1]} : vector<16x32xf32> to vector<8x32xf32>
    %cst_31 = arith.constant dense<0.000000e+00> : vector<8x8xf32>
    %46 = tpu.matmul %45, %44, %cst_31 {dimension_numbers = #tpu.dot_dimension_numbers<[1], [1], [0], [0], [0, 0, 1, 0], [], []>} : vector<8x32xf32>, vector<8x32xf32>, vector<8x8xf32> -> vector<8x8xf32>
    %cst_32 = arith.constant dense<0xFF800000> : vector<8xf32>
    %47 = vector.multi_reduction <maximumf>, %46, %cst_32 [1] : vector<8x8xf32> to vector<8xf32>
    %48 = vector.shape_cast %47 : vector<8xf32> to vector<8x1xf32>
    %49 = vector.broadcast %48 : vector<8x1xf32> to vector<8x8xf32>
    %50 = arith.subf %46, %49 : vector<8x8xf32>
    %51 = math.exp %50 : vector<8x8xf32>
    %cst_33 = arith.constant dense<0.000000e+00> : vector<8xf32>
    %52 = vector.multi_reduction <add>, %51, %cst_33 [1] : vector<8x8xf32> to vector<8xf32>
    %53 = vector.shape_cast %52 : vector<8xf32> to vector<8x1xf32>
    %54 = vector.broadcast %53 : vector<8x1xf32> to vector<8x8xf32>
    %55 = arith.divf %51, %54 : vector<8x8xf32>
    %56 = vector.extract_strided_slice %34 {offsets = [0, 0], sizes = [8, 32], strides = [1, 1]} : vector<16x32xf32> to vector<8x32xf32>
    %cst_34 = arith.constant dense<0.000000e+00> : vector<8x32xf32>
    %57 = tpu.matmul %55, %56, %cst_34 {dimension_numbers = #tpu.dot_dimension_numbers<[1], [0], [0], [1], [0, 0, 1, 1], [], []>} : vector<8x8xf32>, vector<8x32xf32>, vector<8x32xf32> -> vector<8x32xf32>
    %58 = vector.extract_strided_slice %19 {offsets = [0, 0], sizes = [8, 32], strides = [1, 1]} : vector<16x32xf32> to vector<8x32xf32>
    %cst_35 = arith.constant dense<0.000000e+00> : vector<8x8xf32>
    %59 = tpu.matmul %58, %44, %cst_35 {dimension_numbers = #tpu.dot_dimension_numbers<[1], [1], [0], [0], [0, 0, 1, 0], [], []>} : vector<8x32xf32>, vector<8x32xf32>, vector<8x8xf32> -> vector<8x8xf32>
    %cst_36 = arith.constant dense<0xFF800000> : vector<8xf32>
    %60 = vector.multi_reduction <maximumf>, %59, %cst_36 [1] : vector<8x8xf32> to vector<8xf32>
    %61 = vector.shape_cast %60 : vector<8xf32> to vector<8x1xf32>
    %62 = vector.broadcast %61 : vector<8x1xf32> to vector<8x8xf32>
    %63 = arith.subf %59, %62 : vector<8x8xf32>
    %64 = math.exp %63 : vector<8x8xf32>
    %cst_37 = arith.constant dense<0.000000e+00> : vector<8xf32>
    %65 = vector.multi_reduction <add>, %64, %cst_37 [1] : vector<8x8xf32> to vector<8xf32>
    %66 = vector.shape_cast %65 : vector<8xf32> to vector<8x1xf32>
    %67 = vector.broadcast %66 : vector<8x1xf32> to vector<8x8xf32>
    %68 = arith.divf %64, %67 : vector<8x8xf32>
    %69 = vector.extract_strided_slice %37 {offsets = [0, 0], sizes = [8, 32], strides = [1, 1]} : vector<16x32xf32> to vector<8x32xf32>
    %cst_38 = arith.constant dense<0.000000e+00> : vector<8x32xf32>
    %70 = tpu.matmul %68, %69, %cst_38 {dimension_numbers = #tpu.dot_dimension_numbers<[1], [0], [0], [1], [0, 0, 1, 1], [], []>} : vector<8x8xf32>, vector<8x32xf32>, vector<8x32xf32> -> vector<8x32xf32>
    %71 = arith.addf %57, %70 : vector<8x32xf32>
    %72 = vector.extract_strided_slice %25 {offsets = [0, 0], sizes = [8, 32], strides = [1, 1]} : vector<16x32xf32> to vector<8x32xf32>
    %cst_39 = arith.constant dense<0.000000e+00> : vector<8x8xf32>
    %73 = tpu.matmul %72, %44, %cst_39 {dimension_numbers = #tpu.dot_dimension_numbers<[1], [1], [0], [0], [0, 0, 1, 0], [], []>} : vector<8x32xf32>, vector<8x32xf32>, vector<8x8xf32> -> vector<8x8xf32>
    %cst_40 = arith.constant dense<0xFF800000> : vector<8xf32>
    %74 = vector.multi_reduction <maximumf>, %73, %cst_40 [1] : vector<8x8xf32> to vector<8xf32>
    %75 = vector.shape_cast %74 : vector<8xf32> to vector<8x1xf32>
    %76 = vector.broadcast %75 : vector<8x1xf32> to vector<8x8xf32>
    %77 = arith.subf %73, %76 : vector<8x8xf32>
    %78 = math.exp %77 : vector<8x8xf32>
    %cst_41 = arith.constant dense<0.000000e+00> : vector<8xf32>
    %79 = vector.multi_reduction <add>, %78, %cst_41 [1] : vector<8x8xf32> to vector<8xf32>
    %80 = vector.shape_cast %79 : vector<8xf32> to vector<8x1xf32>
    %81 = vector.broadcast %80 : vector<8x1xf32> to vector<8x8xf32>
    %82 = arith.divf %78, %81 : vector<8x8xf32>
    %83 = vector.extract_strided_slice %40 {offsets = [0, 0], sizes = [8, 32], strides = [1, 1]} : vector<16x32xf32> to vector<8x32xf32>
    %cst_42 = arith.constant dense<0.000000e+00> : vector<8x32xf32>
    %84 = tpu.matmul %82, %83, %cst_42 {dimension_numbers = #tpu.dot_dimension_numbers<[1], [0], [0], [1], [0, 0, 1, 1], [], []>} : vector<8x8xf32>, vector<8x32xf32>, vector<8x32xf32> -> vector<8x32xf32>
    %85 = arith.addf %71, %84 : vector<8x32xf32>
    %86 = vector.extract_strided_slice %31 {offsets = [0, 0], sizes = [8, 32], strides = [1, 1]} : vector<16x32xf32> to vector<8x32xf32>
    %cst_43 = arith.constant dense<0.000000e+00> : vector<8x8xf32>
    %87 = tpu.matmul %86, %44, %cst_43 {dimension_numbers = #tpu.dot_dimension_numbers<[1], [1], [0], [0], [0, 0, 1, 0], [], []>} : vector<8x32xf32>, vector<8x32xf32>, vector<8x8xf32> -> vector<8x8xf32>
    %cst_44 = arith.constant dense<0xFF800000> : vector<8xf32>
    %88 = vector.multi_reduction <maximumf>, %87, %cst_44 [1] : vector<8x8xf32> to vector<8xf32>
    %89 = vector.shape_cast %88 : vector<8xf32> to vector<8x1xf32>
    %90 = vector.broadcast %89 : vector<8x1xf32> to vector<8x8xf32>
    %91 = arith.subf %87, %90 : vector<8x8xf32>
    %92 = math.exp %91 : vector<8x8xf32>
    %cst_45 = arith.constant dense<0.000000e+00> : vector<8xf32>
    %93 = vector.multi_reduction <add>, %92, %cst_45 [1] : vector<8x8xf32> to vector<8xf32>
    %94 = vector.shape_cast %93 : vector<8xf32> to vector<8x1xf32>
    %95 = vector.broadcast %94 : vector<8x1xf32> to vector<8x8xf32>
    %96 = arith.divf %92, %95 : vector<8x8xf32>
    %97 = vector.extract_strided_slice %43 {offsets = [0, 0], sizes = [8, 32], strides = [1, 1]} : vector<16x32xf32> to vector<8x32xf32>
    %cst_46 = arith.constant dense<0.000000e+00> : vector<8x32xf32>
    %98 = tpu.matmul %96, %97, %cst_46 {dimension_numbers = #tpu.dot_dimension_numbers<[1], [0], [0], [1], [0, 0, 1, 1], [], []>} : vector<8x8xf32>, vector<8x32xf32>, vector<8x32xf32> -> vector<8x32xf32>
    %99 = arith.addf %85, %98 : vector<8x32xf32>
    %100 = vector.extract_strided_slice %4 {offsets = [8, 0], sizes = [8, 32], strides = [1, 1]} : vector<16x32xf32> to vector<8x32xf32>
    %101 = vector.extract_strided_slice %13 {offsets = [8, 0], sizes = [8, 32], strides = [1, 1]} : vector<16x32xf32> to vector<8x32xf32>
    %cst_47 = arith.constant dense<0.000000e+00> : vector<8x8xf32>
    %102 = tpu.matmul %101, %100, %cst_47 {dimension_numbers = #tpu.dot_dimension_numbers<[1], [1], [0], [0], [0, 0, 1, 0], [], []>} : vector<8x32xf32>, vector<8x32xf32>, vector<8x8xf32> -> vector<8x8xf32>
    %cst_48 = arith.constant dense<0xFF800000> : vector<8xf32>
    %103 = vector.multi_reduction <maximumf>, %102, %cst_48 [1] : vector<8x8xf32> to vector<8xf32>
    %104 = vector.shape_cast %103 : vector<8xf32> to vector<8x1xf32>
    %105 = vector.broadcast %104 : vector<8x1xf32> to vector<8x8xf32>
    %106 = arith.subf %102, %105 : vector<8x8xf32>
    %107 = math.exp %106 : vector<8x8xf32>
    %cst_49 = arith.constant dense<0.000000e+00> : vector<8xf32>
    %108 = vector.multi_reduction <add>, %107, %cst_49 [1] : vector<8x8xf32> to vector<8xf32>
    %109 = vector.shape_cast %108 : vector<8xf32> to vector<8x1xf32>
    %110 = vector.broadcast %109 : vector<8x1xf32> to vector<8x8xf32>
    %111 = arith.divf %107, %110 : vector<8x8xf32>
    %112 = vector.extract_strided_slice %34 {offsets = [8, 0], sizes = [8, 32], strides = [1, 1]} : vector<16x32xf32> to vector<8x32xf32>
    %cst_50 = arith.constant dense<0.000000e+00> : vector<8x32xf32>
    %113 = tpu.matmul %111, %112, %cst_50 {dimension_numbers = #tpu.dot_dimension_numbers<[1], [0], [0], [1], [0, 0, 1, 1], [], []>} : vector<8x8xf32>, vector<8x32xf32>, vector<8x32xf32> -> vector<8x32xf32>
    %114 = vector.extract_strided_slice %19 {offsets = [8, 0], sizes = [8, 32], strides = [1, 1]} : vector<16x32xf32> to vector<8x32xf32>
    %cst_51 = arith.constant dense<0.000000e+00> : vector<8x8xf32>
    %115 = tpu.matmul %114, %100, %cst_51 {dimension_numbers = #tpu.dot_dimension_numbers<[1], [1], [0], [0], [0, 0, 1, 0], [], []>} : vector<8x32xf32>, vector<8x32xf32>, vector<8x8xf32> -> vector<8x8xf32>
    %cst_52 = arith.constant dense<0xFF800000> : vector<8xf32>
    %116 = vector.multi_reduction <maximumf>, %115, %cst_52 [1] : vector<8x8xf32> to vector<8xf32>
    %117 = vector.shape_cast %116 : vector<8xf32> to vector<8x1xf32>
    %118 = vector.broadcast %117 : vector<8x1xf32> to vector<8x8xf32>
    %119 = arith.subf %115, %118 : vector<8x8xf32>
    %120 = math.exp %119 : vector<8x8xf32>
    %cst_53 = arith.constant dense<0.000000e+00> : vector<8xf32>
    %121 = vector.multi_reduction <add>, %120, %cst_53 [1] : vector<8x8xf32> to vector<8xf32>
    %122 = vector.shape_cast %121 : vector<8xf32> to vector<8x1xf32>
    %123 = vector.broadcast %122 : vector<8x1xf32> to vector<8x8xf32>
    %124 = arith.divf %120, %123 : vector<8x8xf32>
    %125 = vector.extract_strided_slice %37 {offsets = [8, 0], sizes = [8, 32], strides = [1, 1]} : vector<16x32xf32> to vector<8x32xf32>
    %cst_54 = arith.constant dense<0.000000e+00> : vector<8x32xf32>
    %126 = tpu.matmul %124, %125, %cst_54 {dimension_numbers = #tpu.dot_dimension_numbers<[1], [0], [0], [1], [0, 0, 1, 1], [], []>} : vector<8x8xf32>, vector<8x32xf32>, vector<8x32xf32> -> vector<8x32xf32>
    %127 = arith.addf %113, %126 : vector<8x32xf32>
    %128 = vector.extract_strided_slice %25 {offsets = [8, 0], sizes = [8, 32], strides = [1, 1]} : vector<16x32xf32> to vector<8x32xf32>
    %cst_55 = arith.constant dense<0.000000e+00> : vector<8x8xf32>
    %129 = tpu.matmul %128, %100, %cst_55 {dimension_numbers = #tpu.dot_dimension_numbers<[1], [1], [0], [0], [0, 0, 1, 0], [], []>} : vector<8x32xf32>, vector<8x32xf32>, vector<8x8xf32> -> vector<8x8xf32>
    %cst_56 = arith.constant dense<0xFF800000> : vector<8xf32>
    %130 = vector.multi_reduction <maximumf>, %129, %cst_56 [1] : vector<8x8xf32> to vector<8xf32>
    %131 = vector.shape_cast %130 : vector<8xf32> to vector<8x1xf32>
    %132 = vector.broadcast %131 : vector<8x1xf32> to vector<8x8xf32>
    %133 = arith.subf %129, %132 : vector<8x8xf32>
    %134 = math.exp %133 : vector<8x8xf32>
    %cst_57 = arith.constant dense<0.000000e+00> : vector<8xf32>
    %135 = vector.multi_reduction <add>, %134, %cst_57 [1] : vector<8x8xf32> to vector<8xf32>
    %136 = vector.shape_cast %135 : vector<8xf32> to vector<8x1xf32>
    %137 = vector.broadcast %136 : vector<8x1xf32> to vector<8x8xf32>
    %138 = arith.divf %134, %137 : vector<8x8xf32>
    %139 = vector.extract_strided_slice %40 {offsets = [8, 0], sizes = [8, 32], strides = [1, 1]} : vector<16x32xf32> to vector<8x32xf32>
    %cst_58 = arith.constant dense<0.000000e+00> : vector<8x32xf32>
    %140 = tpu.matmul %138, %139, %cst_58 {dimension_numbers = #tpu.dot_dimension_numbers<[1], [0], [0], [1], [0, 0, 1, 1], [], []>} : vector<8x8xf32>, vector<8x32xf32>, vector<8x32xf32> -> vector<8x32xf32>
    %141 = arith.addf %127, %140 : vector<8x32xf32>
    %142 = vector.extract_strided_slice %31 {offsets = [8, 0], sizes = [8, 32], strides = [1, 1]} : vector<16x32xf32> to vector<8x32xf32>
    %cst_59 = arith.constant dense<0.000000e+00> : vector<8x8xf32>
    %143 = tpu.matmul %142, %100, %cst_59 {dimension_numbers = #tpu.dot_dimension_numbers<[1], [1], [0], [0], [0, 0, 1, 0], [], []>} : vector<8x32xf32>, vector<8x32xf32>, vector<8x8xf32> -> vector<8x8xf32>
    %cst_60 = arith.constant dense<0xFF800000> : vector<8xf32>
    %144 = vector.multi_reduction <maximumf>, %143, %cst_60 [1] : vector<8x8xf32> to vector<8xf32>
    %145 = vector.shape_cast %144 : vector<8xf32> to vector<8x1xf32>
    %146 = vector.broadcast %145 : vector<8x1xf32> to vector<8x8xf32>
    %147 = arith.subf %143, %146 : vector<8x8xf32>
    %148 = math.exp %147 : vector<8x8xf32>
    %cst_61 = arith.constant dense<0.000000e+00> : vector<8xf32>
    %149 = vector.multi_reduction <add>, %148, %cst_61 [1] : vector<8x8xf32> to vector<8xf32>
    %150 = vector.shape_cast %149 : vector<8xf32> to vector<8x1xf32>
    %151 = vector.broadcast %150 : vector<8x1xf32> to vector<8x8xf32>
    %152 = arith.divf %148, %151 : vector<8x8xf32>
    %153 = vector.extract_strided_slice %43 {offsets = [8, 0], sizes = [8, 32], strides = [1, 1]} : vector<16x32xf32> to vector<8x32xf32>
    %cst_62 = arith.constant dense<0.000000e+00> : vector<8x32xf32>
    %154 = tpu.matmul %152, %153, %cst_62 {dimension_numbers = #tpu.dot_dimension_numbers<[1], [0], [0], [1], [0, 0, 1, 1], [], []>} : vector<8x8xf32>, vector<8x32xf32>, vector<8x32xf32> -> vector<8x32xf32>
    %155 = arith.addf %141, %154 : vector<8x32xf32>
    %156 = tpu.concatenate %99, %155 in 0 : vector<8x32xf32>, vector<8x32xf32> -> vector<16x32xf32>
    %c53 = arith.constant 53 : index
    %c0_63 = arith.constant 0 : index
    %157 = vector.load %arg3[%c53, %c0_63] : memref<111x32xf32, #tpu.memory_space<vmem>>, vector<1x32xf32>
    %158 = vector.broadcast %157 : vector<1x32xf32> to vector<16x32xf32>
    %159 = arith.addf %156, %158 : vector<16x32xf32>
    %160 = arith.addf %4, %159 : vector<16x32xf32>
    %cst_64 = arith.constant dense<0.000000e+00> : vector<16xf32>
    %161 = vector.multi_reduction <add>, %160, %cst_64 [1] : vector<16x32xf32> to vector<16xf32>
    %162 = vector.shape_cast %161 : vector<16xf32> to vector<16x1xf32>
    %cst_65 = arith.constant 3.200000e+01 : f32
    %163 = vector.broadcast %cst_65 : f32 to vector<16x1xf32>
    %164 = arith.divf %162, %163 : vector<16x1xf32>
    %165 = arith.mulf %160, %160 : vector<16x32xf32>
    %cst_66 = arith.constant dense<0.000000e+00> : vector<16xf32>
    %166 = vector.multi_reduction <add>, %165, %cst_66 [1] : vector<16x32xf32> to vector<16xf32>
    %167 = vector.shape_cast %166 : vector<16xf32> to vector<16x1xf32>
    %cst_67 = arith.constant 3.200000e+01 : f32
    %168 = vector.broadcast %cst_67 : f32 to vector<16x1xf32>
    %169 = arith.divf %167, %168 : vector<16x1xf32>
    %170 = arith.mulf %164, %164 : vector<16x1xf32>
    %171 = arith.subf %169, %170 : vector<16x1xf32>
    %172 = vector.broadcast %164 : vector<16x1xf32> to vector<16x32xf32>
    %173 = arith.subf %160, %172 : vector<16x32xf32>
    %cst_68 = arith.constant 9.99999974E-6 : f32
    %174 = vector.broadcast %cst_68 : f32 to vector<16x1xf32>
    %175 = arith.addf %171, %174 : vector<16x1xf32>
    %176 = math.rsqrt %175 : vector<16x1xf32>
    %177 = vector.broadcast %176 : vector<16x1xf32> to vector<16x32xf32>
    %178 = arith.mulf %173, %177 : vector<16x32xf32>
    %c87 = arith.constant 87 : index
    %c0_69 = arith.constant 0 : index
    %179 = vector.load %arg3[%c87, %c0_69] : memref<111x32xf32, #tpu.memory_space<vmem>>, vector<1x32xf32>
    %180 = vector.broadcast %179 : vector<1x32xf32> to vector<16x32xf32>
    %181 = arith.mulf %178, %180 : vector<16x32xf32>
    %c88 = arith.constant 88 : index
    %c0_70 = arith.constant 0 : index
    %182 = vector.load %arg3[%c88, %c0_70] : memref<111x32xf32, #tpu.memory_space<vmem>>, vector<1x32xf32>
    %183 = vector.broadcast %182 : vector<1x32xf32> to vector<16x32xf32>
    %184 = arith.addf %181, %183 : vector<16x32xf32>
    %c48 = arith.constant 48 : index
    %c0_71 = arith.constant 0 : index
    %c0_72 = arith.constant 0 : index
    %185 = vector.load %arg2[%c48, %c0_71, %c0_72] : memref<57x32x32xf32, #tpu.memory_space<vmem>>, vector<1x32x32xf32>
    %186 = vector.shape_cast %185 : vector<1x32x32xf32> to vector<32x32xf32>
    %cst_73 = arith.constant dense<0.000000e+00> : vector<16x32xf32>
    %187 = tpu.matmul %184, %186, %cst_73 {dimension_numbers = #tpu.dot_dimension_numbers<[1], [0], [0], [1], [0, 0, 1, 1], [], []>} : vector<16x32xf32>, vector<32x32xf32>, vector<16x32xf32> -> vector<16x32xf32>
    %c79 = arith.constant 79 : index
    %c0_74 = arith.constant 0 : index
    %188 = vector.load %arg3[%c79, %c0_74] : memref<111x32xf32, #tpu.memory_space<vmem>>, vector<1x32xf32>
    %189 = vector.broadcast %188 : vector<1x32xf32> to vector<16x32xf32>
    %190 = arith.addf %187, %189 : vector<16x32xf32>
    %cst_75 = arith.constant 0.000000e+00 : f32
    %191 = vector.broadcast %cst_75 : f32 to vector<16x32xf32>
    %192 = arith.maximumf %190, %191 : vector<16x32xf32>
    %c49_76 = arith.constant 49 : index
    %c0_77 = arith.constant 0 : index
    %c0_78 = arith.constant 0 : index
    %193 = vector.load %arg2[%c49_76, %c0_77, %c0_78] : memref<57x32x32xf32, #tpu.memory_space<vmem>>, vector<1x32x32xf32>
    %194 = vector.shape_cast %193 : vector<1x32x32xf32> to vector<32x32xf32>
    %cst_79 = arith.constant dense<0.000000e+00> : vector<16x32xf32>
    %195 = tpu.matmul %192, %194, %cst_79 {dimension_numbers = #tpu.dot_dimension_numbers<[1], [0], [0], [1], [0, 0, 1, 1], [], []>} : vector<16x32xf32>, vector<32x32xf32>, vector<16x32xf32> -> vector<16x32xf32>
    %c80 = arith.constant 80 : index
    %c0_80 = arith.constant 0 : index
    %196 = vector.load %arg3[%c80, %c0_80] : memref<111x32xf32, #tpu.memory_space<vmem>>, vector<1x32xf32>
    %197 = vector.broadcast %196 : vector<1x32xf32> to vector<16x32xf32>
    %198 = arith.addf %195, %197 : vector<16x32xf32>
    %199 = arith.addf %184, %198 : vector<16x32xf32>
    %cst_81 = arith.constant dense<0.000000e+00> : vector<16xf32>
    %200 = vector.multi_reduction <add>, %199, %cst_81 [1] : vector<16x32xf32> to vector<16xf32>
    %201 = vector.shape_cast %200 : vector<16xf32> to vector<16x1xf32>
    %cst_82 = arith.constant 3.200000e+01 : f32
    %202 = vector.broadcast %cst_82 : f32 to vector<16x1xf32>
    %203 = arith.divf %201, %202 : vector<16x1xf32>
    %204 = arith.mulf %199, %199 : vector<16x32xf32>
    %cst_83 = arith.constant dense<0.000000e+00> : vector<16xf32>
    %205 = vector.multi_reduction <add>, %204, %cst_83 [1] : vector<16x32xf32> to vector<16xf32>
    %206 = vector.shape_cast %205 : vector<16xf32> to vector<16x1xf32>
    %cst_84 = arith.constant 3.200000e+01 : f32
    %207 = vector.broadcast %cst_84 : f32 to vector<16x1xf32>
    %208 = arith.divf %206, %207 : vector<16x1xf32>
    %209 = arith.mulf %203, %203 : vector<16x1xf32>
    %210 = arith.subf %208, %209 : vector<16x1xf32>
    %211 = vector.broadcast %203 : vector<16x1xf32> to vector<16x32xf32>
    %212 = arith.subf %199, %211 : vector<16x32xf32>
    %cst_85 = arith.constant 9.99999974E-6 : f32
    %213 = vector.broadcast %cst_85 : f32 to vector<16x1xf32>
    %214 = arith.addf %210, %213 : vector<16x1xf32>
    %215 = math.rsqrt %214 : vector<16x1xf32>
    %216 = vector.broadcast %215 : vector<16x1xf32> to vector<16x32xf32>
    %217 = arith.mulf %212, %216 : vector<16x32xf32>
    %c89 = arith.constant 89 : index
    %c0_86 = arith.constant 0 : index
    %218 = vector.load %arg3[%c89, %c0_86] : memref<111x32xf32, #tpu.memory_space<vmem>>, vector<1x32xf32>
    %219 = vector.broadcast %218 : vector<1x32xf32> to vector<16x32xf32>
    %220 = arith.mulf %217, %219 : vector<16x32xf32>
    %c90 = arith.constant 90 : index
    %c0_87 = arith.constant 0 : index
    %221 = vector.load %arg3[%c90, %c0_87] : memref<111x32xf32, #tpu.memory_space<vmem>>, vector<1x32xf32>
    %222 = vector.broadcast %221 : vector<1x32xf32> to vector<16x32xf32>
    %223 = arith.addf %220, %222 : vector<16x32xf32>
    %c54 = arith.constant 54 : index
    %c0_88 = arith.constant 0 : index
    %224 = vector.load %arg3[%c54, %c0_88] : memref<111x32xf32, #tpu.memory_space<vmem>>, vector<4x32xf32>
    %c8 = arith.constant 8 : index
    %c0_89 = arith.constant 0 : index
    %c0_90 = arith.constant 0 : index
    %225 = vector.load %arg2[%c8, %c0_89, %c0_90] : memref<57x32x32xf32, #tpu.memory_space<vmem>>, vector<1x32x32xf32>
    %226 = vector.shape_cast %225 : vector<1x32x32xf32> to vector<32x32xf32>
    %cst_91 = arith.constant dense<0.000000e+00> : vector<16x32xf32>
    %227 = tpu.matmul %223, %226, %cst_91 {dimension_numbers = #tpu.dot_dimension_numbers<[1], [0], [0], [1], [0, 0, 1, 1], [], []>} : vector<16x32xf32>, vector<32x32xf32>, vector<16x32xf32> -> vector<16x32xf32>
    %228 = vector.extract_strided_slice %224 {offsets = [0, 0], sizes = [1, 32], strides = [1, 1]} : vector<4x32xf32> to vector<1x32xf32>
    %229 = vector.broadcast %228 : vector<1x32xf32> to vector<16x32xf32>
    %230 = arith.addf %227, %229 : vector<16x32xf32>
    %c9 = arith.constant 9 : index
    %c0_92 = arith.constant 0 : index
    %c0_93 = arith.constant 0 : index
    %231 = vector.load %arg2[%c9, %c0_92, %c0_93] : memref<57x32x32xf32, #tpu.memory_space<vmem>>, vector<1x32x32xf32>
    %232 = vector.shape_cast %231 : vector<1x32x32xf32> to vector<32x32xf32>
    %cst_94 = arith.constant dense<0.000000e+00> : vector<16x32xf32>
    %233 = tpu.matmul %223, %232, %cst_94 {dimension_numbers = #tpu.dot_dimension_numbers<[1], [0], [0], [1], [0, 0, 1, 1], [], []>} : vector<16x32xf32>, vector<32x32xf32>, vector<16x32xf32> -> vector<16x32xf32>
    %234 = vector.extract_strided_slice %224 {offsets = [1, 0], sizes = [1, 32], strides = [1, 1]} : vector<4x32xf32> to vector<1x32xf32>
    %235 = vector.broadcast %234 : vector<1x32xf32> to vector<16x32xf32>
    %236 = arith.addf %233, %235 : vector<16x32xf32>
    %c10 = arith.constant 10 : index
    %c0_95 = arith.constant 0 : index
    %c0_96 = arith.constant 0 : index
    %237 = vector.load %arg2[%c10, %c0_95, %c0_96] : memref<57x32x32xf32, #tpu.memory_space<vmem>>, vector<1x32x32xf32>
    %238 = vector.shape_cast %237 : vector<1x32x32xf32> to vector<32x32xf32>
    %cst_97 = arith.constant dense<0.000000e+00> : vector<16x32xf32>
    %239 = tpu.matmul %223, %238, %cst_97 {dimension_numbers = #tpu.dot_dimension_numbers<[1], [0], [0], [1], [0, 0, 1, 1], [], []>} : vector<16x32xf32>, vector<32x32xf32>, vector<16x32xf32> -> vector<16x32xf32>
    %240 = vector.extract_strided_slice %224 {offsets = [2, 0], sizes = [1, 32], strides = [1, 1]} : vector<4x32xf32> to vector<1x32xf32>
    %241 = vector.broadcast %240 : vector<1x32xf32> to vector<16x32xf32>
    %242 = arith.addf %239, %241 : vector<16x32xf32>
    %c11 = arith.constant 11 : index
    %c0_98 = arith.constant 0 : index
    %c0_99 = arith.constant 0 : index
    %243 = vector.load %arg2[%c11, %c0_98, %c0_99] : memref<57x32x32xf32, #tpu.memory_space<vmem>>, vector<1x32x32xf32>
    %244 = vector.shape_cast %243 : vector<1x32x32xf32> to vector<32x32xf32>
    %cst_100 = arith.constant dense<0.000000e+00> : vector<16x32xf32>
    %245 = tpu.matmul %223, %244, %cst_100 {dimension_numbers = #tpu.dot_dimension_numbers<[1], [0], [0], [1], [0, 0, 1, 1], [], []>} : vector<16x32xf32>, vector<32x32xf32>, vector<16x32xf32> -> vector<16x32xf32>
    %246 = vector.extract_strided_slice %224 {offsets = [3, 0], sizes = [1, 32], strides = [1, 1]} : vector<4x32xf32> to vector<1x32xf32>
    %247 = vector.broadcast %246 : vector<1x32xf32> to vector<16x32xf32>
    %248 = arith.addf %245, %247 : vector<16x32xf32>
    %c12 = arith.constant 12 : index
    %c0_101 = arith.constant 0 : index
    %c0_102 = arith.constant 0 : index
    %249 = vector.load %arg2[%c12, %c0_101, %c0_102] : memref<57x32x32xf32, #tpu.memory_space<vmem>>, vector<1x32x32xf32>
    %250 = vector.shape_cast %249 : vector<1x32x32xf32> to vector<32x32xf32>
    %cst_103 = arith.constant dense<0.000000e+00> : vector<16x32xf32>
    %251 = tpu.matmul %223, %250, %cst_103 {dimension_numbers = #tpu.dot_dimension_numbers<[1], [0], [0], [1], [0, 0, 1, 1], [], []>} : vector<16x32xf32>, vector<32x32xf32>, vector<16x32xf32> -> vector<16x32xf32>
    %c13 = arith.constant 13 : index
    %c0_104 = arith.constant 0 : index
    %c0_105 = arith.constant 0 : index
    %252 = vector.load %arg2[%c13, %c0_104, %c0_105] : memref<57x32x32xf32, #tpu.memory_space<vmem>>, vector<1x32x32xf32>
    %253 = vector.shape_cast %252 : vector<1x32x32xf32> to vector<32x32xf32>
    %cst_106 = arith.constant dense<0.000000e+00> : vector<16x32xf32>
    %254 = tpu.matmul %223, %253, %cst_106 {dimension_numbers = #tpu.dot_dimension_numbers<[1], [0], [0], [1], [0, 0, 1, 1], [], []>} : vector<16x32xf32>, vector<32x32xf32>, vector<16x32xf32> -> vector<16x32xf32>
    %c14 = arith.constant 14 : index
    %c0_107 = arith.constant 0 : index
    %c0_108 = arith.constant 0 : index
    %255 = vector.load %arg2[%c14, %c0_107, %c0_108] : memref<57x32x32xf32, #tpu.memory_space<vmem>>, vector<1x32x32xf32>
    %256 = vector.shape_cast %255 : vector<1x32x32xf32> to vector<32x32xf32>
    %cst_109 = arith.constant dense<0.000000e+00> : vector<16x32xf32>
    %257 = tpu.matmul %223, %256, %cst_109 {dimension_numbers = #tpu.dot_dimension_numbers<[1], [0], [0], [1], [0, 0, 1, 1], [], []>} : vector<16x32xf32>, vector<32x32xf32>, vector<16x32xf32> -> vector<16x32xf32>
    %c15 = arith.constant 15 : index
    %c0_110 = arith.constant 0 : index
    %c0_111 = arith.constant 0 : index
    %258 = vector.load %arg2[%c15, %c0_110, %c0_111] : memref<57x32x32xf32, #tpu.memory_space<vmem>>, vector<1x32x32xf32>
    %259 = vector.shape_cast %258 : vector<1x32x32xf32> to vector<32x32xf32>
    %cst_112 = arith.constant dense<0.000000e+00> : vector<16x32xf32>
    %260 = tpu.matmul %223, %259, %cst_112 {dimension_numbers = #tpu.dot_dimension_numbers<[1], [0], [0], [1], [0, 0, 1, 1], [], []>} : vector<16x32xf32>, vector<32x32xf32>, vector<16x32xf32> -> vector<16x32xf32>
    %261 = vector.extract_strided_slice %223 {offsets = [0, 0], sizes = [8, 32], strides = [1, 1]} : vector<16x32xf32> to vector<8x32xf32>
    %262 = vector.extract_strided_slice %230 {offsets = [0, 0], sizes = [8, 32], strides = [1, 1]} : vector<16x32xf32> to vector<8x32xf32>
    %cst_113 = arith.constant dense<0.000000e+00> : vector<8x8xf32>
    %263 = tpu.matmul %262, %261, %cst_113 {dimension_numbers = #tpu.dot_dimension_numbers<[1], [1], [0], [0], [0, 0, 1, 0], [], []>} : vector<8x32xf32>, vector<8x32xf32>, vector<8x8xf32> -> vector<8x8xf32>
    %cst_114 = arith.constant dense<0xFF800000> : vector<8xf32>
    %264 = vector.multi_reduction <maximumf>, %263, %cst_114 [1] : vector<8x8xf32> to vector<8xf32>
    %265 = vector.shape_cast %264 : vector<8xf32> to vector<8x1xf32>
    %266 = vector.broadcast %265 : vector<8x1xf32> to vector<8x8xf32>
    %267 = arith.subf %263, %266 : vector<8x8xf32>
    %268 = math.exp %267 : vector<8x8xf32>
    %cst_115 = arith.constant dense<0.000000e+00> : vector<8xf32>
    %269 = vector.multi_reduction <add>, %268, %cst_115 [1] : vector<8x8xf32> to vector<8xf32>
    %270 = vector.shape_cast %269 : vector<8xf32> to vector<8x1xf32>
    %271 = vector.broadcast %270 : vector<8x1xf32> to vector<8x8xf32>
    %272 = arith.divf %268, %271 : vector<8x8xf32>
    %273 = vector.extract_strided_slice %251 {offsets = [0, 0], sizes = [8, 32], strides = [1, 1]} : vector<16x32xf32> to vector<8x32xf32>
    %cst_116 = arith.constant dense<0.000000e+00> : vector<8x32xf32>
    %274 = tpu.matmul %272, %273, %cst_116 {dimension_numbers = #tpu.dot_dimension_numbers<[1], [0], [0], [1], [0, 0, 1, 1], [], []>} : vector<8x8xf32>, vector<8x32xf32>, vector<8x32xf32> -> vector<8x32xf32>
    %275 = vector.extract_strided_slice %236 {offsets = [0, 0], sizes = [8, 32], strides = [1, 1]} : vector<16x32xf32> to vector<8x32xf32>
    %cst_117 = arith.constant dense<0.000000e+00> : vector<8x8xf32>
    %276 = tpu.matmul %275, %261, %cst_117 {dimension_numbers = #tpu.dot_dimension_numbers<[1], [1], [0], [0], [0, 0, 1, 0], [], []>} : vector<8x32xf32>, vector<8x32xf32>, vector<8x8xf32> -> vector<8x8xf32>
    %cst_118 = arith.constant dense<0xFF800000> : vector<8xf32>
    %277 = vector.multi_reduction <maximumf>, %276, %cst_118 [1] : vector<8x8xf32> to vector<8xf32>
    %278 = vector.shape_cast %277 : vector<8xf32> to vector<8x1xf32>
    %279 = vector.broadcast %278 : vector<8x1xf32> to vector<8x8xf32>
    %280 = arith.subf %276, %279 : vector<8x8xf32>
    %281 = math.exp %280 : vector<8x8xf32>
    %cst_119 = arith.constant dense<0.000000e+00> : vector<8xf32>
    %282 = vector.multi_reduction <add>, %281, %cst_119 [1] : vector<8x8xf32> to vector<8xf32>
    %283 = vector.shape_cast %282 : vector<8xf32> to vector<8x1xf32>
    %284 = vector.broadcast %283 : vector<8x1xf32> to vector<8x8xf32>
    %285 = arith.divf %281, %284 : vector<8x8xf32>
    %286 = vector.extract_strided_slice %254 {offsets = [0, 0], sizes = [8, 32], strides = [1, 1]} : vector<16x32xf32> to vector<8x32xf32>
    %cst_120 = arith.constant dense<0.000000e+00> : vector<8x32xf32>
    %287 = tpu.matmul %285, %286, %cst_120 {dimension_numbers = #tpu.dot_dimension_numbers<[1], [0], [0], [1], [0, 0, 1, 1], [], []>} : vector<8x8xf32>, vector<8x32xf32>, vector<8x32xf32> -> vector<8x32xf32>
    %288 = arith.addf %274, %287 : vector<8x32xf32>
    %289 = vector.extract_strided_slice %242 {offsets = [0, 0], sizes = [8, 32], strides = [1, 1]} : vector<16x32xf32> to vector<8x32xf32>
    %cst_121 = arith.constant dense<0.000000e+00> : vector<8x8xf32>
    %290 = tpu.matmul %289, %261, %cst_121 {dimension_numbers = #tpu.dot_dimension_numbers<[1], [1], [0], [0], [0, 0, 1, 0], [], []>} : vector<8x32xf32>, vector<8x32xf32>, vector<8x8xf32> -> vector<8x8xf32>
    %cst_122 = arith.constant dense<0xFF800000> : vector<8xf32>
    %291 = vector.multi_reduction <maximumf>, %290, %cst_122 [1] : vector<8x8xf32> to vector<8xf32>
    %292 = vector.shape_cast %291 : vector<8xf32> to vector<8x1xf32>
    %293 = vector.broadcast %292 : vector<8x1xf32> to vector<8x8xf32>
    %294 = arith.subf %290, %293 : vector<8x8xf32>
    %295 = math.exp %294 : vector<8x8xf32>
    %cst_123 = arith.constant dense<0.000000e+00> : vector<8xf32>
    %296 = vector.multi_reduction <add>, %295, %cst_123 [1] : vector<8x8xf32> to vector<8xf32>
    %297 = vector.shape_cast %296 : vector<8xf32> to vector<8x1xf32>
    %298 = vector.broadcast %297 : vector<8x1xf32> to vector<8x8xf32>
    %299 = arith.divf %295, %298 : vector<8x8xf32>
    %300 = vector.extract_strided_slice %257 {offsets = [0, 0], sizes = [8, 32], strides = [1, 1]} : vector<16x32xf32> to vector<8x32xf32>
    %cst_124 = arith.constant dense<0.000000e+00> : vector<8x32xf32>
    %301 = tpu.matmul %299, %300, %cst_124 {dimension_numbers = #tpu.dot_dimension_numbers<[1], [0], [0], [1], [0, 0, 1, 1], [], []>} : vector<8x8xf32>, vector<8x32xf32>, vector<8x32xf32> -> vector<8x32xf32>
    %302 = arith.addf %288, %301 : vector<8x32xf32>
    %303 = vector.extract_strided_slice %248 {offsets = [0, 0], sizes = [8, 32], strides = [1, 1]} : vector<16x32xf32> to vector<8x32xf32>
    %cst_125 = arith.constant dense<0.000000e+00> : vector<8x8xf32>
    %304 = tpu.matmul %303, %261, %cst_125 {dimension_numbers = #tpu.dot_dimension_numbers<[1], [1], [0], [0], [0, 0, 1, 0], [], []>} : vector<8x32xf32>, vector<8x32xf32>, vector<8x8xf32> -> vector<8x8xf32>
    %cst_126 = arith.constant dense<0xFF800000> : vector<8xf32>
    %305 = vector.multi_reduction <maximumf>, %304, %cst_126 [1] : vector<8x8xf32> to vector<8xf32>
    %306 = vector.shape_cast %305 : vector<8xf32> to vector<8x1xf32>
    %307 = vector.broadcast %306 : vector<8x1xf32> to vector<8x8xf32>
    %308 = arith.subf %304, %307 : vector<8x8xf32>
    %309 = math.exp %308 : vector<8x8xf32>
    %cst_127 = arith.constant dense<0.000000e+00> : vector<8xf32>
    %310 = vector.multi_reduction <add>, %309, %cst_127 [1] : vector<8x8xf32> to vector<8xf32>
    %311 = vector.shape_cast %310 : vector<8xf32> to vector<8x1xf32>
    %312 = vector.broadcast %311 : vector<8x1xf32> to vector<8x8xf32>
    %313 = arith.divf %309, %312 : vector<8x8xf32>
    %314 = vector.extract_strided_slice %260 {offsets = [0, 0], sizes = [8, 32], strides = [1, 1]} : vector<16x32xf32> to vector<8x32xf32>
    %cst_128 = arith.constant dense<0.000000e+00> : vector<8x32xf32>
    %315 = tpu.matmul %313, %314, %cst_128 {dimension_numbers = #tpu.dot_dimension_numbers<[1], [0], [0], [1], [0, 0, 1, 1], [], []>} : vector<8x8xf32>, vector<8x32xf32>, vector<8x32xf32> -> vector<8x32xf32>
    %316 = arith.addf %302, %315 : vector<8x32xf32>
    %317 = vector.extract_strided_slice %223 {offsets = [8, 0], sizes = [8, 32], strides = [1, 1]} : vector<16x32xf32> to vector<8x32xf32>
    %318 = vector.extract_strided_slice %230 {offsets = [8, 0], sizes = [8, 32], strides = [1, 1]} : vector<16x32xf32> to vector<8x32xf32>
    %cst_129 = arith.constant dense<0.000000e+00> : vector<8x8xf32>
    %319 = tpu.matmul %318, %317, %cst_129 {dimension_numbers = #tpu.dot_dimension_numbers<[1], [1], [0], [0], [0, 0, 1, 0], [], []>} : vector<8x32xf32>, vector<8x32xf32>, vector<8x8xf32> -> vector<8x8xf32>
    %cst_130 = arith.constant dense<0xFF800000> : vector<8xf32>
    %320 = vector.multi_reduction <maximumf>, %319, %cst_130 [1] : vector<8x8xf32> to vector<8xf32>
    %321 = vector.shape_cast %320 : vector<8xf32> to vector<8x1xf32>
    %322 = vector.broadcast %321 : vector<8x1xf32> to vector<8x8xf32>
    %323 = arith.subf %319, %322 : vector<8x8xf32>
    %324 = math.exp %323 : vector<8x8xf32>
    %cst_131 = arith.constant dense<0.000000e+00> : vector<8xf32>
    %325 = vector.multi_reduction <add>, %324, %cst_131 [1] : vector<8x8xf32> to vector<8xf32>
    %326 = vector.shape_cast %325 : vector<8xf32> to vector<8x1xf32>
    %327 = vector.broadcast %326 : vector<8x1xf32> to vector<8x8xf32>
    %328 = arith.divf %324, %327 : vector<8x8xf32>
    %329 = vector.extract_strided_slice %251 {offsets = [8, 0], sizes = [8, 32], strides = [1, 1]} : vector<16x32xf32> to vector<8x32xf32>
    %cst_132 = arith.constant dense<0.000000e+00> : vector<8x32xf32>
    %330 = tpu.matmul %328, %329, %cst_132 {dimension_numbers = #tpu.dot_dimension_numbers<[1], [0], [0], [1], [0, 0, 1, 1], [], []>} : vector<8x8xf32>, vector<8x32xf32>, vector<8x32xf32> -> vector<8x32xf32>
    %331 = vector.extract_strided_slice %236 {offsets = [8, 0], sizes = [8, 32], strides = [1, 1]} : vector<16x32xf32> to vector<8x32xf32>
    %cst_133 = arith.constant dense<0.000000e+00> : vector<8x8xf32>
    %332 = tpu.matmul %331, %317, %cst_133 {dimension_numbers = #tpu.dot_dimension_numbers<[1], [1], [0], [0], [0, 0, 1, 0], [], []>} : vector<8x32xf32>, vector<8x32xf32>, vector<8x8xf32> -> vector<8x8xf32>
    %cst_134 = arith.constant dense<0xFF800000> : vector<8xf32>
    %333 = vector.multi_reduction <maximumf>, %332, %cst_134 [1] : vector<8x8xf32> to vector<8xf32>
    %334 = vector.shape_cast %333 : vector<8xf32> to vector<8x1xf32>
    %335 = vector.broadcast %334 : vector<8x1xf32> to vector<8x8xf32>
    %336 = arith.subf %332, %335 : vector<8x8xf32>
    %337 = math.exp %336 : vector<8x8xf32>
    %cst_135 = arith.constant dense<0.000000e+00> : vector<8xf32>
    %338 = vector.multi_reduction <add>, %337, %cst_135 [1] : vector<8x8xf32> to vector<8xf32>
    %339 = vector.shape_cast %338 : vector<8xf32> to vector<8x1xf32>
    %340 = vector.broadcast %339 : vector<8x1xf32> to vector<8x8xf32>
    %341 = arith.divf %337, %340 : vector<8x8xf32>
    %342 = vector.extract_strided_slice %254 {offsets = [8, 0], sizes = [8, 32], strides = [1, 1]} : vector<16x32xf32> to vector<8x32xf32>
    %cst_136 = arith.constant dense<0.000000e+00> : vector<8x32xf32>
    %343 = tpu.matmul %341, %342, %cst_136 {dimension_numbers = #tpu.dot_dimension_numbers<[1], [0], [0], [1], [0, 0, 1, 1], [], []>} : vector<8x8xf32>, vector<8x32xf32>, vector<8x32xf32> -> vector<8x32xf32>
    %344 = arith.addf %330, %343 : vector<8x32xf32>
    %345 = vector.extract_strided_slice %242 {offsets = [8, 0], sizes = [8, 32], strides = [1, 1]} : vector<16x32xf32> to vector<8x32xf32>
    %cst_137 = arith.constant dense<0.000000e+00> : vector<8x8xf32>
    %346 = tpu.matmul %345, %317, %cst_137 {dimension_numbers = #tpu.dot_dimension_numbers<[1], [1], [0], [0], [0, 0, 1, 0], [], []>} : vector<8x32xf32>, vector<8x32xf32>, vector<8x8xf32> -> vector<8x8xf32>
    %cst_138 = arith.constant dense<0xFF800000> : vector<8xf32>
    %347 = vector.multi_reduction <maximumf>, %346, %cst_138 [1] : vector<8x8xf32> to vector<8xf32>
    %348 = vector.shape_cast %347 : vector<8xf32> to vector<8x1xf32>
    %349 = vector.broadcast %348 : vector<8x1xf32> to vector<8x8xf32>
    %350 = arith.subf %346, %349 : vector<8x8xf32>
    %351 = math.exp %350 : vector<8x8xf32>
    %cst_139 = arith.constant dense<0.000000e+00> : vector<8xf32>
    %352 = vector.multi_reduction <add>, %351, %cst_139 [1] : vector<8x8xf32> to vector<8xf32>
    %353 = vector.shape_cast %352 : vector<8xf32> to vector<8x1xf32>
    %354 = vector.broadcast %353 : vector<8x1xf32> to vector<8x8xf32>
    %355 = arith.divf %351, %354 : vector<8x8xf32>
    %356 = vector.extract_strided_slice %257 {offsets = [8, 0], sizes = [8, 32], strides = [1, 1]} : vector<16x32xf32> to vector<8x32xf32>
    %cst_140 = arith.constant dense<0.000000e+00> : vector<8x32xf32>
    %357 = tpu.matmul %355, %356, %cst_140 {dimension_numbers = #tpu.dot_dimension_numbers<[1], [0], [0], [1], [0, 0, 1, 1], [], []>} : vector<8x8xf32>, vector<8x32xf32>, vector<8x32xf32> -> vector<8x32xf32>
    %358 = arith.addf %344, %357 : vector<8x32xf32>
    %359 = vector.extract_strided_slice %248 {offsets = [8, 0], sizes = [8, 32], strides = [1, 1]} : vector<16x32xf32> to vector<8x32xf32>
    %cst_141 = arith.constant dense<0.000000e+00> : vector<8x8xf32>
    %360 = tpu.matmul %359, %317, %cst_141 {dimension_numbers = #tpu.dot_dimension_numbers<[1], [1], [0], [0], [0, 0, 1, 0], [], []>} : vector<8x32xf32>, vector<8x32xf32>, vector<8x8xf32> -> vector<8x8xf32>
    %cst_142 = arith.constant dense<0xFF800000> : vector<8xf32>
    %361 = vector.multi_reduction <maximumf>, %360, %cst_142 [1] : vector<8x8xf32> to vector<8xf32>
    %362 = vector.shape_cast %361 : vector<8xf32> to vector<8x1xf32>
    %363 = vector.broadcast %362 : vector<8x1xf32> to vector<8x8xf32>
    %364 = arith.subf %360, %363 : vector<8x8xf32>
    %365 = math.exp %364 : vector<8x8xf32>
    %cst_143 = arith.constant dense<0.000000e+00> : vector<8xf32>
    %366 = vector.multi_reduction <add>, %365, %cst_143 [1] : vector<8x8xf32> to vector<8xf32>
    %367 = vector.shape_cast %366 : vector<8xf32> to vector<8x1xf32>
    %368 = vector.broadcast %367 : vector<8x1xf32> to vector<8x8xf32>
    %369 = arith.divf %365, %368 : vector<8x8xf32>
    %370 = vector.extract_strided_slice %260 {offsets = [8, 0], sizes = [8, 32], strides = [1, 1]} : vector<16x32xf32> to vector<8x32xf32>
    %cst_144 = arith.constant dense<0.000000e+00> : vector<8x32xf32>
    %371 = tpu.matmul %369, %370, %cst_144 {dimension_numbers = #tpu.dot_dimension_numbers<[1], [0], [0], [1], [0, 0, 1, 1], [], []>} : vector<8x8xf32>, vector<8x32xf32>, vector<8x32xf32> -> vector<8x32xf32>
    %372 = arith.addf %358, %371 : vector<8x32xf32>
    %373 = tpu.concatenate %316, %372 in 0 : vector<8x32xf32>, vector<8x32xf32> -> vector<16x32xf32>
    %c58 = arith.constant 58 : index
    %c0_145 = arith.constant 0 : index
    %374 = vector.load %arg3[%c58, %c0_145] : memref<111x32xf32, #tpu.memory_space<vmem>>, vector<1x32xf32>
    %375 = vector.broadcast %374 : vector<1x32xf32> to vector<16x32xf32>
    %376 = arith.addf %373, %375 : vector<16x32xf32>
    %377 = arith.addf %223, %376 : vector<16x32xf32>
    %cst_146 = arith.constant dense<0.000000e+00> : vector<16xf32>
    %378 = vector.multi_reduction <add>, %377, %cst_146 [1] : vector<16x32xf32> to vector<16xf32>
    %379 = vector.shape_cast %378 : vector<16xf32> to vector<16x1xf32>
    %cst_147 = arith.constant 3.200000e+01 : f32
    %380 = vector.broadcast %cst_147 : f32 to vector<16x1xf32>
    %381 = arith.divf %379, %380 : vector<16x1xf32>
    %382 = arith.mulf %377, %377 : vector<16x32xf32>
    %cst_148 = arith.constant dense<0.000000e+00> : vector<16xf32>
    %383 = vector.multi_reduction <add>, %382, %cst_148 [1] : vector<16x32xf32> to vector<16xf32>
    %384 = vector.shape_cast %383 : vector<16xf32> to vector<16x1xf32>
    %cst_149 = arith.constant 3.200000e+01 : f32
    %385 = vector.broadcast %cst_149 : f32 to vector<16x1xf32>
    %386 = arith.divf %384, %385 : vector<16x1xf32>
    %387 = arith.mulf %381, %381 : vector<16x1xf32>
    %388 = arith.subf %386, %387 : vector<16x1xf32>
    %389 = vector.broadcast %381 : vector<16x1xf32> to vector<16x32xf32>
    %390 = arith.subf %377, %389 : vector<16x32xf32>
    %cst_150 = arith.constant 9.99999974E-6 : f32
    %391 = vector.broadcast %cst_150 : f32 to vector<16x1xf32>
    %392 = arith.addf %388, %391 : vector<16x1xf32>
    %393 = math.rsqrt %392 : vector<16x1xf32>
    %394 = vector.broadcast %393 : vector<16x1xf32> to vector<16x32xf32>
    %395 = arith.mulf %390, %394 : vector<16x32xf32>
    %c91 = arith.constant 91 : index
    %c0_151 = arith.constant 0 : index
    %396 = vector.load %arg3[%c91, %c0_151] : memref<111x32xf32, #tpu.memory_space<vmem>>, vector<1x32xf32>
    %397 = vector.broadcast %396 : vector<1x32xf32> to vector<16x32xf32>
    %398 = arith.mulf %395, %397 : vector<16x32xf32>
    %c92 = arith.constant 92 : index
    %c0_152 = arith.constant 0 : index
    %399 = vector.load %arg3[%c92, %c0_152] : memref<111x32xf32, #tpu.memory_space<vmem>>, vector<1x32xf32>
    %400 = vector.broadcast %399 : vector<1x32xf32> to vector<16x32xf32>
    %401 = arith.addf %398, %400 : vector<16x32xf32>
    %c50 = arith.constant 50 : index
    %c0_153 = arith.constant 0 : index
    %c0_154 = arith.constant 0 : index
    %402 = vector.load %arg2[%c50, %c0_153, %c0_154] : memref<57x32x32xf32, #tpu.memory_space<vmem>>, vector<1x32x32xf32>
    %403 = vector.shape_cast %402 : vector<1x32x32xf32> to vector<32x32xf32>
    %cst_155 = arith.constant dense<0.000000e+00> : vector<16x32xf32>
    %404 = tpu.matmul %401, %403, %cst_155 {dimension_numbers = #tpu.dot_dimension_numbers<[1], [0], [0], [1], [0, 0, 1, 1], [], []>} : vector<16x32xf32>, vector<32x32xf32>, vector<16x32xf32> -> vector<16x32xf32>
    %c81 = arith.constant 81 : index
    %c0_156 = arith.constant 0 : index
    %405 = vector.load %arg3[%c81, %c0_156] : memref<111x32xf32, #tpu.memory_space<vmem>>, vector<1x32xf32>
    %406 = vector.broadcast %405 : vector<1x32xf32> to vector<16x32xf32>
    %407 = arith.addf %404, %406 : vector<16x32xf32>
    %cst_157 = arith.constant 0.000000e+00 : f32
    %408 = vector.broadcast %cst_157 : f32 to vector<16x32xf32>
    %409 = arith.maximumf %407, %408 : vector<16x32xf32>
    %c51 = arith.constant 51 : index
    %c0_158 = arith.constant 0 : index
    %c0_159 = arith.constant 0 : index
    %410 = vector.load %arg2[%c51, %c0_158, %c0_159] : memref<57x32x32xf32, #tpu.memory_space<vmem>>, vector<1x32x32xf32>
    %411 = vector.shape_cast %410 : vector<1x32x32xf32> to vector<32x32xf32>
    %cst_160 = arith.constant dense<0.000000e+00> : vector<16x32xf32>
    %412 = tpu.matmul %409, %411, %cst_160 {dimension_numbers = #tpu.dot_dimension_numbers<[1], [0], [0], [1], [0, 0, 1, 1], [], []>} : vector<16x32xf32>, vector<32x32xf32>, vector<16x32xf32> -> vector<16x32xf32>
    %c82 = arith.constant 82 : index
    %c0_161 = arith.constant 0 : index
    %413 = vector.load %arg3[%c82, %c0_161] : memref<111x32xf32, #tpu.memory_space<vmem>>, vector<1x32xf32>
    %414 = vector.broadcast %413 : vector<1x32xf32> to vector<16x32xf32>
    %415 = arith.addf %412, %414 : vector<16x32xf32>
    %416 = arith.addf %401, %415 : vector<16x32xf32>
    %cst_162 = arith.constant dense<0.000000e+00> : vector<16xf32>
    %417 = vector.multi_reduction <add>, %416, %cst_162 [1] : vector<16x32xf32> to vector<16xf32>
    %418 = vector.shape_cast %417 : vector<16xf32> to vector<16x1xf32>
    %cst_163 = arith.constant 3.200000e+01 : f32
    %419 = vector.broadcast %cst_163 : f32 to vector<16x1xf32>
    %420 = arith.divf %418, %419 : vector<16x1xf32>
    %421 = arith.mulf %416, %416 : vector<16x32xf32>
    %cst_164 = arith.constant dense<0.000000e+00> : vector<16xf32>
    %422 = vector.multi_reduction <add>, %421, %cst_164 [1] : vector<16x32xf32> to vector<16xf32>
    %423 = vector.shape_cast %422 : vector<16xf32> to vector<16x1xf32>
    %cst_165 = arith.constant 3.200000e+01 : f32
    %424 = vector.broadcast %cst_165 : f32 to vector<16x1xf32>
    %425 = arith.divf %423, %424 : vector<16x1xf32>
    %426 = arith.mulf %420, %420 : vector<16x1xf32>
    %427 = arith.subf %425, %426 : vector<16x1xf32>
    %428 = vector.broadcast %420 : vector<16x1xf32> to vector<16x32xf32>
    %429 = arith.subf %416, %428 : vector<16x32xf32>
    %cst_166 = arith.constant 9.99999974E-6 : f32
    %430 = vector.broadcast %cst_166 : f32 to vector<16x1xf32>
    %431 = arith.addf %427, %430 : vector<16x1xf32>
    %432 = math.rsqrt %431 : vector<16x1xf32>
    %433 = vector.broadcast %432 : vector<16x1xf32> to vector<16x32xf32>
    %434 = arith.mulf %429, %433 : vector<16x32xf32>
    %c93 = arith.constant 93 : index
    %c0_167 = arith.constant 0 : index
    %435 = vector.load %arg3[%c93, %c0_167] : memref<111x32xf32, #tpu.memory_space<vmem>>, vector<1x32xf32>
    %436 = vector.broadcast %435 : vector<1x32xf32> to vector<16x32xf32>
    %437 = arith.mulf %434, %436 : vector<16x32xf32>
    %c94 = arith.constant 94 : index
    %c0_168 = arith.constant 0 : index
    %438 = vector.load %arg3[%c94, %c0_168] : memref<111x32xf32, #tpu.memory_space<vmem>>, vector<1x32xf32>
    %439 = vector.broadcast %438 : vector<1x32xf32> to vector<16x32xf32>
    %440 = arith.addf %437, %439 : vector<16x32xf32>
    %cst_169 = arith.constant dense<0.000000e+00> : vector<16xf32>
    %441 = vector.multi_reduction <add>, %440, %cst_169 [1] : vector<16x32xf32> to vector<16xf32>
    %442 = vector.shape_cast %441 : vector<16xf32> to vector<16x1xf32>
    %cst_170 = arith.constant 3.200000e+01 : f32
    %443 = vector.broadcast %cst_170 : f32 to vector<16x1xf32>
    %444 = arith.divf %442, %443 : vector<16x1xf32>
    %445 = arith.mulf %440, %440 : vector<16x32xf32>
    %cst_171 = arith.constant dense<0.000000e+00> : vector<16xf32>
    %446 = vector.multi_reduction <add>, %445, %cst_171 [1] : vector<16x32xf32> to vector<16xf32>
    %447 = vector.shape_cast %446 : vector<16xf32> to vector<16x1xf32>
    %cst_172 = arith.constant 3.200000e+01 : f32
    %448 = vector.broadcast %cst_172 : f32 to vector<16x1xf32>
    %449 = arith.divf %447, %448 : vector<16x1xf32>
    %450 = arith.mulf %444, %444 : vector<16x1xf32>
    %451 = arith.subf %449, %450 : vector<16x1xf32>
    %452 = vector.broadcast %444 : vector<16x1xf32> to vector<16x32xf32>
    %453 = arith.subf %440, %452 : vector<16x32xf32>
    %cst_173 = arith.constant 9.99999974E-6 : f32
    %454 = vector.broadcast %cst_173 : f32 to vector<16x1xf32>
    %455 = arith.addf %451, %454 : vector<16x1xf32>
    %456 = math.rsqrt %455 : vector<16x1xf32>
    %457 = vector.broadcast %456 : vector<16x1xf32> to vector<16x32xf32>
    %458 = arith.mulf %453, %457 : vector<16x32xf32>
    %c95 = arith.constant 95 : index
    %c0_174 = arith.constant 0 : index
    %459 = vector.load %arg3[%c95, %c0_174] : memref<111x32xf32, #tpu.memory_space<vmem>>, vector<1x32xf32>
    %460 = vector.broadcast %459 : vector<1x32xf32> to vector<16x32xf32>
    %461 = arith.mulf %458, %460 : vector<16x32xf32>
    %c96 = arith.constant 96 : index
    %c0_175 = arith.constant 0 : index
    %462 = vector.load %arg3[%c96, %c0_175] : memref<111x32xf32, #tpu.memory_space<vmem>>, vector<1x32xf32>
    %463 = vector.broadcast %462 : vector<1x32xf32> to vector<16x32xf32>
    %464 = arith.addf %461, %463 : vector<16x32xf32>
    %c59 = arith.constant 59 : index
    %c0_176 = arith.constant 0 : index
    %465 = vector.load %arg3[%c59, %c0_176] : memref<111x32xf32, #tpu.memory_space<vmem>>, vector<4x32xf32>
    %c16_177 = arith.constant 16 : index
    %c0_178 = arith.constant 0 : index
    %c0_179 = arith.constant 0 : index
    %466 = vector.load %arg2[%c16_177, %c0_178, %c0_179] : memref<57x32x32xf32, #tpu.memory_space<vmem>>, vector<1x32x32xf32>
    %467 = vector.shape_cast %466 : vector<1x32x32xf32> to vector<32x32xf32>
    %cst_180 = arith.constant dense<0.000000e+00> : vector<16x32xf32>
    %468 = tpu.matmul %6, %467, %cst_180 {dimension_numbers = #tpu.dot_dimension_numbers<[1], [0], [0], [1], [0, 0, 1, 1], [], []>} : vector<16x32xf32>, vector<32x32xf32>, vector<16x32xf32> -> vector<16x32xf32>
    %469 = vector.extract_strided_slice %465 {offsets = [0, 0], sizes = [1, 32], strides = [1, 1]} : vector<4x32xf32> to vector<1x32xf32>
    %470 = vector.broadcast %469 : vector<1x32xf32> to vector<16x32xf32>
    %471 = arith.addf %468, %470 : vector<16x32xf32>
    %c17 = arith.constant 17 : index
    %c0_181 = arith.constant 0 : index
    %c0_182 = arith.constant 0 : index
    %472 = vector.load %arg2[%c17, %c0_181, %c0_182] : memref<57x32x32xf32, #tpu.memory_space<vmem>>, vector<1x32x32xf32>
    %473 = vector.shape_cast %472 : vector<1x32x32xf32> to vector<32x32xf32>
    %cst_183 = arith.constant dense<0.000000e+00> : vector<16x32xf32>
    %474 = tpu.matmul %6, %473, %cst_183 {dimension_numbers = #tpu.dot_dimension_numbers<[1], [0], [0], [1], [0, 0, 1, 1], [], []>} : vector<16x32xf32>, vector<32x32xf32>, vector<16x32xf32> -> vector<16x32xf32>
    %475 = vector.extract_strided_slice %465 {offsets = [1, 0], sizes = [1, 32], strides = [1, 1]} : vector<4x32xf32> to vector<1x32xf32>
    %476 = vector.broadcast %475 : vector<1x32xf32> to vector<16x32xf32>
    %477 = arith.addf %474, %476 : vector<16x32xf32>
    %c18 = arith.constant 18 : index
    %c0_184 = arith.constant 0 : index
    %c0_185 = arith.constant 0 : index
    %478 = vector.load %arg2[%c18, %c0_184, %c0_185] : memref<57x32x32xf32, #tpu.memory_space<vmem>>, vector<1x32x32xf32>
    %479 = vector.shape_cast %478 : vector<1x32x32xf32> to vector<32x32xf32>
    %cst_186 = arith.constant dense<0.000000e+00> : vector<16x32xf32>
    %480 = tpu.matmul %6, %479, %cst_186 {dimension_numbers = #tpu.dot_dimension_numbers<[1], [0], [0], [1], [0, 0, 1, 1], [], []>} : vector<16x32xf32>, vector<32x32xf32>, vector<16x32xf32> -> vector<16x32xf32>
    %481 = vector.extract_strided_slice %465 {offsets = [2, 0], sizes = [1, 32], strides = [1, 1]} : vector<4x32xf32> to vector<1x32xf32>
    %482 = vector.broadcast %481 : vector<1x32xf32> to vector<16x32xf32>
    %483 = arith.addf %480, %482 : vector<16x32xf32>
    %c19 = arith.constant 19 : index
    %c0_187 = arith.constant 0 : index
    %c0_188 = arith.constant 0 : index
    %484 = vector.load %arg2[%c19, %c0_187, %c0_188] : memref<57x32x32xf32, #tpu.memory_space<vmem>>, vector<1x32x32xf32>
    %485 = vector.shape_cast %484 : vector<1x32x32xf32> to vector<32x32xf32>
    %cst_189 = arith.constant dense<0.000000e+00> : vector<16x32xf32>
    %486 = tpu.matmul %6, %485, %cst_189 {dimension_numbers = #tpu.dot_dimension_numbers<[1], [0], [0], [1], [0, 0, 1, 1], [], []>} : vector<16x32xf32>, vector<32x32xf32>, vector<16x32xf32> -> vector<16x32xf32>
    %487 = vector.extract_strided_slice %465 {offsets = [3, 0], sizes = [1, 32], strides = [1, 1]} : vector<4x32xf32> to vector<1x32xf32>
    %488 = vector.broadcast %487 : vector<1x32xf32> to vector<16x32xf32>
    %489 = arith.addf %486, %488 : vector<16x32xf32>
    %c20 = arith.constant 20 : index
    %c0_190 = arith.constant 0 : index
    %c0_191 = arith.constant 0 : index
    %490 = vector.load %arg2[%c20, %c0_190, %c0_191] : memref<57x32x32xf32, #tpu.memory_space<vmem>>, vector<1x32x32xf32>
    %491 = vector.shape_cast %490 : vector<1x32x32xf32> to vector<32x32xf32>
    %cst_192 = arith.constant dense<0.000000e+00> : vector<16x32xf32>
    %492 = tpu.matmul %6, %491, %cst_192 {dimension_numbers = #tpu.dot_dimension_numbers<[1], [0], [0], [1], [0, 0, 1, 1], [], []>} : vector<16x32xf32>, vector<32x32xf32>, vector<16x32xf32> -> vector<16x32xf32>
    %c21 = arith.constant 21 : index
    %c0_193 = arith.constant 0 : index
    %c0_194 = arith.constant 0 : index
    %493 = vector.load %arg2[%c21, %c0_193, %c0_194] : memref<57x32x32xf32, #tpu.memory_space<vmem>>, vector<1x32x32xf32>
    %494 = vector.shape_cast %493 : vector<1x32x32xf32> to vector<32x32xf32>
    %cst_195 = arith.constant dense<0.000000e+00> : vector<16x32xf32>
    %495 = tpu.matmul %6, %494, %cst_195 {dimension_numbers = #tpu.dot_dimension_numbers<[1], [0], [0], [1], [0, 0, 1, 1], [], []>} : vector<16x32xf32>, vector<32x32xf32>, vector<16x32xf32> -> vector<16x32xf32>
    %c22 = arith.constant 22 : index
    %c0_196 = arith.constant 0 : index
    %c0_197 = arith.constant 0 : index
    %496 = vector.load %arg2[%c22, %c0_196, %c0_197] : memref<57x32x32xf32, #tpu.memory_space<vmem>>, vector<1x32x32xf32>
    %497 = vector.shape_cast %496 : vector<1x32x32xf32> to vector<32x32xf32>
    %cst_198 = arith.constant dense<0.000000e+00> : vector<16x32xf32>
    %498 = tpu.matmul %6, %497, %cst_198 {dimension_numbers = #tpu.dot_dimension_numbers<[1], [0], [0], [1], [0, 0, 1, 1], [], []>} : vector<16x32xf32>, vector<32x32xf32>, vector<16x32xf32> -> vector<16x32xf32>
    %c23 = arith.constant 23 : index
    %c0_199 = arith.constant 0 : index
    %c0_200 = arith.constant 0 : index
    %499 = vector.load %arg2[%c23, %c0_199, %c0_200] : memref<57x32x32xf32, #tpu.memory_space<vmem>>, vector<1x32x32xf32>
    %500 = vector.shape_cast %499 : vector<1x32x32xf32> to vector<32x32xf32>
    %cst_201 = arith.constant dense<0.000000e+00> : vector<16x32xf32>
    %501 = tpu.matmul %6, %500, %cst_201 {dimension_numbers = #tpu.dot_dimension_numbers<[1], [0], [0], [1], [0, 0, 1, 1], [], []>} : vector<16x32xf32>, vector<32x32xf32>, vector<16x32xf32> -> vector<16x32xf32>
    %502 = vector.extract_strided_slice %6 {offsets = [0, 0], sizes = [8, 32], strides = [1, 1]} : vector<16x32xf32> to vector<8x32xf32>
    %503 = vector.extract_strided_slice %471 {offsets = [0, 0], sizes = [8, 32], strides = [1, 1]} : vector<16x32xf32> to vector<8x32xf32>
    %cst_202 = arith.constant dense<0.000000e+00> : vector<8x8xf32>
    %504 = tpu.matmul %503, %502, %cst_202 {dimension_numbers = #tpu.dot_dimension_numbers<[1], [1], [0], [0], [0, 0, 1, 0], [], []>} : vector<8x32xf32>, vector<8x32xf32>, vector<8x8xf32> -> vector<8x8xf32>
    %cst_203 = arith.constant dense<0xFF800000> : vector<8xf32>
    %505 = vector.multi_reduction <maximumf>, %504, %cst_203 [1] : vector<8x8xf32> to vector<8xf32>
    %506 = vector.shape_cast %505 : vector<8xf32> to vector<8x1xf32>
    %507 = vector.broadcast %506 : vector<8x1xf32> to vector<8x8xf32>
    %508 = arith.subf %504, %507 : vector<8x8xf32>
    %509 = math.exp %508 : vector<8x8xf32>
    %cst_204 = arith.constant dense<0.000000e+00> : vector<8xf32>
    %510 = vector.multi_reduction <add>, %509, %cst_204 [1] : vector<8x8xf32> to vector<8xf32>
    %511 = vector.shape_cast %510 : vector<8xf32> to vector<8x1xf32>
    %512 = vector.broadcast %511 : vector<8x1xf32> to vector<8x8xf32>
    %513 = arith.divf %509, %512 : vector<8x8xf32>
    %514 = vector.extract_strided_slice %492 {offsets = [0, 0], sizes = [8, 32], strides = [1, 1]} : vector<16x32xf32> to vector<8x32xf32>
    %cst_205 = arith.constant dense<0.000000e+00> : vector<8x32xf32>
    %515 = tpu.matmul %513, %514, %cst_205 {dimension_numbers = #tpu.dot_dimension_numbers<[1], [0], [0], [1], [0, 0, 1, 1], [], []>} : vector<8x8xf32>, vector<8x32xf32>, vector<8x32xf32> -> vector<8x32xf32>
    %516 = vector.extract_strided_slice %477 {offsets = [0, 0], sizes = [8, 32], strides = [1, 1]} : vector<16x32xf32> to vector<8x32xf32>
    %cst_206 = arith.constant dense<0.000000e+00> : vector<8x8xf32>
    %517 = tpu.matmul %516, %502, %cst_206 {dimension_numbers = #tpu.dot_dimension_numbers<[1], [1], [0], [0], [0, 0, 1, 0], [], []>} : vector<8x32xf32>, vector<8x32xf32>, vector<8x8xf32> -> vector<8x8xf32>
    %cst_207 = arith.constant dense<0xFF800000> : vector<8xf32>
    %518 = vector.multi_reduction <maximumf>, %517, %cst_207 [1] : vector<8x8xf32> to vector<8xf32>
    %519 = vector.shape_cast %518 : vector<8xf32> to vector<8x1xf32>
    %520 = vector.broadcast %519 : vector<8x1xf32> to vector<8x8xf32>
    %521 = arith.subf %517, %520 : vector<8x8xf32>
    %522 = math.exp %521 : vector<8x8xf32>
    %cst_208 = arith.constant dense<0.000000e+00> : vector<8xf32>
    %523 = vector.multi_reduction <add>, %522, %cst_208 [1] : vector<8x8xf32> to vector<8xf32>
    %524 = vector.shape_cast %523 : vector<8xf32> to vector<8x1xf32>
    %525 = vector.broadcast %524 : vector<8x1xf32> to vector<8x8xf32>
    %526 = arith.divf %522, %525 : vector<8x8xf32>
    %527 = vector.extract_strided_slice %495 {offsets = [0, 0], sizes = [8, 32], strides = [1, 1]} : vector<16x32xf32> to vector<8x32xf32>
    %cst_209 = arith.constant dense<0.000000e+00> : vector<8x32xf32>
    %528 = tpu.matmul %526, %527, %cst_209 {dimension_numbers = #tpu.dot_dimension_numbers<[1], [0], [0], [1], [0, 0, 1, 1], [], []>} : vector<8x8xf32>, vector<8x32xf32>, vector<8x32xf32> -> vector<8x32xf32>
    %529 = arith.addf %515, %528 : vector<8x32xf32>
    %530 = vector.extract_strided_slice %483 {offsets = [0, 0], sizes = [8, 32], strides = [1, 1]} : vector<16x32xf32> to vector<8x32xf32>
    %cst_210 = arith.constant dense<0.000000e+00> : vector<8x8xf32>
    %531 = tpu.matmul %530, %502, %cst_210 {dimension_numbers = #tpu.dot_dimension_numbers<[1], [1], [0], [0], [0, 0, 1, 0], [], []>} : vector<8x32xf32>, vector<8x32xf32>, vector<8x8xf32> -> vector<8x8xf32>
    %cst_211 = arith.constant dense<0xFF800000> : vector<8xf32>
    %532 = vector.multi_reduction <maximumf>, %531, %cst_211 [1] : vector<8x8xf32> to vector<8xf32>
    %533 = vector.shape_cast %532 : vector<8xf32> to vector<8x1xf32>
    %534 = vector.broadcast %533 : vector<8x1xf32> to vector<8x8xf32>
    %535 = arith.subf %531, %534 : vector<8x8xf32>
    %536 = math.exp %535 : vector<8x8xf32>
    %cst_212 = arith.constant dense<0.000000e+00> : vector<8xf32>
    %537 = vector.multi_reduction <add>, %536, %cst_212 [1] : vector<8x8xf32> to vector<8xf32>
    %538 = vector.shape_cast %537 : vector<8xf32> to vector<8x1xf32>
    %539 = vector.broadcast %538 : vector<8x1xf32> to vector<8x8xf32>
    %540 = arith.divf %536, %539 : vector<8x8xf32>
    %541 = vector.extract_strided_slice %498 {offsets = [0, 0], sizes = [8, 32], strides = [1, 1]} : vector<16x32xf32> to vector<8x32xf32>
    %cst_213 = arith.constant dense<0.000000e+00> : vector<8x32xf32>
    %542 = tpu.matmul %540, %541, %cst_213 {dimension_numbers = #tpu.dot_dimension_numbers<[1], [0], [0], [1], [0, 0, 1, 1], [], []>} : vector<8x8xf32>, vector<8x32xf32>, vector<8x32xf32> -> vector<8x32xf32>
    %543 = arith.addf %529, %542 : vector<8x32xf32>
    %544 = vector.extract_strided_slice %489 {offsets = [0, 0], sizes = [8, 32], strides = [1, 1]} : vector<16x32xf32> to vector<8x32xf32>
    %cst_214 = arith.constant dense<0.000000e+00> : vector<8x8xf32>
    %545 = tpu.matmul %544, %502, %cst_214 {dimension_numbers = #tpu.dot_dimension_numbers<[1], [1], [0], [0], [0, 0, 1, 0], [], []>} : vector<8x32xf32>, vector<8x32xf32>, vector<8x8xf32> -> vector<8x8xf32>
    %cst_215 = arith.constant dense<0xFF800000> : vector<8xf32>
    %546 = vector.multi_reduction <maximumf>, %545, %cst_215 [1] : vector<8x8xf32> to vector<8xf32>
    %547 = vector.shape_cast %546 : vector<8xf32> to vector<8x1xf32>
    %548 = vector.broadcast %547 : vector<8x1xf32> to vector<8x8xf32>
    %549 = arith.subf %545, %548 : vector<8x8xf32>
    %550 = math.exp %549 : vector<8x8xf32>
    %cst_216 = arith.constant dense<0.000000e+00> : vector<8xf32>
    %551 = vector.multi_reduction <add>, %550, %cst_216 [1] : vector<8x8xf32> to vector<8xf32>
    %552 = vector.shape_cast %551 : vector<8xf32> to vector<8x1xf32>
    %553 = vector.broadcast %552 : vector<8x1xf32> to vector<8x8xf32>
    %554 = arith.divf %550, %553 : vector<8x8xf32>
    %555 = vector.extract_strided_slice %501 {offsets = [0, 0], sizes = [8, 32], strides = [1, 1]} : vector<16x32xf32> to vector<8x32xf32>
    %cst_217 = arith.constant dense<0.000000e+00> : vector<8x32xf32>
    %556 = tpu.matmul %554, %555, %cst_217 {dimension_numbers = #tpu.dot_dimension_numbers<[1], [0], [0], [1], [0, 0, 1, 1], [], []>} : vector<8x8xf32>, vector<8x32xf32>, vector<8x32xf32> -> vector<8x32xf32>
    %557 = arith.addf %543, %556 : vector<8x32xf32>
    %558 = vector.extract_strided_slice %6 {offsets = [8, 0], sizes = [8, 32], strides = [1, 1]} : vector<16x32xf32> to vector<8x32xf32>
    %559 = vector.extract_strided_slice %471 {offsets = [8, 0], sizes = [8, 32], strides = [1, 1]} : vector<16x32xf32> to vector<8x32xf32>
    %cst_218 = arith.constant dense<0.000000e+00> : vector<8x8xf32>
    %560 = tpu.matmul %559, %558, %cst_218 {dimension_numbers = #tpu.dot_dimension_numbers<[1], [1], [0], [0], [0, 0, 1, 0], [], []>} : vector<8x32xf32>, vector<8x32xf32>, vector<8x8xf32> -> vector<8x8xf32>
    %cst_219 = arith.constant dense<0xFF800000> : vector<8xf32>
    %561 = vector.multi_reduction <maximumf>, %560, %cst_219 [1] : vector<8x8xf32> to vector<8xf32>
    %562 = vector.shape_cast %561 : vector<8xf32> to vector<8x1xf32>
    %563 = vector.broadcast %562 : vector<8x1xf32> to vector<8x8xf32>
    %564 = arith.subf %560, %563 : vector<8x8xf32>
    %565 = math.exp %564 : vector<8x8xf32>
    %cst_220 = arith.constant dense<0.000000e+00> : vector<8xf32>
    %566 = vector.multi_reduction <add>, %565, %cst_220 [1] : vector<8x8xf32> to vector<8xf32>
    %567 = vector.shape_cast %566 : vector<8xf32> to vector<8x1xf32>
    %568 = vector.broadcast %567 : vector<8x1xf32> to vector<8x8xf32>
    %569 = arith.divf %565, %568 : vector<8x8xf32>
    %570 = vector.extract_strided_slice %492 {offsets = [8, 0], sizes = [8, 32], strides = [1, 1]} : vector<16x32xf32> to vector<8x32xf32>
    %cst_221 = arith.constant dense<0.000000e+00> : vector<8x32xf32>
    %571 = tpu.matmul %569, %570, %cst_221 {dimension_numbers = #tpu.dot_dimension_numbers<[1], [0], [0], [1], [0, 0, 1, 1], [], []>} : vector<8x8xf32>, vector<8x32xf32>, vector<8x32xf32> -> vector<8x32xf32>
    %572 = vector.extract_strided_slice %477 {offsets = [8, 0], sizes = [8, 32], strides = [1, 1]} : vector<16x32xf32> to vector<8x32xf32>
    %cst_222 = arith.constant dense<0.000000e+00> : vector<8x8xf32>
    %573 = tpu.matmul %572, %558, %cst_222 {dimension_numbers = #tpu.dot_dimension_numbers<[1], [1], [0], [0], [0, 0, 1, 0], [], []>} : vector<8x32xf32>, vector<8x32xf32>, vector<8x8xf32> -> vector<8x8xf32>
    %cst_223 = arith.constant dense<0xFF800000> : vector<8xf32>
    %574 = vector.multi_reduction <maximumf>, %573, %cst_223 [1] : vector<8x8xf32> to vector<8xf32>
    %575 = vector.shape_cast %574 : vector<8xf32> to vector<8x1xf32>
    %576 = vector.broadcast %575 : vector<8x1xf32> to vector<8x8xf32>
    %577 = arith.subf %573, %576 : vector<8x8xf32>
    %578 = math.exp %577 : vector<8x8xf32>
    %cst_224 = arith.constant dense<0.000000e+00> : vector<8xf32>
    %579 = vector.multi_reduction <add>, %578, %cst_224 [1] : vector<8x8xf32> to vector<8xf32>
    %580 = vector.shape_cast %579 : vector<8xf32> to vector<8x1xf32>
    %581 = vector.broadcast %580 : vector<8x1xf32> to vector<8x8xf32>
    %582 = arith.divf %578, %581 : vector<8x8xf32>
    %583 = vector.extract_strided_slice %495 {offsets = [8, 0], sizes = [8, 32], strides = [1, 1]} : vector<16x32xf32> to vector<8x32xf32>
    %cst_225 = arith.constant dense<0.000000e+00> : vector<8x32xf32>
    %584 = tpu.matmul %582, %583, %cst_225 {dimension_numbers = #tpu.dot_dimension_numbers<[1], [0], [0], [1], [0, 0, 1, 1], [], []>} : vector<8x8xf32>, vector<8x32xf32>, vector<8x32xf32> -> vector<8x32xf32>
    %585 = arith.addf %571, %584 : vector<8x32xf32>
    %586 = vector.extract_strided_slice %483 {offsets = [8, 0], sizes = [8, 32], strides = [1, 1]} : vector<16x32xf32> to vector<8x32xf32>
    %cst_226 = arith.constant dense<0.000000e+00> : vector<8x8xf32>
    %587 = tpu.matmul %586, %558, %cst_226 {dimension_numbers = #tpu.dot_dimension_numbers<[1], [1], [0], [0], [0, 0, 1, 0], [], []>} : vector<8x32xf32>, vector<8x32xf32>, vector<8x8xf32> -> vector<8x8xf32>
    %cst_227 = arith.constant dense<0xFF800000> : vector<8xf32>
    %588 = vector.multi_reduction <maximumf>, %587, %cst_227 [1] : vector<8x8xf32> to vector<8xf32>
    %589 = vector.shape_cast %588 : vector<8xf32> to vector<8x1xf32>
    %590 = vector.broadcast %589 : vector<8x1xf32> to vector<8x8xf32>
    %591 = arith.subf %587, %590 : vector<8x8xf32>
    %592 = math.exp %591 : vector<8x8xf32>
    %cst_228 = arith.constant dense<0.000000e+00> : vector<8xf32>
    %593 = vector.multi_reduction <add>, %592, %cst_228 [1] : vector<8x8xf32> to vector<8xf32>
    %594 = vector.shape_cast %593 : vector<8xf32> to vector<8x1xf32>
    %595 = vector.broadcast %594 : vector<8x1xf32> to vector<8x8xf32>
    %596 = arith.divf %592, %595 : vector<8x8xf32>
    %597 = vector.extract_strided_slice %498 {offsets = [8, 0], sizes = [8, 32], strides = [1, 1]} : vector<16x32xf32> to vector<8x32xf32>
    %cst_229 = arith.constant dense<0.000000e+00> : vector<8x32xf32>
    %598 = tpu.matmul %596, %597, %cst_229 {dimension_numbers = #tpu.dot_dimension_numbers<[1], [0], [0], [1], [0, 0, 1, 1], [], []>} : vector<8x8xf32>, vector<8x32xf32>, vector<8x32xf32> -> vector<8x32xf32>
    %599 = arith.addf %585, %598 : vector<8x32xf32>
    %600 = vector.extract_strided_slice %489 {offsets = [8, 0], sizes = [8, 32], strides = [1, 1]} : vector<16x32xf32> to vector<8x32xf32>
    %cst_230 = arith.constant dense<0.000000e+00> : vector<8x8xf32>
    %601 = tpu.matmul %600, %558, %cst_230 {dimension_numbers = #tpu.dot_dimension_numbers<[1], [1], [0], [0], [0, 0, 1, 0], [], []>} : vector<8x32xf32>, vector<8x32xf32>, vector<8x8xf32> -> vector<8x8xf32>
    %cst_231 = arith.constant dense<0xFF800000> : vector<8xf32>
    %602 = vector.multi_reduction <maximumf>, %601, %cst_231 [1] : vector<8x8xf32> to vector<8xf32>
    %603 = vector.shape_cast %602 : vector<8xf32> to vector<8x1xf32>
    %604 = vector.broadcast %603 : vector<8x1xf32> to vector<8x8xf32>
    %605 = arith.subf %601, %604 : vector<8x8xf32>
    %606 = math.exp %605 : vector<8x8xf32>
    %cst_232 = arith.constant dense<0.000000e+00> : vector<8xf32>
    %607 = vector.multi_reduction <add>, %606, %cst_232 [1] : vector<8x8xf32> to vector<8xf32>
    %608 = vector.shape_cast %607 : vector<8xf32> to vector<8x1xf32>
    %609 = vector.broadcast %608 : vector<8x1xf32> to vector<8x8xf32>
    %610 = arith.divf %606, %609 : vector<8x8xf32>
    %611 = vector.extract_strided_slice %501 {offsets = [8, 0], sizes = [8, 32], strides = [1, 1]} : vector<16x32xf32> to vector<8x32xf32>
    %cst_233 = arith.constant dense<0.000000e+00> : vector<8x32xf32>
    %612 = tpu.matmul %610, %611, %cst_233 {dimension_numbers = #tpu.dot_dimension_numbers<[1], [0], [0], [1], [0, 0, 1, 1], [], []>} : vector<8x8xf32>, vector<8x32xf32>, vector<8x32xf32> -> vector<8x32xf32>
    %613 = arith.addf %599, %612 : vector<8x32xf32>
    %614 = tpu.concatenate %557, %613 in 0 : vector<8x32xf32>, vector<8x32xf32> -> vector<16x32xf32>
    %c63 = arith.constant 63 : index
    %c0_234 = arith.constant 0 : index
    %615 = vector.load %arg3[%c63, %c0_234] : memref<111x32xf32, #tpu.memory_space<vmem>>, vector<1x32xf32>
    %616 = vector.broadcast %615 : vector<1x32xf32> to vector<16x32xf32>
    %617 = arith.addf %614, %616 : vector<16x32xf32>
    %618 = arith.addf %6, %617 : vector<16x32xf32>
    %cst_235 = arith.constant dense<0.000000e+00> : vector<16xf32>
    %619 = vector.multi_reduction <add>, %618, %cst_235 [1] : vector<16x32xf32> to vector<16xf32>
    %620 = vector.shape_cast %619 : vector<16xf32> to vector<16x1xf32>
    %cst_236 = arith.constant 3.200000e+01 : f32
    %621 = vector.broadcast %cst_236 : f32 to vector<16x1xf32>
    %622 = arith.divf %620, %621 : vector<16x1xf32>
    %623 = arith.mulf %618, %618 : vector<16x32xf32>
    %cst_237 = arith.constant dense<0.000000e+00> : vector<16xf32>
    %624 = vector.multi_reduction <add>, %623, %cst_237 [1] : vector<16x32xf32> to vector<16xf32>
    %625 = vector.shape_cast %624 : vector<16xf32> to vector<16x1xf32>
    %cst_238 = arith.constant 3.200000e+01 : f32
    %626 = vector.broadcast %cst_238 : f32 to vector<16x1xf32>
    %627 = arith.divf %625, %626 : vector<16x1xf32>
    %628 = arith.mulf %622, %622 : vector<16x1xf32>
    %629 = arith.subf %627, %628 : vector<16x1xf32>
    %630 = vector.broadcast %622 : vector<16x1xf32> to vector<16x32xf32>
    %631 = arith.subf %618, %630 : vector<16x32xf32>
    %cst_239 = arith.constant 9.99999974E-6 : f32
    %632 = vector.broadcast %cst_239 : f32 to vector<16x1xf32>
    %633 = arith.addf %629, %632 : vector<16x1xf32>
    %634 = math.rsqrt %633 : vector<16x1xf32>
    %635 = vector.broadcast %634 : vector<16x1xf32> to vector<16x32xf32>
    %636 = arith.mulf %631, %635 : vector<16x32xf32>
    %c97 = arith.constant 97 : index
    %c0_240 = arith.constant 0 : index
    %637 = vector.load %arg3[%c97, %c0_240] : memref<111x32xf32, #tpu.memory_space<vmem>>, vector<1x32xf32>
    %638 = vector.broadcast %637 : vector<1x32xf32> to vector<16x32xf32>
    %639 = arith.mulf %636, %638 : vector<16x32xf32>
    %c98 = arith.constant 98 : index
    %c0_241 = arith.constant 0 : index
    %640 = vector.load %arg3[%c98, %c0_241] : memref<111x32xf32, #tpu.memory_space<vmem>>, vector<1x32xf32>
    %641 = vector.broadcast %640 : vector<1x32xf32> to vector<16x32xf32>
    %642 = arith.addf %639, %641 : vector<16x32xf32>
    %c64 = arith.constant 64 : index
    %c0_242 = arith.constant 0 : index
    %643 = vector.load %arg3[%c64, %c0_242] : memref<111x32xf32, #tpu.memory_space<vmem>>, vector<4x32xf32>
    %c24 = arith.constant 24 : index
    %c0_243 = arith.constant 0 : index
    %c0_244 = arith.constant 0 : index
    %644 = vector.load %arg2[%c24, %c0_243, %c0_244] : memref<57x32x32xf32, #tpu.memory_space<vmem>>, vector<1x32x32xf32>
    %645 = vector.shape_cast %644 : vector<1x32x32xf32> to vector<32x32xf32>
    %cst_245 = arith.constant dense<0.000000e+00> : vector<16x32xf32>
    %646 = tpu.matmul %642, %645, %cst_245 {dimension_numbers = #tpu.dot_dimension_numbers<[1], [0], [0], [1], [0, 0, 1, 1], [], []>} : vector<16x32xf32>, vector<32x32xf32>, vector<16x32xf32> -> vector<16x32xf32>
    %647 = vector.extract_strided_slice %643 {offsets = [0, 0], sizes = [1, 32], strides = [1, 1]} : vector<4x32xf32> to vector<1x32xf32>
    %648 = vector.broadcast %647 : vector<1x32xf32> to vector<16x32xf32>
    %649 = arith.addf %646, %648 : vector<16x32xf32>
    %c25 = arith.constant 25 : index
    %c0_246 = arith.constant 0 : index
    %c0_247 = arith.constant 0 : index
    %650 = vector.load %arg2[%c25, %c0_246, %c0_247] : memref<57x32x32xf32, #tpu.memory_space<vmem>>, vector<1x32x32xf32>
    %651 = vector.shape_cast %650 : vector<1x32x32xf32> to vector<32x32xf32>
    %cst_248 = arith.constant dense<0.000000e+00> : vector<16x32xf32>
    %652 = tpu.matmul %642, %651, %cst_248 {dimension_numbers = #tpu.dot_dimension_numbers<[1], [0], [0], [1], [0, 0, 1, 1], [], []>} : vector<16x32xf32>, vector<32x32xf32>, vector<16x32xf32> -> vector<16x32xf32>
    %653 = vector.extract_strided_slice %643 {offsets = [1, 0], sizes = [1, 32], strides = [1, 1]} : vector<4x32xf32> to vector<1x32xf32>
    %654 = vector.broadcast %653 : vector<1x32xf32> to vector<16x32xf32>
    %655 = arith.addf %652, %654 : vector<16x32xf32>
    %c26 = arith.constant 26 : index
    %c0_249 = arith.constant 0 : index
    %c0_250 = arith.constant 0 : index
    %656 = vector.load %arg2[%c26, %c0_249, %c0_250] : memref<57x32x32xf32, #tpu.memory_space<vmem>>, vector<1x32x32xf32>
    %657 = vector.shape_cast %656 : vector<1x32x32xf32> to vector<32x32xf32>
    %cst_251 = arith.constant dense<0.000000e+00> : vector<16x32xf32>
    %658 = tpu.matmul %642, %657, %cst_251 {dimension_numbers = #tpu.dot_dimension_numbers<[1], [0], [0], [1], [0, 0, 1, 1], [], []>} : vector<16x32xf32>, vector<32x32xf32>, vector<16x32xf32> -> vector<16x32xf32>
    %659 = vector.extract_strided_slice %643 {offsets = [2, 0], sizes = [1, 32], strides = [1, 1]} : vector<4x32xf32> to vector<1x32xf32>
    %660 = vector.broadcast %659 : vector<1x32xf32> to vector<16x32xf32>
    %661 = arith.addf %658, %660 : vector<16x32xf32>
    %c27 = arith.constant 27 : index
    %c0_252 = arith.constant 0 : index
    %c0_253 = arith.constant 0 : index
    %662 = vector.load %arg2[%c27, %c0_252, %c0_253] : memref<57x32x32xf32, #tpu.memory_space<vmem>>, vector<1x32x32xf32>
    %663 = vector.shape_cast %662 : vector<1x32x32xf32> to vector<32x32xf32>
    %cst_254 = arith.constant dense<0.000000e+00> : vector<16x32xf32>
    %664 = tpu.matmul %642, %663, %cst_254 {dimension_numbers = #tpu.dot_dimension_numbers<[1], [0], [0], [1], [0, 0, 1, 1], [], []>} : vector<16x32xf32>, vector<32x32xf32>, vector<16x32xf32> -> vector<16x32xf32>
    %665 = vector.extract_strided_slice %643 {offsets = [3, 0], sizes = [1, 32], strides = [1, 1]} : vector<4x32xf32> to vector<1x32xf32>
    %666 = vector.broadcast %665 : vector<1x32xf32> to vector<16x32xf32>
    %667 = arith.addf %664, %666 : vector<16x32xf32>
    %c28 = arith.constant 28 : index
    %c0_255 = arith.constant 0 : index
    %c0_256 = arith.constant 0 : index
    %668 = vector.load %arg2[%c28, %c0_255, %c0_256] : memref<57x32x32xf32, #tpu.memory_space<vmem>>, vector<1x32x32xf32>
    %669 = vector.shape_cast %668 : vector<1x32x32xf32> to vector<32x32xf32>
    %cst_257 = arith.constant dense<0.000000e+00> : vector<16x32xf32>
    %670 = tpu.matmul %464, %669, %cst_257 {dimension_numbers = #tpu.dot_dimension_numbers<[1], [0], [0], [1], [0, 0, 1, 1], [], []>} : vector<16x32xf32>, vector<32x32xf32>, vector<16x32xf32> -> vector<16x32xf32>
    %c29 = arith.constant 29 : index
    %c0_258 = arith.constant 0 : index
    %c0_259 = arith.constant 0 : index
    %671 = vector.load %arg2[%c29, %c0_258, %c0_259] : memref<57x32x32xf32, #tpu.memory_space<vmem>>, vector<1x32x32xf32>
    %672 = vector.shape_cast %671 : vector<1x32x32xf32> to vector<32x32xf32>
    %cst_260 = arith.constant dense<0.000000e+00> : vector<16x32xf32>
    %673 = tpu.matmul %464, %672, %cst_260 {dimension_numbers = #tpu.dot_dimension_numbers<[1], [0], [0], [1], [0, 0, 1, 1], [], []>} : vector<16x32xf32>, vector<32x32xf32>, vector<16x32xf32> -> vector<16x32xf32>
    %c30 = arith.constant 30 : index
    %c0_261 = arith.constant 0 : index
    %c0_262 = arith.constant 0 : index
    %674 = vector.load %arg2[%c30, %c0_261, %c0_262] : memref<57x32x32xf32, #tpu.memory_space<vmem>>, vector<1x32x32xf32>
    %675 = vector.shape_cast %674 : vector<1x32x32xf32> to vector<32x32xf32>
    %cst_263 = arith.constant dense<0.000000e+00> : vector<16x32xf32>
    %676 = tpu.matmul %464, %675, %cst_263 {dimension_numbers = #tpu.dot_dimension_numbers<[1], [0], [0], [1], [0, 0, 1, 1], [], []>} : vector<16x32xf32>, vector<32x32xf32>, vector<16x32xf32> -> vector<16x32xf32>
    %c31 = arith.constant 31 : index
    %c0_264 = arith.constant 0 : index
    %c0_265 = arith.constant 0 : index
    %677 = vector.load %arg2[%c31, %c0_264, %c0_265] : memref<57x32x32xf32, #tpu.memory_space<vmem>>, vector<1x32x32xf32>
    %678 = vector.shape_cast %677 : vector<1x32x32xf32> to vector<32x32xf32>
    %cst_266 = arith.constant dense<0.000000e+00> : vector<16x32xf32>
    %679 = tpu.matmul %464, %678, %cst_266 {dimension_numbers = #tpu.dot_dimension_numbers<[1], [0], [0], [1], [0, 0, 1, 1], [], []>} : vector<16x32xf32>, vector<32x32xf32>, vector<16x32xf32> -> vector<16x32xf32>
    %680 = vector.extract_strided_slice %464 {offsets = [0, 0], sizes = [8, 32], strides = [1, 1]} : vector<16x32xf32> to vector<8x32xf32>
    %681 = vector.extract_strided_slice %649 {offsets = [0, 0], sizes = [8, 32], strides = [1, 1]} : vector<16x32xf32> to vector<8x32xf32>
    %cst_267 = arith.constant dense<0.000000e+00> : vector<8x8xf32>
    %682 = tpu.matmul %681, %680, %cst_267 {dimension_numbers = #tpu.dot_dimension_numbers<[1], [1], [0], [0], [0, 0, 1, 0], [], []>} : vector<8x32xf32>, vector<8x32xf32>, vector<8x8xf32> -> vector<8x8xf32>
    %cst_268 = arith.constant dense<0xFF800000> : vector<8xf32>
    %683 = vector.multi_reduction <maximumf>, %682, %cst_268 [1] : vector<8x8xf32> to vector<8xf32>
    %684 = vector.shape_cast %683 : vector<8xf32> to vector<8x1xf32>
    %685 = vector.broadcast %684 : vector<8x1xf32> to vector<8x8xf32>
    %686 = arith.subf %682, %685 : vector<8x8xf32>
    %687 = math.exp %686 : vector<8x8xf32>
    %cst_269 = arith.constant dense<0.000000e+00> : vector<8xf32>
    %688 = vector.multi_reduction <add>, %687, %cst_269 [1] : vector<8x8xf32> to vector<8xf32>
    %689 = vector.shape_cast %688 : vector<8xf32> to vector<8x1xf32>
    %690 = vector.broadcast %689 : vector<8x1xf32> to vector<8x8xf32>
    %691 = arith.divf %687, %690 : vector<8x8xf32>
    %692 = vector.extract_strided_slice %670 {offsets = [0, 0], sizes = [8, 32], strides = [1, 1]} : vector<16x32xf32> to vector<8x32xf32>
    %cst_270 = arith.constant dense<0.000000e+00> : vector<8x32xf32>
    %693 = tpu.matmul %691, %692, %cst_270 {dimension_numbers = #tpu.dot_dimension_numbers<[1], [0], [0], [1], [0, 0, 1, 1], [], []>} : vector<8x8xf32>, vector<8x32xf32>, vector<8x32xf32> -> vector<8x32xf32>
    %694 = vector.extract_strided_slice %655 {offsets = [0, 0], sizes = [8, 32], strides = [1, 1]} : vector<16x32xf32> to vector<8x32xf32>
    %cst_271 = arith.constant dense<0.000000e+00> : vector<8x8xf32>
    %695 = tpu.matmul %694, %680, %cst_271 {dimension_numbers = #tpu.dot_dimension_numbers<[1], [1], [0], [0], [0, 0, 1, 0], [], []>} : vector<8x32xf32>, vector<8x32xf32>, vector<8x8xf32> -> vector<8x8xf32>
    %cst_272 = arith.constant dense<0xFF800000> : vector<8xf32>
    %696 = vector.multi_reduction <maximumf>, %695, %cst_272 [1] : vector<8x8xf32> to vector<8xf32>
    %697 = vector.shape_cast %696 : vector<8xf32> to vector<8x1xf32>
    %698 = vector.broadcast %697 : vector<8x1xf32> to vector<8x8xf32>
    %699 = arith.subf %695, %698 : vector<8x8xf32>
    %700 = math.exp %699 : vector<8x8xf32>
    %cst_273 = arith.constant dense<0.000000e+00> : vector<8xf32>
    %701 = vector.multi_reduction <add>, %700, %cst_273 [1] : vector<8x8xf32> to vector<8xf32>
    %702 = vector.shape_cast %701 : vector<8xf32> to vector<8x1xf32>
    %703 = vector.broadcast %702 : vector<8x1xf32> to vector<8x8xf32>
    %704 = arith.divf %700, %703 : vector<8x8xf32>
    %705 = vector.extract_strided_slice %673 {offsets = [0, 0], sizes = [8, 32], strides = [1, 1]} : vector<16x32xf32> to vector<8x32xf32>
    %cst_274 = arith.constant dense<0.000000e+00> : vector<8x32xf32>
    %706 = tpu.matmul %704, %705, %cst_274 {dimension_numbers = #tpu.dot_dimension_numbers<[1], [0], [0], [1], [0, 0, 1, 1], [], []>} : vector<8x8xf32>, vector<8x32xf32>, vector<8x32xf32> -> vector<8x32xf32>
    %707 = arith.addf %693, %706 : vector<8x32xf32>
    %708 = vector.extract_strided_slice %661 {offsets = [0, 0], sizes = [8, 32], strides = [1, 1]} : vector<16x32xf32> to vector<8x32xf32>
    %cst_275 = arith.constant dense<0.000000e+00> : vector<8x8xf32>
    %709 = tpu.matmul %708, %680, %cst_275 {dimension_numbers = #tpu.dot_dimension_numbers<[1], [1], [0], [0], [0, 0, 1, 0], [], []>} : vector<8x32xf32>, vector<8x32xf32>, vector<8x8xf32> -> vector<8x8xf32>
    %cst_276 = arith.constant dense<0xFF800000> : vector<8xf32>
    %710 = vector.multi_reduction <maximumf>, %709, %cst_276 [1] : vector<8x8xf32> to vector<8xf32>
    %711 = vector.shape_cast %710 : vector<8xf32> to vector<8x1xf32>
    %712 = vector.broadcast %711 : vector<8x1xf32> to vector<8x8xf32>
    %713 = arith.subf %709, %712 : vector<8x8xf32>
    %714 = math.exp %713 : vector<8x8xf32>
    %cst_277 = arith.constant dense<0.000000e+00> : vector<8xf32>
    %715 = vector.multi_reduction <add>, %714, %cst_277 [1] : vector<8x8xf32> to vector<8xf32>
    %716 = vector.shape_cast %715 : vector<8xf32> to vector<8x1xf32>
    %717 = vector.broadcast %716 : vector<8x1xf32> to vector<8x8xf32>
    %718 = arith.divf %714, %717 : vector<8x8xf32>
    %719 = vector.extract_strided_slice %676 {offsets = [0, 0], sizes = [8, 32], strides = [1, 1]} : vector<16x32xf32> to vector<8x32xf32>
    %cst_278 = arith.constant dense<0.000000e+00> : vector<8x32xf32>
    %720 = tpu.matmul %718, %719, %cst_278 {dimension_numbers = #tpu.dot_dimension_numbers<[1], [0], [0], [1], [0, 0, 1, 1], [], []>} : vector<8x8xf32>, vector<8x32xf32>, vector<8x32xf32> -> vector<8x32xf32>
    %721 = arith.addf %707, %720 : vector<8x32xf32>
    %722 = vector.extract_strided_slice %667 {offsets = [0, 0], sizes = [8, 32], strides = [1, 1]} : vector<16x32xf32> to vector<8x32xf32>
    %cst_279 = arith.constant dense<0.000000e+00> : vector<8x8xf32>
    %723 = tpu.matmul %722, %680, %cst_279 {dimension_numbers = #tpu.dot_dimension_numbers<[1], [1], [0], [0], [0, 0, 1, 0], [], []>} : vector<8x32xf32>, vector<8x32xf32>, vector<8x8xf32> -> vector<8x8xf32>
    %cst_280 = arith.constant dense<0xFF800000> : vector<8xf32>
    %724 = vector.multi_reduction <maximumf>, %723, %cst_280 [1] : vector<8x8xf32> to vector<8xf32>
    %725 = vector.shape_cast %724 : vector<8xf32> to vector<8x1xf32>
    %726 = vector.broadcast %725 : vector<8x1xf32> to vector<8x8xf32>
    %727 = arith.subf %723, %726 : vector<8x8xf32>
    %728 = math.exp %727 : vector<8x8xf32>
    %cst_281 = arith.constant dense<0.000000e+00> : vector<8xf32>
    %729 = vector.multi_reduction <add>, %728, %cst_281 [1] : vector<8x8xf32> to vector<8xf32>
    %730 = vector.shape_cast %729 : vector<8xf32> to vector<8x1xf32>
    %731 = vector.broadcast %730 : vector<8x1xf32> to vector<8x8xf32>
    %732 = arith.divf %728, %731 : vector<8x8xf32>
    %733 = vector.extract_strided_slice %679 {offsets = [0, 0], sizes = [8, 32], strides = [1, 1]} : vector<16x32xf32> to vector<8x32xf32>
    %cst_282 = arith.constant dense<0.000000e+00> : vector<8x32xf32>
    %734 = tpu.matmul %732, %733, %cst_282 {dimension_numbers = #tpu.dot_dimension_numbers<[1], [0], [0], [1], [0, 0, 1, 1], [], []>} : vector<8x8xf32>, vector<8x32xf32>, vector<8x32xf32> -> vector<8x32xf32>
    %735 = arith.addf %721, %734 : vector<8x32xf32>
    %736 = vector.extract_strided_slice %464 {offsets = [8, 0], sizes = [8, 32], strides = [1, 1]} : vector<16x32xf32> to vector<8x32xf32>
    %737 = vector.extract_strided_slice %649 {offsets = [8, 0], sizes = [8, 32], strides = [1, 1]} : vector<16x32xf32> to vector<8x32xf32>
    %cst_283 = arith.constant dense<0.000000e+00> : vector<8x8xf32>
    %738 = tpu.matmul %737, %736, %cst_283 {dimension_numbers = #tpu.dot_dimension_numbers<[1], [1], [0], [0], [0, 0, 1, 0], [], []>} : vector<8x32xf32>, vector<8x32xf32>, vector<8x8xf32> -> vector<8x8xf32>
    %cst_284 = arith.constant dense<0xFF800000> : vector<8xf32>
    %739 = vector.multi_reduction <maximumf>, %738, %cst_284 [1] : vector<8x8xf32> to vector<8xf32>
    %740 = vector.shape_cast %739 : vector<8xf32> to vector<8x1xf32>
    %741 = vector.broadcast %740 : vector<8x1xf32> to vector<8x8xf32>
    %742 = arith.subf %738, %741 : vector<8x8xf32>
    %743 = math.exp %742 : vector<8x8xf32>
    %cst_285 = arith.constant dense<0.000000e+00> : vector<8xf32>
    %744 = vector.multi_reduction <add>, %743, %cst_285 [1] : vector<8x8xf32> to vector<8xf32>
    %745 = vector.shape_cast %744 : vector<8xf32> to vector<8x1xf32>
    %746 = vector.broadcast %745 : vector<8x1xf32> to vector<8x8xf32>
    %747 = arith.divf %743, %746 : vector<8x8xf32>
    %748 = vector.extract_strided_slice %670 {offsets = [8, 0], sizes = [8, 32], strides = [1, 1]} : vector<16x32xf32> to vector<8x32xf32>
    %cst_286 = arith.constant dense<0.000000e+00> : vector<8x32xf32>
    %749 = tpu.matmul %747, %748, %cst_286 {dimension_numbers = #tpu.dot_dimension_numbers<[1], [0], [0], [1], [0, 0, 1, 1], [], []>} : vector<8x8xf32>, vector<8x32xf32>, vector<8x32xf32> -> vector<8x32xf32>
    %750 = vector.extract_strided_slice %655 {offsets = [8, 0], sizes = [8, 32], strides = [1, 1]} : vector<16x32xf32> to vector<8x32xf32>
    %cst_287 = arith.constant dense<0.000000e+00> : vector<8x8xf32>
    %751 = tpu.matmul %750, %736, %cst_287 {dimension_numbers = #tpu.dot_dimension_numbers<[1], [1], [0], [0], [0, 0, 1, 0], [], []>} : vector<8x32xf32>, vector<8x32xf32>, vector<8x8xf32> -> vector<8x8xf32>
    %cst_288 = arith.constant dense<0xFF800000> : vector<8xf32>
    %752 = vector.multi_reduction <maximumf>, %751, %cst_288 [1] : vector<8x8xf32> to vector<8xf32>
    %753 = vector.shape_cast %752 : vector<8xf32> to vector<8x1xf32>
    %754 = vector.broadcast %753 : vector<8x1xf32> to vector<8x8xf32>
    %755 = arith.subf %751, %754 : vector<8x8xf32>
    %756 = math.exp %755 : vector<8x8xf32>
    %cst_289 = arith.constant dense<0.000000e+00> : vector<8xf32>
    %757 = vector.multi_reduction <add>, %756, %cst_289 [1] : vector<8x8xf32> to vector<8xf32>
    %758 = vector.shape_cast %757 : vector<8xf32> to vector<8x1xf32>
    %759 = vector.broadcast %758 : vector<8x1xf32> to vector<8x8xf32>
    %760 = arith.divf %756, %759 : vector<8x8xf32>
    %761 = vector.extract_strided_slice %673 {offsets = [8, 0], sizes = [8, 32], strides = [1, 1]} : vector<16x32xf32> to vector<8x32xf32>
    %cst_290 = arith.constant dense<0.000000e+00> : vector<8x32xf32>
    %762 = tpu.matmul %760, %761, %cst_290 {dimension_numbers = #tpu.dot_dimension_numbers<[1], [0], [0], [1], [0, 0, 1, 1], [], []>} : vector<8x8xf32>, vector<8x32xf32>, vector<8x32xf32> -> vector<8x32xf32>
    %763 = arith.addf %749, %762 : vector<8x32xf32>
    %764 = vector.extract_strided_slice %661 {offsets = [8, 0], sizes = [8, 32], strides = [1, 1]} : vector<16x32xf32> to vector<8x32xf32>
    %cst_291 = arith.constant dense<0.000000e+00> : vector<8x8xf32>
    %765 = tpu.matmul %764, %736, %cst_291 {dimension_numbers = #tpu.dot_dimension_numbers<[1], [1], [0], [0], [0, 0, 1, 0], [], []>} : vector<8x32xf32>, vector<8x32xf32>, vector<8x8xf32> -> vector<8x8xf32>
    %cst_292 = arith.constant dense<0xFF800000> : vector<8xf32>
    %766 = vector.multi_reduction <maximumf>, %765, %cst_292 [1] : vector<8x8xf32> to vector<8xf32>
    %767 = vector.shape_cast %766 : vector<8xf32> to vector<8x1xf32>
    %768 = vector.broadcast %767 : vector<8x1xf32> to vector<8x8xf32>
    %769 = arith.subf %765, %768 : vector<8x8xf32>
    %770 = math.exp %769 : vector<8x8xf32>
    %cst_293 = arith.constant dense<0.000000e+00> : vector<8xf32>
    %771 = vector.multi_reduction <add>, %770, %cst_293 [1] : vector<8x8xf32> to vector<8xf32>
    %772 = vector.shape_cast %771 : vector<8xf32> to vector<8x1xf32>
    %773 = vector.broadcast %772 : vector<8x1xf32> to vector<8x8xf32>
    %774 = arith.divf %770, %773 : vector<8x8xf32>
    %775 = vector.extract_strided_slice %676 {offsets = [8, 0], sizes = [8, 32], strides = [1, 1]} : vector<16x32xf32> to vector<8x32xf32>
    %cst_294 = arith.constant dense<0.000000e+00> : vector<8x32xf32>
    %776 = tpu.matmul %774, %775, %cst_294 {dimension_numbers = #tpu.dot_dimension_numbers<[1], [0], [0], [1], [0, 0, 1, 1], [], []>} : vector<8x8xf32>, vector<8x32xf32>, vector<8x32xf32> -> vector<8x32xf32>
    %777 = arith.addf %763, %776 : vector<8x32xf32>
    %778 = vector.extract_strided_slice %667 {offsets = [8, 0], sizes = [8, 32], strides = [1, 1]} : vector<16x32xf32> to vector<8x32xf32>
    %cst_295 = arith.constant dense<0.000000e+00> : vector<8x8xf32>
    %779 = tpu.matmul %778, %736, %cst_295 {dimension_numbers = #tpu.dot_dimension_numbers<[1], [1], [0], [0], [0, 0, 1, 0], [], []>} : vector<8x32xf32>, vector<8x32xf32>, vector<8x8xf32> -> vector<8x8xf32>
    %cst_296 = arith.constant dense<0xFF800000> : vector<8xf32>
    %780 = vector.multi_reduction <maximumf>, %779, %cst_296 [1] : vector<8x8xf32> to vector<8xf32>
    %781 = vector.shape_cast %780 : vector<8xf32> to vector<8x1xf32>
    %782 = vector.broadcast %781 : vector<8x1xf32> to vector<8x8xf32>
    %783 = arith.subf %779, %782 : vector<8x8xf32>
    %784 = math.exp %783 : vector<8x8xf32>
    %cst_297 = arith.constant dense<0.000000e+00> : vector<8xf32>
    %785 = vector.multi_reduction <add>, %784, %cst_297 [1] : vector<8x8xf32> to vector<8xf32>
    %786 = vector.shape_cast %785 : vector<8xf32> to vector<8x1xf32>
    %787 = vector.broadcast %786 : vector<8x1xf32> to vector<8x8xf32>
    %788 = arith.divf %784, %787 : vector<8x8xf32>
    %789 = vector.extract_strided_slice %679 {offsets = [8, 0], sizes = [8, 32], strides = [1, 1]} : vector<16x32xf32> to vector<8x32xf32>
    %cst_298 = arith.constant dense<0.000000e+00> : vector<8x32xf32>
    %790 = tpu.matmul %788, %789, %cst_298 {dimension_numbers = #tpu.dot_dimension_numbers<[1], [0], [0], [1], [0, 0, 1, 1], [], []>} : vector<8x8xf32>, vector<8x32xf32>, vector<8x32xf32> -> vector<8x32xf32>
    %791 = arith.addf %777, %790 : vector<8x32xf32>
    %792 = tpu.concatenate %735, %791 in 0 : vector<8x32xf32>, vector<8x32xf32> -> vector<16x32xf32>
    %c68 = arith.constant 68 : index
    %c0_299 = arith.constant 0 : index
    %793 = vector.load %arg3[%c68, %c0_299] : memref<111x32xf32, #tpu.memory_space<vmem>>, vector<1x32xf32>
    %794 = vector.broadcast %793 : vector<1x32xf32> to vector<16x32xf32>
    %795 = arith.addf %792, %794 : vector<16x32xf32>
    %796 = arith.addf %642, %795 : vector<16x32xf32>
    %cst_300 = arith.constant dense<0.000000e+00> : vector<16xf32>
    %797 = vector.multi_reduction <add>, %796, %cst_300 [1] : vector<16x32xf32> to vector<16xf32>
    %798 = vector.shape_cast %797 : vector<16xf32> to vector<16x1xf32>
    %cst_301 = arith.constant 3.200000e+01 : f32
    %799 = vector.broadcast %cst_301 : f32 to vector<16x1xf32>
    %800 = arith.divf %798, %799 : vector<16x1xf32>
    %801 = arith.mulf %796, %796 : vector<16x32xf32>
    %cst_302 = arith.constant dense<0.000000e+00> : vector<16xf32>
    %802 = vector.multi_reduction <add>, %801, %cst_302 [1] : vector<16x32xf32> to vector<16xf32>
    %803 = vector.shape_cast %802 : vector<16xf32> to vector<16x1xf32>
    %cst_303 = arith.constant 3.200000e+01 : f32
    %804 = vector.broadcast %cst_303 : f32 to vector<16x1xf32>
    %805 = arith.divf %803, %804 : vector<16x1xf32>
    %806 = arith.mulf %800, %800 : vector<16x1xf32>
    %807 = arith.subf %805, %806 : vector<16x1xf32>
    %808 = vector.broadcast %800 : vector<16x1xf32> to vector<16x32xf32>
    %809 = arith.subf %796, %808 : vector<16x32xf32>
    %cst_304 = arith.constant 9.99999974E-6 : f32
    %810 = vector.broadcast %cst_304 : f32 to vector<16x1xf32>
    %811 = arith.addf %807, %810 : vector<16x1xf32>
    %812 = math.rsqrt %811 : vector<16x1xf32>
    %813 = vector.broadcast %812 : vector<16x1xf32> to vector<16x32xf32>
    %814 = arith.mulf %809, %813 : vector<16x32xf32>
    %c99 = arith.constant 99 : index
    %c0_305 = arith.constant 0 : index
    %815 = vector.load %arg3[%c99, %c0_305] : memref<111x32xf32, #tpu.memory_space<vmem>>, vector<1x32xf32>
    %816 = vector.broadcast %815 : vector<1x32xf32> to vector<16x32xf32>
    %817 = arith.mulf %814, %816 : vector<16x32xf32>
    %c100 = arith.constant 100 : index
    %c0_306 = arith.constant 0 : index
    %818 = vector.load %arg3[%c100, %c0_306] : memref<111x32xf32, #tpu.memory_space<vmem>>, vector<1x32xf32>
    %819 = vector.broadcast %818 : vector<1x32xf32> to vector<16x32xf32>
    %820 = arith.addf %817, %819 : vector<16x32xf32>
    %c52 = arith.constant 52 : index
    %c0_307 = arith.constant 0 : index
    %c0_308 = arith.constant 0 : index
    %821 = vector.load %arg2[%c52, %c0_307, %c0_308] : memref<57x32x32xf32, #tpu.memory_space<vmem>>, vector<1x32x32xf32>
    %822 = vector.shape_cast %821 : vector<1x32x32xf32> to vector<32x32xf32>
    %cst_309 = arith.constant dense<0.000000e+00> : vector<16x32xf32>
    %823 = tpu.matmul %820, %822, %cst_309 {dimension_numbers = #tpu.dot_dimension_numbers<[1], [0], [0], [1], [0, 0, 1, 1], [], []>} : vector<16x32xf32>, vector<32x32xf32>, vector<16x32xf32> -> vector<16x32xf32>
    %c83 = arith.constant 83 : index
    %c0_310 = arith.constant 0 : index
    %824 = vector.load %arg3[%c83, %c0_310] : memref<111x32xf32, #tpu.memory_space<vmem>>, vector<1x32xf32>
    %825 = vector.broadcast %824 : vector<1x32xf32> to vector<16x32xf32>
    %826 = arith.addf %823, %825 : vector<16x32xf32>
    %cst_311 = arith.constant 0.000000e+00 : f32
    %827 = vector.broadcast %cst_311 : f32 to vector<16x32xf32>
    %828 = arith.maximumf %826, %827 : vector<16x32xf32>
    %c53_312 = arith.constant 53 : index
    %c0_313 = arith.constant 0 : index
    %c0_314 = arith.constant 0 : index
    %829 = vector.load %arg2[%c53_312, %c0_313, %c0_314] : memref<57x32x32xf32, #tpu.memory_space<vmem>>, vector<1x32x32xf32>
    %830 = vector.shape_cast %829 : vector<1x32x32xf32> to vector<32x32xf32>
    %cst_315 = arith.constant dense<0.000000e+00> : vector<16x32xf32>
    %831 = tpu.matmul %828, %830, %cst_315 {dimension_numbers = #tpu.dot_dimension_numbers<[1], [0], [0], [1], [0, 0, 1, 1], [], []>} : vector<16x32xf32>, vector<32x32xf32>, vector<16x32xf32> -> vector<16x32xf32>
    %c84 = arith.constant 84 : index
    %c0_316 = arith.constant 0 : index
    %832 = vector.load %arg3[%c84, %c0_316] : memref<111x32xf32, #tpu.memory_space<vmem>>, vector<1x32xf32>
    %833 = vector.broadcast %832 : vector<1x32xf32> to vector<16x32xf32>
    %834 = arith.addf %831, %833 : vector<16x32xf32>
    %835 = arith.addf %820, %834 : vector<16x32xf32>
    %cst_317 = arith.constant dense<0.000000e+00> : vector<16xf32>
    %836 = vector.multi_reduction <add>, %835, %cst_317 [1] : vector<16x32xf32> to vector<16xf32>
    %837 = vector.shape_cast %836 : vector<16xf32> to vector<16x1xf32>
    %cst_318 = arith.constant 3.200000e+01 : f32
    %838 = vector.broadcast %cst_318 : f32 to vector<16x1xf32>
    %839 = arith.divf %837, %838 : vector<16x1xf32>
    %840 = arith.mulf %835, %835 : vector<16x32xf32>
    %cst_319 = arith.constant dense<0.000000e+00> : vector<16xf32>
    %841 = vector.multi_reduction <add>, %840, %cst_319 [1] : vector<16x32xf32> to vector<16xf32>
    %842 = vector.shape_cast %841 : vector<16xf32> to vector<16x1xf32>
    %cst_320 = arith.constant 3.200000e+01 : f32
    %843 = vector.broadcast %cst_320 : f32 to vector<16x1xf32>
    %844 = arith.divf %842, %843 : vector<16x1xf32>
    %845 = arith.mulf %839, %839 : vector<16x1xf32>
    %846 = arith.subf %844, %845 : vector<16x1xf32>
    %847 = vector.broadcast %839 : vector<16x1xf32> to vector<16x32xf32>
    %848 = arith.subf %835, %847 : vector<16x32xf32>
    %cst_321 = arith.constant 9.99999974E-6 : f32
    %849 = vector.broadcast %cst_321 : f32 to vector<16x1xf32>
    %850 = arith.addf %846, %849 : vector<16x1xf32>
    %851 = math.rsqrt %850 : vector<16x1xf32>
    %852 = vector.broadcast %851 : vector<16x1xf32> to vector<16x32xf32>
    %853 = arith.mulf %848, %852 : vector<16x32xf32>
    %c101 = arith.constant 101 : index
    %c0_322 = arith.constant 0 : index
    %854 = vector.load %arg3[%c101, %c0_322] : memref<111x32xf32, #tpu.memory_space<vmem>>, vector<1x32xf32>
    %855 = vector.broadcast %854 : vector<1x32xf32> to vector<16x32xf32>
    %856 = arith.mulf %853, %855 : vector<16x32xf32>
    %c102 = arith.constant 102 : index
    %c0_323 = arith.constant 0 : index
    %857 = vector.load %arg3[%c102, %c0_323] : memref<111x32xf32, #tpu.memory_space<vmem>>, vector<1x32xf32>
    %858 = vector.broadcast %857 : vector<1x32xf32> to vector<16x32xf32>
    %859 = arith.addf %856, %858 : vector<16x32xf32>
    %c69 = arith.constant 69 : index
    %c0_324 = arith.constant 0 : index
    %860 = vector.load %arg3[%c69, %c0_324] : memref<111x32xf32, #tpu.memory_space<vmem>>, vector<4x32xf32>
    %c32_325 = arith.constant 32 : index
    %c0_326 = arith.constant 0 : index
    %c0_327 = arith.constant 0 : index
    %861 = vector.load %arg2[%c32_325, %c0_326, %c0_327] : memref<57x32x32xf32, #tpu.memory_space<vmem>>, vector<1x32x32xf32>
    %862 = vector.shape_cast %861 : vector<1x32x32xf32> to vector<32x32xf32>
    %cst_328 = arith.constant dense<0.000000e+00> : vector<16x32xf32>
    %863 = tpu.matmul %859, %862, %cst_328 {dimension_numbers = #tpu.dot_dimension_numbers<[1], [0], [0], [1], [0, 0, 1, 1], [], []>} : vector<16x32xf32>, vector<32x32xf32>, vector<16x32xf32> -> vector<16x32xf32>
    %864 = vector.extract_strided_slice %860 {offsets = [0, 0], sizes = [1, 32], strides = [1, 1]} : vector<4x32xf32> to vector<1x32xf32>
    %865 = vector.broadcast %864 : vector<1x32xf32> to vector<16x32xf32>
    %866 = arith.addf %863, %865 : vector<16x32xf32>
    %c33 = arith.constant 33 : index
    %c0_329 = arith.constant 0 : index
    %c0_330 = arith.constant 0 : index
    %867 = vector.load %arg2[%c33, %c0_329, %c0_330] : memref<57x32x32xf32, #tpu.memory_space<vmem>>, vector<1x32x32xf32>
    %868 = vector.shape_cast %867 : vector<1x32x32xf32> to vector<32x32xf32>
    %cst_331 = arith.constant dense<0.000000e+00> : vector<16x32xf32>
    %869 = tpu.matmul %859, %868, %cst_331 {dimension_numbers = #tpu.dot_dimension_numbers<[1], [0], [0], [1], [0, 0, 1, 1], [], []>} : vector<16x32xf32>, vector<32x32xf32>, vector<16x32xf32> -> vector<16x32xf32>
    %870 = vector.extract_strided_slice %860 {offsets = [1, 0], sizes = [1, 32], strides = [1, 1]} : vector<4x32xf32> to vector<1x32xf32>
    %871 = vector.broadcast %870 : vector<1x32xf32> to vector<16x32xf32>
    %872 = arith.addf %869, %871 : vector<16x32xf32>
    %c34 = arith.constant 34 : index
    %c0_332 = arith.constant 0 : index
    %c0_333 = arith.constant 0 : index
    %873 = vector.load %arg2[%c34, %c0_332, %c0_333] : memref<57x32x32xf32, #tpu.memory_space<vmem>>, vector<1x32x32xf32>
    %874 = vector.shape_cast %873 : vector<1x32x32xf32> to vector<32x32xf32>
    %cst_334 = arith.constant dense<0.000000e+00> : vector<16x32xf32>
    %875 = tpu.matmul %859, %874, %cst_334 {dimension_numbers = #tpu.dot_dimension_numbers<[1], [0], [0], [1], [0, 0, 1, 1], [], []>} : vector<16x32xf32>, vector<32x32xf32>, vector<16x32xf32> -> vector<16x32xf32>
    %876 = vector.extract_strided_slice %860 {offsets = [2, 0], sizes = [1, 32], strides = [1, 1]} : vector<4x32xf32> to vector<1x32xf32>
    %877 = vector.broadcast %876 : vector<1x32xf32> to vector<16x32xf32>
    %878 = arith.addf %875, %877 : vector<16x32xf32>
    %c35 = arith.constant 35 : index
    %c0_335 = arith.constant 0 : index
    %c0_336 = arith.constant 0 : index
    %879 = vector.load %arg2[%c35, %c0_335, %c0_336] : memref<57x32x32xf32, #tpu.memory_space<vmem>>, vector<1x32x32xf32>
    %880 = vector.shape_cast %879 : vector<1x32x32xf32> to vector<32x32xf32>
    %cst_337 = arith.constant dense<0.000000e+00> : vector<16x32xf32>
    %881 = tpu.matmul %859, %880, %cst_337 {dimension_numbers = #tpu.dot_dimension_numbers<[1], [0], [0], [1], [0, 0, 1, 1], [], []>} : vector<16x32xf32>, vector<32x32xf32>, vector<16x32xf32> -> vector<16x32xf32>
    %882 = vector.extract_strided_slice %860 {offsets = [3, 0], sizes = [1, 32], strides = [1, 1]} : vector<4x32xf32> to vector<1x32xf32>
    %883 = vector.broadcast %882 : vector<1x32xf32> to vector<16x32xf32>
    %884 = arith.addf %881, %883 : vector<16x32xf32>
    %c36 = arith.constant 36 : index
    %c0_338 = arith.constant 0 : index
    %c0_339 = arith.constant 0 : index
    %885 = vector.load %arg2[%c36, %c0_338, %c0_339] : memref<57x32x32xf32, #tpu.memory_space<vmem>>, vector<1x32x32xf32>
    %886 = vector.shape_cast %885 : vector<1x32x32xf32> to vector<32x32xf32>
    %cst_340 = arith.constant dense<0.000000e+00> : vector<16x32xf32>
    %887 = tpu.matmul %859, %886, %cst_340 {dimension_numbers = #tpu.dot_dimension_numbers<[1], [0], [0], [1], [0, 0, 1, 1], [], []>} : vector<16x32xf32>, vector<32x32xf32>, vector<16x32xf32> -> vector<16x32xf32>
    %c37 = arith.constant 37 : index
    %c0_341 = arith.constant 0 : index
    %c0_342 = arith.constant 0 : index
    %888 = vector.load %arg2[%c37, %c0_341, %c0_342] : memref<57x32x32xf32, #tpu.memory_space<vmem>>, vector<1x32x32xf32>
    %889 = vector.shape_cast %888 : vector<1x32x32xf32> to vector<32x32xf32>
    %cst_343 = arith.constant dense<0.000000e+00> : vector<16x32xf32>
    %890 = tpu.matmul %859, %889, %cst_343 {dimension_numbers = #tpu.dot_dimension_numbers<[1], [0], [0], [1], [0, 0, 1, 1], [], []>} : vector<16x32xf32>, vector<32x32xf32>, vector<16x32xf32> -> vector<16x32xf32>
    %c38 = arith.constant 38 : index
    %c0_344 = arith.constant 0 : index
    %c0_345 = arith.constant 0 : index
    %891 = vector.load %arg2[%c38, %c0_344, %c0_345] : memref<57x32x32xf32, #tpu.memory_space<vmem>>, vector<1x32x32xf32>
    %892 = vector.shape_cast %891 : vector<1x32x32xf32> to vector<32x32xf32>
    %cst_346 = arith.constant dense<0.000000e+00> : vector<16x32xf32>
    %893 = tpu.matmul %859, %892, %cst_346 {dimension_numbers = #tpu.dot_dimension_numbers<[1], [0], [0], [1], [0, 0, 1, 1], [], []>} : vector<16x32xf32>, vector<32x32xf32>, vector<16x32xf32> -> vector<16x32xf32>
    %c39 = arith.constant 39 : index
    %c0_347 = arith.constant 0 : index
    %c0_348 = arith.constant 0 : index
    %894 = vector.load %arg2[%c39, %c0_347, %c0_348] : memref<57x32x32xf32, #tpu.memory_space<vmem>>, vector<1x32x32xf32>
    %895 = vector.shape_cast %894 : vector<1x32x32xf32> to vector<32x32xf32>
    %cst_349 = arith.constant dense<0.000000e+00> : vector<16x32xf32>
    %896 = tpu.matmul %859, %895, %cst_349 {dimension_numbers = #tpu.dot_dimension_numbers<[1], [0], [0], [1], [0, 0, 1, 1], [], []>} : vector<16x32xf32>, vector<32x32xf32>, vector<16x32xf32> -> vector<16x32xf32>
    %897 = vector.extract_strided_slice %859 {offsets = [0, 0], sizes = [8, 32], strides = [1, 1]} : vector<16x32xf32> to vector<8x32xf32>
    %898 = vector.extract_strided_slice %866 {offsets = [0, 0], sizes = [8, 32], strides = [1, 1]} : vector<16x32xf32> to vector<8x32xf32>
    %cst_350 = arith.constant dense<0.000000e+00> : vector<8x8xf32>
    %899 = tpu.matmul %898, %897, %cst_350 {dimension_numbers = #tpu.dot_dimension_numbers<[1], [1], [0], [0], [0, 0, 1, 0], [], []>} : vector<8x32xf32>, vector<8x32xf32>, vector<8x8xf32> -> vector<8x8xf32>
    %cst_351 = arith.constant dense<0xFF800000> : vector<8xf32>
    %900 = vector.multi_reduction <maximumf>, %899, %cst_351 [1] : vector<8x8xf32> to vector<8xf32>
    %901 = vector.shape_cast %900 : vector<8xf32> to vector<8x1xf32>
    %902 = vector.broadcast %901 : vector<8x1xf32> to vector<8x8xf32>
    %903 = arith.subf %899, %902 : vector<8x8xf32>
    %904 = math.exp %903 : vector<8x8xf32>
    %cst_352 = arith.constant dense<0.000000e+00> : vector<8xf32>
    %905 = vector.multi_reduction <add>, %904, %cst_352 [1] : vector<8x8xf32> to vector<8xf32>
    %906 = vector.shape_cast %905 : vector<8xf32> to vector<8x1xf32>
    %907 = vector.broadcast %906 : vector<8x1xf32> to vector<8x8xf32>
    %908 = arith.divf %904, %907 : vector<8x8xf32>
    %909 = vector.extract_strided_slice %887 {offsets = [0, 0], sizes = [8, 32], strides = [1, 1]} : vector<16x32xf32> to vector<8x32xf32>
    %cst_353 = arith.constant dense<0.000000e+00> : vector<8x32xf32>
    %910 = tpu.matmul %908, %909, %cst_353 {dimension_numbers = #tpu.dot_dimension_numbers<[1], [0], [0], [1], [0, 0, 1, 1], [], []>} : vector<8x8xf32>, vector<8x32xf32>, vector<8x32xf32> -> vector<8x32xf32>
    %911 = vector.extract_strided_slice %872 {offsets = [0, 0], sizes = [8, 32], strides = [1, 1]} : vector<16x32xf32> to vector<8x32xf32>
    %cst_354 = arith.constant dense<0.000000e+00> : vector<8x8xf32>
    %912 = tpu.matmul %911, %897, %cst_354 {dimension_numbers = #tpu.dot_dimension_numbers<[1], [1], [0], [0], [0, 0, 1, 0], [], []>} : vector<8x32xf32>, vector<8x32xf32>, vector<8x8xf32> -> vector<8x8xf32>
    %cst_355 = arith.constant dense<0xFF800000> : vector<8xf32>
    %913 = vector.multi_reduction <maximumf>, %912, %cst_355 [1] : vector<8x8xf32> to vector<8xf32>
    %914 = vector.shape_cast %913 : vector<8xf32> to vector<8x1xf32>
    %915 = vector.broadcast %914 : vector<8x1xf32> to vector<8x8xf32>
    %916 = arith.subf %912, %915 : vector<8x8xf32>
    %917 = math.exp %916 : vector<8x8xf32>
    %cst_356 = arith.constant dense<0.000000e+00> : vector<8xf32>
    %918 = vector.multi_reduction <add>, %917, %cst_356 [1] : vector<8x8xf32> to vector<8xf32>
    %919 = vector.shape_cast %918 : vector<8xf32> to vector<8x1xf32>
    %920 = vector.broadcast %919 : vector<8x1xf32> to vector<8x8xf32>
    %921 = arith.divf %917, %920 : vector<8x8xf32>
    %922 = vector.extract_strided_slice %890 {offsets = [0, 0], sizes = [8, 32], strides = [1, 1]} : vector<16x32xf32> to vector<8x32xf32>
    %cst_357 = arith.constant dense<0.000000e+00> : vector<8x32xf32>
    %923 = tpu.matmul %921, %922, %cst_357 {dimension_numbers = #tpu.dot_dimension_numbers<[1], [0], [0], [1], [0, 0, 1, 1], [], []>} : vector<8x8xf32>, vector<8x32xf32>, vector<8x32xf32> -> vector<8x32xf32>
    %924 = arith.addf %910, %923 : vector<8x32xf32>
    %925 = vector.extract_strided_slice %878 {offsets = [0, 0], sizes = [8, 32], strides = [1, 1]} : vector<16x32xf32> to vector<8x32xf32>
    %cst_358 = arith.constant dense<0.000000e+00> : vector<8x8xf32>
    %926 = tpu.matmul %925, %897, %cst_358 {dimension_numbers = #tpu.dot_dimension_numbers<[1], [1], [0], [0], [0, 0, 1, 0], [], []>} : vector<8x32xf32>, vector<8x32xf32>, vector<8x8xf32> -> vector<8x8xf32>
    %cst_359 = arith.constant dense<0xFF800000> : vector<8xf32>
    %927 = vector.multi_reduction <maximumf>, %926, %cst_359 [1] : vector<8x8xf32> to vector<8xf32>
    %928 = vector.shape_cast %927 : vector<8xf32> to vector<8x1xf32>
    %929 = vector.broadcast %928 : vector<8x1xf32> to vector<8x8xf32>
    %930 = arith.subf %926, %929 : vector<8x8xf32>
    %931 = math.exp %930 : vector<8x8xf32>
    %cst_360 = arith.constant dense<0.000000e+00> : vector<8xf32>
    %932 = vector.multi_reduction <add>, %931, %cst_360 [1] : vector<8x8xf32> to vector<8xf32>
    %933 = vector.shape_cast %932 : vector<8xf32> to vector<8x1xf32>
    %934 = vector.broadcast %933 : vector<8x1xf32> to vector<8x8xf32>
    %935 = arith.divf %931, %934 : vector<8x8xf32>
    %936 = vector.extract_strided_slice %893 {offsets = [0, 0], sizes = [8, 32], strides = [1, 1]} : vector<16x32xf32> to vector<8x32xf32>
    %cst_361 = arith.constant dense<0.000000e+00> : vector<8x32xf32>
    %937 = tpu.matmul %935, %936, %cst_361 {dimension_numbers = #tpu.dot_dimension_numbers<[1], [0], [0], [1], [0, 0, 1, 1], [], []>} : vector<8x8xf32>, vector<8x32xf32>, vector<8x32xf32> -> vector<8x32xf32>
    %938 = arith.addf %924, %937 : vector<8x32xf32>
    %939 = vector.extract_strided_slice %884 {offsets = [0, 0], sizes = [8, 32], strides = [1, 1]} : vector<16x32xf32> to vector<8x32xf32>
    %cst_362 = arith.constant dense<0.000000e+00> : vector<8x8xf32>
    %940 = tpu.matmul %939, %897, %cst_362 {dimension_numbers = #tpu.dot_dimension_numbers<[1], [1], [0], [0], [0, 0, 1, 0], [], []>} : vector<8x32xf32>, vector<8x32xf32>, vector<8x8xf32> -> vector<8x8xf32>
    %cst_363 = arith.constant dense<0xFF800000> : vector<8xf32>
    %941 = vector.multi_reduction <maximumf>, %940, %cst_363 [1] : vector<8x8xf32> to vector<8xf32>
    %942 = vector.shape_cast %941 : vector<8xf32> to vector<8x1xf32>
    %943 = vector.broadcast %942 : vector<8x1xf32> to vector<8x8xf32>
    %944 = arith.subf %940, %943 : vector<8x8xf32>
    %945 = math.exp %944 : vector<8x8xf32>
    %cst_364 = arith.constant dense<0.000000e+00> : vector<8xf32>
    %946 = vector.multi_reduction <add>, %945, %cst_364 [1] : vector<8x8xf32> to vector<8xf32>
    %947 = vector.shape_cast %946 : vector<8xf32> to vector<8x1xf32>
    %948 = vector.broadcast %947 : vector<8x1xf32> to vector<8x8xf32>
    %949 = arith.divf %945, %948 : vector<8x8xf32>
    %950 = vector.extract_strided_slice %896 {offsets = [0, 0], sizes = [8, 32], strides = [1, 1]} : vector<16x32xf32> to vector<8x32xf32>
    %cst_365 = arith.constant dense<0.000000e+00> : vector<8x32xf32>
    %951 = tpu.matmul %949, %950, %cst_365 {dimension_numbers = #tpu.dot_dimension_numbers<[1], [0], [0], [1], [0, 0, 1, 1], [], []>} : vector<8x8xf32>, vector<8x32xf32>, vector<8x32xf32> -> vector<8x32xf32>
    %952 = arith.addf %938, %951 : vector<8x32xf32>
    %953 = vector.extract_strided_slice %859 {offsets = [8, 0], sizes = [8, 32], strides = [1, 1]} : vector<16x32xf32> to vector<8x32xf32>
    %954 = vector.extract_strided_slice %866 {offsets = [8, 0], sizes = [8, 32], strides = [1, 1]} : vector<16x32xf32> to vector<8x32xf32>
    %cst_366 = arith.constant dense<0.000000e+00> : vector<8x8xf32>
    %955 = tpu.matmul %954, %953, %cst_366 {dimension_numbers = #tpu.dot_dimension_numbers<[1], [1], [0], [0], [0, 0, 1, 0], [], []>} : vector<8x32xf32>, vector<8x32xf32>, vector<8x8xf32> -> vector<8x8xf32>
    %cst_367 = arith.constant dense<0xFF800000> : vector<8xf32>
    %956 = vector.multi_reduction <maximumf>, %955, %cst_367 [1] : vector<8x8xf32> to vector<8xf32>
    %957 = vector.shape_cast %956 : vector<8xf32> to vector<8x1xf32>
    %958 = vector.broadcast %957 : vector<8x1xf32> to vector<8x8xf32>
    %959 = arith.subf %955, %958 : vector<8x8xf32>
    %960 = math.exp %959 : vector<8x8xf32>
    %cst_368 = arith.constant dense<0.000000e+00> : vector<8xf32>
    %961 = vector.multi_reduction <add>, %960, %cst_368 [1] : vector<8x8xf32> to vector<8xf32>
    %962 = vector.shape_cast %961 : vector<8xf32> to vector<8x1xf32>
    %963 = vector.broadcast %962 : vector<8x1xf32> to vector<8x8xf32>
    %964 = arith.divf %960, %963 : vector<8x8xf32>
    %965 = vector.extract_strided_slice %887 {offsets = [8, 0], sizes = [8, 32], strides = [1, 1]} : vector<16x32xf32> to vector<8x32xf32>
    %cst_369 = arith.constant dense<0.000000e+00> : vector<8x32xf32>
    %966 = tpu.matmul %964, %965, %cst_369 {dimension_numbers = #tpu.dot_dimension_numbers<[1], [0], [0], [1], [0, 0, 1, 1], [], []>} : vector<8x8xf32>, vector<8x32xf32>, vector<8x32xf32> -> vector<8x32xf32>
    %967 = vector.extract_strided_slice %872 {offsets = [8, 0], sizes = [8, 32], strides = [1, 1]} : vector<16x32xf32> to vector<8x32xf32>
    %cst_370 = arith.constant dense<0.000000e+00> : vector<8x8xf32>
    %968 = tpu.matmul %967, %953, %cst_370 {dimension_numbers = #tpu.dot_dimension_numbers<[1], [1], [0], [0], [0, 0, 1, 0], [], []>} : vector<8x32xf32>, vector<8x32xf32>, vector<8x8xf32> -> vector<8x8xf32>
    %cst_371 = arith.constant dense<0xFF800000> : vector<8xf32>
    %969 = vector.multi_reduction <maximumf>, %968, %cst_371 [1] : vector<8x8xf32> to vector<8xf32>
    %970 = vector.shape_cast %969 : vector<8xf32> to vector<8x1xf32>
    %971 = vector.broadcast %970 : vector<8x1xf32> to vector<8x8xf32>
    %972 = arith.subf %968, %971 : vector<8x8xf32>
    %973 = math.exp %972 : vector<8x8xf32>
    %cst_372 = arith.constant dense<0.000000e+00> : vector<8xf32>
    %974 = vector.multi_reduction <add>, %973, %cst_372 [1] : vector<8x8xf32> to vector<8xf32>
    %975 = vector.shape_cast %974 : vector<8xf32> to vector<8x1xf32>
    %976 = vector.broadcast %975 : vector<8x1xf32> to vector<8x8xf32>
    %977 = arith.divf %973, %976 : vector<8x8xf32>
    %978 = vector.extract_strided_slice %890 {offsets = [8, 0], sizes = [8, 32], strides = [1, 1]} : vector<16x32xf32> to vector<8x32xf32>
    %cst_373 = arith.constant dense<0.000000e+00> : vector<8x32xf32>
    %979 = tpu.matmul %977, %978, %cst_373 {dimension_numbers = #tpu.dot_dimension_numbers<[1], [0], [0], [1], [0, 0, 1, 1], [], []>} : vector<8x8xf32>, vector<8x32xf32>, vector<8x32xf32> -> vector<8x32xf32>
    %980 = arith.addf %966, %979 : vector<8x32xf32>
    %981 = vector.extract_strided_slice %878 {offsets = [8, 0], sizes = [8, 32], strides = [1, 1]} : vector<16x32xf32> to vector<8x32xf32>
    %cst_374 = arith.constant dense<0.000000e+00> : vector<8x8xf32>
    %982 = tpu.matmul %981, %953, %cst_374 {dimension_numbers = #tpu.dot_dimension_numbers<[1], [1], [0], [0], [0, 0, 1, 0], [], []>} : vector<8x32xf32>, vector<8x32xf32>, vector<8x8xf32> -> vector<8x8xf32>
    %cst_375 = arith.constant dense<0xFF800000> : vector<8xf32>
    %983 = vector.multi_reduction <maximumf>, %982, %cst_375 [1] : vector<8x8xf32> to vector<8xf32>
    %984 = vector.shape_cast %983 : vector<8xf32> to vector<8x1xf32>
    %985 = vector.broadcast %984 : vector<8x1xf32> to vector<8x8xf32>
    %986 = arith.subf %982, %985 : vector<8x8xf32>
    %987 = math.exp %986 : vector<8x8xf32>
    %cst_376 = arith.constant dense<0.000000e+00> : vector<8xf32>
    %988 = vector.multi_reduction <add>, %987, %cst_376 [1] : vector<8x8xf32> to vector<8xf32>
    %989 = vector.shape_cast %988 : vector<8xf32> to vector<8x1xf32>
    %990 = vector.broadcast %989 : vector<8x1xf32> to vector<8x8xf32>
    %991 = arith.divf %987, %990 : vector<8x8xf32>
    %992 = vector.extract_strided_slice %893 {offsets = [8, 0], sizes = [8, 32], strides = [1, 1]} : vector<16x32xf32> to vector<8x32xf32>
    %cst_377 = arith.constant dense<0.000000e+00> : vector<8x32xf32>
    %993 = tpu.matmul %991, %992, %cst_377 {dimension_numbers = #tpu.dot_dimension_numbers<[1], [0], [0], [1], [0, 0, 1, 1], [], []>} : vector<8x8xf32>, vector<8x32xf32>, vector<8x32xf32> -> vector<8x32xf32>
    %994 = arith.addf %980, %993 : vector<8x32xf32>
    %995 = vector.extract_strided_slice %884 {offsets = [8, 0], sizes = [8, 32], strides = [1, 1]} : vector<16x32xf32> to vector<8x32xf32>
    %cst_378 = arith.constant dense<0.000000e+00> : vector<8x8xf32>
    %996 = tpu.matmul %995, %953, %cst_378 {dimension_numbers = #tpu.dot_dimension_numbers<[1], [1], [0], [0], [0, 0, 1, 0], [], []>} : vector<8x32xf32>, vector<8x32xf32>, vector<8x8xf32> -> vector<8x8xf32>
    %cst_379 = arith.constant dense<0xFF800000> : vector<8xf32>
    %997 = vector.multi_reduction <maximumf>, %996, %cst_379 [1] : vector<8x8xf32> to vector<8xf32>
    %998 = vector.shape_cast %997 : vector<8xf32> to vector<8x1xf32>
    %999 = vector.broadcast %998 : vector<8x1xf32> to vector<8x8xf32>
    %1000 = arith.subf %996, %999 : vector<8x8xf32>
    %1001 = math.exp %1000 : vector<8x8xf32>
    %cst_380 = arith.constant dense<0.000000e+00> : vector<8xf32>
    %1002 = vector.multi_reduction <add>, %1001, %cst_380 [1] : vector<8x8xf32> to vector<8xf32>
    %1003 = vector.shape_cast %1002 : vector<8xf32> to vector<8x1xf32>
    %1004 = vector.broadcast %1003 : vector<8x1xf32> to vector<8x8xf32>
    %1005 = arith.divf %1001, %1004 : vector<8x8xf32>
    %1006 = vector.extract_strided_slice %896 {offsets = [8, 0], sizes = [8, 32], strides = [1, 1]} : vector<16x32xf32> to vector<8x32xf32>
    %cst_381 = arith.constant dense<0.000000e+00> : vector<8x32xf32>
    %1007 = tpu.matmul %1005, %1006, %cst_381 {dimension_numbers = #tpu.dot_dimension_numbers<[1], [0], [0], [1], [0, 0, 1, 1], [], []>} : vector<8x8xf32>, vector<8x32xf32>, vector<8x32xf32> -> vector<8x32xf32>
    %1008 = arith.addf %994, %1007 : vector<8x32xf32>
    %1009 = tpu.concatenate %952, %1008 in 0 : vector<8x32xf32>, vector<8x32xf32> -> vector<16x32xf32>
    %c73 = arith.constant 73 : index
    %c0_382 = arith.constant 0 : index
    %1010 = vector.load %arg3[%c73, %c0_382] : memref<111x32xf32, #tpu.memory_space<vmem>>, vector<1x32xf32>
    %1011 = vector.broadcast %1010 : vector<1x32xf32> to vector<16x32xf32>
    %1012 = arith.addf %1009, %1011 : vector<16x32xf32>
    %1013 = arith.addf %859, %1012 : vector<16x32xf32>
    %cst_383 = arith.constant dense<0.000000e+00> : vector<16xf32>
    %1014 = vector.multi_reduction <add>, %1013, %cst_383 [1] : vector<16x32xf32> to vector<16xf32>
    %1015 = vector.shape_cast %1014 : vector<16xf32> to vector<16x1xf32>
    %cst_384 = arith.constant 3.200000e+01 : f32
    %1016 = vector.broadcast %cst_384 : f32 to vector<16x1xf32>
    %1017 = arith.divf %1015, %1016 : vector<16x1xf32>
    %1018 = arith.mulf %1013, %1013 : vector<16x32xf32>
    %cst_385 = arith.constant dense<0.000000e+00> : vector<16xf32>
    %1019 = vector.multi_reduction <add>, %1018, %cst_385 [1] : vector<16x32xf32> to vector<16xf32>
    %1020 = vector.shape_cast %1019 : vector<16xf32> to vector<16x1xf32>
    %cst_386 = arith.constant 3.200000e+01 : f32
    %1021 = vector.broadcast %cst_386 : f32 to vector<16x1xf32>
    %1022 = arith.divf %1020, %1021 : vector<16x1xf32>
    %1023 = arith.mulf %1017, %1017 : vector<16x1xf32>
    %1024 = arith.subf %1022, %1023 : vector<16x1xf32>
    %1025 = vector.broadcast %1017 : vector<16x1xf32> to vector<16x32xf32>
    %1026 = arith.subf %1013, %1025 : vector<16x32xf32>
    %cst_387 = arith.constant 9.99999974E-6 : f32
    %1027 = vector.broadcast %cst_387 : f32 to vector<16x1xf32>
    %1028 = arith.addf %1024, %1027 : vector<16x1xf32>
    %1029 = math.rsqrt %1028 : vector<16x1xf32>
    %1030 = vector.broadcast %1029 : vector<16x1xf32> to vector<16x32xf32>
    %1031 = arith.mulf %1026, %1030 : vector<16x32xf32>
    %c103 = arith.constant 103 : index
    %c0_388 = arith.constant 0 : index
    %1032 = vector.load %arg3[%c103, %c0_388] : memref<111x32xf32, #tpu.memory_space<vmem>>, vector<1x32xf32>
    %1033 = vector.broadcast %1032 : vector<1x32xf32> to vector<16x32xf32>
    %1034 = arith.mulf %1031, %1033 : vector<16x32xf32>
    %c104 = arith.constant 104 : index
    %c0_389 = arith.constant 0 : index
    %1035 = vector.load %arg3[%c104, %c0_389] : memref<111x32xf32, #tpu.memory_space<vmem>>, vector<1x32xf32>
    %1036 = vector.broadcast %1035 : vector<1x32xf32> to vector<16x32xf32>
    %1037 = arith.addf %1034, %1036 : vector<16x32xf32>
    %c74 = arith.constant 74 : index
    %c0_390 = arith.constant 0 : index
    %1038 = vector.load %arg3[%c74, %c0_390] : memref<111x32xf32, #tpu.memory_space<vmem>>, vector<4x32xf32>
    %c40 = arith.constant 40 : index
    %c0_391 = arith.constant 0 : index
    %c0_392 = arith.constant 0 : index
    %1039 = vector.load %arg2[%c40, %c0_391, %c0_392] : memref<57x32x32xf32, #tpu.memory_space<vmem>>, vector<1x32x32xf32>
    %1040 = vector.shape_cast %1039 : vector<1x32x32xf32> to vector<32x32xf32>
    %cst_393 = arith.constant dense<0.000000e+00> : vector<16x32xf32>
    %1041 = tpu.matmul %1037, %1040, %cst_393 {dimension_numbers = #tpu.dot_dimension_numbers<[1], [0], [0], [1], [0, 0, 1, 1], [], []>} : vector<16x32xf32>, vector<32x32xf32>, vector<16x32xf32> -> vector<16x32xf32>
    %1042 = vector.extract_strided_slice %1038 {offsets = [0, 0], sizes = [1, 32], strides = [1, 1]} : vector<4x32xf32> to vector<1x32xf32>
    %1043 = vector.broadcast %1042 : vector<1x32xf32> to vector<16x32xf32>
    %1044 = arith.addf %1041, %1043 : vector<16x32xf32>
    %c41 = arith.constant 41 : index
    %c0_394 = arith.constant 0 : index
    %c0_395 = arith.constant 0 : index
    %1045 = vector.load %arg2[%c41, %c0_394, %c0_395] : memref<57x32x32xf32, #tpu.memory_space<vmem>>, vector<1x32x32xf32>
    %1046 = vector.shape_cast %1045 : vector<1x32x32xf32> to vector<32x32xf32>
    %cst_396 = arith.constant dense<0.000000e+00> : vector<16x32xf32>
    %1047 = tpu.matmul %1037, %1046, %cst_396 {dimension_numbers = #tpu.dot_dimension_numbers<[1], [0], [0], [1], [0, 0, 1, 1], [], []>} : vector<16x32xf32>, vector<32x32xf32>, vector<16x32xf32> -> vector<16x32xf32>
    %1048 = vector.extract_strided_slice %1038 {offsets = [1, 0], sizes = [1, 32], strides = [1, 1]} : vector<4x32xf32> to vector<1x32xf32>
    %1049 = vector.broadcast %1048 : vector<1x32xf32> to vector<16x32xf32>
    %1050 = arith.addf %1047, %1049 : vector<16x32xf32>
    %c42 = arith.constant 42 : index
    %c0_397 = arith.constant 0 : index
    %c0_398 = arith.constant 0 : index
    %1051 = vector.load %arg2[%c42, %c0_397, %c0_398] : memref<57x32x32xf32, #tpu.memory_space<vmem>>, vector<1x32x32xf32>
    %1052 = vector.shape_cast %1051 : vector<1x32x32xf32> to vector<32x32xf32>
    %cst_399 = arith.constant dense<0.000000e+00> : vector<16x32xf32>
    %1053 = tpu.matmul %1037, %1052, %cst_399 {dimension_numbers = #tpu.dot_dimension_numbers<[1], [0], [0], [1], [0, 0, 1, 1], [], []>} : vector<16x32xf32>, vector<32x32xf32>, vector<16x32xf32> -> vector<16x32xf32>
    %1054 = vector.extract_strided_slice %1038 {offsets = [2, 0], sizes = [1, 32], strides = [1, 1]} : vector<4x32xf32> to vector<1x32xf32>
    %1055 = vector.broadcast %1054 : vector<1x32xf32> to vector<16x32xf32>
    %1056 = arith.addf %1053, %1055 : vector<16x32xf32>
    %c43 = arith.constant 43 : index
    %c0_400 = arith.constant 0 : index
    %c0_401 = arith.constant 0 : index
    %1057 = vector.load %arg2[%c43, %c0_400, %c0_401] : memref<57x32x32xf32, #tpu.memory_space<vmem>>, vector<1x32x32xf32>
    %1058 = vector.shape_cast %1057 : vector<1x32x32xf32> to vector<32x32xf32>
    %cst_402 = arith.constant dense<0.000000e+00> : vector<16x32xf32>
    %1059 = tpu.matmul %1037, %1058, %cst_402 {dimension_numbers = #tpu.dot_dimension_numbers<[1], [0], [0], [1], [0, 0, 1, 1], [], []>} : vector<16x32xf32>, vector<32x32xf32>, vector<16x32xf32> -> vector<16x32xf32>
    %1060 = vector.extract_strided_slice %1038 {offsets = [3, 0], sizes = [1, 32], strides = [1, 1]} : vector<4x32xf32> to vector<1x32xf32>
    %1061 = vector.broadcast %1060 : vector<1x32xf32> to vector<16x32xf32>
    %1062 = arith.addf %1059, %1061 : vector<16x32xf32>
    %c44 = arith.constant 44 : index
    %c0_403 = arith.constant 0 : index
    %c0_404 = arith.constant 0 : index
    %1063 = vector.load %arg2[%c44, %c0_403, %c0_404] : memref<57x32x32xf32, #tpu.memory_space<vmem>>, vector<1x32x32xf32>
    %1064 = vector.shape_cast %1063 : vector<1x32x32xf32> to vector<32x32xf32>
    %cst_405 = arith.constant dense<0.000000e+00> : vector<16x32xf32>
    %1065 = tpu.matmul %464, %1064, %cst_405 {dimension_numbers = #tpu.dot_dimension_numbers<[1], [0], [0], [1], [0, 0, 1, 1], [], []>} : vector<16x32xf32>, vector<32x32xf32>, vector<16x32xf32> -> vector<16x32xf32>
    %c45 = arith.constant 45 : index
    %c0_406 = arith.constant 0 : index
    %c0_407 = arith.constant 0 : index
    %1066 = vector.load %arg2[%c45, %c0_406, %c0_407] : memref<57x32x32xf32, #tpu.memory_space<vmem>>, vector<1x32x32xf32>
    %1067 = vector.shape_cast %1066 : vector<1x32x32xf32> to vector<32x32xf32>
    %cst_408 = arith.constant dense<0.000000e+00> : vector<16x32xf32>
    %1068 = tpu.matmul %464, %1067, %cst_408 {dimension_numbers = #tpu.dot_dimension_numbers<[1], [0], [0], [1], [0, 0, 1, 1], [], []>} : vector<16x32xf32>, vector<32x32xf32>, vector<16x32xf32> -> vector<16x32xf32>
    %c46 = arith.constant 46 : index
    %c0_409 = arith.constant 0 : index
    %c0_410 = arith.constant 0 : index
    %1069 = vector.load %arg2[%c46, %c0_409, %c0_410] : memref<57x32x32xf32, #tpu.memory_space<vmem>>, vector<1x32x32xf32>
    %1070 = vector.shape_cast %1069 : vector<1x32x32xf32> to vector<32x32xf32>
    %cst_411 = arith.constant dense<0.000000e+00> : vector<16x32xf32>
    %1071 = tpu.matmul %464, %1070, %cst_411 {dimension_numbers = #tpu.dot_dimension_numbers<[1], [0], [0], [1], [0, 0, 1, 1], [], []>} : vector<16x32xf32>, vector<32x32xf32>, vector<16x32xf32> -> vector<16x32xf32>
    %c47 = arith.constant 47 : index
    %c0_412 = arith.constant 0 : index
    %c0_413 = arith.constant 0 : index
    %1072 = vector.load %arg2[%c47, %c0_412, %c0_413] : memref<57x32x32xf32, #tpu.memory_space<vmem>>, vector<1x32x32xf32>
    %1073 = vector.shape_cast %1072 : vector<1x32x32xf32> to vector<32x32xf32>
    %cst_414 = arith.constant dense<0.000000e+00> : vector<16x32xf32>
    %1074 = tpu.matmul %464, %1073, %cst_414 {dimension_numbers = #tpu.dot_dimension_numbers<[1], [0], [0], [1], [0, 0, 1, 1], [], []>} : vector<16x32xf32>, vector<32x32xf32>, vector<16x32xf32> -> vector<16x32xf32>
    %1075 = vector.extract_strided_slice %464 {offsets = [0, 0], sizes = [8, 32], strides = [1, 1]} : vector<16x32xf32> to vector<8x32xf32>
    %1076 = vector.extract_strided_slice %1044 {offsets = [0, 0], sizes = [8, 32], strides = [1, 1]} : vector<16x32xf32> to vector<8x32xf32>
    %cst_415 = arith.constant dense<0.000000e+00> : vector<8x8xf32>
    %1077 = tpu.matmul %1076, %1075, %cst_415 {dimension_numbers = #tpu.dot_dimension_numbers<[1], [1], [0], [0], [0, 0, 1, 0], [], []>} : vector<8x32xf32>, vector<8x32xf32>, vector<8x8xf32> -> vector<8x8xf32>
    %cst_416 = arith.constant dense<0xFF800000> : vector<8xf32>
    %1078 = vector.multi_reduction <maximumf>, %1077, %cst_416 [1] : vector<8x8xf32> to vector<8xf32>
    %1079 = vector.shape_cast %1078 : vector<8xf32> to vector<8x1xf32>
    %1080 = vector.broadcast %1079 : vector<8x1xf32> to vector<8x8xf32>
    %1081 = arith.subf %1077, %1080 : vector<8x8xf32>
    %1082 = math.exp %1081 : vector<8x8xf32>
    %cst_417 = arith.constant dense<0.000000e+00> : vector<8xf32>
    %1083 = vector.multi_reduction <add>, %1082, %cst_417 [1] : vector<8x8xf32> to vector<8xf32>
    %1084 = vector.shape_cast %1083 : vector<8xf32> to vector<8x1xf32>
    %1085 = vector.broadcast %1084 : vector<8x1xf32> to vector<8x8xf32>
    %1086 = arith.divf %1082, %1085 : vector<8x8xf32>
    %1087 = vector.extract_strided_slice %1065 {offsets = [0, 0], sizes = [8, 32], strides = [1, 1]} : vector<16x32xf32> to vector<8x32xf32>
    %cst_418 = arith.constant dense<0.000000e+00> : vector<8x32xf32>
    %1088 = tpu.matmul %1086, %1087, %cst_418 {dimension_numbers = #tpu.dot_dimension_numbers<[1], [0], [0], [1], [0, 0, 1, 1], [], []>} : vector<8x8xf32>, vector<8x32xf32>, vector<8x32xf32> -> vector<8x32xf32>
    %1089 = vector.extract_strided_slice %1050 {offsets = [0, 0], sizes = [8, 32], strides = [1, 1]} : vector<16x32xf32> to vector<8x32xf32>
    %cst_419 = arith.constant dense<0.000000e+00> : vector<8x8xf32>
    %1090 = tpu.matmul %1089, %1075, %cst_419 {dimension_numbers = #tpu.dot_dimension_numbers<[1], [1], [0], [0], [0, 0, 1, 0], [], []>} : vector<8x32xf32>, vector<8x32xf32>, vector<8x8xf32> -> vector<8x8xf32>
    %cst_420 = arith.constant dense<0xFF800000> : vector<8xf32>
    %1091 = vector.multi_reduction <maximumf>, %1090, %cst_420 [1] : vector<8x8xf32> to vector<8xf32>
    %1092 = vector.shape_cast %1091 : vector<8xf32> to vector<8x1xf32>
    %1093 = vector.broadcast %1092 : vector<8x1xf32> to vector<8x8xf32>
    %1094 = arith.subf %1090, %1093 : vector<8x8xf32>
    %1095 = math.exp %1094 : vector<8x8xf32>
    %cst_421 = arith.constant dense<0.000000e+00> : vector<8xf32>
    %1096 = vector.multi_reduction <add>, %1095, %cst_421 [1] : vector<8x8xf32> to vector<8xf32>
    %1097 = vector.shape_cast %1096 : vector<8xf32> to vector<8x1xf32>
    %1098 = vector.broadcast %1097 : vector<8x1xf32> to vector<8x8xf32>
    %1099 = arith.divf %1095, %1098 : vector<8x8xf32>
    %1100 = vector.extract_strided_slice %1068 {offsets = [0, 0], sizes = [8, 32], strides = [1, 1]} : vector<16x32xf32> to vector<8x32xf32>
    %cst_422 = arith.constant dense<0.000000e+00> : vector<8x32xf32>
    %1101 = tpu.matmul %1099, %1100, %cst_422 {dimension_numbers = #tpu.dot_dimension_numbers<[1], [0], [0], [1], [0, 0, 1, 1], [], []>} : vector<8x8xf32>, vector<8x32xf32>, vector<8x32xf32> -> vector<8x32xf32>
    %1102 = arith.addf %1088, %1101 : vector<8x32xf32>
    %1103 = vector.extract_strided_slice %1056 {offsets = [0, 0], sizes = [8, 32], strides = [1, 1]} : vector<16x32xf32> to vector<8x32xf32>
    %cst_423 = arith.constant dense<0.000000e+00> : vector<8x8xf32>
    %1104 = tpu.matmul %1103, %1075, %cst_423 {dimension_numbers = #tpu.dot_dimension_numbers<[1], [1], [0], [0], [0, 0, 1, 0], [], []>} : vector<8x32xf32>, vector<8x32xf32>, vector<8x8xf32> -> vector<8x8xf32>
    %cst_424 = arith.constant dense<0xFF800000> : vector<8xf32>
    %1105 = vector.multi_reduction <maximumf>, %1104, %cst_424 [1] : vector<8x8xf32> to vector<8xf32>
    %1106 = vector.shape_cast %1105 : vector<8xf32> to vector<8x1xf32>
    %1107 = vector.broadcast %1106 : vector<8x1xf32> to vector<8x8xf32>
    %1108 = arith.subf %1104, %1107 : vector<8x8xf32>
    %1109 = math.exp %1108 : vector<8x8xf32>
    %cst_425 = arith.constant dense<0.000000e+00> : vector<8xf32>
    %1110 = vector.multi_reduction <add>, %1109, %cst_425 [1] : vector<8x8xf32> to vector<8xf32>
    %1111 = vector.shape_cast %1110 : vector<8xf32> to vector<8x1xf32>
    %1112 = vector.broadcast %1111 : vector<8x1xf32> to vector<8x8xf32>
    %1113 = arith.divf %1109, %1112 : vector<8x8xf32>
    %1114 = vector.extract_strided_slice %1071 {offsets = [0, 0], sizes = [8, 32], strides = [1, 1]} : vector<16x32xf32> to vector<8x32xf32>
    %cst_426 = arith.constant dense<0.000000e+00> : vector<8x32xf32>
    %1115 = tpu.matmul %1113, %1114, %cst_426 {dimension_numbers = #tpu.dot_dimension_numbers<[1], [0], [0], [1], [0, 0, 1, 1], [], []>} : vector<8x8xf32>, vector<8x32xf32>, vector<8x32xf32> -> vector<8x32xf32>
    %1116 = arith.addf %1102, %1115 : vector<8x32xf32>
    %1117 = vector.extract_strided_slice %1062 {offsets = [0, 0], sizes = [8, 32], strides = [1, 1]} : vector<16x32xf32> to vector<8x32xf32>
    %cst_427 = arith.constant dense<0.000000e+00> : vector<8x8xf32>
    %1118 = tpu.matmul %1117, %1075, %cst_427 {dimension_numbers = #tpu.dot_dimension_numbers<[1], [1], [0], [0], [0, 0, 1, 0], [], []>} : vector<8x32xf32>, vector<8x32xf32>, vector<8x8xf32> -> vector<8x8xf32>
    %cst_428 = arith.constant dense<0xFF800000> : vector<8xf32>
    %1119 = vector.multi_reduction <maximumf>, %1118, %cst_428 [1] : vector<8x8xf32> to vector<8xf32>
    %1120 = vector.shape_cast %1119 : vector<8xf32> to vector<8x1xf32>
    %1121 = vector.broadcast %1120 : vector<8x1xf32> to vector<8x8xf32>
    %1122 = arith.subf %1118, %1121 : vector<8x8xf32>
    %1123 = math.exp %1122 : vector<8x8xf32>
    %cst_429 = arith.constant dense<0.000000e+00> : vector<8xf32>
    %1124 = vector.multi_reduction <add>, %1123, %cst_429 [1] : vector<8x8xf32> to vector<8xf32>
    %1125 = vector.shape_cast %1124 : vector<8xf32> to vector<8x1xf32>
    %1126 = vector.broadcast %1125 : vector<8x1xf32> to vector<8x8xf32>
    %1127 = arith.divf %1123, %1126 : vector<8x8xf32>
    %1128 = vector.extract_strided_slice %1074 {offsets = [0, 0], sizes = [8, 32], strides = [1, 1]} : vector<16x32xf32> to vector<8x32xf32>
    %cst_430 = arith.constant dense<0.000000e+00> : vector<8x32xf32>
    %1129 = tpu.matmul %1127, %1128, %cst_430 {dimension_numbers = #tpu.dot_dimension_numbers<[1], [0], [0], [1], [0, 0, 1, 1], [], []>} : vector<8x8xf32>, vector<8x32xf32>, vector<8x32xf32> -> vector<8x32xf32>
    %1130 = arith.addf %1116, %1129 : vector<8x32xf32>
    %1131 = vector.extract_strided_slice %464 {offsets = [8, 0], sizes = [8, 32], strides = [1, 1]} : vector<16x32xf32> to vector<8x32xf32>
    %1132 = vector.extract_strided_slice %1044 {offsets = [8, 0], sizes = [8, 32], strides = [1, 1]} : vector<16x32xf32> to vector<8x32xf32>
    %cst_431 = arith.constant dense<0.000000e+00> : vector<8x8xf32>
    %1133 = tpu.matmul %1132, %1131, %cst_431 {dimension_numbers = #tpu.dot_dimension_numbers<[1], [1], [0], [0], [0, 0, 1, 0], [], []>} : vector<8x32xf32>, vector<8x32xf32>, vector<8x8xf32> -> vector<8x8xf32>
    %cst_432 = arith.constant dense<0xFF800000> : vector<8xf32>
    %1134 = vector.multi_reduction <maximumf>, %1133, %cst_432 [1] : vector<8x8xf32> to vector<8xf32>
    %1135 = vector.shape_cast %1134 : vector<8xf32> to vector<8x1xf32>
    %1136 = vector.broadcast %1135 : vector<8x1xf32> to vector<8x8xf32>
    %1137 = arith.subf %1133, %1136 : vector<8x8xf32>
    %1138 = math.exp %1137 : vector<8x8xf32>
    %cst_433 = arith.constant dense<0.000000e+00> : vector<8xf32>
    %1139 = vector.multi_reduction <add>, %1138, %cst_433 [1] : vector<8x8xf32> to vector<8xf32>
    %1140 = vector.shape_cast %1139 : vector<8xf32> to vector<8x1xf32>
    %1141 = vector.broadcast %1140 : vector<8x1xf32> to vector<8x8xf32>
    %1142 = arith.divf %1138, %1141 : vector<8x8xf32>
    %1143 = vector.extract_strided_slice %1065 {offsets = [8, 0], sizes = [8, 32], strides = [1, 1]} : vector<16x32xf32> to vector<8x32xf32>
    %cst_434 = arith.constant dense<0.000000e+00> : vector<8x32xf32>
    %1144 = tpu.matmul %1142, %1143, %cst_434 {dimension_numbers = #tpu.dot_dimension_numbers<[1], [0], [0], [1], [0, 0, 1, 1], [], []>} : vector<8x8xf32>, vector<8x32xf32>, vector<8x32xf32> -> vector<8x32xf32>
    %1145 = vector.extract_strided_slice %1050 {offsets = [8, 0], sizes = [8, 32], strides = [1, 1]} : vector<16x32xf32> to vector<8x32xf32>
    %cst_435 = arith.constant dense<0.000000e+00> : vector<8x8xf32>
    %1146 = tpu.matmul %1145, %1131, %cst_435 {dimension_numbers = #tpu.dot_dimension_numbers<[1], [1], [0], [0], [0, 0, 1, 0], [], []>} : vector<8x32xf32>, vector<8x32xf32>, vector<8x8xf32> -> vector<8x8xf32>
    %cst_436 = arith.constant dense<0xFF800000> : vector<8xf32>
    %1147 = vector.multi_reduction <maximumf>, %1146, %cst_436 [1] : vector<8x8xf32> to vector<8xf32>
    %1148 = vector.shape_cast %1147 : vector<8xf32> to vector<8x1xf32>
    %1149 = vector.broadcast %1148 : vector<8x1xf32> to vector<8x8xf32>
    %1150 = arith.subf %1146, %1149 : vector<8x8xf32>
    %1151 = math.exp %1150 : vector<8x8xf32>
    %cst_437 = arith.constant dense<0.000000e+00> : vector<8xf32>
    %1152 = vector.multi_reduction <add>, %1151, %cst_437 [1] : vector<8x8xf32> to vector<8xf32>
    %1153 = vector.shape_cast %1152 : vector<8xf32> to vector<8x1xf32>
    %1154 = vector.broadcast %1153 : vector<8x1xf32> to vector<8x8xf32>
    %1155 = arith.divf %1151, %1154 : vector<8x8xf32>
    %1156 = vector.extract_strided_slice %1068 {offsets = [8, 0], sizes = [8, 32], strides = [1, 1]} : vector<16x32xf32> to vector<8x32xf32>
    %cst_438 = arith.constant dense<0.000000e+00> : vector<8x32xf32>
    %1157 = tpu.matmul %1155, %1156, %cst_438 {dimension_numbers = #tpu.dot_dimension_numbers<[1], [0], [0], [1], [0, 0, 1, 1], [], []>} : vector<8x8xf32>, vector<8x32xf32>, vector<8x32xf32> -> vector<8x32xf32>
    %1158 = arith.addf %1144, %1157 : vector<8x32xf32>
    %1159 = vector.extract_strided_slice %1056 {offsets = [8, 0], sizes = [8, 32], strides = [1, 1]} : vector<16x32xf32> to vector<8x32xf32>
    %cst_439 = arith.constant dense<0.000000e+00> : vector<8x8xf32>
    %1160 = tpu.matmul %1159, %1131, %cst_439 {dimension_numbers = #tpu.dot_dimension_numbers<[1], [1], [0], [0], [0, 0, 1, 0], [], []>} : vector<8x32xf32>, vector<8x32xf32>, vector<8x8xf32> -> vector<8x8xf32>
    %cst_440 = arith.constant dense<0xFF800000> : vector<8xf32>
    %1161 = vector.multi_reduction <maximumf>, %1160, %cst_440 [1] : vector<8x8xf32> to vector<8xf32>
    %1162 = vector.shape_cast %1161 : vector<8xf32> to vector<8x1xf32>
    %1163 = vector.broadcast %1162 : vector<8x1xf32> to vector<8x8xf32>
    %1164 = arith.subf %1160, %1163 : vector<8x8xf32>
    %1165 = math.exp %1164 : vector<8x8xf32>
    %cst_441 = arith.constant dense<0.000000e+00> : vector<8xf32>
    %1166 = vector.multi_reduction <add>, %1165, %cst_441 [1] : vector<8x8xf32> to vector<8xf32>
    %1167 = vector.shape_cast %1166 : vector<8xf32> to vector<8x1xf32>
    %1168 = vector.broadcast %1167 : vector<8x1xf32> to vector<8x8xf32>
    %1169 = arith.divf %1165, %1168 : vector<8x8xf32>
    %1170 = vector.extract_strided_slice %1071 {offsets = [8, 0], sizes = [8, 32], strides = [1, 1]} : vector<16x32xf32> to vector<8x32xf32>
    %cst_442 = arith.constant dense<0.000000e+00> : vector<8x32xf32>
    %1171 = tpu.matmul %1169, %1170, %cst_442 {dimension_numbers = #tpu.dot_dimension_numbers<[1], [0], [0], [1], [0, 0, 1, 1], [], []>} : vector<8x8xf32>, vector<8x32xf32>, vector<8x32xf32> -> vector<8x32xf32>
    %1172 = arith.addf %1158, %1171 : vector<8x32xf32>
    %1173 = vector.extract_strided_slice %1062 {offsets = [8, 0], sizes = [8, 32], strides = [1, 1]} : vector<16x32xf32> to vector<8x32xf32>
    %cst_443 = arith.constant dense<0.000000e+00> : vector<8x8xf32>
    %1174 = tpu.matmul %1173, %1131, %cst_443 {dimension_numbers = #tpu.dot_dimension_numbers<[1], [1], [0], [0], [0, 0, 1, 0], [], []>} : vector<8x32xf32>, vector<8x32xf32>, vector<8x8xf32> -> vector<8x8xf32>
    %cst_444 = arith.constant dense<0xFF800000> : vector<8xf32>
    %1175 = vector.multi_reduction <maximumf>, %1174, %cst_444 [1] : vector<8x8xf32> to vector<8xf32>
    %1176 = vector.shape_cast %1175 : vector<8xf32> to vector<8x1xf32>
    %1177 = vector.broadcast %1176 : vector<8x1xf32> to vector<8x8xf32>
    %1178 = arith.subf %1174, %1177 : vector<8x8xf32>
    %1179 = math.exp %1178 : vector<8x8xf32>
    %cst_445 = arith.constant dense<0.000000e+00> : vector<8xf32>
    %1180 = vector.multi_reduction <add>, %1179, %cst_445 [1] : vector<8x8xf32> to vector<8xf32>
    %1181 = vector.shape_cast %1180 : vector<8xf32> to vector<8x1xf32>
    %1182 = vector.broadcast %1181 : vector<8x1xf32> to vector<8x8xf32>
    %1183 = arith.divf %1179, %1182 : vector<8x8xf32>
    %1184 = vector.extract_strided_slice %1074 {offsets = [8, 0], sizes = [8, 32], strides = [1, 1]} : vector<16x32xf32> to vector<8x32xf32>
    %cst_446 = arith.constant dense<0.000000e+00> : vector<8x32xf32>
    %1185 = tpu.matmul %1183, %1184, %cst_446 {dimension_numbers = #tpu.dot_dimension_numbers<[1], [0], [0], [1], [0, 0, 1, 1], [], []>} : vector<8x8xf32>, vector<8x32xf32>, vector<8x32xf32> -> vector<8x32xf32>
    %1186 = arith.addf %1172, %1185 : vector<8x32xf32>
    %1187 = tpu.concatenate %1130, %1186 in 0 : vector<8x32xf32>, vector<8x32xf32> -> vector<16x32xf32>
    %c78 = arith.constant 78 : index
    %c0_447 = arith.constant 0 : index
    %1188 = vector.load %arg3[%c78, %c0_447] : memref<111x32xf32, #tpu.memory_space<vmem>>, vector<1x32xf32>
    %1189 = vector.broadcast %1188 : vector<1x32xf32> to vector<16x32xf32>
    %1190 = arith.addf %1187, %1189 : vector<16x32xf32>
    %1191 = arith.addf %1037, %1190 : vector<16x32xf32>
    %cst_448 = arith.constant dense<0.000000e+00> : vector<16xf32>
    %1192 = vector.multi_reduction <add>, %1191, %cst_448 [1] : vector<16x32xf32> to vector<16xf32>
    %1193 = vector.shape_cast %1192 : vector<16xf32> to vector<16x1xf32>
    %cst_449 = arith.constant 3.200000e+01 : f32
    %1194 = vector.broadcast %cst_449 : f32 to vector<16x1xf32>
    %1195 = arith.divf %1193, %1194 : vector<16x1xf32>
    %1196 = arith.mulf %1191, %1191 : vector<16x32xf32>
    %cst_450 = arith.constant dense<0.000000e+00> : vector<16xf32>
    %1197 = vector.multi_reduction <add>, %1196, %cst_450 [1] : vector<16x32xf32> to vector<16xf32>
    %1198 = vector.shape_cast %1197 : vector<16xf32> to vector<16x1xf32>
    %cst_451 = arith.constant 3.200000e+01 : f32
    %1199 = vector.broadcast %cst_451 : f32 to vector<16x1xf32>
    %1200 = arith.divf %1198, %1199 : vector<16x1xf32>
    %1201 = arith.mulf %1195, %1195 : vector<16x1xf32>
    %1202 = arith.subf %1200, %1201 : vector<16x1xf32>
    %1203 = vector.broadcast %1195 : vector<16x1xf32> to vector<16x32xf32>
    %1204 = arith.subf %1191, %1203 : vector<16x32xf32>
    %cst_452 = arith.constant 9.99999974E-6 : f32
    %1205 = vector.broadcast %cst_452 : f32 to vector<16x1xf32>
    %1206 = arith.addf %1202, %1205 : vector<16x1xf32>
    %1207 = math.rsqrt %1206 : vector<16x1xf32>
    %1208 = vector.broadcast %1207 : vector<16x1xf32> to vector<16x32xf32>
    %1209 = arith.mulf %1204, %1208 : vector<16x32xf32>
    %c105 = arith.constant 105 : index
    %c0_453 = arith.constant 0 : index
    %1210 = vector.load %arg3[%c105, %c0_453] : memref<111x32xf32, #tpu.memory_space<vmem>>, vector<1x32xf32>
    %1211 = vector.broadcast %1210 : vector<1x32xf32> to vector<16x32xf32>
    %1212 = arith.mulf %1209, %1211 : vector<16x32xf32>
    %c106 = arith.constant 106 : index
    %c0_454 = arith.constant 0 : index
    %1213 = vector.load %arg3[%c106, %c0_454] : memref<111x32xf32, #tpu.memory_space<vmem>>, vector<1x32xf32>
    %1214 = vector.broadcast %1213 : vector<1x32xf32> to vector<16x32xf32>
    %1215 = arith.addf %1212, %1214 : vector<16x32xf32>
    %c54_455 = arith.constant 54 : index
    %c0_456 = arith.constant 0 : index
    %c0_457 = arith.constant 0 : index
    %1216 = vector.load %arg2[%c54_455, %c0_456, %c0_457] : memref<57x32x32xf32, #tpu.memory_space<vmem>>, vector<1x32x32xf32>
    %1217 = vector.shape_cast %1216 : vector<1x32x32xf32> to vector<32x32xf32>
    %cst_458 = arith.constant dense<0.000000e+00> : vector<16x32xf32>
    %1218 = tpu.matmul %1215, %1217, %cst_458 {dimension_numbers = #tpu.dot_dimension_numbers<[1], [0], [0], [1], [0, 0, 1, 1], [], []>} : vector<16x32xf32>, vector<32x32xf32>, vector<16x32xf32> -> vector<16x32xf32>
    %c85 = arith.constant 85 : index
    %c0_459 = arith.constant 0 : index
    %1219 = vector.load %arg3[%c85, %c0_459] : memref<111x32xf32, #tpu.memory_space<vmem>>, vector<1x32xf32>
    %1220 = vector.broadcast %1219 : vector<1x32xf32> to vector<16x32xf32>
    %1221 = arith.addf %1218, %1220 : vector<16x32xf32>
    %cst_460 = arith.constant 0.000000e+00 : f32
    %1222 = vector.broadcast %cst_460 : f32 to vector<16x32xf32>
    %1223 = arith.maximumf %1221, %1222 : vector<16x32xf32>
    %c55 = arith.constant 55 : index
    %c0_461 = arith.constant 0 : index
    %c0_462 = arith.constant 0 : index
    %1224 = vector.load %arg2[%c55, %c0_461, %c0_462] : memref<57x32x32xf32, #tpu.memory_space<vmem>>, vector<1x32x32xf32>
    %1225 = vector.shape_cast %1224 : vector<1x32x32xf32> to vector<32x32xf32>
    %cst_463 = arith.constant dense<0.000000e+00> : vector<16x32xf32>
    %1226 = tpu.matmul %1223, %1225, %cst_463 {dimension_numbers = #tpu.dot_dimension_numbers<[1], [0], [0], [1], [0, 0, 1, 1], [], []>} : vector<16x32xf32>, vector<32x32xf32>, vector<16x32xf32> -> vector<16x32xf32>
    %c86 = arith.constant 86 : index
    %c0_464 = arith.constant 0 : index
    %1227 = vector.load %arg3[%c86, %c0_464] : memref<111x32xf32, #tpu.memory_space<vmem>>, vector<1x32xf32>
    %1228 = vector.broadcast %1227 : vector<1x32xf32> to vector<16x32xf32>
    %1229 = arith.addf %1226, %1228 : vector<16x32xf32>
    %1230 = arith.addf %1215, %1229 : vector<16x32xf32>
    %cst_465 = arith.constant dense<0.000000e+00> : vector<16xf32>
    %1231 = vector.multi_reduction <add>, %1230, %cst_465 [1] : vector<16x32xf32> to vector<16xf32>
    %1232 = vector.shape_cast %1231 : vector<16xf32> to vector<16x1xf32>
    %cst_466 = arith.constant 3.200000e+01 : f32
    %1233 = vector.broadcast %cst_466 : f32 to vector<16x1xf32>
    %1234 = arith.divf %1232, %1233 : vector<16x1xf32>
    %1235 = arith.mulf %1230, %1230 : vector<16x32xf32>
    %cst_467 = arith.constant dense<0.000000e+00> : vector<16xf32>
    %1236 = vector.multi_reduction <add>, %1235, %cst_467 [1] : vector<16x32xf32> to vector<16xf32>
    %1237 = vector.shape_cast %1236 : vector<16xf32> to vector<16x1xf32>
    %cst_468 = arith.constant 3.200000e+01 : f32
    %1238 = vector.broadcast %cst_468 : f32 to vector<16x1xf32>
    %1239 = arith.divf %1237, %1238 : vector<16x1xf32>
    %1240 = arith.mulf %1234, %1234 : vector<16x1xf32>
    %1241 = arith.subf %1239, %1240 : vector<16x1xf32>
    %1242 = vector.broadcast %1234 : vector<16x1xf32> to vector<16x32xf32>
    %1243 = arith.subf %1230, %1242 : vector<16x32xf32>
    %cst_469 = arith.constant 9.99999974E-6 : f32
    %1244 = vector.broadcast %cst_469 : f32 to vector<16x1xf32>
    %1245 = arith.addf %1241, %1244 : vector<16x1xf32>
    %1246 = math.rsqrt %1245 : vector<16x1xf32>
    %1247 = vector.broadcast %1246 : vector<16x1xf32> to vector<16x32xf32>
    %1248 = arith.mulf %1243, %1247 : vector<16x32xf32>
    %c107 = arith.constant 107 : index
    %c0_470 = arith.constant 0 : index
    %1249 = vector.load %arg3[%c107, %c0_470] : memref<111x32xf32, #tpu.memory_space<vmem>>, vector<1x32xf32>
    %1250 = vector.broadcast %1249 : vector<1x32xf32> to vector<16x32xf32>
    %1251 = arith.mulf %1248, %1250 : vector<16x32xf32>
    %c108 = arith.constant 108 : index
    %c0_471 = arith.constant 0 : index
    %1252 = vector.load %arg3[%c108, %c0_471] : memref<111x32xf32, #tpu.memory_space<vmem>>, vector<1x32xf32>
    %1253 = vector.broadcast %1252 : vector<1x32xf32> to vector<16x32xf32>
    %1254 = arith.addf %1251, %1253 : vector<16x32xf32>
    %cst_472 = arith.constant dense<0.000000e+00> : vector<16xf32>
    %1255 = vector.multi_reduction <add>, %1254, %cst_472 [1] : vector<16x32xf32> to vector<16xf32>
    %1256 = vector.shape_cast %1255 : vector<16xf32> to vector<16x1xf32>
    %cst_473 = arith.constant 3.200000e+01 : f32
    %1257 = vector.broadcast %cst_473 : f32 to vector<16x1xf32>
    %1258 = arith.divf %1256, %1257 : vector<16x1xf32>
    %1259 = arith.mulf %1254, %1254 : vector<16x32xf32>
    %cst_474 = arith.constant dense<0.000000e+00> : vector<16xf32>
    %1260 = vector.multi_reduction <add>, %1259, %cst_474 [1] : vector<16x32xf32> to vector<16xf32>
    %1261 = vector.shape_cast %1260 : vector<16xf32> to vector<16x1xf32>
    %cst_475 = arith.constant 3.200000e+01 : f32
    %1262 = vector.broadcast %cst_475 : f32 to vector<16x1xf32>
    %1263 = arith.divf %1261, %1262 : vector<16x1xf32>
    %1264 = arith.mulf %1258, %1258 : vector<16x1xf32>
    %1265 = arith.subf %1263, %1264 : vector<16x1xf32>
    %1266 = vector.broadcast %1258 : vector<16x1xf32> to vector<16x32xf32>
    %1267 = arith.subf %1254, %1266 : vector<16x32xf32>
    %cst_476 = arith.constant 9.99999974E-6 : f32
    %1268 = vector.broadcast %cst_476 : f32 to vector<16x1xf32>
    %1269 = arith.addf %1265, %1268 : vector<16x1xf32>
    %1270 = math.rsqrt %1269 : vector<16x1xf32>
    %1271 = vector.broadcast %1270 : vector<16x1xf32> to vector<16x32xf32>
    %1272 = arith.mulf %1267, %1271 : vector<16x32xf32>
    %c109 = arith.constant 109 : index
    %c0_477 = arith.constant 0 : index
    %1273 = vector.load %arg3[%c109, %c0_477] : memref<111x32xf32, #tpu.memory_space<vmem>>, vector<1x32xf32>
    %1274 = vector.broadcast %1273 : vector<1x32xf32> to vector<16x32xf32>
    %1275 = arith.mulf %1272, %1274 : vector<16x32xf32>
    %c110 = arith.constant 110 : index
    %c0_478 = arith.constant 0 : index
    %1276 = vector.load %arg3[%c110, %c0_478] : memref<111x32xf32, #tpu.memory_space<vmem>>, vector<1x32xf32>
    %1277 = vector.broadcast %1276 : vector<1x32xf32> to vector<16x32xf32>
    %1278 = arith.addf %1275, %1277 : vector<16x32xf32>
    %1279 = vector.extract_strided_slice %1278 {offsets = [2, 0], sizes = [4, 32], strides = [1, 1]} : vector<16x32xf32> to vector<4x32xf32>
    %1280 = vector.extract_strided_slice %1278 {offsets = [10, 0], sizes = [4, 32], strides = [1, 1]} : vector<16x32xf32> to vector<4x32xf32>
    %1281 = tpu.concatenate %1279, %1280 in 0 : vector<4x32xf32>, vector<4x32xf32> -> vector<8x32xf32>
    %c56 = arith.constant 56 : index
    %c0_479 = arith.constant 0 : index
    %c0_480 = arith.constant 0 : index
    %1282 = vector.load %arg2[%c56, %c0_479, %c0_480] : memref<57x32x32xf32, #tpu.memory_space<vmem>>, vector<1x32x32xf32>
    %1283 = vector.shape_cast %1282 : vector<1x32x32xf32> to vector<32x32xf32>
    %cst_481 = arith.constant dense<0.000000e+00> : vector<8x32xf32>
    %1284 = tpu.matmul %1281, %1283, %cst_481 {dimension_numbers = #tpu.dot_dimension_numbers<[1], [0], [0], [1], [0, 0, 1, 1], [], []>} : vector<8x32xf32>, vector<32x32xf32>, vector<8x32xf32> -> vector<8x32xf32>
    %c48_482 = arith.constant 48 : index
    %c0_483 = arith.constant 0 : index
    %1285 = vector.load %arg3[%c48_482, %c0_483] : memref<111x32xf32, #tpu.memory_space<vmem>>, vector<1x32xf32>
    %1286 = vector.broadcast %1285 : vector<1x32xf32> to vector<8x32xf32>
    %1287 = arith.addf %1284, %1286 : vector<8x32xf32>
    %c0_484 = arith.constant 0 : index
    %c0_485 = arith.constant 0 : index
    %1288 = vector.load %arg4[%c0_484, %c0_485] : memref<8x32xf32, #tpu.memory_space<vmem>>, vector<8x32xf32>
    tpu.vector_store %arg4[%c0_484, %c0_485], %1287 {strides = array<i32>} : memref<8x32xf32, #tpu.memory_space<vmem>>, vector<8x32xf32>,
    return
  }
  func.func @transform_0(%arg0: i32) -> (i32, i32) {
    %c0_i32 = arith.constant 0 : i32
    %c0_i32_0 = arith.constant 0 : i32
    return %arg0, %c0_i32 : i32, i32
  }
  func.func @transform_1(%arg0: i32) -> (i32, i32, i32) {
    %c0_i32 = arith.constant 0 : i32
    %c0_i32_0 = arith.constant 0 : i32
    %c0_i32_1 = arith.constant 0 : i32
    %c0_i32_2 = arith.constant 0 : i32
    return %c0_i32, %c0_i32_0, %c0_i32_1 : i32, i32, i32
  }
  func.func @transform_2(%arg0: i32) -> (i32, i32) {
    %c0_i32 = arith.constant 0 : i32
    %c0_i32_0 = arith.constant 0 : i32
    %c0_i32_1 = arith.constant 0 : i32
    return %c0_i32, %c0_i32_0 : i32, i32
  }
  func.func @transform_3(%arg0: i32) -> (i32, i32) {
    %c0_i32 = arith.constant 0 : i32
    %c0_i32_0 = arith.constant 0 : i32
    return %arg0, %c0_i32 : i32, i32
  }
}

</mosaic_0001>

<bundles_post_ra>
// kernel: tom_forward.1
= control target key start
LH: loop header
LB: loop body
LE: loop exit
PB: predicated region body
PF: predicated region fallthrough
CT: control target
= control target key end

     0   :  { %vm19_vm0 = vcmask 130048   ;;  %s8815_s0 = inlined_call_operand.vmem [shape: f32[16,16], index: 0, kind: input, shape index: {}]   ;;  %s8816_s1 = inlined_call_operand.vmem [shape: f32[57,32,32], index: 1, kind: input, shape index: {}]   ;;  %s8817_s2 = inlined_call_operand.vmem [shape: f32[111,32], index: 2, kind: input, shape index: {}]   ;;  %s8818_s3 = inlined_call_operand.hbm [shape: f32[8,32], index: 3, kind: output, shape index: {}]  }
   0x1   :  { %v18_v0 = vld [vmem:[%s8817_s2 + $0x28] sm:$0xff]  ;;  %v17_v1 = vld [vmem:[%s8817_s2 + $0x20] sm:$0xff]  ;;  %v61_v3 = vld [vmem:[%s8816_s1 + $0x18] sm:$0xff] }
   0x2   :  { %40 = vmatpush.msra.mxu0 %v18_v0  ;;  %v15_v2 = vld [vmem:[%s8815_s0] sm:$0xff]  ;;  %v5939_v4 = vld [vmem:[%s8816_s1 + $0x38] sm:$0xff]  ;;  %82 = vmatpush.msra.mxu1 %v61_v3  ;;  %v60_v6 = vld [vmem:[%s8816_s1 + $0x10] sm:$0xff] }
   0x3   :  { %111 = vmatpush.msra.mxu2 %v5939_v4  ;;  %v5951_v5 = vld [vmem:[%s8816_s1 + $0x78] sm:$0xff]  ;;  %v5938_v7 = vld [vmem:[%s8816_s1 + $0x30] sm:$0xff]  ;;  %v59_v8 = vld [vmem:[%s8816_s1 + $0x8] sm:$0xff] }
   0x4   :  { %41 = vmatpush.msra.mxu0 %v17_v1  ;;  %83 = vmatpush.msra.mxu1 %v60_v6  ;;  %v5950_v9 = vld [vmem:[%s8816_s1 + $0x70] sm:$0xff]  ;;  %v5937_v10 = vld [vmem:[%s8816_s1 + $0x28] sm:$0xff]  ;;  %v58_v12 = vld [vmem:[%s8816_s1] sm:$0xff] }
   0x5   :  { %5932 = vmatmul.msk.f32.vlgmr.msra.gmra.mxu0 %vm19_vm0, %v15_v2  ;;  %112 = vmatpush.msra.mxu2 %v5938_v7  ;;  %v5949_v11 = vld [vmem:[%s8816_s1 + $0x68] sm:$0xff]  ;;  %v5945_v13 = vld [vmem:[%s8816_s1 + $0x58] sm:$0xff]  ;;  %v5936_v14 = vld [vmem:[%s8816_s1 + $0x20] sm:$0xff] }
   0x6   :  { %169 = vmatpush.msrb.mxu0 %v5951_v5  ;;  %84 = vmatpush.msra.mxu1 %v59_v8  ;;  %v5948_v15 = vld [vmem:[%s8816_s1 + $0x60] sm:$0xff]  ;;  %v5944_v16 = vld [vmem:[%s8816_s1 + $0x50] sm:$0xff]  ;;  %v16_v17 = vld [vmem:[%s8815_s0 + $0x8] sm:$0xff] }
   0x7   :  { %140 = vmatpush.msra.mxu3 %v5945_v13  ;;  %113 = vmatpush.msra.mxu2 %v5937_v10  ;;  %v5957_v18 = vld [vmem:[%s8816_s1 + $0x98] sm:$0xff]  ;;  %v5956_v20 = vld [vmem:[%s8816_s1 + $0x90] sm:$0xff] }
   0x8   :  { %170 = vmatpush.msrb.mxu0 %v5950_v9  ;;  %v5963_v19 = vld [vmem:[%s8816_s1 + $0xb8] sm:$0xff]  ;;  %85 = vmatpush.msra.mxu1 %v58_v12  ;;  %v5962_v22 = vld [vmem:[%s8816_s1 + $0xb0] sm:$0xff] }
   0x9   :  { %v5975_v21 = vld [vmem:[%s8816_s1 + $0xf8] sm:$0xff]  ;;  %141 = vmatpush.msra.mxu3 %v5944_v16  ;;  %114 = vmatpush.msra.mxu2 %v5936_v14  ;;  %v5974_v23 = vld [vmem:[%s8816_s1 + $0xf0] sm:$0xff] }
   0xa   :  { %171 = vmatpush.msrb.mxu0 %v5949_v11  ;;  %197 = vmatpush.msrb.mxu1 %v5957_v18 }
   0xb   :  { %225 = vmatpush.msrb.mxu2 %v5963_v19 }
   0xc   :  { %172 = vmatpush.msrb.mxu0 %v5948_v15  ;;  %198 = vmatpush.msrb.mxu1 %v5956_v20 }
   0xd   :  { %5933 = vmatmul.msk.f32.gmra.mxu0 %vm19_vm0, %v16_v17  ;;  %226 = vmatpush.msrb.mxu2 %v5962_v22 }
   0xe   :  { %281 = vmatpush.msra.mxu0 %v5975_v21 }
  0x10   :  { %282 = vmatpush.msra.mxu0 %v5974_v23 }
  0x11   :  { %8 = vsyncpa [#allocation3], 0  ;;  %v5943_v24 = vld [vmem:[%s8816_s1 + $0x48] sm:$0xff]  ;;  %v5942_v28 = vld [vmem:[%s8816_s1 + $0x40] sm:$0xff]  ;;  %vm63_vm1 = vcmask 261120   ;;  %vm315_vm2 = vcmask 64512  }
  0x12   :  { %v5955_v25 = vld [vmem:[%s8816_s1 + $0x88] sm:$0xff]  ;;  %142 = vmatpush.msra.mxu3 %v5943_v24  ;;  %v5954_v29 = vld [vmem:[%s8816_s1 + $0x80] sm:$0xff]  ;;  %v5969_v32 = vld [vmem:[%s8816_s1 + $0xd8] sm:$0xff]  ;;  %s6725_s14 = smov [#allocation2]   ;;  %s5923_s18 = sshll.u32 %s8818_s3, 4  ;;  %s5924_s18 = int_to_ptr.hbm [resolvable:$true] %s5923_s18 }
  0x13   :  { %v5961_v26 = vld [vmem:[%s8816_s1 + $0xa8] sm:$0xff]  ;;  %199 = vmatpush.msrb.mxu1 %v5955_v25  ;;  %v5960_v30 = vld [vmem:[%s8816_s1 + $0xa0] sm:$0xff]  ;;  %v5968_v33 = vld [vmem:[%s8816_s1 + $0xd0] sm:$0xff]  ;;  %s5921_s15 = sshll.u32 %s6725_s14, 4  ;;  %s5922_s15 = int_to_ptr.vmem [resolvable:$true] %s5921_s15 }
  0x14   :  { %v5973_v27 = vld [vmem:[%s8816_s1 + $0xe8] sm:$0xff]  ;;  %227 = vmatpush.msrb.mxu2 %v5961_v26  ;;  %143 = vmatpush.msra.mxu3 %v5942_v28  ;;  %v5972_v31 = vld [vmem:[%s8816_s1 + $0xe0] sm:$0xff]  ;;  %v6915_v42 = vld [vmem:[%s8817_s2 + $0x31] sm:$0xf] }
  0x15   :  { %283 = vmatpush.msra.mxu0 %v5973_v27  ;;  %200 = vmatpush.msrb.mxu1 %v5954_v29  ;;  %v5967_v34 = vld [vmem:[%s8816_s1 + $0xc8] sm:$0xff]  ;;  %v5966_v35 = vld [vmem:[%s8816_s1 + $0xc0] sm:$0xff]  ;;  %v62_v43 = vperm.slane %v6915_v42, 0  ;;  %v156_v44 = vperm.slane %v6915_v42, 3  ;;  %v98_v49 = vperm.slane %v6915_v42, 1  ;;  %v127_v55 = vperm.slane %v6915_v42, 2 }
  0x16   :  { %228 = vmatpush.msrb.mxu2 %v5960_v30  ;;  %253 = vmatpush.msrb.mxu3 %v5969_v32  ;;  %v49_v36 = vld [vmem:[%s8817_s2] sm:$0xff]  ;;  %v50_v39 = vld [vmem:[%s8817_s2 + $0x8] sm:$0xff] }
  0x17   :  { %284 = vmatpush.msra.mxu0 %v5972_v31 }
  0x18   :  { %254 = vmatpush.msrb.mxu3 %v5968_v33 }
  0x1a   :  { %255 = vmatpush.msrb.mxu3 %v5967_v34 }
  0x1c   :  { %256 = vmatpush.msrb.mxu3 %v5966_v35 }
  0x82   :  { %v6859_v37 = vpop.f32.mrf.mxu0 }
  0x83   :  { %v6862_v38 = vadd.f32 %v49_v36, %v6859_v37 }
  0x85   :  { %5934 = vmatmul.msk.f32.vlgmr.msra.gmra.mxu1 %vm63_vm1, %v6862_v38  ;;  %5940 = vmatmul.msk.f32.vlgmr.msra.gmra.mxu2 %vm63_vm1, %v6862_v38 }
  0x86   :  { %5946 = vmatmul.msk.f32.vlgmr.msra.gmra.mxu3 %vm63_vm1, %v6862_v38  ;;  %5952 = vmatmul.msk.f32.vlgmr.msrb.gmra.mxu0 %vm63_vm1, %v6862_v38 }
  0x87   :  { %5978 = vmatpush.xpose.msk.msra.mxu1 %vm63_vm1, %v6862_v38  ;;  %5980 = vmatpush.xpose.msk.msra.mxu2 %vm63_vm1, %v6862_v38 }
  0x88   :  { %5987 = vmatpush.xpose.msk.msrb.mxu0 %vm63_vm1, %v6862_v38 }
  0x8a   :  { %v6881_v40 = vpop.f32.mrf.mxu0 }
  0x8b   :  { %v6884_v41 = vadd.f32 %v50_v39, %v6881_v40 }
  0x8d   :  { %5935 = vmatmul.msk.f32.gmra.mxu1 %vm63_vm1, %v6884_v41  ;;  %5941 = vmatmul.msk.f32.gmra.mxu2 %vm63_vm1, %v6884_v41 }
  0x8e   :  { %5947 = vmatmul.msk.f32.gmra.mxu3 %vm63_vm1, %v6884_v41  ;;  %5953 = vmatmul.msk.f32.gmra.mxu0 %vm63_vm1, %v6884_v41 }
  0x95   :  { %5958 = vmatmul.msk.f32.vlgmr.msrb.gmra.mxu1 %vm63_vm1, %v6862_v38  ;;  %5964 = vmatmul.msk.f32.vlgmr.msrb.gmra.mxu2 %vm63_vm1, %v6862_v38 }
  0x96   :  { %5970 = vmatmul.msk.f32.vlgmr.msrb.gmra.mxu3 %vm63_vm1, %v6862_v38  ;;  %5976 = vmatmul.msk.f32.vlgmr.msra.gmra.mxu0 %vm63_vm1, %v6862_v38 }
  0x97   :  { %5984 = vmatpush.xpose.msk.msrb.mxu2 %vm63_vm1, %v6862_v38 }
  0x9d   :  { %5965 = vmatmul.msk.f32.gmra.mxu2 %vm63_vm1, %v6884_v41  ;;  %5959 = vmatmul.msk.f32.gmra.mxu1 %vm63_vm1, %v6884_v41 }
  0x9e   :  { %5971 = vmatmul.msk.f32.gmra.mxu3 %vm63_vm1, %v6884_v41  ;;  %5977 = vmatmul.msk.f32.gmra.mxu0 %vm63_vm1, %v6884_v41 }
 0x102   :  { %v87_v45 = vpop.f32.mrf.mxu1 }
 0x103   :  { %v88_v46 = vadd.f32 %v87_v45, %v62_v43  ;;  %v174_v47 = vpop.f32.mrf.mxu0 }
 0x104   :  { %v175_v48 = vadd.f32 %v174_v47, %v156_v44 }
 0x105   :  { %5979 = vmatmul.msk.f32.vlgmr.msra.gmra.mxu1 %vm63_vm1, %v88_v46 }
 0x106   :  { %5988 = vmatmul.msk.f32.vlgmr.msrb.gmra.mxu0 %vm63_vm1, %v175_v48 }
 0x108   :  { %v116_v50 = vpop.f32.mrf.mxu2 }
 0x109   :  { %v117_v51 = vadd.f32 %v116_v50, %v98_v49  ;;  %v145_v52 = vpop.f32.mrf.mxu3 }
 0x10a   :  { %v90_v53 = vpop.f32.mrf.mxu1  ;;  %v146_v57 = vadd.f32 %v145_v52, %v127_v55 }
 0x10b   :  { %v6926_v54 = vpop.f32.mrf.mxu0  ;;  %5981 = vmatmul.msk.f32.vlgmr.msra.gmra.mxu2 %vm63_vm1, %v117_v51  ;;  %v91_v61 = vadd.f32 %v90_v53, %v62_v43 }
 0x10c   :  { %5990 = vmatpush.xpose.msk.msra.mxu2 %vm63_vm1, %v6884_v41 }
 0x110   :  { %v6932_v56 = vpop.f32.mrf.mxu2 }
 0x111   :  { %v148_v58 = vpop.f32.mrf.mxu3 }
 0x112   :  { %v202_v59 = vpop.f32.mrf.mxu1  ;;  %v149_v0 = vadd.f32 %v148_v58, %v127_v55 }
 0x113   :  { %v286_v60 = vpop.f32.mrf.mxu0  ;;  %428 = vmatpush.msrb.mxu1 %v202_v59  ;;  %5985 = vmatmul.msk.f32.vlgmr.msrb.gmra.mxu2 %vm63_vm1, %v146_v57 }
 0x114   :  { %5996 = vmatpush.xpose.msk.msrb.mxu2 %vm63_vm1, %v6884_v41 }
 0x115   :  { %569 = vmatpush.msra.mxu1 %v286_v60 }
 0x118   :  { %v230_v62 = vpop.f32.mrf.mxu2 }
 0x119   :  { %v258_v63 = vpop.f32.mrf.mxu3  ;;  %405 = vmatpush.msra.mxu3 %v230_v62 }
 0x11a   :  { %v6942_v4 = vpop.f32.mrf.mxu1 }
 0x11b   :  { %498 = vmatpush.msrb.mxu3 %v258_v63  ;;  %5991 = vmatmul.msk.f32.vlgmr.msra.gmra.mxu2 %vm63_vm1, %v91_v61  ;;  %v6950_v17 = vpop.f32.mrf.mxu0 }
 0x120   :  { %v233_v1 = vpop.f32.mrf.mxu2 }
 0x121   :  { %687 = vmatpush.msra.mxu0 %v233_v1 }
 0x123   :  { %5999 = vmatpush.xpose.msk.msrb.mxu0 %vm63_vm1, %v6884_v41  ;;  %5997 = vmatmul.msk.f32.vlgmr.msrb.gmra.mxu2 %vm63_vm1, %v149_v0  ;;  %v261_v0 = vpop.f32.mrf.mxu3 }
 0x182   :  { %v6945_v7 = vpop.f32.mrf.mxu1 }
 0x183   :  { %v316_v8 = vsel %vm315_vm2, %v6945_v7, -inf  ;;  %v524_v20 = vpop.f32.mrf.mxu0 }
 0x184   :  { %v527_v21 = vsel %vm315_vm2, %v524_v20, -inf }
 0x18e   :  { %v360_v2 = vpop.f32.mrf.mxu2 }
 0x18f   :  { %v363_v3 = vsel %vm315_vm2, %v360_v2, -inf }
 0x190   :  { %364 = vmax.xlane.f32.xlu0 %v363_v3 }
 0x196   :  { %v453_v5 = vpop.f32.mrf.mxu2 }
 0x197   :  { %v456_v6 = vsel %vm315_vm2, %v453_v5, -inf }
 0x198   :  { %457 = vmax.xlane.f32.xlu0 %v456_v6 }
 0x19e   :  { %v595_v22 = vpop.f32.mrf.mxu2 }
 0x19f   :  { %v598_v23 = vsel %vm315_vm2, %v595_v22, -inf }
 0x1a0   :  { %317 = vmax.xlane.f32.xlu0 %v316_v8 }
 0x203   :  { %v365_v9 = vpop.xlane.xlu0 %364 }
 0x204   :  { %v366_v10 = vsub.f32 %v360_v2, %v365_v9  ;;  %v120_v2 = vadd.f32 %v6932_v56, %v98_v49 }
 0x206   :  { %v367_v11 = vmul.f32 1.442695, %v366_v10 }
 0x208   :  { %6456 = vpow2.f32 %v367_v11 }
 0x20b   :  { %v458_v12 = vpop.xlane.xlu0 %457 }
 0x20c   :  { %v459_v13 = vsub.f32 %v453_v5, %v458_v12 }
 0x20e   :  { %v6457_v14 = vpop.eup %6456  ;;  %v460_v15 = vmul.f32 1.442695, %v459_v13 }
 0x20f   :  { %v369_v16 = vsel %vm315_vm2, %v6457_v14, 0.0 }
 0x210   :  { %6458 = vpow2.f32 %v460_v15  ;;  %370 = vadd.xlane.f32.xlu1 %v369_v16 }
 0x213   :  { %v318_v11 = vpop.xlane.xlu0 %317 }
 0x214   :  { %v319_v49 = vsub.f32 %v6945_v7, %v318_v11 }
 0x216   :  { %v6459_v18 = vpop.eup %6458 }
 0x217   :  { %v462_v19 = vsel %vm315_vm2, %v6459_v18, 0.0 }
 0x218   :  { %463 = vadd.xlane.f32.xlu1 %v462_v19 }
 0x220   :  { %528 = vmax.xlane.f32.xlu1 %v527_v21 }
 0x228   :  { %599 = vmax.xlane.f32.xlu1 %v598_v23 }
 0x283   :  { %v371_v24 = vpop.xlane.xlu1 %370 }
 0x284   :  { %6460 = vrcp.f32 %v371_v24  ;;  %v383_v29 = vand.u32 2147483648, %v371_v24  ;;  %v381_v31 = vand.u32 2147483647, %v371_v24  ;;  %vm377_vm4 = vweird.f32 %v371_v24 }
 0x286   :  { %v384_v34 = vor.u32 1.1754944e-38, %v383_v29  ;;  %vm382_vm6 = vcmp.eq.f32.partialorder %v381_v31, 8.507059e+37 }
 0x28a   :  { %v6461_v25 = vpop.eup %6460 }
 0x28b   :  { %v373_v26 = vmul.f32 %v6461_v25, %v371_v24  ;;  %v464_v27 = vpop.xlane.xlu1 %463  ;;  %vm378_vm3 = vweird.f32 %v6461_v25 }
 0x28c   :  { %6462 = vrcp.f32 %v464_v27  ;;  %vm379_vm5 = vmor %vm377_vm4, %vm378_vm3  ;;  %v476_v48 = vand.u32 2147483648, %v464_v27  ;;  %v474_v52 = vand.u32 2147483647, %v464_v27  ;;  %vm470_vm8 = vweird.f32 %v464_v27 }
 0x28d   :  { %v374_v28 = vsub.f32 1.0, %v373_v26 }
 0x28e   :  { %v477_v55 = vor.u32 1.1754944e-38, %v476_v48  ;;  %vm475_vm10 = vcmp.eq.f32.partialorder %v474_v52, 8.507059e+37 }
 0x28f   :  { %v375_v30 = vmul.f32 %v6461_v25, %v374_v28 }
 0x291   :  { %v376_v32 = vadd.f32 %v6461_v25, %v375_v30 }
 0x292   :  { %v6463_v33 = vpop.eup %6462 }
 0x293   :  { %v380_v35 = vsel %vm379_vm5, %v6461_v25, %v376_v32  ;;  %v466_v36 = vmul.f32 %v6463_v33, %v464_v27  ;;  %v529_v39 = vpop.xlane.xlu1 %528  ;;  %vm471_vm7 = vweird.f32 %v6463_v33 }
 0x294   :  { %v385_v43 = vsel %vm382_vm6, %v384_v34, %v380_v35  ;;  %v530_v45 = vsub.f32 %v524_v20, %v529_v39  ;;  %vm472_vm9 = vmor %vm470_vm8, %vm471_vm7  ;;  %v735_v20 = vpop.f32.mrf.mxu2 }
 0x295   :  { %v467_v46 = vsub.f32 1.0, %v466_v36  ;;  %v386_v47 = vmul.f32 %v6457_v14, %v385_v43  ;;  %v320_v14 = vmul.f32 1.442695, %v319_v49  ;;  %v738_v21 = vsel %vm315_vm2, %v735_v20, -inf }
 0x296   :  { %v531_v50 = vmul.f32 1.442695, %v530_v45 }
 0x297   :  { %v468_v51 = vmul.f32 %v6463_v33, %v467_v46  ;;  %5982 = vmatmul.msk.f32.vlgmr.msra.gmra.mxu3 %vm315_vm2, %v386_v47 }
 0x298   :  { %6464 = vpow2.f32 %v531_v50  ;;  %5992 = vmatpush.xpose.msk.msra.mxu3 %vm63_vm1, %v6884_v41 }
 0x299   :  { %v469_v53 = vadd.f32 %v6463_v33, %v468_v51 }
 0x29b   :  { %v473_v57 = vsel %vm472_vm9, %v6463_v33, %v469_v53  ;;  %v600_v58 = vpop.xlane.xlu1 %599 }
 0x29c   :  { %v478_v59 = vsel %vm475_vm10, %v477_v55, %v473_v57  ;;  %v601_v60 = vsub.f32 %v595_v22, %v600_v58 }
 0x29d   :  { %v479_v61 = vmul.f32 %v6459_v18, %v478_v59 }
 0x29e   :  { %v6958_v62 = vpop.eup %6464  ;;  %v602_v63 = vmul.f32 1.442695, %v601_v60 }
 0x29f   :  { %5986 = vmatmul.msk.f32.vlgmr.msrb.gmra.mxu3 %vm315_vm2, %v479_v61  ;;  %v533_v1 = vsel %vm315_vm2, %v6958_v62, 0.0 }
 0x2a0   :  { %6466 = vpow2.f32 %v602_v63  ;;  %780 = vmatpush.msrb.mxu3 %v261_v0  ;;  %534 = vadd.xlane.f32.xlu0 %v533_v1 }
 0x2a6   :  { %v6966_v3 = vpop.eup %6466 }
 0x2a7   :  { %5993 = vmatmul.msk.f32.vlgmr.msra.gmra.mxu3 %vm63_vm1, %v120_v2  ;;  %v604_v5 = vsel %vm315_vm2, %v6966_v3, 0.0 }
 0x2a8   :  { %605 = vadd.xlane.f32.xlu1 %v604_v5 }
 0x313   :  { %v6980_v22 = vpop.xlane.xlu0 %534 }
 0x314   :  { %v547_v2 = vand.u32 2147483648, %v6980_v22  ;;  %vm541_vm6 = vweird.f32 %v6980_v22 }
 0x31a   :  { %v6971_v6 = vpop.f32.mrf.mxu3 }
 0x31b   :  { %v6985_v25 = vpop.xlane.xlu1 %605 }
 0x31c   :  { %vm612_vm10 = vweird.f32 %v6985_v25 }
 0x322   :  { %v6973_v8 = vpop.f32.mrf.mxu3 }
 0x32a   :  { %v642_v9 = vpop.f32.mrf.mxu3 }
 0x32b   :  { %v645_v10 = vsel %vm315_vm2, %v642_v9, -inf }
 0x32c   :  { %646 = vmax.xlane.f32.xlu2 %v645_v10  ;;  %v545_v10 = vand.u32 2147483647, %v6980_v22 }
 0x32e   :  { %vm546_vm8 = vcmp.eq.f32.partialorder %v545_v10, 8.507059e+37 }
 0x39f   :  { %v647_v12 = vpop.xlane.xlu2 %646 }
 0x3a0   :  { %v648_v13 = vsub.f32 %v642_v9, %v647_v12  ;;  %v178_v9 = vadd.f32 %v6926_v54, %v156_v44  ;;  %v618_v54 = vand.u32 2147483648, %v6985_v25 }
 0x3a2   :  { %v649_v56 = vmul.f32 1.442695, %v648_v13 }
 0x3a4   :  { %6468 = vpow2.f32 %v649_v56 }
 0x3a5   :  { %6470 = vpow2.f32 %v320_v14  ;;  %v548_v14 = vor.u32 1.1754944e-38, %v547_v2  ;;  %v6002_v2 = vld [vmem:[%s8816_s1 + $0x600] sm:$0xff] }
 0x3aa   :  { %v6469_v15 = vpop.eup %6468 }
 0x3ab   :  { %v651_v16 = vsel %vm315_vm2, %v6469_v15, 0.0  ;;  %v6471_v18 = vpop.eup %6470 }
 0x3ac   :  { %652 = vadd.xlane.f32.xlu2 %v651_v16  ;;  %v322_v19 = vsel %vm315_vm2, %v6471_v18, 0.0 }
 0x3b4   :  { %323 = vadd.xlane.f32.xlu2 %v322_v19  ;;  %v619_v19 = vor.u32 1.1754944e-38, %v618_v54 }
 0x3bc   :  { %739 = vmax.xlane.f32.xlu2 %v738_v21 }
 0x41f   :  { %v653_v23 = vpop.xlane.xlu2 %652 }
 0x420   :  { %6472 = vrcp.f32 %v653_v23  ;;  %v665_v30 = vand.u32 2147483648, %v653_v23  ;;  %v663_v32 = vand.u32 2147483647, %v653_v23  ;;  %vm659_vm12 = vweird.f32 %v653_v23 }
 0x421   :  { %6474 = vrcp.f32 %v6980_v22 }
 0x422   :  { %v666_v36 = vor.u32 1.1754944e-38, %v665_v30  ;;  %vm664_vm14 = vcmp.eq.f32.partialorder %v663_v32, 8.507059e+37 }
 0x426   :  { %v6473_v7 = vpop.eup %6472 }
 0x427   :  { %v6983_v24 = vpop.eup %6474  ;;  %v655_v26 = vmul.f32 %v6473_v7, %v653_v23  ;;  %v324_v27 = vpop.xlane.xlu2 %323  ;;  %vm660_vm11 = vweird.f32 %v6473_v7 }
 0x428   :  { %6476 = vrcp.f32 %v324_v27  ;;  %v537_v29 = vmul.f32 %v6983_v24, %v6980_v22  ;;  %vm661_vm13 = vmor %vm659_vm12, %vm660_vm11  ;;  %v336_v53 = vand.u32 2147483648, %v324_v27  ;;  %v334_v59 = vand.u32 2147483647, %v324_v27 }
 0x429   :  { %v656_v28 = vsub.f32 1.0, %v655_v26  ;;  %6478 = vrcp.f32 %v6985_v25  ;;  %vm330_vm0 = vweird.f32 %v324_v27  ;;  %vm542_vm3 = vweird.f32 %v6983_v24 }
 0x42a   :  { %v538_v35 = vsub.f32 1.0, %v537_v29  ;;  %v337_v61 = vor.u32 1.1754944e-38, %v336_v53  ;;  %vm335_vm5 = vcmp.eq.f32.partialorder %v334_v59, 8.507059e+37  ;;  %vm543_vm7 = vmor %vm541_vm6, %vm542_vm3 }
 0x42b   :  { %v657_v31 = vmul.f32 %v6473_v7, %v656_v28 }
 0x42c   :  { %v539_v52 = vmul.f32 %v6983_v24, %v538_v35 }
 0x42d   :  { %v658_v33 = vadd.f32 %v6473_v7, %v657_v31 }
 0x42e   :  { %v6477_v34 = vpop.eup %6476  ;;  %v540_v63 = vadd.f32 %v6983_v24, %v539_v52 }
 0x42f   :  { %v662_v39 = vsel %vm661_vm13, %v6473_v7, %v658_v33  ;;  %v326_v43 = vmul.f32 %v6477_v34, %v324_v27  ;;  %v740_v45 = vpop.xlane.xlu2 %739  ;;  %v6479_v46 = vpop.eup %6478  ;;  %vm331_vm15 = vweird.f32 %v6477_v34  ;;  %v7022_v33 = vld [vmem:[%s8817_s2 + $0x35] ss:$0 sm:$0xff] }
 0x430   :  { %v667_v47 = vsel %vm664_vm14, %v666_v36, %v662_v39  ;;  %v741_v48 = vsub.f32 %v735_v20, %v740_v45  ;;  %v608_v57 = vmul.f32 %v6479_v46, %v6985_v25  ;;  %vm332_vm4 = vmor %vm330_vm0, %vm331_vm15  ;;  %v544_v13 = vsel %vm543_vm7, %v6983_v24, %v540_v63 }
 0x431   :  { %v327_v50 = vsub.f32 1.0, %v326_v43  ;;  %v668_v51 = vmul.f32 %v6469_v15, %v667_v47  ;;  %v549_v42 = vsel %vm546_vm8, %v548_v14, %v544_v13  ;;  %vm613_vm9 = vweird.f32 %v6479_v46 }
 0x432   :  { %v742_v55 = vmul.f32 1.442695, %v741_v48  ;;  %v609_v0 = vsub.f32 1.0, %v608_v57  ;;  %v616_v15 = vand.u32 2147483647, %v6985_v25  ;;  %v550_v16 = vmul.f32 %v6958_v62, %v549_v42  ;;  %vm614_vm11 = vmor %vm612_vm10, %vm613_vm9 }
 0x433   :  { %v328_v58 = vmul.f32 %v6477_v34, %v327_v50  ;;  %5994 = vmatmul.msk.f32.vlgmr.msra.gmra.mxu0 %vm315_vm2, %v668_v51  ;;  %v6724_v47 = vmov 32.0  }
 0x434   :  { %6480 = vpow2.f32 %v742_v55  ;;  %v610_v49 = vmul.f32 %v6479_v46, %v609_v0  ;;  %vm617_vm12 = vcmp.eq.f32.partialorder %v616_v15, 8.507059e+37  ;;  %v6003_v0 = vld [vmem:[%s8816_s1 + $0x608] sm:$0xff] }
 0x435   :  { %v329_v60 = vadd.f32 %v6477_v34, %v328_v58 }
 0x436   :  { %v611_v44 = vadd.f32 %v6479_v46, %v610_v49 }
 0x437   :  { %v333_v1 = vsel %vm332_vm4, %v6477_v34, %v329_v60  ;;  %v6004_v60 = vld [vmem:[%s8816_s1 + $0x610] sm:$0xff] }
 0x438   :  { %v338_v5 = vsel %vm335_vm5, %v337_v61, %v333_v1 }
 0x439   :  { %v339_v11 = vmul.f32 %v6471_v18, %v338_v5  ;;  %v615_v18 = vsel %vm614_vm11, %v6479_v46, %v611_v44 }
 0x43a   :  { %v6481_v12 = vpop.eup %6480 }
 0x43b   :  { %5983 = vmatmul.msk.f32.vlgmr.msrb.gmra.mxu1 %vm315_vm2, %v339_v11  ;;  %6000 = vmatmul.msk.f32.vlgmr.msrb.gmra.mxu0 %vm63_vm1, %v178_v9  ;;  %v744_v56 = vsel %vm315_vm2, %v6481_v12, 0.0 }
 0x43c   :  { %710 = vmatpush.msrb.mxu1 %v6942_v4  ;;  %745 = vadd.xlane.f32.xlu2 %v744_v56  ;;  %v620_v4 = vsel %vm617_vm12, %v619_v19, %v615_v18 }
 0x43d   :  { %v621_v20 = vmul.f32 %v6966_v3, %v620_v4  ;;  %v7054_v4 = vld [vmem:[%s8817_s2 + $0x58] ss:$0 sm:$0xff] }
 0x443   :  { %5989 = vmatmul.msk.f32.vlgmr.msra.gmra.mxu1 %vm315_vm2, %v550_v16  ;;  %v7049_v16 = vld [vmem:[%s8817_s2 + $0x57] ss:$0 sm:$0xff] }
 0x444   :  { %851 = vmatpush.msra.mxu1 %v6950_v17 }
 0x44b   :  { %5995 = vmatmul.msk.f32.vlgmr.msrb.gmra.mxu1 %vm315_vm2, %v621_v20 }
 0x4af   :  { %v746_v21 = vpop.xlane.xlu2 %745 }
 0x4b0   :  { %6482 = vrcp.f32 %v746_v21  ;;  %v7014_v22 = vpop.f32.mrf.mxu0  ;;  %v758_v27 = vand.u32 2147483648, %v746_v21  ;;  %v756_v28 = vand.u32 2147483647, %v746_v21  ;;  %vm752_vm14 = vweird.f32 %v746_v21 }
 0x4b1   :  { %6484 = vrcp.f32 %v6724_v47 }
 0x4b2   :  { %v759_v30 = vor.u32 1.1754944e-38, %v758_v27  ;;  %vm757_vm0 = vcmp.eq.f32.partialorder %v756_v28, 8.507059e+37 }
 0x4b6   :  { %v6483_v23 = vpop.eup %6482 }
 0x4b7   :  { %v748_v7 = vmul.f32 %v6483_v23, %v746_v21  ;;  %vm753_vm13 = vweird.f32 %v6483_v23  ;;  %v6485_v48 = vpop.eup %6484 }
 0x4b8   :  { %v430_v62 = vpop.f32.mrf.mxu1  ;;  %v806_v24 = vpop.f32.mrf.mxu0  ;;  %vm754_vm15 = vmor %vm752_vm14, %vm753_vm13  ;;  %v870_v50 = vmul.f32 32.0, %v6485_v48  ;;  %vm874_vm3 = vweird.f32 %v6485_v48 }
 0x4b9   :  { %v749_v25 = vsub.f32 1.0, %v748_v7  ;;  %v809_v26 = vsel %vm315_vm2, %v806_v24, -inf  ;;  %v431_v3 = vadd.f32 %v430_v62, %v6971_v6 }
 0x4ba   :  { %810 = vmax.xlane.f32.xlu0 %v809_v26  ;;  %v871_v52 = vsub.f32 1.0, %v870_v50 }
 0x4bb   :  { %v750_v17 = vmul.f32 %v6483_v23, %v749_v25  ;;  %v503_v32 = vadd.f32 %v6973_v8, %v431_v3 }
 0x4bc   :  { %v872_v57 = vmul.f32 %v6485_v48, %v871_v52 }
 0x4bd   :  { %v751_v29 = vadd.f32 %v6483_v23, %v750_v17 }
 0x4be   :  { %v873_v58 = vadd.f32 %v6485_v48, %v872_v57 }
 0x4bf   :  { %v755_v31 = vsel %vm754_vm15, %v6483_v23, %v751_v29  ;;  %v6011_v23 = vld [vmem:[%s8816_s1 + $0x638] sm:$0xff] }
 0x4c0   :  { %v760_v34 = vsel %vm757_vm0, %v759_v30, %v755_v31  ;;  %v571_v35 = vpop.f32.mrf.mxu1  ;;  %v7036_v63 = vsel %vm874_vm3, %v6485_v48, %v873_v58  ;;  %989 = vmatpush.msra.mxu3 %v6011_v23  ;;  %v7087_v58 = vld [vmem:[%s8817_s2 + $0x50] ss:$0 sm:$0xff] }
 0x4c1   :  { %v574_v36 = vadd.f32 %v571_v35, %v503_v32  ;;  %v761_v39 = vmul.f32 %v6481_v12, %v760_v34  ;;  %v6010_v32 = vld [vmem:[%s8816_s1 + $0x630] sm:$0xff]  ;;  %v6009_v34 = vld [vmem:[%s8816_s1 + $0x628] sm:$0xff]  ;;  %v6008_v35 = vld [vmem:[%s8816_s1 + $0x620] sm:$0xff] }
 0x4c2   :  { %990 = vmatpush.msra.mxu3 %v6010_v32  ;;  %v6022_v23 = vld [vmem:[%s8816_s1 + $0x130] sm:$0xff]  ;;  %v6039_v32 = vld [vmem:[%s8816_s1 + $0x188] sm:$0xff] }
 0x4c3   :  { %v859_v43 = vadd.f32 %v7022_v33, %v574_v36  ;;  %5998 = vmatmul.msk.f32.vlgmr.msrb.gmra.mxu3 %vm315_vm2, %v761_v39  ;;  %v7075_v36 = vld [vmem:[%s8817_s2 + $0x4f] ss:$0 sm:$0xff] }
 0x4c4   :  { %991 = vmatpush.msra.mxu3 %v6009_v34  ;;  %v6045_v34 = vld [vmem:[%s8816_s1 + $0x1a8] sm:$0xff] }
 0x4c5   :  { %v861_v6 = vadd.f32 %v859_v43, %v6862_v38  ;;  %v6005_v38 = vld [vmem:[%s8816_s1 + $0x618] sm:$0xff] }
 0x4c6   :  { %951 = vmatpush.msra.mxu2 %v6005_v38  ;;  %992 = vmatpush.msra.mxu3 %v6008_v35 }
 0x4c7   :  { %v863_v45 = vsel %vm63_vm1, %v861_v6, 0.0  ;;  %v878_v46 = vmul.f32 %v861_v6, %v861_v6 }
 0x4c8   :  { %864 = vadd.xlane.f32.xlu1 %v863_v45  ;;  %952 = vmatpush.msra.mxu2 %v6004_v60  ;;  %v712_v45 = vpop.f32.mrf.mxu1 }
 0x4c9   :  { %v880_v8 = vsel %vm63_vm1, %v878_v46, 0.0 }
 0x4ca   :  { %881 = vadd.xlane.f32.xlu2 %v880_v8  ;;  %953 = vmatpush.msra.mxu2 %v6003_v0  ;;  %v713_v8 = vadd.f32 %v712_v45, %v7014_v22  ;;  %v6044_v45 = vld [vmem:[%s8816_s1 + $0x1a0] sm:$0xff] }
 0x4cc   :  { %954 = vmatpush.msra.mxu2 %v6002_v2 }
 0x52d   :  { %v811_v51 = vpop.xlane.xlu0 %810 }
 0x52e   :  { %v812_v53 = vsub.f32 %v806_v24, %v811_v51 }
 0x530   :  { %v813_v55 = vmul.f32 1.442695, %v812_v53 }
 0x532   :  { %6486 = vpow2.f32 %v813_v55 }
 0x538   :  { %v6487_v59 = vpop.eup %6486 }
 0x539   :  { %v815_v61 = vsel %vm315_vm2, %v6487_v59, 0.0 }
 0x53a   :  { %816 = vadd.xlane.f32.xlu0 %v815_v61 }
 0x53b   :  { %v865_v1 = vpop.xlane.xlu1 %864 }
 0x53c   :  { %v876_v5 = vmul.f32 %v7036_v63, %v865_v1 }
 0x53d   :  { %v882_v9 = vpop.xlane.xlu2 %881 }
 0x53e   :  { %v888_v10 = vmul.f32 %v876_v5, %v876_v5  ;;  %v886_v11 = vmul.f32 %v882_v9, %v7036_v63  ;;  %v892_v15 = vsub.f32 %v861_v6, %v876_v5 }
 0x540   :  { %v890_v12 = vsub.f32 %v886_v11, %v888_v10 }
 0x542   :  { %v894_v13 = vadd.f32 1e-05, %v890_v12 }
 0x544   :  { %6488 = vrsqrt.f32 %v894_v13  ;;  %vm902_vm5 = vweird.f32 %v894_v13 }
 0x546   :  { %v782_v46 = vpop.f32.mrf.mxu3 }
 0x547   :  { %v785_v47 = vadd.f32 %v782_v46, %v713_v8  ;;  %v6050_v8 = vld [vmem:[%s8816_s1 + $0x1c0] sm:$0xff] }
 0x54a   :  { %v6489_v49 = vpop.eup %6488 }
 0x54b   :  { %v897_v56 = vmul.f32 %v6489_v49, %v894_v13  ;;  %vm903_vm4 = vweird.f32 %v6489_v49 }
 0x54c   :  { %vm904_vm6 = vmor %vm902_vm5, %vm903_vm4 }
 0x54d   :  { %v898_v14 = vmul.f32 %v6489_v49, %v897_v56 }
 0x54f   :  { %v899_v42 = vmul.f32 0.5, %v898_v14 }
 0x551   :  { %v900_v44 = vsub.f32 1.5, %v899_v42 }
 0x553   :  { %v901_v54 = vmul.f32 %v6489_v49, %v900_v44 }
 0x555   :  { %v905_v18 = vsel %vm904_vm6, %v6489_v49, %v901_v54 }
 0x556   :  { %v916_v19 = vmul.f32 %v905_v18, %v892_v15  ;;  %v6017_v15 = vld [vmem:[%s8816_s1 + $0x118] sm:$0xff] }
 0x557   :  { %v6023_v18 = vld [vmem:[%s8816_s1 + $0x138] sm:$0xff]  ;;  %1083 = vmatpush.msra.mxu0 %v6017_v15 }
 0x558   :  { %v920_v20 = vmul.f32 %v7049_v16, %v916_v19  ;;  %v6029_v19 = vld [vmem:[%s8816_s1 + $0x158] sm:$0xff]  ;;  %1112 = vmatpush.msrb.mxu1 %v6023_v18 }
 0x559   :  { %1141 = vmatpush.msrb.mxu2 %v6029_v19  ;;  %v6059_v19 = vld [vmem:[%s8816_s1 + $0x1f8] sm:$0xff] }
 0x55a   :  { %v924_v21 = vadd.f32 %v7054_v4, %v920_v20  ;;  %1113 = vmatpush.msrb.mxu1 %v6022_v23  ;;  %v6057_v23 = vld [vmem:[%s8816_s1 + $0x1e8] sm:$0xff] }
 0x55c   :  { %6006 = vmatmul.msk.f32.vlgmr.msra.gmra.mxu2 %vm63_vm1, %v924_v21 }
 0x5ad   :  { %v817_v7 = vpop.xlane.xlu0 %816 }
 0x5ae   :  { %6490 = vrcp.f32 %v817_v7  ;;  %v829_v26 = vand.u32 2147483648, %v817_v7  ;;  %v827_v17 = vand.u32 2147483647, %v817_v7  ;;  %vm823_vm8 = vweird.f32 %v817_v7 }
 0x5b0   :  { %v830_v3 = vor.u32 1.1754944e-38, %v829_v26  ;;  %vm828_vm10 = vcmp.eq.f32.partialorder %v827_v17, 8.507059e+37  ;;  %v6020_v26 = vld [vmem:[%s8816_s1 + $0x120] sm:$0xff]  ;;  %v6041_v17 = vld [vmem:[%s8816_s1 + $0x198] sm:$0xff] }
 0x5b4   :  { %v6491_v62 = vpop.eup %6490 }
 0x5b5   :  { %v819_v24 = vmul.f32 %v6491_v62, %v817_v7  ;;  %vm824_vm7 = vweird.f32 %v6491_v62  ;;  %v6028_v7 = vld [vmem:[%s8816_s1 + $0x150] sm:$0xff] }
 0x5b6   :  { %vm825_vm9 = vmor %vm823_vm8, %vm824_vm7  ;;  %1142 = vmatpush.msrb.mxu2 %v6028_v7 }
 0x5b7   :  { %v820_v25 = vsub.f32 1.0, %v819_v24  ;;  %v6021_v24 = vld [vmem:[%s8816_s1 + $0x128] sm:$0xff] }
 0x5b8   :  { %1114 = vmatpush.msrb.mxu1 %v6021_v24 }
 0x5b9   :  { %v821_v27 = vmul.f32 %v6491_v62, %v820_v25  ;;  %v6027_v25 = vld [vmem:[%s8816_s1 + $0x148] sm:$0xff] }
 0x5ba   :  { %1143 = vmatpush.msrb.mxu2 %v6027_v25  ;;  %1115 = vmatpush.msrb.mxu1 %v6020_v26 }
 0x5bb   :  { %v822_v28 = vadd.f32 %v6491_v62, %v821_v27  ;;  %v6026_v27 = vld [vmem:[%s8816_s1 + $0x140] sm:$0xff] }
 0x5bc   :  { %1144 = vmatpush.msrb.mxu2 %v6026_v27 }
 0x5bd   :  { %v826_v29 = vsel %vm825_vm9, %v6491_v62, %v822_v28  ;;  %v6047_v28 = vld [vmem:[%s8816_s1 + $0x1b8] sm:$0xff] }
 0x5be   :  { %v831_v30 = vsel %vm828_vm10, %v830_v3, %v826_v29  ;;  %v6053_v3 = vld [vmem:[%s8816_s1 + $0x1d8] sm:$0xff]  ;;  %v6040_v29 = vld [vmem:[%s8816_s1 + $0x190] sm:$0xff] }
 0x5bf   :  { %v832_v31 = vmul.f32 %v6487_v59, %v831_v30  ;;  %v6046_v30 = vld [vmem:[%s8816_s1 + $0x1b0] sm:$0xff]  ;;  %1254 = vmatpush.msra.mxu2 %v6053_v3 }
 0x5c1   :  { %6001 = vmatmul.msk.f32.vlgmr.msra.gmra.mxu1 %vm315_vm2, %v832_v31  ;;  %v6052_v31 = vld [vmem:[%s8816_s1 + $0x1d0] sm:$0xff] }
 0x5c2   :  { %1226 = vmatpush.msra.mxu1 %v6047_v28  ;;  %1255 = vmatpush.msra.mxu2 %v6052_v31 }
 0x5c4   :  { %1227 = vmatpush.msra.mxu1 %v6046_v30 }
 0x5c6   :  { %1228 = vmatpush.msra.mxu1 %v6045_v34 }
 0x5c8   :  { %1229 = vmatpush.msra.mxu1 %v6044_v45 }
 0x5df   :  { %v956_v39 = vpop.f32.mrf.mxu2 }
 0x5e0   :  { %v957_v43 = vadd.f32 %v7075_v36, %v956_v39  ;;  %v6051_v39 = vld [vmem:[%s8816_s1 + $0x1c8] sm:$0xff] }
 0x5e1   :  { %1256 = vmatpush.msra.mxu2 %v6051_v39 }
 0x5e2   :  { %v962_v6 = vmax.f32 %v957_v43, 0.0 }
 0x5e3   :  { %1257 = vmatpush.msra.mxu2 %v6050_v8 }
 0x5e4   :  { %6012 = vmatmul.msk.f32.vlgmr.msra.gmra.mxu3 %vm63_vm1, %v962_v6  ;;  %v6038_v6 = vld [vmem:[%s8816_s1 + $0x180] sm:$0xff] }
 0x63e   :  { %v853_v48 = vpop.f32.mrf.mxu1 }
 0x63f   :  { %v856_v50 = vadd.f32 %v853_v48, %v785_v47 }
 0x641   :  { %v860_v51 = vadd.f32 %v7022_v33, %v856_v50 }
 0x643   :  { %v862_v52 = vadd.f32 %v860_v51, %v6884_v41 }
 0x645   :  { %v866_v53 = vsel %vm63_vm1, %v862_v52, 0.0  ;;  %v879_v55 = vmul.f32 %v862_v52, %v862_v52 }
 0x646   :  { %867 = vadd.xlane.f32.xlu0 %v866_v53 }
 0x647   :  { %v883_v57 = vsel %vm63_vm1, %v879_v55, 0.0 }
 0x648   :  { %884 = vadd.xlane.f32.xlu1 %v883_v57 }
 0x667   :  { %v994_v22 = vpop.f32.mrf.mxu3 }
 0x668   :  { %v995_v38 = vadd.f32 %v7087_v58, %v994_v22 }
 0x66a   :  { %v7090_v59 = vadd.f32 %v995_v38, %v924_v21  ;;  %v6016_v21 = vld [vmem:[%s8816_s1 + $0x110] sm:$0xff] }
 0x66b   :  { %1084 = vmatpush.msra.mxu0 %v6016_v21 }
 0x66c   :  { %v1002_v41 = vsel %vm63_vm1, %v7090_v59, 0.0  ;;  %v1010_v33 = vmul.f32 %v7090_v59, %v7090_v59 }
 0x66d   :  { %1003 = vadd.xlane.f32.xlu2 %v1002_v41 }
 0x66e   :  { %v1012_v60 = vsel %vm63_vm1, %v1010_v33, 0.0  ;;  %v6422_v33 = vld [vmem:[%s8817_s2 + $0x59] ss:$0 sm:$0xff] }
 0x66f   :  { %1013 = vadd.xlane.f32.xlu0 %v1012_v60 }
 0x6b9   :  { %v868_v61 = vpop.xlane.xlu0 %867 }
 0x6ba   :  { %v877_v0 = vmul.f32 %v7036_v63, %v868_v61  ;;  %v6423_v61 = vld [vmem:[%s8817_s2 + $0x5a] ss:$0 sm:$0xff] }
 0x6bb   :  { %v885_v1 = vpop.xlane.xlu1 %884 }
 0x6bc   :  { %v889_v2 = vmul.f32 %v877_v0, %v877_v0  ;;  %v887_v5 = vmul.f32 %v885_v1, %v7036_v63  ;;  %v893_v42 = vsub.f32 %v862_v52, %v877_v0 }
 0x6be   :  { %v891_v9 = vsub.f32 %v887_v5, %v889_v2  ;;  %v6034_v5 = vld [vmem:[%s8816_s1 + $0x170] sm:$0xff] }
 0x6c0   :  { %v895_v10 = vadd.f32 1e-05, %v891_v9  ;;  %v6033_v9 = vld [vmem:[%s8816_s1 + $0x168] sm:$0xff] }
 0x6c2   :  { %6492 = vrsqrt.f32 %v895_v10  ;;  %vm912_vm12 = vweird.f32 %v895_v10 }
 0x6c8   :  { %v6493_v11 = vpop.eup %6492 }
 0x6c9   :  { %v907_v12 = vmul.f32 %v6493_v11, %v895_v10  ;;  %vm913_vm11 = vweird.f32 %v6493_v11  ;;  %v6032_v10 = vld [vmem:[%s8816_s1 + $0x160] sm:$0xff] }
 0x6ca   :  { %vm914_vm13 = vmor %vm912_vm12, %vm913_vm11 }
 0x6cb   :  { %v908_v13 = vmul.f32 %v6493_v11, %v907_v12 }
 0x6cd   :  { %v909_v49 = vmul.f32 0.5, %v908_v13 }
 0x6cf   :  { %v910_v56 = vsub.f32 1.5, %v909_v49 }
 0x6d1   :  { %v911_v14 = vmul.f32 %v6493_v11, %v910_v56 }
 0x6d3   :  { %v915_v44 = vsel %vm914_vm13, %v6493_v11, %v911_v14 }
 0x6d4   :  { %v917_v54 = vmul.f32 %v915_v44, %v893_v42 }
 0x6d6   :  { %v921_v20 = vmul.f32 %v7049_v16, %v917_v54  ;;  %v6015_v16 = vld [vmem:[%s8816_s1 + $0x108] sm:$0xff] }
 0x6d7   :  { %1085 = vmatpush.msra.mxu0 %v6015_v16 }
 0x6d8   :  { %v7119_v62 = vadd.f32 %v7054_v4, %v921_v20  ;;  %v6014_v4 = vld [vmem:[%s8816_s1 + $0x100] sm:$0xff] }
 0x6d9   :  { %1086 = vmatpush.msra.mxu0 %v6014_v4 }
 0x6da   :  { %6007 = vmatmul.msk.f32.gmra.mxu2 %vm63_vm1, %v7119_v62 }
 0x6db   :  { %1198 = vmatpush.msrb.mxu0 %v6041_v17 }
 0x6dd   :  { %1199 = vmatpush.msrb.mxu0 %v6040_v29 }
 0x6df   :  { %1200 = vmatpush.msrb.mxu0 %v6039_v32  ;;  %v7257_v32 = vld [vmem:[%s8817_s2 + $0x36] sm:$0xf] }
 0x6e0   :  { %v1004_v35 = vpop.xlane.xlu2 %1003  ;;  %v1064_v34 = vperm.slane %v7257_v32, 0 }
 0x6e1   :  { %v1008_v43 = vmul.f32 %v1004_v35, %v7036_v63  ;;  %1201 = vmatpush.msrb.mxu0 %v6038_v6  ;;  %v1099_v35 = vperm.slane %v7257_v32, 1  ;;  %v1128_v6 = vperm.slane %v7257_v32, 2 }
 0x6e2   :  { %v1014_v46 = vpop.xlane.xlu0 %1013 }
 0x6e3   :  { %v1020_v47 = vmul.f32 %v1008_v43, %v1008_v43  ;;  %v1018_v48 = vmul.f32 %v1014_v46, %v7036_v63  ;;  %v1024_v41 = vsub.f32 %v7090_v59, %v1008_v43  ;;  %v6035_v59 = vld [vmem:[%s8816_s1 + $0x178] sm:$0xff] }
 0x6e4   :  { %1170 = vmatpush.msrb.mxu3 %v6035_v59 }
 0x6e5   :  { %v1022_v50 = vsub.f32 %v1018_v48, %v1020_v47 }
 0x6e6   :  { %1171 = vmatpush.msrb.mxu3 %v6034_v5 }
 0x6e7   :  { %v1026_v51 = vadd.f32 1e-05, %v1022_v50 }
 0x6e8   :  { %1172 = vmatpush.msrb.mxu3 %v6033_v9 }
 0x6e9   :  { %6494 = vrsqrt.f32 %v1026_v51  ;;  %vm1034_vm15 = vweird.f32 %v1026_v51 }
 0x6ea   :  { %1173 = vmatpush.msrb.mxu3 %v6032_v10 }
 0x6ec   :  { %1282 = vmatpush.msra.mxu3 %v6059_v19 }
 0x6ef   :  { %v6495_v52 = vpop.eup %6494 }
 0x6f0   :  { %v1029_v53 = vmul.f32 %v6495_v52, %v1026_v51  ;;  %vm1035_vm14 = vweird.f32 %v6495_v52 }
 0x6f1   :  { %vm1036_vm0 = vmor %vm1034_vm15, %vm1035_vm14 }
 0x6f2   :  { %v1030_v55 = vmul.f32 %v6495_v52, %v1029_v53 }
 0x6f4   :  { %v1031_v57 = vmul.f32 0.5, %v1030_v55 }
 0x6f6   :  { %v1032_v22 = vsub.f32 1.5, %v1031_v57 }
 0x6f8   :  { %v1033_v38 = vmul.f32 %v6495_v52, %v1032_v22 }
 0x6fa   :  { %v1037_v60 = vsel %vm1036_vm0, %v6495_v52, %v1033_v38 }
 0x6fb   :  { %v1048_v0 = vmul.f32 %v1037_v60, %v1024_v41 }
 0x6fd   :  { %v1052_v1 = vmul.f32 %v6422_v33, %v1048_v0 }
 0x6ff   :  { %v7186_v2 = vadd.f32 %v6423_v61, %v1052_v1 }
 0x701   :  { %6018 = vmatmul.msk.f32.vlgmr.msra.gmra.mxu0 %vm63_vm1, %v7186_v2  ;;  %6024 = vmatmul.msk.f32.vlgmr.msrb.gmra.mxu1 %vm63_vm1, %v7186_v2 }
 0x702   :  { %6030 = vmatmul.msk.f32.vlgmr.msrb.gmra.mxu2 %vm63_vm1, %v7186_v2  ;;  %6062 = vmatpush.xpose.msk.msra.mxu0 %vm63_vm1, %v7186_v2 }
 0x703   :  { %6064 = vmatpush.xpose.msk.msrb.mxu1 %vm63_vm1, %v7186_v2  ;;  %6068 = vmatpush.xpose.msk.msrb.mxu2 %vm63_vm1, %v7186_v2 }
 0x75d   :  { %v959_v11 = vpop.f32.mrf.mxu2 }
 0x75e   :  { %v960_v12 = vadd.f32 %v7075_v36, %v959_v11 }
 0x760   :  { %v963_v13 = vmax.f32 %v960_v12, 0.0 }
 0x762   :  { %6013 = vmatmul.msk.f32.gmra.mxu3 %vm63_vm1, %v963_v13 }
 0x76a   :  { %6036 = vmatmul.msk.f32.vlgmr.msrb.gmra.mxu3 %vm63_vm1, %v7186_v2 }
 0x77e   :  { %v1088_v39 = vpop.f32.mrf.mxu0  ;;  %v1117_v43 = vpop.f32.mrf.mxu1 }
 0x77f   :  { %v1089_v46 = vadd.f32 %v1088_v39, %v1064_v34  ;;  %v1118_v8 = vadd.f32 %v1117_v43, %v1099_v35 }
 0x785   :  { %v1146_v45 = vpop.f32.mrf.mxu2 }
 0x786   :  { %v1147_v47 = vadd.f32 %v1146_v45, %v1128_v6 }
 0x7e5   :  { %v997_v49 = vpop.f32.mrf.mxu3 }
 0x7e6   :  { %v998_v56 = vadd.f32 %v7087_v58, %v997_v49  ;;  %v6058_v58 = vld [vmem:[%s8816_s1 + $0x1f0] sm:$0xff] }
 0x7e7   :  { %1283 = vmatpush.msra.mxu3 %v6058_v58 }
 0x7e8   :  { %v1001_v14 = vadd.f32 %v998_v56, %v7119_v62  ;;  %v6056_v62 = vld [vmem:[%s8816_s1 + $0x1e0] sm:$0xff] }
 0x7e9   :  { %1284 = vmatpush.msra.mxu3 %v6057_v23 }
 0x7ea   :  { %v1005_v42 = vsel %vm63_vm1, %v1001_v14, 0.0  ;;  %v1011_v44 = vmul.f32 %v1001_v14, %v1001_v14 }
 0x7eb   :  { %1006 = vadd.xlane.f32.xlu1 %v1005_v42  ;;  %1285 = vmatpush.msra.mxu3 %v6056_v62 }
 0x7ec   :  { %v1015_v54 = vsel %vm63_vm1, %v1011_v44, 0.0 }
 0x7ed   :  { %1016 = vadd.xlane.f32.xlu2 %v1015_v54  ;;  %v7277_v48 = vpop.f32.mrf.mxu3 }
 0x85e   :  { %v1007_v15 = vpop.xlane.xlu1 %1006 }
 0x85f   :  { %v1009_v36 = vmul.f32 %v1007_v15, %v7036_v63 }
 0x860   :  { %v1017_v18 = vpop.xlane.xlu2 %1016 }
 0x861   :  { %v1021_v20 = vmul.f32 %v1009_v36, %v1009_v36  ;;  %v1019_v21 = vmul.f32 %v1017_v18, %v7036_v63  ;;  %v1025_v28 = vsub.f32 %v1001_v14, %v1009_v36 }
 0x863   :  { %v1023_v7 = vsub.f32 %v1019_v21, %v1021_v20 }
 0x865   :  { %v1027_v16 = vadd.f32 1e-05, %v1023_v7 }
 0x867   :  { %6496 = vrsqrt.f32 %v1027_v16  ;;  %vm1044_vm4 = vweird.f32 %v1027_v16 }
 0x86d   :  { %v6497_v24 = vpop.eup %6496 }
 0x86e   :  { %v1039_v25 = vmul.f32 %v6497_v24, %v1027_v16  ;;  %vm1045_vm3 = vweird.f32 %v6497_v24 }
 0x86f   :  { %vm1046_vm5 = vmor %vm1044_vm4, %vm1045_vm3 }
 0x870   :  { %v1040_v4 = vmul.f32 %v6497_v24, %v1039_v25 }
 0x872   :  { %v1041_v26 = vmul.f32 0.5, %v1040_v4 }
 0x874   :  { %v1042_v27 = vsub.f32 1.5, %v1041_v26 }
 0x876   :  { %v1043_v17 = vmul.f32 %v6497_v24, %v1042_v27 }
 0x878   :  { %v1047_v3 = vsel %vm1046_vm5, %v6497_v24, %v1043_v17 }
 0x879   :  { %v1049_v29 = vmul.f32 %v1047_v3, %v1025_v28 }
 0x87b   :  { %v1053_v30 = vmul.f32 %v6422_v33, %v1049_v29 }
 0x87d   :  { %v7234_v31 = vadd.f32 %v6423_v61, %v1053_v30 }
 0x87f   :  { %6019 = vmatmul.msk.f32.gmra.mxu0 %vm63_vm1, %v7234_v31  ;;  %6025 = vmatmul.msk.f32.gmra.mxu1 %vm63_vm1, %v7234_v31 }
 0x880   :  { %6031 = vmatmul.msk.f32.gmra.mxu2 %vm63_vm1, %v7234_v31  ;;  %6037 = vmatmul.msk.f32.gmra.mxu3 %vm63_vm1, %v7234_v31 }
 0x887   :  { %6042 = vmatmul.msk.f32.vlgmr.msrb.gmra.mxu0 %vm63_vm1, %v7186_v2  ;;  %6048 = vmatmul.msk.f32.vlgmr.msra.gmra.mxu1 %vm63_vm1, %v7186_v2 }
 0x888   :  { %6054 = vmatmul.msk.f32.vlgmr.msra.gmra.mxu2 %vm63_vm1, %v7186_v2  ;;  %6060 = vmatmul.msk.f32.vlgmr.msra.gmra.mxu3 %vm63_vm1, %v7186_v2 }
 0x889   :  { %6074 = vmatpush.xpose.msk.msra.mxu2 %vm63_vm1, %v7234_v31 }
 0x88f   :  { %6043 = vmatmul.msk.f32.gmra.mxu0 %vm63_vm1, %v7234_v31  ;;  %6049 = vmatmul.msk.f32.gmra.mxu1 %vm63_vm1, %v7234_v31 }
 0x890   :  { %6055 = vmatmul.msk.f32.gmra.mxu2 %vm63_vm1, %v7234_v31  ;;  %6061 = vmatmul.msk.f32.gmra.mxu3 %vm63_vm1, %v7234_v31 }
 0x897   :  { %6063 = vmatmul.msk.f32.vlgmr.msra.gmra.mxu0 %vm63_vm1, %v1089_v46  ;;  %6065 = vmatmul.msk.f32.vlgmr.msrb.gmra.mxu1 %vm63_vm1, %v1118_v8 }
 0x898   :  { %6069 = vmatmul.msk.f32.vlgmr.msrb.gmra.mxu2 %vm63_vm1, %v1147_v47 }
 0x899   :  { %6080 = vmatpush.xpose.msk.msrb.mxu2 %vm63_vm1, %v7234_v31 }
 0x8fc   :  { %v1091_v50 = vpop.f32.mrf.mxu0  ;;  %v7279_v51 = vpop.f32.mrf.mxu1 }
 0x8fd   :  { %v1092_v52 = vadd.f32 %v1091_v50, %v1064_v34  ;;  %v1121_v39 = vadd.f32 %v7279_v51, %v1099_v35 }
 0x8ff   :  { %6075 = vmatmul.msk.f32.vlgmr.msra.gmra.mxu2 %vm63_vm1, %v1092_v52 }
 0x903   :  { %v1149_v53 = vpop.f32.mrf.mxu2  ;;  %v7282_v55 = vpop.f32.mrf.mxu3 }
 0x904   :  { %v1203_v57 = vpop.f32.mrf.mxu0  ;;  %v1231_v22 = vpop.f32.mrf.mxu1  ;;  %v1150_v38 = vadd.f32 %v1149_v53, %v1128_v6  ;;  %v1157_v6 = vperm.slane %v7257_v32, 3  ;;  %v6124_v32 = vld [vmem:[%s8816_s1 + $0x290] sm:$0xff] }
 0x905   :  { %1405 = vmatpush.msrb.mxu0 %v1231_v22  ;;  %1428 = vmatpush.msra.mxu1 %v1203_v57 }
 0x906   :  { %v1176_v45 = vadd.f32 %v7277_v48, %v1157_v6 }
 0x907   :  { %6071 = vmatpush.xpose.msk.msra.mxu0 %vm63_vm1, %v7186_v2  ;;  %6081 = vmatmul.msk.f32.vlgmr.msrb.gmra.mxu2 %vm63_vm1, %v1150_v38 }
 0x90b   :  { %v1259_v41 = vpop.f32.mrf.mxu2  ;;  %v1287_v33 = vpop.f32.mrf.mxu3 }
 0x90c   :  { %1498 = vmatpush.msrb.mxu3 %v1259_v41  ;;  %1569 = vmatpush.msrb.mxu1 %v1287_v33  ;;  %v1234_v60 = vpop.f32.mrf.mxu1  ;;  %v7306_v46 = vpop.f32.mrf.mxu0 }
 0x90e   :  { %6076 = vmatpush.xpose.msk.msra.mxu3 %vm63_vm1, %v7234_v31 }
 0x913   :  { %v1262_v61 = vpop.f32.mrf.mxu2  ;;  %v7308_v35 = vpop.f32.mrf.mxu3 }
 0x914   :  { %v1360_v0 = vpop.f32.mrf.mxu1  ;;  %v1313_v8 = vpop.f32.mrf.mxu0 }
 0x915   :  { %v1363_v1 = vsel %vm315_vm2, %v1360_v0, -inf  ;;  %v1316_v22 = vsel %vm315_vm2, %v1313_v8, -inf }
 0x916   :  { %1364 = vmax.xlane.f32.xlu2 %v1363_v1 }
 0x91b   :  { %v1453_v59 = vpop.f32.mrf.mxu2 }
 0x91c   :  { %v1456_v5 = vsel %vm315_vm2, %v1453_v59, -inf }
 0x91d   :  { %1457 = vmax.xlane.f32.xlu0 %v1456_v5 }
 0x982   :  { %v7316_v57 = vpop.f32.mrf.mxu2 }
 0x989   :  { %v1365_v9 = vpop.xlane.xlu2 %1364 }
 0x98a   :  { %v1366_v12 = vsub.f32 %v1360_v0, %v1365_v9  ;;  %v1735_v38 = vpop.f32.mrf.mxu2 }
 0x98b   :  { %v1738_v41 = vsel %vm315_vm2, %v1735_v38, -inf }
 0x98c   :  { %v1367_v49 = vmul.f32 1.442695, %v1366_v12 }
 0x990   :  { %v1458_v10 = vpop.xlane.xlu0 %1457 }
 0x991   :  { %v1459_v11 = vsub.f32 %v1453_v59, %v1458_v10 }
 0x993   :  { %v1460_v13 = vmul.f32 1.442695, %v1459_v11 }
 0x995   :  { %6498 = vpow2.f32 %v1460_v13 }
 0x996   :  { %6500 = vpow2.f32 %v1367_v49 }
 0x99b   :  { %v6499_v56 = vpop.eup %6498 }
 0x99c   :  { %v1462_v14 = vsel %vm315_vm2, %v6499_v56, 0.0  ;;  %v6501_v42 = vpop.eup %6500 }
 0x99d   :  { %1463 = vadd.xlane.f32.xlu1 %v1462_v14  ;;  %v1369_v44 = vsel %vm315_vm2, %v6501_v42, 0.0 }
 0x9a5   :  { %1370 = vadd.xlane.f32.xlu1 %v1369_v44 }
 0xa10   :  { %v1464_v54 = vpop.xlane.xlu1 %1463 }
 0xa11   :  { %6502 = vrcp.f32 %v1464_v54  ;;  %v1476_v58 = vand.u32 2147483648, %v1464_v54  ;;  %v1474_v21 = vand.u32 2147483647, %v1464_v54  ;;  %vm1470_vm7 = vweird.f32 %v1464_v54 }
 0xa13   :  { %v1477_v62 = vor.u32 1.1754944e-38, %v1476_v58  ;;  %vm1475_vm9 = vcmp.eq.f32.partialorder %v1474_v21, 8.507059e+37 }
 0xa17   :  { %v6503_v15 = vpop.eup %6502 }
 0xa18   :  { %v1466_v36 = vmul.f32 %v6503_v15, %v1464_v54  ;;  %v1371_v18 = vpop.xlane.xlu1 %1370  ;;  %vm1471_vm6 = vweird.f32 %v6503_v15 }
 0xa19   :  { %6504 = vrcp.f32 %v1371_v18  ;;  %vm1472_vm8 = vmor %vm1470_vm7, %vm1471_vm6  ;;  %v1383_v27 = vand.u32 2147483648, %v1371_v18  ;;  %v1381_v28 = vand.u32 2147483647, %v1371_v18  ;;  %vm1377_vm11 = vweird.f32 %v1371_v18 }
 0xa1a   :  { %v1467_v19 = vsub.f32 1.0, %v1466_v36 }
 0xa1b   :  { %v1384_v29 = vor.u32 1.1754944e-38, %v1383_v27  ;;  %vm1382_vm13 = vcmp.eq.f32.partialorder %v1381_v28, 8.507059e+37 }
 0xa1c   :  { %v1468_v20 = vmul.f32 %v6503_v15, %v1467_v19 }
 0xa1e   :  { %v1469_v23 = vadd.f32 %v6503_v15, %v1468_v20 }
 0xa1f   :  { %v6505_v7 = vpop.eup %6504 }
 0xa20   :  { %v1473_v16 = vsel %vm1472_vm8, %v6503_v15, %v1469_v23  ;;  %v1373_v24 = vmul.f32 %v6505_v7, %v1371_v18  ;;  %vm1378_vm10 = vweird.f32 %v6505_v7 }
 0xa21   :  { %v1478_v25 = vsel %vm1475_vm9, %v1477_v62, %v1473_v16  ;;  %vm1379_vm12 = vmor %vm1377_vm11, %vm1378_vm10 }
 0xa22   :  { %v1374_v4 = vsub.f32 1.0, %v1373_v24  ;;  %v1479_v26 = vmul.f32 %v6499_v56, %v1478_v25 }
 0xa24   :  { %v1375_v17 = vmul.f32 %v6505_v7, %v1374_v4  ;;  %6070 = vmatmul.msk.f32.vlgmr.msrb.gmra.mxu3 %vm315_vm2, %v1479_v26 }
 0xa25   :  { %1780 = vmatpush.msrb.mxu3 %v1262_v61 }
 0xa26   :  { %v1376_v3 = vadd.f32 %v6505_v7, %v1375_v17 }
 0xa28   :  { %v1380_v30 = vsel %vm1379_vm12, %v6505_v7, %v1376_v3 }
 0xa29   :  { %v1385_v34 = vsel %vm1382_vm13, %v1384_v29, %v1380_v30  ;;  %v6101_v29 = vld [vmem:[%s8816_s1 + $0x218] sm:$0xff] }
 0xa2a   :  { %v1386_v43 = vmul.f32 %v6501_v42, %v1385_v34  ;;  %v1598_v42 = vsel %vm315_vm2, %v7316_v57, -inf  ;;  %v6100_v34 = vld [vmem:[%s8816_s1 + $0x210] sm:$0xff] }
 0xa2c   :  { %6066 = vmatmul.msk.f32.vlgmr.msrb.gmra.mxu0 %vm315_vm2, %v1386_v43  ;;  %6077 = vmatmul.msk.f32.vlgmr.msra.gmra.mxu3 %vm63_vm1, %v1121_v39  ;;  %v6099_v39 = vld [vmem:[%s8816_s1 + $0x208] sm:$0xff] }
 0xa2d   :  { %1687 = vmatpush.msrb.mxu0 %v1234_v60 }
 0xa34   :  { %6072 = vmatmul.msk.f32.vlgmr.msra.gmra.mxu0 %vm63_vm1, %v1176_v45 }
 0xa35   :  { %6083 = vmatpush.xpose.msk.msra.mxu0 %vm63_vm1, %v7234_v31 }
 0xaa7   :  { %v7310_v47 = vpop.f32.mrf.mxu3 }
 0xaa9   :  { %v7312_v50 = vpop.f32.mrf.mxu0 }
 0xaaf   :  { %v1642_v51 = vpop.f32.mrf.mxu3 }
 0xab0   :  { %v1645_v52 = vsel %vm315_vm2, %v1642_v51, -inf }
 0xab1   :  { %1646 = vmax.xlane.f32.xlu0 %v1645_v52  ;;  %v1524_v53 = vpop.f32.mrf.mxu0  ;;  %v6098_v52 = vld [vmem:[%s8816_s1 + $0x200] sm:$0xff] }
 0xab2   :  { %v1527_v48 = vsel %vm315_vm2, %v1524_v53, -inf }
 0xab3   :  { %1528 = vmax.xlane.f32.xlu1 %v1527_v48 }
 0xab9   :  { %1317 = vmax.xlane.f32.xlu0 %v1316_v22  ;;  %v6125_v22 = vld [vmem:[%s8816_s1 + $0x298] sm:$0xff] }
 0xac1   :  { %1739 = vmax.xlane.f32.xlu0 %v1738_v41 }
 0xb24   :  { %v1647_v33 = vpop.xlane.xlu0 %1646 }
 0xb25   :  { %v1648_v60 = vsub.f32 %v1642_v51, %v1647_v33 }
 0xb26   :  { %v1529_v61 = vpop.xlane.xlu1 %1528 }
 0xb27   :  { %v1649_v0 = vmul.f32 1.442695, %v1648_v60  ;;  %v1530_v1 = vsub.f32 %v1524_v53, %v1529_v61  ;;  %v1179_v53 = vadd.f32 %v7282_v55, %v1157_v6  ;;  %v53_v55 = vld [vmem:[%s8817_s2 + $0x10] sm:$0xff]  ;;  %v6123_v61 = vld [vmem:[%s8816_s1 + $0x288] sm:$0xff] }
 0xb29   :  { %6506 = vpow2.f32 %v1649_v0  ;;  %v1531_v59 = vmul.f32 1.442695, %v1530_v1 }
 0xb2b   :  { %6508 = vpow2.f32 %v1531_v59 }
 0xb2c   :  { %v1318_v5 = vpop.xlane.xlu0 %1317 }
 0xb2d   :  { %v1319_v10 = vsub.f32 %v1313_v8, %v1318_v5 }
 0xb2f   :  { %v6507_v9 = vpop.eup %6506  ;;  %v1320_v49 = vmul.f32 1.442695, %v1319_v10  ;;  %v6122_v10 = vld [vmem:[%s8816_s1 + $0x280] sm:$0xff] }
 0xb30   :  { %v1651_v11 = vsel %vm315_vm2, %v6507_v9, 0.0 }
 0xb31   :  { %v7321_v12 = vpop.eup %6508  ;;  %1652 = vadd.xlane.f32.xlu2 %v1651_v11  ;;  %6510 = vpow2.f32 %v1320_v49  ;;  %v7380_v11 = vadd.f32 %v53_v55, %v6859_v37 }
 0xb32   :  { %v1533_v13 = vsel %vm315_vm2, %v7321_v12, 0.0 }
 0xb33   :  { %1534 = vadd.xlane.f32.xlu0 %v1533_v13 }
 0xb34   :  { %v1740_v56 = vpop.xlane.xlu0 %1739 }
 0xb35   :  { %v1741_v14 = vsub.f32 %v1735_v38, %v1740_v56 }
 0xb37   :  { %v1742_v44 = vmul.f32 1.442695, %v1741_v14  ;;  %v7327_v54 = vpop.eup %6510 }
 0xb38   :  { %v1322_v15 = vsel %vm315_vm2, %v7327_v54, 0.0 }
 0xb39   :  { %1599 = vmax.xlane.f32.xlu2 %v1598_v42  ;;  %6512 = vpow2.f32 %v1742_v44 }
 0xb3f   :  { %v7331_v36 = vpop.eup %6512 }
 0xb40   :  { %v1744_v18 = vsel %vm315_vm2, %v7331_v36, 0.0 }
 0xb41   :  { %1323 = vadd.xlane.f32.xlu2 %v1322_v15 }
 0xb49   :  { %1745 = vadd.xlane.f32.xlu2 %v1744_v18 }
 0xba4   :  { %v1653_v19 = vpop.xlane.xlu2 %1652 }
 0xba5   :  { %6514 = vrcp.f32 %v1653_v19  ;;  %v1665_v62 = vand.u32 2147483648, %v1653_v19  ;;  %v1663_v24 = vand.u32 2147483647, %v1653_v19  ;;  %vm1659_vm15 = vweird.f32 %v1653_v19 }
 0xba6   :  { %v7335_v21 = vpop.xlane.xlu0 %1534 }
 0xba7   :  { %6516 = vrcp.f32 %v7335_v21  ;;  %v1666_v4 = vor.u32 1.1754944e-38, %v1665_v62  ;;  %vm1664_vm3 = vcmp.eq.f32.partialorder %v1663_v24, 8.507059e+37  ;;  %v1547_v13 = vand.u32 2147483648, %v7335_v21 }
 0xba8   :  { %vm1541_vm9 = vweird.f32 %v7335_v21  ;;  %v1545_v56 = vand.u32 2147483647, %v7335_v21 }
 0xbaa   :  { %vm1546_vm12 = vcmp.eq.f32.partialorder %v1545_v56, 8.507059e+37 }
 0xbab   :  { %v6515_v58 = vpop.eup %6514 }
 0xbac   :  { %v1655_v20 = vmul.f32 %v6515_v58, %v1653_v19  ;;  %v7337_v23 = vpop.xlane.xlu2 %1599  ;;  %vm1660_vm14 = vweird.f32 %v6515_v58 }
 0xbad   :  { %vm1661_vm0 = vmor %vm1659_vm15, %vm1660_vm14  ;;  %v7340_v17 = vpop.eup %6516 }
 0xbae   :  { %v1656_v7 = vsub.f32 1.0, %v1655_v20  ;;  %v1537_v30 = vmul.f32 %v7340_v17, %v7335_v21  ;;  %vm1542_vm6 = vweird.f32 %v7340_v17 }
 0xbaf   :  { %vm7388_vm10 = vmor %vm1541_vm9, %vm1542_vm6 }
 0xbb0   :  { %v1657_v16 = vmul.f32 %v6515_v58, %v1656_v7  ;;  %v1538_v45 = vsub.f32 1.0, %v1537_v30  ;;  %v54_v7 = vld [vmem:[%s8817_s2 + $0x18] sm:$0xff] }
 0xbb2   :  { %v1658_v25 = vadd.f32 %v6515_v58, %v1657_v16  ;;  %v1539_v41 = vmul.f32 %v7340_v17, %v1538_v45 }
 0xbb4   :  { %v1662_v26 = vsel %vm1661_vm0, %v6515_v58, %v1658_v25  ;;  %v1324_v27 = vpop.xlane.xlu2 %1323  ;;  %v1540_v59 = vadd.f32 %v7340_v17, %v1539_v41  ;;  %v7407_v25 = vadd.f32 %v54_v7, %v6881_v40 }
 0xbb5   :  { %v1667_v28 = vsel %vm1664_vm3, %v1666_v4, %v1662_v26  ;;  %6518 = vrcp.f32 %v1324_v27  ;;  %v1336_v38 = vand.u32 2147483648, %v1324_v27  ;;  %v1334_v60 = vand.u32 2147483647, %v1324_v27 }
 0xbb6   :  { %v1668_v3 = vmul.f32 %v6507_v9, %v1667_v28  ;;  %vm1330_vm5 = vweird.f32 %v1324_v27  ;;  %v1544_v37 = vsel %vm7388_vm10, %v7340_v17, %v1540_v59  ;;  %v6086_v59 = vld [vmem:[%s8816_s1 + $0x640] sm:$0xff] }
 0xbb7   :  { %v1337_v1 = vor.u32 1.1754944e-38, %v1336_v38  ;;  %vm1335_vm8 = vcmp.eq.f32.partialorder %v1334_v60, 8.507059e+37  ;;  %v6089_v60 = vld [vmem:[%s8816_s1 + $0x658] sm:$0xff] }
 0xbb8   :  { %6078 = vmatmul.msk.f32.vlgmr.msrb.gmra.mxu0 %vm315_vm2, %v1668_v3  ;;  %1944 = vmatpush.msra.mxu2 %v6089_v60  ;;  %v6092_v60 = vld [vmem:[%s8816_s1 + $0x660] sm:$0xff] }
 0xbb9   :  { %2132 = vmatpush.msrb.mxu0 %v6101_v29 }
 0xbbb   :  { %v6519_v43 = vpop.eup %6518  ;;  %2133 = vmatpush.msrb.mxu0 %v6100_v34  ;;  %v7438_v34 = vld [vmem:[%s8817_s2 + $0x3a] ss:$0 sm:$0xff] }
 0xbbc   :  { %v1326_v8 = vmul.f32 %v6519_v43, %v1324_v27  ;;  %v1746_v51 = vpop.xlane.xlu2 %1745  ;;  %vm1331_vm4 = vweird.f32 %v6519_v43 }
 0xbbd   :  { %6520 = vrcp.f32 %v1746_v51  ;;  %2134 = vmatpush.msrb.mxu0 %v6099_v39  ;;  %vm1332_vm7 = vmor %vm1330_vm5, %vm1331_vm4  ;;  %v1758_v15 = vand.u32 2147483648, %v1746_v51  ;;  %v1756_v19 = vand.u32 2147483647, %v1746_v51  ;;  %vm1752_vm13 = vweird.f32 %v1746_v51 }
 0xbbe   :  { %v1327_v48 = vsub.f32 1.0, %v1326_v8 }
 0xbbf   :  { %2135 = vmatpush.msrb.mxu0 %v6098_v52  ;;  %v1759_v21 = vor.u32 1.1754944e-38, %v1758_v15  ;;  %vm1757_vm15 = vcmp.eq.f32.partialorder %v1756_v19, 8.507059e+37 }
 0xbc0   :  { %v1328_v33 = vmul.f32 %v6519_v43, %v1327_v48  ;;  %6084 = vmatmul.msk.f32.vlgmr.msra.gmra.mxu0 %vm63_vm1, %v1179_v53 }
 0xbc1   :  { %2247 = vmatpush.msra.mxu0 %v6125_v22 }
 0xbc2   :  { %v1329_v6 = vadd.f32 %v6519_v43, %v1328_v33 }
 0xbc3   :  { %v6521_v0 = vpop.eup %6520  ;;  %2248 = vmatpush.msra.mxu0 %v6124_v32 }
 0xbc4   :  { %v1333_v5 = vsel %vm1332_vm7, %v6519_v43, %v1329_v6  ;;  %v1748_v9 = vmul.f32 %v6521_v0, %v1746_v51  ;;  %vm1753_vm11 = vweird.f32 %v6521_v0  ;;  %v6088_v6 = vld [vmem:[%s8816_s1 + $0x650] sm:$0xff] }
 0xbc5   :  { %v1338_v49 = vsel %vm1335_vm8, %v1337_v1, %v1333_v5  ;;  %2249 = vmatpush.msra.mxu0 %v6123_v61  ;;  %vm1754_vm14 = vmor %vm1752_vm13, %vm1753_vm11  ;;  %v6087_v61 = vld [vmem:[%s8816_s1 + $0x648] sm:$0xff]  ;;  %1945 = vmatpush.msra.mxu2 %v6088_v6  ;;  %v7532_v6 = vld [vmem:[%s8817_s2 + $0x51] ss:$0 sm:$0xff] }
 0xbc6   :  { %v1749_v14 = vsub.f32 1.0, %v1748_v9  ;;  %v1339_v42 = vmul.f32 %v7327_v54, %v1338_v49  ;;  %v1548_v54 = vor.u32 1.1754944e-38, %v1547_v13 }
 0xbc7   :  { %2250 = vmatpush.msra.mxu0 %v6122_v10  ;;  %1946 = vmatpush.msra.mxu2 %v6087_v61 }
 0xbc8   :  { %v1750_v18 = vmul.f32 %v6521_v0, %v1749_v14  ;;  %6067 = vmatmul.msk.f32.vlgmr.msra.gmra.mxu1 %vm315_vm2, %v1339_v42  ;;  %6102 = vmatmul.msk.f32.vlgmr.msrb.gmra.mxu0 %vm63_vm1, %v7380_v11  ;;  %v1549_v20 = vsel %vm1546_vm12, %v1548_v54, %v1544_v37 }
 0xbc9   :  { %1710 = vmatpush.msra.mxu1 %v7306_v46  ;;  %6146 = vmatpush.xpose.msk.msrb.mxu0 %vm63_vm1, %v7380_v11  ;;  %v1550_v24 = vmul.f32 %v7321_v12, %v1549_v20  ;;  %v1601_v12 = vsub.f32 %v7316_v57, %v7337_v23 }
 0xbca   :  { %v1751_v58 = vadd.f32 %v6521_v0, %v1750_v18  ;;  %1947 = vmatpush.msra.mxu2 %v6086_v59 }
 0xbcc   :  { %v1755_v62 = vsel %vm1754_vm14, %v6521_v0, %v1751_v58 }
 0xbcd   :  { %v1760_v16 = vsel %vm1757_vm15, %v1759_v21, %v1755_v62 }
 0xbce   :  { %v1761_v46 = vmul.f32 %v7331_v36, %v1760_v16  ;;  %v1602_v36 = vmul.f32 1.442695, %v1601_v12  ;;  %v7466_v16 = vld [vmem:[%s8817_s2 + $0x5b] ss:$0 sm:$0xff]  ;;  %v7471_v12 = vld [vmem:[%s8817_s2 + $0x5c] ss:$0 sm:$0xff] }
 0xbd0   :  { %6073 = vmatmul.msk.f32.vlgmr.msrb.gmra.mxu1 %vm315_vm2, %v1550_v24  ;;  %6082 = vmatmul.msk.f32.vlgmr.msrb.gmra.mxu3 %vm315_vm2, %v1761_v46  ;;  %6522 = vpow2.f32 %v1602_v36 }
 0xbd1   :  { %1851 = vmatpush.msrb.mxu1 %v7308_v35  ;;  %6103 = vmatmul.msk.f32.gmra.mxu0 %vm63_vm1, %v7407_v25  ;;  %v7426_v35 = vld [vmem:[%s8817_s2 + $0x3b] sm:$0xf] }
 0xbd2   :  { %v2113_v27 = vperm.slane %v7426_v35, 0 }
 0xbd6   :  { %v6523_v17 = vpop.eup %6522 }
 0xbd7   :  { %v1604_v23 = vsel %vm315_vm2, %v6523_v17, 0.0 }
 0xbd9   :  { %6126 = vmatmul.msk.f32.vlgmr.msra.gmra.mxu0 %vm63_vm1, %v7380_v11 }
 0xbe1   :  { %6127 = vmatmul.msk.f32.gmra.mxu0 %vm63_vm1, %v7407_v25 }
 0xc35   :  { %v7420_v40 = vpop.f32.mrf.mxu0 }
 0xc3d   :  { %v1806_v4 = vpop.f32.mrf.mxu0 }
 0xc3e   :  { %v1809_v26 = vsel %vm315_vm2, %v1806_v4, -inf }
 0xc3f   :  { %1810 = vmax.xlane.f32.xlu1 %v1809_v26  ;;  %v6107_v26 = vld [vmem:[%s8816_s1 + $0x238] sm:$0xff] }
 0xc45   :  { %v1430_v28 = vpop.f32.mrf.mxu1  ;;  %v2137_v3 = vpop.f32.mrf.mxu0 }
 0xc46   :  { %v2138_v57 = vadd.f32 %v2137_v3, %v2113_v27  ;;  %v1431_v29 = vadd.f32 %v1430_v28, %v7312_v50  ;;  %v6105_v28 = vld [vmem:[%s8816_s1 + $0x228] sm:$0xff]  ;;  %v6104_v3 = vld [vmem:[%s8816_s1 + $0x220] sm:$0xff] }
 0xc47   :  { %1605 = vadd.xlane.f32.xlu1 %v1604_v23 }
 0xc48   :  { %6147 = vmatmul.msk.f32.vlgmr.msrb.gmra.mxu0 %vm63_vm1, %v2138_v57  ;;  %v1503_v30 = vadd.f32 %v7310_v47, %v1431_v29 }
 0xc4d   :  { %v1571_v39 = vpop.f32.mrf.mxu1 }
 0xc4e   :  { %v1574_v43 = vadd.f32 %v1571_v39, %v1503_v30 }
 0xc50   :  { %v1859_v45 = vadd.f32 %v7438_v34, %v1574_v43 }
 0xc52   :  { %v1861_v8 = vadd.f32 %v1859_v45, %v7186_v2 }
 0xc54   :  { %v1863_v51 = vsel %vm63_vm1, %v1861_v8, 0.0  ;;  %v1871_v52 = vmul.f32 %v1861_v8, %v1861_v8 }
 0xc55   :  { %1864 = vadd.xlane.f32.xlu1 %v1863_v51 }
 0xc56   :  { %v1873_v50 = vsel %vm63_vm1, %v1871_v52, 0.0 }
 0xc57   :  { %1874 = vadd.xlane.f32.xlu2 %v1873_v50 }
 0xcb2   :  { %v1811_v53 = vpop.xlane.xlu1 %1810 }
 0xcb3   :  { %v1812_v47 = vsub.f32 %v1806_v4, %v1811_v53 }
 0xcb5   :  { %v1813_v48 = vmul.f32 1.442695, %v1812_v47  ;;  %v6131_v47 = vld [vmem:[%s8816_s1 + $0x2b8] sm:$0xff] }
 0xcb7   :  { %6524 = vpow2.f32 %v1813_v48  ;;  %v6130_v48 = vld [vmem:[%s8816_s1 + $0x2b0] sm:$0xff] }
 0xcba   :  { %v1606_v22 = vpop.xlane.xlu1 %1605 }
 0xcbb   :  { %6526 = vrcp.f32 %v1606_v22  ;;  %v1618_v55 = vand.u32 2147483648, %v1606_v22  ;;  %v1616_v1 = vand.u32 2147483647, %v1606_v22  ;;  %vm1612_vm3 = vweird.f32 %v1606_v22 }
 0xcbd   :  { %v7444_v38 = vpop.eup %6524  ;;  %v1619_v10 = vor.u32 1.1754944e-38, %v1618_v55  ;;  %vm1617_vm5 = vcmp.eq.f32.partialorder %v1616_v1, 8.507059e+37 }
 0xcbe   :  { %v1815_v41 = vsel %vm315_vm2, %v7444_v38, 0.0 }
 0xcbf   :  { %1816 = vadd.xlane.f32.xlu0 %v1815_v41  ;;  %v6128_v41 = vld [vmem:[%s8816_s1 + $0x2a0] sm:$0xff] }
 0xcc1   :  { %v6527_v2 = vpop.eup %6526 }
 0xcc2   :  { %v1608_v33 = vmul.f32 %v6527_v2, %v1606_v22  ;;  %vm1613_vm0 = vweird.f32 %v6527_v2  ;;  %v6095_v22 = vld [vmem:[%s8816_s1 + $0x678] sm:$0xff] }
 0xcc3   :  { %vm1614_vm4 = vmor %vm1612_vm3, %vm1613_vm0  ;;  %1982 = vmatpush.msra.mxu3 %v6095_v22 }
 0xcc4   :  { %v1609_v32 = vsub.f32 1.0, %v1608_v33  ;;  %v6093_v33 = vld [vmem:[%s8816_s1 + $0x668] sm:$0xff] }
 0xcc6   :  { %v1610_v0 = vmul.f32 %v6527_v2, %v1609_v32  ;;  %v7521_v32 = vpop.f32.mrf.mxu0 }
 0xcc8   :  { %v1611_v5 = vadd.f32 %v6527_v2, %v1610_v0  ;;  %v1865_v9 = vpop.xlane.xlu1 %1864 }
 0xcc9   :  { %v1869_v13 = vmul.f32 %v1865_v9, %v7036_v63  ;;  %v1782_v9 = vpop.f32.mrf.mxu3 }
 0xcca   :  { %v1615_v49 = vsel %vm1614_vm4, %v6527_v2, %v1611_v5  ;;  %v1875_v56 = vpop.xlane.xlu2 %1874  ;;  %v6094_v2 = vld [vmem:[%s8816_s1 + $0x670] sm:$0xff] }
 0xccb   :  { %v1620_v14 = vsel %vm1617_vm5, %v1619_v10, %v1615_v49  ;;  %v1881_v42 = vmul.f32 %v1869_v13, %v1869_v13  ;;  %v1879_v44 = vmul.f32 %v1875_v56, %v7036_v63  ;;  %v1885_v62 = vsub.f32 %v1861_v8, %v1869_v13  ;;  %1983 = vmatpush.msra.mxu3 %v6094_v2  ;;  %v6143_v2 = vld [vmem:[%s8816_s1 + $0x2f8] sm:$0xff] }
 0xccc   :  { %v1621_v15 = vmul.f32 %v6523_v17, %v1620_v14  ;;  %v6106_v17 = vld [vmem:[%s8816_s1 + $0x230] sm:$0xff]  ;;  %v2148_v14 = vperm.slane %v7426_v35, 1 }
 0xccd   :  { %v1883_v37 = vsub.f32 %v1879_v44, %v1881_v42  ;;  %1984 = vmatpush.msra.mxu3 %v6093_v33  ;;  %v6142_v33 = vld [vmem:[%s8816_s1 + $0x2f0] sm:$0xff] }
 0xcce   :  { %6079 = vmatmul.msk.f32.vlgmr.msra.gmra.mxu1 %vm315_vm2, %v1621_v15  ;;  %v2252_v55 = vpop.f32.mrf.mxu0 }
 0xccf   :  { %v1887_v18 = vadd.f32 1e-05, %v1883_v37  ;;  %2161 = vmatpush.msra.mxu1 %v6107_v26  ;;  %1985 = vmatpush.msra.mxu3 %v6092_v60  ;;  %v6141_v60 = vld [vmem:[%s8816_s1 + $0x2e8] sm:$0xff] }
 0xcd1   :  { %6528 = vrsqrt.f32 %v1887_v18  ;;  %vm1895_vm7 = vweird.f32 %v1887_v18  ;;  %2162 = vmatpush.msra.mxu1 %v6106_v17  ;;  %v6135_v17 = vld [vmem:[%s8816_s1 + $0x2c8] sm:$0xff] }
 0xcd3   :  { %2163 = vmatpush.msra.mxu1 %v6105_v28 }
 0xcd5   :  { %2164 = vmatpush.msra.mxu1 %v6104_v3 }
 0xcd7   :  { %v6529_v19 = vpop.eup %6528 }
 0xcd8   :  { %v1890_v54 = vmul.f32 %v6529_v19, %v1887_v18  ;;  %vm1896_vm6 = vweird.f32 %v6529_v19 }
 0xcd9   :  { %vm1897_vm8 = vmor %vm1895_vm7, %vm1896_vm6 }
 0xcda   :  { %v1891_v58 = vmul.f32 %v6529_v19, %v1890_v54  ;;  %v6112_v54 = vld [vmem:[%s8816_s1 + $0x250] sm:$0xff] }
 0xcdc   :  { %v1892_v20 = vmul.f32 0.5, %v1891_v58  ;;  %v6111_v58 = vld [vmem:[%s8816_s1 + $0x248] sm:$0xff] }
 0xcde   :  { %v1893_v21 = vsub.f32 1.5, %v1892_v20 }
 0xce0   :  { %v1894_v7 = vmul.f32 %v6529_v19, %v1893_v21 }
 0xce2   :  { %v1898_v24 = vsel %vm1897_vm8, %v6529_v19, %v1894_v7  ;;  %v6110_v7 = vld [vmem:[%s8816_s1 + $0x240] sm:$0xff] }
 0xce3   :  { %v1909_v46 = vmul.f32 %v1898_v24, %v1885_v62  ;;  %v6137_v62 = vld [vmem:[%s8816_s1 + $0x2d8] sm:$0xff] }
 0xce5   :  { %v1913_v36 = vmul.f32 %v7466_v16, %v1909_v46  ;;  %v6136_v46 = vld [vmem:[%s8816_s1 + $0x2d0] sm:$0xff] }
 0xce7   :  { %v7475_v4 = vadd.f32 %v7471_v12, %v1913_v36 }
 0xce9   :  { %6090 = vmatmul.msk.f32.vlgmr.msra.gmra.mxu2 %vm63_vm1, %v7475_v4 }
 0xd32   :  { %v1817_v57 = vpop.xlane.xlu0 %1816 }
 0xd33   :  { %6530 = vrcp.f32 %v1817_v57  ;;  %v1829_v39 = vand.u32 2147483648, %v1817_v57  ;;  %v1827_v45 = vand.u32 2147483647, %v1817_v57  ;;  %vm1823_vm10 = vweird.f32 %v1817_v57 }
 0xd35   :  { %v1830_v51 = vor.u32 1.1754944e-38, %v1829_v39  ;;  %vm1828_vm12 = vcmp.eq.f32.partialorder %v1827_v45, 8.507059e+37 }
 0xd39   :  { %v6531_v23 = vpop.eup %6530 }
 0xd3a   :  { %v1819_v29 = vmul.f32 %v6531_v23, %v1817_v57  ;;  %vm1824_vm9 = vweird.f32 %v6531_v23  ;;  %v6134_v57 = vld [vmem:[%s8816_s1 + $0x2c0] sm:$0xff] }
 0xd3b   :  { %vm1825_vm11 = vmor %vm1823_vm10, %vm1824_vm9 }
 0xd3c   :  { %v1820_v30 = vsub.f32 1.0, %v1819_v29 }
 0xd3e   :  { %v1821_v43 = vmul.f32 %v6531_v23, %v1820_v30 }
 0xd40   :  { %v1822_v8 = vadd.f32 %v6531_v23, %v1821_v43 }
 0xd42   :  { %v1826_v52 = vsel %vm1825_vm11, %v6531_v23, %v1822_v8 }
 0xd43   :  { %v1831_v50 = vsel %vm1828_vm12, %v1830_v51, %v1826_v52 }
 0xd44   :  { %v1832_v53 = vmul.f32 %v7444_v38, %v1831_v50  ;;  %v6129_v38 = vld [vmem:[%s8816_s1 + $0x2a8] sm:$0xff] }
 0xd46   :  { %6085 = vmatmul.msk.f32.vlgmr.msrb.gmra.mxu1 %vm315_vm2, %v1832_v53 }
 0xd47   :  { %2275 = vmatpush.msrb.mxu1 %v6131_v47 }
 0xd49   :  { %2276 = vmatpush.msrb.mxu1 %v6130_v48 }
 0xd4b   :  { %2277 = vmatpush.msrb.mxu1 %v6129_v38  ;;  %v1712_v59 = vpop.f32.mrf.mxu1  ;;  %v6117_v38 = vld [vmem:[%s8816_s1 + $0x268] sm:$0xff] }
 0xd4c   :  { %v1713_v5 = vadd.f32 %v1712_v59, %v7420_v40  ;;  %v2177_v59 = vperm.slane %v7426_v35, 2 }
 0xd4d   :  { %2278 = vmatpush.msrb.mxu1 %v6128_v41  ;;  %v6116_v41 = vld [vmem:[%s8816_s1 + $0x260] sm:$0xff] }
 0xd4e   :  { %6108 = vmatmul.msk.f32.vlgmr.msra.gmra.mxu1 %vm63_vm1, %v7380_v11  ;;  %v1785_v10 = vadd.f32 %v1782_v9, %v1713_v5 }
 0xd4f   :  { %6148 = vmatpush.xpose.msk.msra.mxu1 %vm63_vm1, %v7380_v11 }
 0xd56   :  { %6109 = vmatmul.msk.f32.gmra.mxu1 %vm63_vm1, %v7407_v25 }
 0xd5e   :  { %6132 = vmatmul.msk.f32.vlgmr.msrb.gmra.mxu1 %vm63_vm1, %v7380_v11 }
 0xd5f   :  { %2477 = vmatpush.msrb.mxu1 %v2252_v55  ;;  %v6140_v55 = vld [vmem:[%s8816_s1 + $0x2e0] sm:$0xff] }
 0xd66   :  { %6133 = vmatmul.msk.f32.gmra.mxu1 %vm63_vm1, %v7407_v25 }
 0xd6c   :  { %v1949_v61 = vpop.f32.mrf.mxu2 }
 0xd6d   :  { %v1950_v0 = vadd.f32 %v7532_v6, %v1949_v61 }
 0xd6f   :  { %v1955_v1 = vmax.f32 %v1950_v0, 0.0 }
 0xd71   :  { %6096 = vmatmul.msk.f32.vlgmr.msra.gmra.mxu3 %vm63_vm1, %v1955_v1 }
 0xdc3   :  { %v1853_v13 = vpop.f32.mrf.mxu1 }
 0xdc4   :  { %v1856_v49 = vadd.f32 %v1853_v13, %v1785_v10 }
 0xdc6   :  { %v1860_v56 = vadd.f32 %v7438_v34, %v1856_v49 }
 0xdc8   :  { %v1862_v42 = vadd.f32 %v1860_v56, %v7234_v31  ;;  %v6113_v31 = vld [vmem:[%s8816_s1 + $0x258] sm:$0xff] }
 0xdc9   :  { %2190 = vmatpush.msrb.mxu2 %v6113_v31  ;;  %v7652_v31 = vpop.f32.mrf.mxu0 }
 0xdca   :  { %v1866_v44 = vsel %vm63_vm1, %v1862_v42, 0.0  ;;  %v1872_v15 = vmul.f32 %v1862_v42, %v1862_v42 }
 0xdcb   :  { %v2166_v37 = vpop.f32.mrf.mxu1  ;;  %1867 = vadd.xlane.f32.xlu0 %v1866_v44  ;;  %2191 = vmatpush.msrb.mxu2 %v6112_v54 }
 0xdcc   :  { %v2167_v18 = vadd.f32 %v2166_v37, %v2148_v14  ;;  %v1876_v40 = vsel %vm63_vm1, %v1872_v15, 0.0 }
 0xdcd   :  { %1877 = vadd.xlane.f32.xlu1 %v1876_v40  ;;  %2192 = vmatpush.msrb.mxu2 %v6111_v58 }
 0xdce   :  { %6149 = vmatmul.msk.f32.vlgmr.msra.gmra.mxu1 %vm63_vm1, %v2167_v18 }
 0xdcf   :  { %2193 = vmatpush.msrb.mxu2 %v6110_v7 }
 0xdd1   :  { %2303 = vmatpush.msra.mxu2 %v6137_v62 }
 0xdd3   :  { %v7545_v19 = vpop.f32.mrf.mxu1  ;;  %2304 = vmatpush.msra.mxu2 %v6136_v46 }
 0xdd5   :  { %2305 = vmatpush.msra.mxu2 %v6135_v17 }
 0xdd7   :  { %2306 = vmatpush.msra.mxu2 %v6134_v57 }
 0xddb   :  { %v2280_v34 = vpop.f32.mrf.mxu1 }
 0xddc   :  { %2454 = vmatpush.msra.mxu0 %v2280_v34 }
 0xdde   :  { %6155 = vmatpush.xpose.msk.msrb.mxu0 %vm63_vm1, %v7380_v11 }
 0xde3   :  { %v7572_v28 = vpop.f32.mrf.mxu1 }
 0xe3e   :  { %v1868_v20 = vpop.xlane.xlu0 %1867 }
 0xe3f   :  { %v1870_v21 = vmul.f32 %v1868_v20, %v7036_v63  ;;  %v7657_v20 = vpop.f32.mrf.mxu0 }
 0xe40   :  { %v1878_v24 = vpop.xlane.xlu1 %1877 }
 0xe41   :  { %v1882_v36 = vmul.f32 %v1870_v21, %v1870_v21  ;;  %v1880_v26 = vmul.f32 %v1878_v24, %v7036_v63  ;;  %v1886_v50 = vsub.f32 %v1862_v42, %v1870_v21  ;;  %v2365_v21 = vsel %vm315_vm2, %v7657_v20, -inf }
 0xe43   :  { %v1884_v3 = vsub.f32 %v1880_v26, %v1882_v36 }
 0xe45   :  { %v1888_v23 = vadd.f32 1e-05, %v1884_v3 }
 0xe47   :  { %6532 = vrsqrt.f32 %v1888_v23  ;;  %vm1905_vm14 = vweird.f32 %v1888_v23 }
 0xe4b   :  { %v7577_v29 = vpop.f32.mrf.mxu1 }
 0xe4c   :  { %v2412_v30 = vsel %vm315_vm2, %v7577_v29, -inf }
 0xe4d   :  { %v6533_v39 = vpop.eup %6532  ;;  %2413 = vmax.xlane.f32.xlu1 %v2412_v30 }
 0xe4e   :  { %v1900_v43 = vmul.f32 %v6533_v39, %v1888_v23  ;;  %vm1906_vm13 = vweird.f32 %v6533_v39 }
 0xe4f   :  { %vm1907_vm15 = vmor %vm1905_vm14, %vm1906_vm13 }
 0xe50   :  { %v1901_v45 = vmul.f32 %v6533_v39, %v1900_v43 }
 0xe52   :  { %v1902_v8 = vmul.f32 0.5, %v1901_v45 }
 0xe54   :  { %v1903_v51 = vsub.f32 1.5, %v1902_v8 }
 0xe56   :  { %v1904_v52 = vmul.f32 %v6533_v39, %v1903_v51 }
 0xe58   :  { %v1908_v53 = vsel %vm1907_vm15, %v6533_v39, %v1904_v52 }
 0xe59   :  { %v1910_v47 = vmul.f32 %v1908_v53, %v1886_v50  ;;  %v2206_v50 = vperm.slane %v7426_v35, 3 }
 0xe5b   :  { %v1914_v48 = vmul.f32 %v7466_v16, %v1910_v47  ;;  %v6119_v16 = vld [vmem:[%s8816_s1 + $0x278] sm:$0xff] }
 0xe5c   :  { %2219 = vmatpush.msrb.mxu3 %v6119_v16 }
 0xe5d   :  { %v7583_v22 = vadd.f32 %v7471_v12, %v1914_v48  ;;  %v6118_v12 = vld [vmem:[%s8816_s1 + $0x270] sm:$0xff] }
 0xe5e   :  { %2220 = vmatpush.msrb.mxu3 %v6118_v12 }
 0xe5f   :  { %6091 = vmatmul.msk.f32.gmra.mxu2 %vm63_vm1, %v7583_v22 }
 0xe60   :  { %2221 = vmatpush.msrb.mxu3 %v6117_v38 }
 0xe62   :  { %2222 = vmatpush.msrb.mxu3 %v6116_v41 }
 0xe64   :  { %2331 = vmatpush.msra.mxu3 %v6143_v2 }
 0xe66   :  { %2332 = vmatpush.msra.mxu3 %v6142_v33 }
 0xe67   :  { %6114 = vmatmul.msk.f32.vlgmr.msrb.gmra.mxu2 %vm63_vm1, %v7380_v11 }
 0xe68   :  { %6152 = vmatpush.xpose.msk.msrb.mxu2 %vm63_vm1, %v7380_v11  ;;  %2333 = vmatpush.msra.mxu3 %v6141_v60 }
 0xe6a   :  { %2334 = vmatpush.msra.mxu3 %v6140_v55 }
 0xe6f   :  { %6115 = vmatmul.msk.f32.gmra.mxu2 %vm63_vm1, %v7407_v25 }
 0xe77   :  { %6138 = vmatmul.msk.f32.vlgmr.msra.gmra.mxu2 %vm63_vm1, %v7380_v11 }
 0xe78   :  { %6158 = vmatpush.xpose.msk.msra.mxu2 %vm63_vm1, %v7407_v25 }
 0xe7f   :  { %6139 = vmatmul.msk.f32.gmra.mxu2 %vm63_vm1, %v7407_v25 }
 0xee2   :  { %v1952_v61 = vpop.f32.mrf.mxu2 }
 0xee3   :  { %v1953_v0 = vadd.f32 %v7532_v6, %v1952_v61  ;;  %v2141_v6 = vadd.f32 %v7521_v32, %v2113_v27  ;;  %v7644_v27 = vpop.f32.mrf.mxu3  ;;  %v2414_v32 = vpop.xlane.xlu1 %2413 }
 0xee4   :  { %v2415_v56 = vsub.f32 %v7577_v29, %v2414_v32 }
 0xee5   :  { %v1956_v1 = vmax.f32 %v1953_v0, 0.0  ;;  %v2170_v0 = vadd.f32 %v7545_v19, %v2148_v14 }
 0xee6   :  { %v2416_v15 = vmul.f32 1.442695, %v2415_v56 }
 0xee7   :  { %6097 = vmatmul.msk.f32.gmra.mxu3 %vm63_vm1, %v1956_v1 }
 0xee8   :  { %6534 = vpow2.f32 %v2416_v15 }
 0xeea   :  { %v2195_v5 = vpop.f32.mrf.mxu2 }
 0xeeb   :  { %v2196_v9 = vadd.f32 %v2195_v5, %v2177_v59 }
 0xeed   :  { %6153 = vmatmul.msk.f32.vlgmr.msrb.gmra.mxu2 %vm63_vm1, %v2196_v9 }
 0xeee   :  { %6164 = vmatpush.xpose.msk.msrb.mxu2 %vm63_vm1, %v7407_v25  ;;  %v6535_v34 = vpop.eup %6534 }
 0xeef   :  { %6120 = vmatmul.msk.f32.vlgmr.msrb.gmra.mxu3 %vm63_vm1, %v7380_v11  ;;  %v2418_v54 = vsel %vm315_vm2, %v6535_v34, 0.0 }
 0xef2   :  { %v2198_v10 = vpop.f32.mrf.mxu2 }
 0xef3   :  { %v2199_v49 = vadd.f32 %v2198_v10, %v2177_v59 }
 0xef5   :  { %6159 = vmatmul.msk.f32.vlgmr.msra.gmra.mxu2 %vm63_vm1, %v2141_v6 }
 0xef7   :  { %6121 = vmatmul.msk.f32.gmra.mxu3 %vm63_vm1, %v7407_v25 }
 0xefa   :  { %v2308_v13 = vpop.f32.mrf.mxu2 }
 0xefb   :  { %2547 = vmatpush.msrb.mxu3 %v2308_v13 }
 0xefd   :  { %6165 = vmatmul.msk.f32.vlgmr.msrb.gmra.mxu2 %vm63_vm1, %v2199_v49 }
 0xeff   :  { %6144 = vmatmul.msk.f32.vlgmr.msra.gmra.mxu3 %vm63_vm1, %v7380_v11 }
 0xf00   :  { %6160 = vmatpush.xpose.msk.msra.mxu3 %vm63_vm1, %v7407_v25 }
 0xf02   :  { %v7647_v42 = vpop.f32.mrf.mxu2 }
 0xf07   :  { %6145 = vmatmul.msk.f32.gmra.mxu3 %vm63_vm1, %v7407_v25 }
 0xf6a   :  { %v7649_v44 = vpop.f32.mrf.mxu3 }
 0xf70   :  { %v2502_v37 = vpop.f32.mrf.mxu2 }
 0xf71   :  { %v2505_v18 = vsel %vm315_vm2, %v2502_v37, -inf }
 0xf72   :  { %2506 = vmax.xlane.f32.xlu2 %v2505_v18  ;;  %v2224_v40 = vpop.f32.mrf.mxu3 }
 0xf73   :  { %v2225_v53 = vadd.f32 %v2224_v40, %v2206_v50 }
 0xf78   :  { %v2644_v49 = vpop.f32.mrf.mxu2 }
 0xf79   :  { %v2647_v32 = vsel %vm315_vm2, %v2644_v49, -inf }
 0xf7a   :  { %2419 = vadd.xlane.f32.xlu2 %v2418_v54  ;;  %v7655_v58 = vpop.f32.mrf.mxu3 }
 0xf82   :  { %2366 = vmax.xlane.f32.xlu2 %v2365_v21  ;;  %v2336_v7 = vpop.f32.mrf.mxu3 }
 0xf83   :  { %2618 = vmatpush.msra.mxu1 %v2336_v7 }
 0xf8a   :  { %v7676_v1 = vpop.f32.mrf.mxu3 }
 0xfe5   :  { %v2507_v62 = vpop.xlane.xlu2 %2506 }
 0xfe6   :  { %v2508_v24 = vsub.f32 %v2502_v37, %v2507_v62 }
 0xfe8   :  { %v2509_v46 = vmul.f32 1.442695, %v2508_v24 }
 0xfea   :  { %6536 = vpow2.f32 %v2509_v46 }
 0xfed   :  { %v2420_v36 = vpop.xlane.xlu2 %2419 }
 0xfee   :  { %6538 = vrcp.f32 %v2420_v36  ;;  %v2432_v29 = vand.u32 2147483648, %v2420_v36  ;;  %v2430_v39 = vand.u32 2147483647, %v2420_v36  ;;  %vm2426_vm3 = vweird.f32 %v2420_v36 }
 0xff0   :  { %v6537_v26 = vpop.eup %6536  ;;  %v2433_v45 = vor.u32 1.1754944e-38, %v2432_v29  ;;  %vm2431_vm5 = vcmp.eq.f32.partialorder %v2430_v39, 8.507059e+37 }
 0xff1   :  { %v2511_v17 = vsel %vm315_vm2, %v6537_v26, 0.0 }
 0xff2   :  { %2512 = vadd.xlane.f32.xlu0 %v2511_v17  ;;  %v2784_v17 = vpop.f32.mrf.mxu2 }
 0xff4   :  { %v6539_v3 = vpop.eup %6538 }
 0xff5   :  { %v2422_v57 = vmul.f32 %v6539_v3, %v2420_v36  ;;  %vm2427_vm0 = vweird.f32 %v6539_v3  ;;  %v2367_v14 = vpop.xlane.xlu2 %2366 }
 0xff6   :  { %vm2428_vm4 = vmor %vm2426_vm3, %vm2427_vm0 }
 0xff7   :  { %v2423_v23 = vsub.f32 1.0, %v2422_v57  ;;  %v2787_v57 = vsel %vm315_vm2, %v2784_v17, -inf }
 0xff9   :  { %v2424_v30 = vmul.f32 %v6539_v3, %v2423_v23 }
 0xffb   :  { %v2425_v43 = vadd.f32 %v6539_v3, %v2424_v30 }
 0xffd   :  { %v2429_v8 = vsel %vm2428_vm4, %v6539_v3, %v2425_v43 }
 0xffe   :  { %v2434_v51 = vsel %vm2431_vm5, %v2433_v45, %v2429_v8 }
 0xfff   :  { %v2435_v52 = vmul.f32 %v6535_v34, %v2434_v51 }
0x1001   :  { %6150 = vmatmul.msk.f32.vlgmr.msra.gmra.mxu0 %vm315_vm2, %v2435_v52 }
0x1002   :  { %2736 = vmatpush.msra.mxu0 %v7572_v28 }
0x1009   :  { %6156 = vmatmul.msk.f32.vlgmr.msrb.gmra.mxu0 %vm63_vm1, %v2225_v53 }
0x100a   :  { %6167 = vmatpush.xpose.msk.msrb.mxu0 %vm63_vm1, %v7407_v25 }
0x1065   :  { %v2513_v47 = vpop.xlane.xlu0 %2512 }
0x1066   :  { %6540 = vrcp.f32 %v2513_v47  ;;  %v2525_v38 = vand.u32 2147483648, %v2513_v47  ;;  %v2523_v2 = vand.u32 2147483647, %v2513_v47  ;;  %vm2519_vm7 = vweird.f32 %v2513_v47 }
0x1068   :  { %v2526_v33 = vor.u32 1.1754944e-38, %v2525_v38  ;;  %vm2524_vm9 = vcmp.eq.f32.partialorder %v2523_v2, 8.507059e+37 }
0x106c   :  { %v6541_v48 = vpop.eup %6540 }
0x106d   :  { %v2515_v16 = vmul.f32 %v6541_v48, %v2513_v47  ;;  %vm2520_vm6 = vweird.f32 %v6541_v48 }
0x106e   :  { %vm2521_vm8 = vmor %vm2519_vm7, %vm2520_vm6 }
0x106f   :  { %v2516_v12 = vsub.f32 1.0, %v2515_v16 }
0x1071   :  { %v2517_v41 = vmul.f32 %v6541_v48, %v2516_v12 }
0x1073   :  { %v2518_v28 = vadd.f32 %v6541_v48, %v2517_v41 }
0x1075   :  { %v2522_v60 = vsel %vm2521_vm8, %v6541_v48, %v2518_v28 }
0x1076   :  { %v2527_v55 = vsel %vm2524_vm9, %v2526_v33, %v2522_v60 }
0x1077   :  { %v2528_v61 = vmul.f32 %v6537_v26, %v2527_v55 }
0x1079   :  { %6154 = vmatmul.msk.f32.vlgmr.msrb.gmra.mxu3 %vm315_vm2, %v2528_v61 }
0x107a   :  { %2829 = vmatpush.msrb.mxu3 %v7647_v42  ;;  %v2368_v42 = vsub.f32 %v7657_v20, %v2367_v14 }
0x107c   :  { %v2369_v37 = vmul.f32 1.442695, %v2368_v42 }
0x107e   :  { %v7680_v5 = vpop.f32.mrf.mxu0 }
0x1081   :  { %6161 = vmatmul.msk.f32.vlgmr.msra.gmra.mxu3 %vm63_vm1, %v2170_v0 }
0x1086   :  { %v2573_v6 = vpop.f32.mrf.mxu0 }
0x1087   :  { %v2576_v13 = vsel %vm315_vm2, %v2573_v6, -inf }
0x10fc   :  { %v7678_v59 = vpop.f32.mrf.mxu3 }
0x1104   :  { %v2691_v9 = vpop.f32.mrf.mxu3 }
0x1105   :  { %v2694_v10 = vsel %vm315_vm2, %v2691_v9, -inf }
0x1106   :  { %2695 = vmax.xlane.f32.xlu0 %v2694_v10 }
0x110e   :  { %2577 = vmax.xlane.f32.xlu0 %v2576_v13 }
0x1116   :  { %2648 = vmax.xlane.f32.xlu0 %v2647_v32 }
0x1179   :  { %v2696_v19 = vpop.xlane.xlu0 %2695 }
0x117a   :  { %v2697_v56 = vsub.f32 %v2691_v9, %v2696_v19 }
0x117c   :  { %v2698_v15 = vmul.f32 1.442695, %v2697_v56 }
0x117e   :  { %6542 = vpow2.f32 %v2698_v15 }
0x117f   :  { %6544 = vpow2.f32 %v2369_v37 }
0x1181   :  { %v2578_v18 = vpop.xlane.xlu0 %2577 }
0x1182   :  { %v2579_v40 = vsub.f32 %v2573_v6, %v2578_v18 }
0x1184   :  { %v6543_v34 = vpop.eup %6542  ;;  %v2580_v54 = vmul.f32 1.442695, %v2579_v40 }
0x1185   :  { %v2700_v21 = vsel %vm315_vm2, %v6543_v34, 0.0  ;;  %v7687_v62 = vpop.eup %6544 }
0x1186   :  { %6546 = vpow2.f32 %v2580_v54  ;;  %2701 = vadd.xlane.f32.xlu1 %v2700_v21  ;;  %v2371_v20 = vsel %vm315_vm2, %v7687_v62, 0.0 }
0x1189   :  { %v2649_v7 = vpop.xlane.xlu0 %2648 }
0x118a   :  { %v2650_v24 = vsub.f32 %v2644_v49, %v2649_v7 }
0x118c   :  { %v7689_v46 = vpop.eup %6546  ;;  %v2651_v36 = vmul.f32 1.442695, %v2650_v24 }
0x118d   :  { %v2582_v26 = vsel %vm315_vm2, %v7689_v46, 0.0 }
0x118e   :  { %6548 = vpow2.f32 %v2651_v36  ;;  %2372 = vadd.xlane.f32.xlu1 %v2371_v20  ;;  %2583 = vadd.xlane.f32.xlu2 %v2582_v26 }
0x1194   :  { %v7695_v3 = vpop.eup %6548 }
0x1195   :  { %v2653_v23 = vsel %vm315_vm2, %v7695_v3, 0.0 }
0x1196   :  { %2788 = vmax.xlane.f32.xlu1 %v2787_v57  ;;  %2654 = vadd.xlane.f32.xlu0 %v2653_v23 }
0x11f9   :  { %v2702_v29 = vpop.xlane.xlu1 %2701 }
0x11fa   :  { %6550 = vrcp.f32 %v2702_v29  ;;  %v2714_v51 = vand.u32 2147483648, %v2702_v29  ;;  %v2712_v53 = vand.u32 2147483647, %v2702_v29  ;;  %vm2708_vm11 = vweird.f32 %v2702_v29 }
0x11fc   :  { %v2715_v16 = vor.u32 1.1754944e-38, %v2714_v51  ;;  %vm2713_vm13 = vcmp.eq.f32.partialorder %v2712_v53, 8.507059e+37 }
0x1200   :  { %v6551_v30 = vpop.eup %6550 }
0x1201   :  { %v2704_v39 = vmul.f32 %v6551_v30, %v2702_v29  ;;  %v2373_v43 = vpop.xlane.xlu1 %2372  ;;  %v2584_v45 = vpop.xlane.xlu2 %2583  ;;  %vm2709_vm10 = vweird.f32 %v6551_v30 }
0x1202   :  { %6552 = vrcp.f32 %v2373_v43  ;;  %vm2710_vm12 = vmor %vm2708_vm11, %vm2709_vm10  ;;  %v2385_v9 = vand.u32 2147483648, %v2373_v43  ;;  %v2383_v49 = vand.u32 2147483647, %v2373_v43  ;;  %vm2379_vm15 = vweird.f32 %v2373_v43 }
0x1203   :  { %v2705_v8 = vsub.f32 1.0, %v2704_v39  ;;  %6554 = vrcp.f32 %v2584_v45  ;;  %v2596_v18 = vand.u32 2147483648, %v2584_v45  ;;  %vm2590_vm5 = vweird.f32 %v2584_v45 }
0x1204   :  { %v2386_v19 = vor.u32 1.1754944e-38, %v2385_v9  ;;  %vm2384_vm3 = vcmp.eq.f32.partialorder %v2383_v49, 8.507059e+37  ;;  %v2594_v54 = vand.u32 2147483647, %v2584_v45 }
0x1205   :  { %v2706_v52 = vmul.f32 %v6551_v30, %v2705_v8  ;;  %v2597_v26 = vor.u32 1.1754944e-38, %v2596_v18  ;;  %v6178_v18 = vld [vmem:[%s8816_s1 + $0x330] sm:$0xff] }
0x1206   :  { %vm2595_vm7 = vcmp.eq.f32.partialorder %v2594_v54, 8.507059e+37  ;;  %v6171_v54 = vld [vmem:[%s8816_s1 + $0x308] sm:$0xff] }
0x1207   :  { %v2707_v47 = vadd.f32 %v6551_v30, %v2706_v52 }
0x1208   :  { %v6553_v48 = vpop.eup %6552 }
0x1209   :  { %v6555_v12 = vpop.eup %6554  ;;  %v2711_v38 = vsel %vm2710_vm12, %v6551_v30, %v2707_v47  ;;  %v2375_v41 = vmul.f32 %v6553_v48, %v2373_v43  ;;  %v2789_v2 = vpop.xlane.xlu1 %2788  ;;  %vm2380_vm14 = vweird.f32 %v6553_v48 }
0x120a   :  { %v2655_v28 = vpop.xlane.xlu0 %2654  ;;  %v2716_v33 = vsel %vm2713_vm13, %v2715_v16, %v2711_v38  ;;  %v2586_v60 = vmul.f32 %v6555_v12, %v2584_v45  ;;  %v2790_v55 = vsub.f32 %v2784_v17, %v2789_v2  ;;  %vm2381_vm0 = vmor %vm2379_vm15, %vm2380_vm14  ;;  %vm2591_vm4 = vweird.f32 %v6555_v12  ;;  %v6428_v38 = vld [vmem:[%s8817_s2 + $0x52] ss:$0 sm:$0xff] }
0x120b   :  { %v2717_v61 = vmul.f32 %v6543_v34, %v2716_v33  ;;  %v2376_v0 = vsub.f32 1.0, %v2375_v41  ;;  %6556 = vrcp.f32 %v2655_v28  ;;  %v2228_v34 = vadd.f32 %v7655_v58, %v2206_v50  ;;  %vm2592_vm6 = vmor %vm2590_vm5, %vm2591_vm4 }
0x120c   :  { %v2587_v10 = vsub.f32 1.0, %v2586_v60  ;;  %v2791_v6 = vmul.f32 1.442695, %v2790_v55  ;;  %v2667_v50 = vand.u32 2147483648, %v2655_v28  ;;  %vm2661_vm9 = vweird.f32 %v2655_v28 }
0x120d   :  { %v2377_v13 = vmul.f32 %v6553_v48, %v2376_v0  ;;  %6162 = vmatmul.msk.f32.vlgmr.msra.gmra.mxu0 %vm315_vm2, %v2717_v61  ;;  %v2665_v57 = vand.u32 2147483647, %v2655_v28  ;;  %v1988_v61 = vadd.f32 %v6428_v38, %v7644_v27 }
0x120e   :  { %v2588_v32 = vmul.f32 %v6555_v12, %v2587_v10  ;;  %6558 = vpow2.f32 %v2791_v6  ;;  %v2668_v29 = vor.u32 1.1754944e-38, %v2667_v50 }
0x120f   :  { %v2378_v14 = vadd.f32 %v6553_v48, %v2377_v13  ;;  %vm2666_vm11 = vcmp.eq.f32.partialorder %v2665_v57, 8.507059e+37  ;;  %v1991_v13 = vadd.f32 %v6428_v38, %v7649_v44  ;;  %v6173_v44 = vld [vmem:[%s8816_s1 + $0x318] sm:$0xff]  ;;  %v6190_v38 = vld [vmem:[%s8816_s1 + $0x370] sm:$0xff] }
0x1210   :  { %v2589_v15 = vadd.f32 %v6555_v12, %v2588_v32  ;;  %2993 = vmatpush.msra.mxu2 %v6173_v44 }
0x1211   :  { %v6557_v56 = vpop.eup %6556  ;;  %v2382_v42 = vsel %vm2381_vm0, %v6553_v48, %v2378_v14 }
0x1212   :  { %v2387_v37 = vsel %vm2384_vm3, %v2386_v19, %v2382_v42  ;;  %v2657_v40 = vmul.f32 %v6557_v56, %v2655_v28  ;;  %v2593_v36 = vsel %vm2592_vm6, %v6555_v12, %v2589_v15  ;;  %vm2662_vm8 = vweird.f32 %v6557_v56  ;;  %v7725_v28 = vld [vmem:[%s8817_s2 + $0x3f] ss:$0 sm:$0xff] }
0x1213   :  { %v2388_v21 = vmul.f32 %v7687_v62, %v2387_v37  ;;  %v2598_v35 = vsel %vm2595_vm7, %v2597_v26, %v2593_v36  ;;  %vm2663_vm10 = vmor %vm2661_vm9, %vm2662_vm8  ;;  %v6185_v42 = vld [vmem:[%s8816_s1 + $0x358] sm:$0xff]  ;;  %v6172_v37 = vld [vmem:[%s8816_s1 + $0x310] sm:$0xff] }
0x1214   :  { %v6559_v7 = vpop.eup %6558  ;;  %v2658_v24 = vsub.f32 1.0, %v2657_v40  ;;  %v2599_v62 = vmul.f32 %v7689_v46, %v2598_v35  ;;  %3051 = vmatpush.msra.mxu0 %v6185_v42  ;;  %v6184_v40 = vld [vmem:[%s8816_s1 + $0x350] sm:$0xff]  ;;  %2994 = vmatpush.msra.mxu2 %v6172_v37  ;;  %v6170_v36 = vld [vmem:[%s8816_s1 + $0x300] sm:$0xff] }
0x1215   :  { %6151 = vmatmul.msk.f32.vlgmr.msrb.gmra.mxu1 %vm315_vm2, %v2388_v21  ;;  %6168 = vmatmul.msk.f32.vlgmr.msrb.gmra.mxu0 %vm63_vm1, %v2228_v34  ;;  %v2793_v20 = vsel %vm315_vm2, %v6559_v7, 0.0  ;;  %v6177_v21 = vld [vmem:[%s8816_s1 + $0x328] sm:$0xff]  ;;  %v6182_v26 = vld [vmem:[%s8816_s1 + $0x340] sm:$0xff] }
0x1216   :  { %v2659_v17 = vmul.f32 %v6557_v56, %v2658_v24  ;;  %2759 = vmatpush.msrb.mxu1 %v7652_v31  ;;  %2794 = vadd.xlane.f32.xlu1 %v2793_v20  ;;  %v6176_v20 = vld [vmem:[%s8816_s1 + $0x320] sm:$0xff] }
0x1217   :  { %3052 = vmatpush.msra.mxu0 %v6184_v40  ;;  %2995 = vmatpush.msra.mxu2 %v6171_v54 }
0x1218   :  { %v2660_v58 = vadd.f32 %v6557_v56, %v2659_v17 }
0x1219   :  { %2996 = vmatpush.msra.mxu2 %v6170_v36 }
0x121a   :  { %v2664_v23 = vsel %vm2663_vm10, %v6557_v56, %v2660_v58 }
0x121b   :  { %v2669_v30 = vsel %vm2666_vm11, %v2668_v29, %v2664_v23 }
0x121c   :  { %v2670_v31 = vmul.f32 %v7695_v3, %v2669_v30 }
0x121d   :  { %6157 = vmatmul.msk.f32.vlgmr.msra.gmra.mxu1 %vm315_vm2, %v2599_v62 }
0x121e   :  { %2900 = vmatpush.msra.mxu1 %v7676_v1 }
0x1225   :  { %6163 = vmatmul.msk.f32.vlgmr.msrb.gmra.mxu1 %vm315_vm2, %v2670_v31 }
0x1289   :  { %v2795_v39 = vpop.xlane.xlu1 %2794 }
0x128a   :  { %6560 = vrcp.f32 %v2795_v39  ;;  %v7714_v43 = vpop.f32.mrf.mxu0  ;;  %v2807_v47 = vand.u32 2147483648, %v2795_v39  ;;  %v2805_v48 = vand.u32 2147483647, %v2795_v39  ;;  %vm2801_vm13 = vweird.f32 %v2795_v39 }
0x128c   :  { %v2808_v12 = vor.u32 1.1754944e-38, %v2807_v47  ;;  %vm2806_vm15 = vcmp.eq.f32.partialorder %v2805_v48, 8.507059e+37 }
0x1290   :  { %v6561_v46 = vpop.eup %6560 }
0x1291   :  { %v2797_v45 = vmul.f32 %v6561_v46, %v2795_v39  ;;  %vm2802_vm12 = vweird.f32 %v6561_v46 }
0x1292   :  { %v2479_v8 = vpop.f32.mrf.mxu1  ;;  %v2855_v51 = vpop.f32.mrf.mxu0  ;;  %vm2803_vm14 = vmor %vm2801_vm13, %vm2802_vm12 }
0x1293   :  { %v2798_v52 = vsub.f32 1.0, %v2797_v45  ;;  %v2858_v53 = vsel %vm315_vm2, %v2855_v51, -inf  ;;  %v2480_v3 = vadd.f32 %v2479_v8, %v7680_v5 }
0x1294   :  { %2859 = vmax.xlane.f32.xlu2 %v2858_v53  ;;  %v7801_v53 = vld [vmem:[%s8817_s2 + $0x61] ss:$0 sm:$0xff] }
0x1295   :  { %v2799_v1 = vmul.f32 %v6561_v46, %v2798_v52  ;;  %v2552_v2 = vadd.f32 %v7678_v59, %v2480_v3  ;;  %v7734_v59 = vadd.f32 %v1988_v61, %v7475_v4 }
0x1297   :  { %v2800_v16 = vadd.f32 %v6561_v46, %v2799_v1  ;;  %v2003_v49 = vmul.f32 %v7734_v59, %v7734_v59  ;;  %v1995_v57 = vsel %vm63_vm1, %v7734_v59, 0.0  ;;  %v7806_v1 = vld [vmem:[%s8817_s2 + $0x62] ss:$0 sm:$0xff] }
0x1299   :  { %v2804_v41 = vsel %vm2803_vm14, %v6561_v46, %v2800_v16  ;;  %v2005_v4 = vsel %vm63_vm1, %v2003_v49, 0.0 }
0x129a   :  { %v2809_v33 = vsel %vm2806_vm15, %v2808_v12, %v2804_v41  ;;  %v2620_v60 = vpop.f32.mrf.mxu1  ;;  %v6191_v12 = vld [vmem:[%s8816_s1 + $0x378] sm:$0xff]  ;;  %v6189_v41 = vld [vmem:[%s8816_s1 + $0x368] sm:$0xff] }
0x129b   :  { %v2810_v5 = vmul.f32 %v6559_v7, %v2809_v33  ;;  %v2623_v55 = vadd.f32 %v2620_v60, %v2552_v2  ;;  %v6183_v7 = vld [vmem:[%s8816_s1 + $0x348] sm:$0xff]  ;;  %3080 = vmatpush.msrb.mxu1 %v6191_v12  ;;  %v6188_v2 = vld [vmem:[%s8816_s1 + $0x360] sm:$0xff] }
0x129c   :  { %3053 = vmatpush.msra.mxu0 %v6183_v7 }
0x129d   :  { %v2908_v0 = vadd.f32 %v7725_v28, %v2623_v55  ;;  %6166 = vmatmul.msk.f32.vlgmr.msrb.gmra.mxu3 %vm315_vm2, %v2810_v5  ;;  %3081 = vmatpush.msrb.mxu1 %v6190_v38 }
0x129e   :  { %3054 = vmatpush.msra.mxu0 %v6182_v26 }
0x129f   :  { %v7731_v9 = vadd.f32 %v2908_v0, %v7380_v11  ;;  %v7745_v11 = vadd.f32 %v1991_v13, %v7583_v22  ;;  %v6179_v22 = vld [vmem:[%s8816_s1 + $0x338] sm:$0xff]  ;;  %3082 = vmatpush.msrb.mxu1 %v6189_v41 }
0x12a0   :  { %3022 = vmatpush.msra.mxu3 %v6179_v22 }
0x12a1   :  { %v2912_v10 = vsel %vm63_vm1, %v7731_v9, 0.0  ;;  %v2920_v6 = vmul.f32 %v7731_v9, %v7731_v9  ;;  %v1998_v32 = vsel %vm63_vm1, %v7745_v11, 0.0  ;;  %v2004_v29 = vmul.f32 %v7745_v11, %v7745_v11  ;;  %3083 = vmatpush.msrb.mxu1 %v6188_v2 }
0x12a2   :  { %2913 = vadd.xlane.f32.xlu0 %v2912_v10  ;;  %3023 = vmatpush.msra.mxu3 %v6178_v18  ;;  %v2761_v38 = vpop.f32.mrf.mxu1 }
0x12a3   :  { %v2922_v27 = vsel %vm63_vm1, %v2920_v6, 0.0  ;;  %v2008_v30 = vsel %vm63_vm1, %v2004_v29, 0.0  ;;  %v2762_v41 = vadd.f32 %v2761_v38, %v7714_v43 }
0x12a4   :  { %2923 = vadd.xlane.f32.xlu1 %v2922_v27  ;;  %3024 = vmatpush.msra.mxu3 %v6177_v21 }
0x12a6   :  { %3025 = vmatpush.msra.mxu3 %v6176_v20 }
0x12aa   :  { %2006 = vadd.xlane.f32.xlu0 %v2005_v4 }
0x12ac   :  { %1999 = vadd.xlane.f32.xlu1 %v1998_v32 }
0x1307   :  { %v2860_v14 = vpop.xlane.xlu2 %2859 }
0x1308   :  { %v2861_v19 = vsub.f32 %v2855_v51, %v2860_v14 }
0x130a   :  { %v2862_v56 = vmul.f32 1.442695, %v2861_v19 }
0x130c   :  { %6562 = vpow2.f32 %v2862_v56 }
0x1312   :  { %v7759_v15 = vpop.eup %6562 }
0x1313   :  { %v2864_v34 = vsel %vm315_vm2, %v7759_v15, 0.0 }
0x1314   :  { %2865 = vadd.xlane.f32.xlu2 %v2864_v34 }
0x1315   :  { %v2914_v24 = vpop.xlane.xlu0 %2913 }
0x1316   :  { %v2918_v17 = vmul.f32 %v2914_v24, %v7036_v63 }
0x1317   :  { %v2924_v35 = vpop.xlane.xlu1 %2923 }
0x1318   :  { %v2930_v58 = vmul.f32 %v2918_v17, %v2918_v17  ;;  %v2928_v50 = vmul.f32 %v2924_v35, %v7036_v63  ;;  %v2934_v52 = vsub.f32 %v7731_v9, %v2918_v17 }
0x131a   :  { %v2932_v62 = vsub.f32 %v2928_v50, %v2930_v58 }
0x131c   :  { %v2936_v23 = vadd.f32 1e-05, %v2932_v62  ;;  %1996 = vadd.xlane.f32.xlu2 %v1995_v57 }
0x131d   :  { %v2007_v5 = vpop.xlane.xlu0 %2006 }
0x131e   :  { %6564 = vrsqrt.f32 %v2936_v23  ;;  %vm2944_vm3 = vweird.f32 %v2936_v23  ;;  %v2011_v6 = vmul.f32 %v2007_v5, %v7036_v63 }
0x131f   :  { %v2000_v9 = vpop.xlane.xlu1 %1999 }
0x1320   :  { %v2002_v32 = vmul.f32 %v2000_v9, %v7036_v63 }
0x1322   :  { %v2014_v37 = vmul.f32 %v2002_v32, %v2002_v32 }
0x1324   :  { %v6565_v31 = vpop.eup %6564  ;;  %2009 = vadd.xlane.f32.xlu2 %v2008_v30  ;;  %v6433_v30 = vld [vmem:[%s8817_s2 + $0x5e] ss:$0 sm:$0xff] }
0x1325   :  { %v2939_v39 = vmul.f32 %v6565_v31, %v2936_v23  ;;  %vm2945_vm0 = vweird.f32 %v6565_v31 }
0x1326   :  { %vm2946_vm4 = vmor %vm2944_vm3, %vm2945_vm0 }
0x1327   :  { %v2940_v46 = vmul.f32 %v6565_v31, %v2939_v39 }
0x1329   :  { %v2941_v45 = vmul.f32 0.5, %v2940_v46 }
0x132b   :  { %v2942_v8 = vsub.f32 1.5, %v2941_v45  ;;  %v2018_v45 = vsub.f32 %v7745_v11, %v2002_v32  ;;  %v2831_v11 = vpop.f32.mrf.mxu3 }
0x132c   :  { %v2834_v2 = vadd.f32 %v2831_v11, %v2762_v41 }
0x132d   :  { %v2943_v51 = vmul.f32 %v6565_v31, %v2942_v8 }
0x132f   :  { %v2947_v47 = vsel %vm2946_vm4, %v6565_v31, %v2943_v51 }
0x1330   :  { %v2958_v48 = vmul.f32 %v2947_v47, %v2934_v52 }
0x1332   :  { %v2962_v3 = vmul.f32 %v7801_v53, %v2958_v48 }
0x1334   :  { %v7810_v16 = vadd.f32 %v7806_v1, %v2962_v3 }
0x1336   :  { %6174 = vmatmul.msk.f32.vlgmr.msra.gmra.mxu2 %vm63_vm1, %v7810_v16  ;;  %6180 = vmatmul.msk.f32.vlgmr.msra.gmra.mxu3 %vm63_vm1, %v7810_v16 }
0x1337   :  { %6186 = vmatmul.msk.f32.vlgmr.msra.gmra.mxu0 %vm63_vm1, %v7810_v16 }
0x1387   :  { %v2866_v33 = vpop.xlane.xlu2 %2865 }
0x1388   :  { %6566 = vrcp.f32 %v2866_v33  ;;  %v2878_v13 = vand.u32 2147483648, %v2866_v33  ;;  %v2876_v4 = vand.u32 2147483647, %v2866_v33  ;;  %vm2872_vm6 = vweird.f32 %v2866_v33 }
0x138a   :  { %v2879_v56 = vor.u32 1.1754944e-38, %v2878_v13  ;;  %vm2877_vm8 = vcmp.eq.f32.partialorder %v2876_v4, 8.507059e+37  ;;  %v6203_v4 = vld [vmem:[%s8816_s1 + $0x3b8] sm:$0xff] }
0x138b   :  { %3142 = vmatpush.msrb.mxu3 %v6203_v4 }
0x138e   :  { %v6567_v60 = vpop.eup %6566 }
0x138f   :  { %v2868_v55 = vmul.f32 %v6567_v60, %v2866_v33  ;;  %v1997_v61 = vpop.xlane.xlu2 %1996  ;;  %vm2873_vm5 = vweird.f32 %v6567_v60 }
0x1390   :  { %v2001_v0 = vmul.f32 %v1997_v61, %v7036_v63  ;;  %vm2874_vm7 = vmor %vm2872_vm6, %vm2873_vm5 }
0x1391   :  { %v2869_v10 = vsub.f32 1.0, %v2868_v55 }
0x1392   :  { %v2013_v27 = vmul.f32 %v2001_v0, %v2001_v0  ;;  %v2017_v62 = vsub.f32 %v7734_v59, %v2001_v0 }
0x1393   :  { %v2870_v49 = vmul.f32 %v6567_v60, %v2869_v10 }
0x1394   :  { %v2015_v14 = vsub.f32 %v2011_v6, %v2013_v27  ;;  %v6197_v27 = vld [vmem:[%s8816_s1 + $0x398] sm:$0xff] }
0x1395   :  { %v2871_v19 = vadd.f32 %v6567_v60, %v2870_v49  ;;  %3114 = vmatpush.msrb.mxu2 %v6197_v27 }
0x1396   :  { %v2019_v44 = vadd.f32 1e-05, %v2015_v14 }
0x1397   :  { %v2875_v22 = vsel %vm2874_vm7, %v6567_v60, %v2871_v19  ;;  %v2010_v42 = vpop.xlane.xlu2 %2009  ;;  %v6196_v19 = vld [vmem:[%s8816_s1 + $0x390] sm:$0xff] }
0x1398   :  { %v2880_v18 = vsel %vm2877_vm8, %v2879_v56, %v2875_v22  ;;  %6568 = vrsqrt.f32 %v2019_v44  ;;  %v2012_v40 = vmul.f32 %v2010_v42, %v7036_v63  ;;  %vm2027_vm10 = vweird.f32 %v2019_v44  ;;  %v6202_v56 = vld [vmem:[%s8816_s1 + $0x3b0] sm:$0xff]  ;;  %3115 = vmatpush.msrb.mxu2 %v6196_v19  ;;  %v6215_v22 = vld [vmem:[%s8816_s1 + $0x3f8] sm:$0xff] }
0x1399   :  { %v2881_v34 = vmul.f32 %v7759_v15, %v2880_v18  ;;  %v6432_v15 = vld [vmem:[%s8817_s2 + $0x5d] ss:$0 sm:$0xff]  ;;  %v6195_v18 = vld [vmem:[%s8816_s1 + $0x388] sm:$0xff]  ;;  %3143 = vmatpush.msrb.mxu3 %v6202_v56 }
0x139a   :  { %v2016_v54 = vsub.f32 %v2012_v40, %v2014_v37  ;;  %v6201_v40 = vld [vmem:[%s8816_s1 + $0x3a8] sm:$0xff]  ;;  %3116 = vmatpush.msrb.mxu2 %v6195_v18 }
0x139b   :  { %6169 = vmatmul.msk.f32.vlgmr.msra.gmra.mxu1 %vm315_vm2, %v2881_v34  ;;  %v6208_v34 = vld [vmem:[%s8816_s1 + $0x3d0] sm:$0xff]  ;;  %3144 = vmatpush.msrb.mxu3 %v6201_v40 }
0x139c   :  { %v2020_v21 = vadd.f32 1e-05, %v2016_v54  ;;  %3198 = vmatpush.msra.mxu1 %v6215_v22  ;;  %v6214_v54 = vld [vmem:[%s8816_s1 + $0x3f0] sm:$0xff] }
0x139e   :  { %v6569_v7 = vpop.eup %6568  ;;  %6570 = vrsqrt.f32 %v2020_v21  ;;  %vm2037_vm13 = vweird.f32 %v2020_v21  ;;  %3199 = vmatpush.msra.mxu1 %v6214_v54 }
0x139f   :  { %v2022_v24 = vmul.f32 %v6569_v7, %v2019_v44  ;;  %vm2028_vm9 = vweird.f32 %v6569_v7  ;;  %v6209_v44 = vld [vmem:[%s8816_s1 + $0x3d8] sm:$0xff] }
0x13a0   :  { %vm2029_vm11 = vmor %vm2027_vm10, %vm2028_vm9  ;;  %3170 = vmatpush.msrb.mxu0 %v6209_v44  ;;  %v7980_v44 = vld [vmem:[%s8817_s2 + $0x40] sm:$0xf] }
0x13a1   :  { %v2023_v36 = vmul.f32 %v6569_v7, %v2022_v24  ;;  %v6200_v24 = vld [vmem:[%s8816_s1 + $0x3a0] sm:$0xff]  ;;  %v2974_v22 = vperm.slane %v7980_v44, 0  ;;  %v3038_v54 = vperm.slane %v7980_v44, 2 }
0x13a2   :  { %3171 = vmatpush.msrb.mxu0 %v6208_v34  ;;  %3145 = vmatpush.msrb.mxu3 %v6200_v24 }
0x13a3   :  { %v2024_v20 = vmul.f32 0.5, %v2023_v36  ;;  %6192 = vmatmul.msk.f32.vlgmr.msrb.gmra.mxu1 %vm63_vm1, %v7810_v16  ;;  %v6207_v36 = vld [vmem:[%s8816_s1 + $0x3c8] sm:$0xff] }
0x13a4   :  { %v6571_v26 = vpop.eup %6570  ;;  %3172 = vmatpush.msrb.mxu0 %v6207_v36 }
0x13a5   :  { %v2025_v17 = vsub.f32 1.5, %v2024_v20  ;;  %v2032_v35 = vmul.f32 %v6571_v26, %v2020_v21  ;;  %vm2038_vm12 = vweird.f32 %v6571_v26 }
0x13a6   :  { %vm2039_vm14 = vmor %vm2037_vm13, %vm2038_vm12 }
0x13a7   :  { %v2026_v58 = vmul.f32 %v6569_v7, %v2025_v17  ;;  %v2033_v50 = vmul.f32 %v6571_v26, %v2032_v35 }
0x13a9   :  { %v2030_v57 = vsel %vm2029_vm11, %v6569_v7, %v2026_v58  ;;  %v2034_v23 = vmul.f32 0.5, %v2033_v50  ;;  %v6194_v7 = vld [vmem:[%s8816_s1 + $0x380] sm:$0xff] }
0x13aa   :  { %v2041_v29 = vmul.f32 %v2030_v57, %v2017_v62  ;;  %3117 = vmatpush.msrb.mxu2 %v6194_v7  ;;  %v6206_v58 = vld [vmem:[%s8816_s1 + $0x3c0] sm:$0xff] }
0x13ab   :  { %v2035_v31 = vsub.f32 1.5, %v2034_v23  ;;  %v6212_v50 = vld [vmem:[%s8816_s1 + $0x3e0] sm:$0xff]  ;;  %3173 = vmatpush.msrb.mxu0 %v6206_v58 }
0x13ac   :  { %v2045_v39 = vmul.f32 %v6432_v15, %v2041_v29 }
0x13ad   :  { %v2036_v46 = vmul.f32 %v6571_v26, %v2035_v31 }
0x13ae   :  { %v7846_v8 = vadd.f32 %v6433_v30, %v2045_v39 }
0x13af   :  { %v2040_v51 = vsel %vm2039_vm14, %v6571_v26, %v2036_v46  ;;  %v6213_v26 = vld [vmem:[%s8816_s1 + $0x3e8] sm:$0xff] }
0x13b0   :  { %v2051_v59 = vsel %vm63_vm1, %v7846_v8, 0.0  ;;  %v2042_v52 = vmul.f32 %v2040_v51, %v2018_v45  ;;  %v2059_v43 = vmul.f32 %v7846_v8, %v7846_v8  ;;  %3200 = vmatpush.msra.mxu1 %v6213_v26 }
0x13b1   :  { %2052 = vadd.xlane.f32.xlu2 %v2051_v59 }
0x13b2   :  { %v2046_v47 = vmul.f32 %v6432_v15, %v2042_v52  ;;  %v2061_v10 = vsel %vm63_vm1, %v2059_v43, 0.0  ;;  %3201 = vmatpush.msra.mxu1 %v6212_v50 }
0x13b4   :  { %v7850_v48 = vadd.f32 %v6433_v30, %v2046_v47 }
0x13b6   :  { %v2060_v3 = vmul.f32 %v7850_v48, %v7850_v48 }
0x13b8   :  { %v2064_v12 = vsel %vm63_vm1, %v2060_v3, 0.0 }
0x13b9   :  { %2065 = vadd.xlane.f32.xlu2 %v2064_v12  ;;  %v3027_v18 = vpop.f32.mrf.mxu3 }
0x1418   :  { %v2902_v33 = vpop.f32.mrf.mxu1 }
0x1419   :  { %v2905_v60 = vadd.f32 %v2902_v33, %v2834_v2 }
0x141b   :  { %v2909_v5 = vadd.f32 %v7725_v28, %v2905_v60 }
0x141d   :  { %v7858_v55 = vadd.f32 %v2909_v5, %v7407_v25  ;;  %v2054_v25 = vsel %vm63_vm1, %v7850_v48, 0.0 }
0x141f   :  { %v2915_v61 = vsel %vm63_vm1, %v7858_v55, 0.0  ;;  %v2921_v0 = vmul.f32 %v7858_v55, %v7858_v55 }
0x1420   :  { %2916 = vadd.xlane.f32.xlu0 %v2915_v61  ;;  %v7998_v24 = vpop.f32.mrf.mxu1 }
0x1421   :  { %v2925_v9 = vsel %vm63_vm1, %v2921_v0, 0.0 }
0x1422   :  { %2926 = vadd.xlane.f32.xlu1 %v2925_v9 }
0x1424   :  { %v2053_v28 = vpop.xlane.xlu2 %2052 }
0x1425   :  { %v7895_v42 = vmul.f32 %v2053_v28, %v7036_v63 }
0x1427   :  { %v2069_v17 = vmul.f32 %v7895_v42, %v7895_v42  ;;  %v2073_v28 = vsub.f32 %v7846_v8, %v7895_v42  ;;  %v3009_v42 = vperm.slane %v7980_v44, 1 }
0x1428   :  { %2062 = vadd.xlane.f32.xlu0 %v2061_v10 }
0x1429   :  { %v3028_v34 = vadd.f32 %v3027_v18, %v3009_v42 }
0x142a   :  { %2055 = vadd.xlane.f32.xlu1 %v2054_v25 }
0x142c   :  { %v2066_v15 = vpop.xlane.xlu2 %2065 }
0x142d   :  { %v2068_v29 = vmul.f32 %v2066_v15, %v7036_v63 }
0x1493   :  { %v2917_v6 = vpop.xlane.xlu0 %2916 }
0x1494   :  { %v7871_v13 = vmul.f32 %v2917_v6, %v7036_v63 }
0x1495   :  { %v2927_v49 = vpop.xlane.xlu1 %2926 }
0x1496   :  { %v2931_v32 = vmul.f32 %v7871_v13, %v7871_v13  ;;  %v2929_v14 = vmul.f32 %v2927_v49, %v7036_v63  ;;  %v2935_v2 = vsub.f32 %v7858_v55, %v7871_v13  ;;  %v6434_v55 = vld [vmem:[%s8817_s2 + $0x5f] ss:$0 sm:$0xff] }
0x1498   :  { %v2933_v37 = vsub.f32 %v2929_v14, %v2931_v32 }
0x149a   :  { %v2937_v21 = vadd.f32 1e-05, %v2933_v37  ;;  %v2998_v37 = vpop.f32.mrf.mxu2 }
0x149b   :  { %v2063_v20 = vpop.xlane.xlu0 %2062  ;;  %v2999_v40 = vadd.f32 %v2998_v37, %v2974_v22 }
0x149c   :  { %6572 = vrsqrt.f32 %v2937_v21  ;;  %v2067_v35 = vmul.f32 %v2063_v20, %v7036_v63  ;;  %vm2954_vm0 = vweird.f32 %v2937_v21 }
0x149d   :  { %v2056_v62 = vpop.xlane.xlu1 %2055 }
0x149e   :  { %v2071_v57 = vsub.f32 %v2067_v35, %v2069_v17  ;;  %v2058_v23 = vmul.f32 %v2056_v62, %v7036_v63 }
0x14a0   :  { %v2075_v30 = vadd.f32 1e-05, %v2071_v57  ;;  %v2070_v31 = vmul.f32 %v2058_v23, %v2058_v23  ;;  %v2074_v32 = vsub.f32 %v7850_v48, %v2058_v23 }
0x14a2   :  { %v6573_v39 = vpop.eup %6572  ;;  %6574 = vrsqrt.f32 %v2075_v30  ;;  %v2072_v46 = vsub.f32 %v2068_v29, %v2070_v31  ;;  %vm2083_vm5 = vweird.f32 %v2075_v30 }
0x14a3   :  { %v2949_v45 = vmul.f32 %v6573_v39, %v2937_v21  ;;  %vm2955_vm15 = vweird.f32 %v6573_v39  ;;  %v3056_v21 = vpop.f32.mrf.mxu0 }
0x14a4   :  { %v2076_v51 = vadd.f32 1e-05, %v2072_v46  ;;  %vm2956_vm3 = vmor %vm2954_vm0, %vm2955_vm15  ;;  %v3057_v7 = vadd.f32 %v3056_v21, %v3038_v54 }
0x14a5   :  { %v2950_v59 = vmul.f32 %v6573_v39, %v2949_v45 }
0x14a6   :  { %6576 = vrsqrt.f32 %v2076_v51  ;;  %vm2093_vm8 = vweird.f32 %v2076_v51 }
0x14a7   :  { %v2951_v52 = vmul.f32 0.5, %v2950_v59 }
0x14a8   :  { %v6575_v47 = vpop.eup %6574 }
0x14a9   :  { %v2952_v3 = vsub.f32 1.5, %v2951_v52  ;;  %v2078_v12 = vmul.f32 %v6575_v47, %v2075_v30  ;;  %vm2084_vm4 = vweird.f32 %v6575_v47 }
0x14aa   :  { %vm2085_vm6 = vmor %vm2083_vm5, %vm2084_vm4 }
0x14ab   :  { %v2953_v38 = vmul.f32 %v6573_v39, %v2952_v3  ;;  %v2079_v11 = vmul.f32 %v6575_v47, %v2078_v12 }
0x14ac   :  { %v6577_v41 = vpop.eup %6576 }
0x14ad   :  { %v2957_v33 = vsel %vm2956_vm3, %v6573_v39, %v2953_v38  ;;  %v2080_v60 = vmul.f32 0.5, %v2079_v11  ;;  %v2088_v5 = vmul.f32 %v6577_v41, %v2076_v51  ;;  %vm2094_vm7 = vweird.f32 %v6577_v41 }
0x14ae   :  { %v2959_v61 = vmul.f32 %v2957_v33, %v2935_v2  ;;  %vm2095_vm9 = vmor %vm2093_vm8, %vm2094_vm7 }
0x14af   :  { %v2081_v0 = vsub.f32 1.5, %v2080_v60  ;;  %v2089_v9 = vmul.f32 %v6577_v41, %v2088_v5 }
0x14b0   :  { %v2963_v43 = vmul.f32 %v7801_v53, %v2959_v61  ;;  %v6435_v53 = vld [vmem:[%s8817_s2 + $0x60] ss:$0 sm:$0xff] }
0x14b1   :  { %v2082_v10 = vmul.f32 %v6575_v47, %v2081_v0  ;;  %v2090_v25 = vmul.f32 0.5, %v2089_v9 }
0x14b2   :  { %v7941_v6 = vadd.f32 %v7806_v1, %v2963_v43 }
0x14b3   :  { %v2086_v13 = vsel %vm2085_vm6, %v6575_v47, %v2082_v10  ;;  %v2091_v27 = vsub.f32 1.5, %v2090_v25 }
0x14b4   :  { %v2097_v49 = vmul.f32 %v2086_v13, %v2073_v28  ;;  %6175 = vmatmul.msk.f32.gmra.mxu2 %vm63_vm1, %v7941_v6  ;;  %6181 = vmatmul.msk.f32.gmra.mxu3 %vm63_vm1, %v7941_v6 }
0x14b5   :  { %v2092_v8 = vmul.f32 %v6577_v41, %v2091_v27  ;;  %6187 = vmatmul.msk.f32.gmra.mxu0 %vm63_vm1, %v7941_v6  ;;  %6193 = vmatmul.msk.f32.gmra.mxu1 %vm63_vm1, %v7941_v6 }
0x14b6   :  { %v2101_v1 = vmul.f32 %v6434_v55, %v2097_v49 }
0x14b7   :  { %v2096_v4 = vsel %vm2095_vm9, %v6577_v41, %v2092_v8 }
0x14b8   :  { %v7955_v14 = vadd.f32 %v6435_v53, %v2101_v1  ;;  %v2098_v19 = vmul.f32 %v2096_v4, %v2074_v32 }
0x14ba   :  { %6218 = vmatpush.xpose.msk.msra.mxu2 %vm63_vm1, %v7955_v14  ;;  %6220 = vmatpush.xpose.msk.msra.mxu3 %vm63_vm1, %v7955_v14  ;;  %v2102_v48 = vmul.f32 %v6434_v55, %v2098_v19 }
0x14bc   :  { %6198 = vmatmul.msk.f32.vlgmr.msrb.gmra.mxu2 %vm63_vm1, %v7955_v14  ;;  %6204 = vmatmul.msk.f32.vlgmr.msrb.gmra.mxu3 %vm63_vm1, %v7955_v14  ;;  %v7971_v56 = vadd.f32 %v6435_v53, %v2102_v48  ;;  %v3067_v48 = vperm.slane %v7980_v44, 3 }
0x14bd   :  { %6210 = vmatmul.msk.f32.vlgmr.msrb.gmra.mxu0 %vm63_vm1, %v7955_v14  ;;  %6216 = vmatmul.msk.f32.vlgmr.msra.gmra.mxu1 %vm63_vm1, %v7955_v14 }
0x14be   :  { %6224 = vmatpush.xpose.msk.msrb.mxu2 %vm63_vm1, %v7955_v14 }
0x14c4   :  { %6199 = vmatmul.msk.f32.gmra.mxu2 %vm63_vm1, %v7971_v56  ;;  %6205 = vmatmul.msk.f32.gmra.mxu3 %vm63_vm1, %v7971_v56 }
0x14c5   :  { %6211 = vmatmul.msk.f32.gmra.mxu0 %vm63_vm1, %v7971_v56  ;;  %6217 = vmatmul.msk.f32.gmra.mxu1 %vm63_vm1, %v7971_v56 }
0x14cc   :  { %6219 = vmatmul.msk.f32.vlgmr.msra.gmra.mxu2 %vm63_vm1, %v2999_v40  ;;  %6221 = vmatmul.msk.f32.vlgmr.msra.gmra.mxu3 %vm63_vm1, %v3028_v34  ;;  %v3086_v34 = vadd.f32 %v7998_v24, %v3067_v48 }
0x14cd   :  { %6230 = vmatpush.xpose.msk.msra.mxu2 %vm63_vm1, %v7971_v56 }
0x14d4   :  { %6225 = vmatmul.msk.f32.vlgmr.msrb.gmra.mxu2 %vm63_vm1, %v3057_v7 }
0x14d5   :  { %6236 = vmatpush.xpose.msk.msrb.mxu2 %vm63_vm1, %v7971_v56 }
0x1532   :  { %v3059_v36 = vpop.f32.mrf.mxu0  ;;  %v8000_v20 = vpop.f32.mrf.mxu1 }
0x1533   :  { %v3060_v62 = vadd.f32 %v3059_v36, %v3038_v54 }
0x1537   :  { %v3001_v26 = vpop.f32.mrf.mxu2  ;;  %v8002_v17 = vpop.f32.mrf.mxu3 }
0x1538   :  { %v3002_v35 = vadd.f32 %v3001_v26, %v2974_v22  ;;  %v3031_v7 = vadd.f32 %v8002_v17, %v3009_v42 }
0x153a   :  { %v3175_v58 = vpop.f32.mrf.mxu0  ;;  %6231 = vmatmul.msk.f32.vlgmr.msra.gmra.mxu2 %vm63_vm1, %v3002_v35  ;;  %v3203_v57 = vpop.f32.mrf.mxu1 }
0x153b   :  { %3414 = vmatpush.msrb.mxu3 %v3175_v58 }
0x153d   :  { %6232 = vmatpush.xpose.msk.msra.mxu3 %vm63_vm1, %v7971_v56 }
0x153f   :  { %v3119_v50 = vpop.f32.mrf.mxu2  ;;  %v3147_v15 = vpop.f32.mrf.mxu3 }
0x1540   :  { %3321 = vmatpush.msra.mxu0 %v3147_v15  ;;  %3344 = vmatpush.msrb.mxu1 %v3119_v50 }
0x1542   :  { %6227 = vmatpush.xpose.msk.msrb.mxu0 %vm63_vm1, %v7955_v14  ;;  %3485 = vmatpush.msra.mxu1 %v3203_v57  ;;  %v3178_v21 = vpop.f32.mrf.mxu0 }
0x1543   :  { %6237 = vmatmul.msk.f32.vlgmr.msrb.gmra.mxu2 %vm63_vm1, %v3060_v62 }
0x1547   :  { %v8010_v23 = vpop.f32.mrf.mxu2  ;;  %v3150_v29 = vpop.f32.mrf.mxu3 }
0x154f   :  { %v8012_v30 = vpop.f32.mrf.mxu2  ;;  %v3276_v31 = vpop.f32.mrf.mxu3 }
0x1550   :  { %v3279_v39 = vsel %vm315_vm2, %v3276_v31, -inf  ;;  %v3232_v33 = vsel %vm315_vm2, %v8012_v30, -inf }
0x1551   :  { %3280 = vmax.xlane.f32.xlu2 %v3279_v39 }
0x1557   :  { %v3369_v46 = vpop.f32.mrf.mxu2 }
0x1558   :  { %v3372_v45 = vsel %vm315_vm2, %v3369_v46, -inf }
0x1559   :  { %3373 = vmax.xlane.f32.xlu0 %v3372_v45 }
0x15bd   :  { %v3511_v15 = vpop.f32.mrf.mxu2 }
0x15be   :  { %v3514_v62 = vsel %vm315_vm2, %v3511_v15, -inf }
0x15c4   :  { %v3281_v51 = vpop.xlane.xlu2 %3280 }
0x15c5   :  { %v3282_v59 = vsub.f32 %v3276_v31, %v3281_v51 }
0x15c7   :  { %v3283_v52 = vmul.f32 1.442695, %v3282_v59 }
0x15c9   :  { %6578 = vpow2.f32 %v3283_v52 }
0x15cc   :  { %v3374_v47 = vpop.xlane.xlu0 %3373 }
0x15cd   :  { %v3375_v3 = vsub.f32 %v3369_v46, %v3374_v47 }
0x15cf   :  { %v6579_v12 = vpop.eup %6578  ;;  %v3376_v38 = vmul.f32 1.442695, %v3375_v3 }
0x15d0   :  { %v3285_v11 = vsel %vm315_vm2, %v6579_v12, 0.0 }
0x15d1   :  { %6580 = vpow2.f32 %v3376_v38  ;;  %3286 = vadd.xlane.f32.xlu0 %v3285_v11 }
0x15d7   :  { %v6581_v41 = vpop.eup %6580 }
0x15d8   :  { %v3378_v2 = vsel %vm315_vm2, %v6581_v41, 0.0 }
0x15d9   :  { %3379 = vadd.xlane.f32.xlu1 %v3378_v2  ;;  %3233 = vmax.xlane.f32.xlu0 %v3232_v33  ;;  %v3651_v2 = vpop.f32.mrf.mxu2 }
0x1644   :  { %v3287_v60 = vpop.xlane.xlu0 %3286 }
0x1645   :  { %6582 = vrcp.f32 %v3287_v60  ;;  %v3299_v43 = vand.u32 2147483648, %v3287_v60  ;;  %v3297_v25 = vand.u32 2147483647, %v3287_v60  ;;  %vm3293_vm11 = vweird.f32 %v3287_v60 }
0x1647   :  { %v3300_v13 = vor.u32 1.1754944e-38, %v3299_v43  ;;  %vm3298_vm13 = vcmp.eq.f32.partialorder %v3297_v25, 8.507059e+37 }
0x164b   :  { %v6583_v5 = vpop.eup %6582 }
0x164c   :  { %v3289_v61 = vmul.f32 %v6583_v5, %v3287_v60  ;;  %v3380_v0 = vpop.xlane.xlu1 %3379  ;;  %vm3294_vm10 = vweird.f32 %v6583_v5  ;;  %v3234_v57 = vpop.xlane.xlu0 %3233 }
0x164d   :  { %6584 = vrcp.f32 %v3380_v0  ;;  %vm3295_vm12 = vmor %vm3293_vm11, %vm3294_vm10  ;;  %v3392_v4 = vand.u32 2147483648, %v3380_v0  ;;  %v3390_v19 = vand.u32 2147483647, %v3380_v0  ;;  %vm3386_vm15 = vweird.f32 %v3380_v0 }
0x164e   :  { %v3290_v9 = vsub.f32 1.0, %v3289_v61 }
0x164f   :  { %v3393_v37 = vor.u32 1.1754944e-38, %v3392_v4  ;;  %vm3391_vm3 = vcmp.eq.f32.partialorder %v3390_v19, 8.507059e+37 }
0x1650   :  { %v3291_v10 = vmul.f32 %v6583_v5, %v3290_v9 }
0x1652   :  { %v3292_v28 = vadd.f32 %v6583_v5, %v3291_v10 }
0x1653   :  { %v6585_v55 = vpop.eup %6584 }
0x1654   :  { %v3296_v27 = vsel %vm3295_vm12, %v6583_v5, %v3292_v28  ;;  %v3382_v49 = vmul.f32 %v6585_v55, %v3380_v0  ;;  %vm3387_vm14 = vweird.f32 %v6585_v55  ;;  %v3654_v5 = vsel %vm315_vm2, %v3651_v2, -inf }
0x1655   :  { %v3301_v53 = vsel %vm3298_vm13, %v3300_v13, %v3296_v27  ;;  %vm3388_vm0 = vmor %vm3386_vm15, %vm3387_vm14 }
0x1656   :  { %v3302_v8 = vmul.f32 %v6579_v12, %v3301_v53  ;;  %v3383_v1 = vsub.f32 1.0, %v3382_v49 }
0x1658   :  { %v3384_v32 = vmul.f32 %v6585_v55, %v3383_v1  ;;  %6222 = vmatmul.msk.f32.vlgmr.msra.gmra.mxu0 %vm315_vm2, %v3302_v8 }
0x1659   :  { %3603 = vmatpush.msra.mxu0 %v3150_v29  ;;  %v3235_v29 = vsub.f32 %v8012_v30, %v3234_v57 }
0x165a   :  { %v3385_v22 = vadd.f32 %v6585_v55, %v3384_v32 }
0x165b   :  { %v3236_v39 = vmul.f32 1.442695, %v3235_v29  ;;  %v3089_v29 = vadd.f32 %v8000_v20, %v3067_v48 }
0x165c   :  { %v3389_v18 = vsel %vm3388_vm0, %v6585_v55, %v3385_v22 }
0x165d   :  { %v3394_v40 = vsel %vm3391_vm3, %v3393_v37, %v3389_v18 }
0x165e   :  { %v3395_v54 = vmul.f32 %v6581_v41, %v3394_v40 }
0x1660   :  { %6226 = vmatmul.msk.f32.vlgmr.msrb.gmra.mxu3 %vm315_vm2, %v3395_v54  ;;  %6228 = vmatmul.msk.f32.vlgmr.msrb.gmra.mxu0 %vm63_vm1, %v3086_v34 }
0x1661   :  { %3696 = vmatpush.msrb.mxu3 %v3178_v21  ;;  %6239 = vmatpush.xpose.msk.msrb.mxu0 %vm63_vm1, %v7971_v56 }
0x1668   :  { %6233 = vmatmul.msk.f32.vlgmr.msra.gmra.mxu3 %vm63_vm1, %v3031_v7 }
0x16d5   :  { %v8035_v26 = vpop.f32.mrf.mxu0 }
0x16dd   :  { %v3440_v58 = vpop.f32.mrf.mxu0 }
0x16de   :  { %v3443_v50 = vsel %vm315_vm2, %v3440_v58, -inf }
0x16e3   :  { %v8033_v36 = vpop.f32.mrf.mxu3 }
0x16eb   :  { %v3558_v24 = vpop.f32.mrf.mxu3 }
0x16ec   :  { %v3561_v35 = vsel %vm315_vm2, %v3558_v24, -inf }
0x16ed   :  { %3562 = vmax.xlane.f32.xlu1 %v3561_v35 }
0x16f5   :  { %3444 = vmax.xlane.f32.xlu1 %v3443_v50 }
0x16fd   :  { %3515 = vmax.xlane.f32.xlu1 %v3514_v62 }
0x1760   :  { %v3563_v42 = vpop.xlane.xlu1 %3562 }
0x1761   :  { %v3564_v17 = vsub.f32 %v3558_v24, %v3563_v42 }
0x1763   :  { %v3565_v31 = vmul.f32 1.442695, %v3564_v17 }
0x1765   :  { %6586 = vpow2.f32 %v3565_v31 }
0x1766   :  { %6588 = vpow2.f32 %v3236_v39 }
0x1768   :  { %v3445_v46 = vpop.xlane.xlu1 %3444 }
0x1769   :  { %v3446_v45 = vsub.f32 %v3440_v58, %v3445_v46 }
0x176b   :  { %v6587_v51 = vpop.eup %6586  ;;  %v3447_v59 = vmul.f32 1.442695, %v3446_v45 }
0x176c   :  { %v3567_v52 = vsel %vm315_vm2, %v6587_v51, 0.0  ;;  %v8042_v3 = vpop.eup %6588 }
0x176d   :  { %6590 = vpow2.f32 %v3447_v59  ;;  %3568 = vadd.xlane.f32.xlu2 %v3567_v52  ;;  %v3238_v41 = vsel %vm315_vm2, %v8042_v3, 0.0 }
0x1770   :  { %v3516_v47 = vpop.xlane.xlu1 %3515 }
0x1771   :  { %v3517_v12 = vsub.f32 %v3511_v15, %v3516_v47 }
0x1773   :  { %v8044_v38 = vpop.eup %6590  ;;  %v3518_v11 = vmul.f32 1.442695, %v3517_v12 }
0x1774   :  { %v3449_v30 = vsel %vm315_vm2, %v8044_v38, 0.0 }
0x1775   :  { %6592 = vpow2.f32 %v3518_v11  ;;  %3450 = vadd.xlane.f32.xlu0 %v3449_v30  ;;  %3239 = vadd.xlane.f32.xlu2 %v3238_v41  ;;  %v3206_v41 = vpop.f32.mrf.mxu1 }
0x177b   :  { %v8050_v33 = vpop.eup %6592 }
0x177c   :  { %v3520_v60 = vsel %vm315_vm2, %v8050_v33, 0.0 }
0x177d   :  { %3521 = vadd.xlane.f32.xlu1 %v3520_v60  ;;  %3655 = vmax.xlane.f32.xlu2 %v3654_v5 }
0x17e0   :  { %v3569_v61 = vpop.xlane.xlu2 %3568 }
0x17e1   :  { %6594 = vrcp.f32 %v3569_v61  ;;  %v3581_v28 = vand.u32 2147483648, %v3569_v61  ;;  %v3579_v13 = vand.u32 2147483647, %v3569_v61  ;;  %vm3575_vm5 = vweird.f32 %v3569_v61 }
0x17e3   :  { %v3582_v53 = vor.u32 1.1754944e-38, %v3581_v28  ;;  %vm3580_vm7 = vcmp.eq.f32.partialorder %v3579_v13, 8.507059e+37 }
0x17e7   :  { %v6595_v0 = vpop.eup %6594 }
0x17e8   :  { %v3571_v9 = vmul.f32 %v6595_v0, %v3569_v61  ;;  %v3240_v43 = vpop.xlane.xlu2 %3239  ;;  %v3451_v10 = vpop.xlane.xlu0 %3450  ;;  %vm3576_vm4 = vweird.f32 %v6595_v0 }
0x17e9   :  { %6596 = vrcp.f32 %v3240_v43  ;;  %vm3577_vm6 = vmor %vm3575_vm5, %vm3576_vm4  ;;  %v3250_v34 = vand.u32 2147483647, %v3240_v43  ;;  %v3252_v54 = vand.u32 2147483648, %v3240_v43  ;;  %vm3246_vm9 = vweird.f32 %v3240_v43 }
0x17ea   :  { %v3572_v25 = vsub.f32 1.0, %v3571_v9  ;;  %6598 = vrcp.f32 %v3451_v10  ;;  %v3463_v39 = vand.u32 2147483648, %v3451_v10  ;;  %vm3457_vm13 = vweird.f32 %v3451_v10 }
0x17eb   :  { %vm3251_vm11 = vcmp.eq.f32.partialorder %v3250_v34, 8.507059e+37  ;;  %v3253_v62 = vor.u32 1.1754944e-38, %v3252_v54  ;;  %v3461_v45 = vand.u32 2147483647, %v3451_v10 }
0x17ec   :  { %v3573_v55 = vmul.f32 %v6595_v0, %v3572_v25  ;;  %v3464_v12 = vor.u32 1.1754944e-38, %v3463_v39 }
0x17ed   :  { %vm3462_vm15 = vcmp.eq.f32.partialorder %v3461_v45, 8.507059e+37 }
0x17ee   :  { %v3574_v27 = vadd.f32 %v6595_v0, %v3573_v55 }
0x17ef   :  { %v6597_v49 = vpop.eup %6596 }
0x17f0   :  { %v6599_v8 = vpop.eup %6598  ;;  %v3578_v1 = vsel %vm3577_vm6, %v6595_v0, %v3574_v27  ;;  %v3242_v4 = vmul.f32 %v6597_v49, %v3240_v43  ;;  %v3522_v32 = vpop.xlane.xlu1 %3521  ;;  %vm3247_vm8 = vweird.f32 %v6597_v49 }
0x17f1   :  { %v3656_v19 = vpop.xlane.xlu2 %3655  ;;  %v3583_v22 = vsel %vm3580_vm7, %v3582_v53, %v3578_v1  ;;  %v3453_v37 = vmul.f32 %v6599_v8, %v3451_v10  ;;  %6600 = vrcp.f32 %v3522_v32  ;;  %vm3248_vm10 = vmor %vm3246_vm9, %vm3247_vm8  ;;  %vm3458_vm12 = vweird.f32 %v6599_v8 }
0x17f2   :  { %v3584_v18 = vmul.f32 %v6587_v51, %v3583_v22  ;;  %v3243_v40 = vsub.f32 1.0, %v3242_v4  ;;  %v3657_v7 = vsub.f32 %v3651_v2, %v3656_v19  ;;  %vm3459_vm14 = vmor %vm3457_vm13, %vm3458_vm12  ;;  %vm3528_vm3 = vweird.f32 %v3522_v32 }
0x17f3   :  { %v3454_v21 = vsub.f32 1.0, %v3453_v37  ;;  %v3532_v30 = vand.u32 2147483647, %v3522_v32 }
0x17f4   :  { %v3244_v24 = vmul.f32 %v6597_v49, %v3243_v40  ;;  %6234 = vmatmul.msk.f32.vlgmr.msra.gmra.mxu0 %vm315_vm2, %v3584_v18  ;;  %v3658_v58 = vmul.f32 1.442695, %v3657_v7 }
0x17f5   :  { %v3455_v35 = vmul.f32 %v6599_v8, %v3454_v21  ;;  %vm3533_vm5 = vcmp.eq.f32.partialorder %v3532_v30, 8.507059e+37 }
0x17f6   :  { %v3245_v50 = vadd.f32 %v6597_v49, %v3244_v24  ;;  %6602 = vpow2.f32 %v3658_v58  ;;  %v6245_v24 = vld [vmem:[%s8816_s1 + $0x698] sm:$0xff] }
0x17f7   :  { %v6601_v15 = vpop.eup %6600  ;;  %v3456_v42 = vadd.f32 %v6599_v8, %v3455_v35  ;;  %3860 = vmatpush.msra.mxu2 %v6245_v24 }
0x17f8   :  { %v3249_v57 = vsel %vm3248_vm10, %v6597_v49, %v3245_v50  ;;  %v3524_v17 = vmul.f32 %v6601_v15, %v3522_v32  ;;  %vm3529_vm0 = vweird.f32 %v6601_v15  ;;  %v6243_v50 = vld [vmem:[%s8816_s1 + $0x688] sm:$0xff] }
0x17f9   :  { %v3254_v31 = vsel %vm3251_vm11, %v3253_v62, %v3249_v57  ;;  %v3460_v59 = vsel %vm3459_vm14, %v6599_v8, %v3456_v42  ;;  %vm3530_vm4 = vmor %vm3528_vm3, %vm3529_vm0  ;;  %v8076_v8 = vld [vmem:[%s8817_s2 + $0x44] ss:$0 sm:$0xff] }
0x17fa   :  { %v3255_v46 = vmul.f32 %v8042_v3, %v3254_v31  ;;  %v3525_v51 = vsub.f32 1.0, %v3524_v17  ;;  %v3465_v20 = vsel %vm3462_vm15, %v3464_v12, %v3460_v59  ;;  %v3534_v3 = vand.u32 2147483648, %v3522_v32 }
0x17fb   :  { %v3466_v11 = vmul.f32 %v8044_v38, %v3465_v20 }
0x17fc   :  { %v3526_v52 = vmul.f32 %v6601_v15, %v3525_v51  ;;  %6223 = vmatmul.msk.f32.vlgmr.msrb.gmra.mxu1 %vm315_vm2, %v3255_v46  ;;  %6240 = vmatmul.msk.f32.vlgmr.msrb.gmra.mxu0 %vm63_vm1, %v3089_v29  ;;  %v6603_v47 = vpop.eup %6602  ;;  %v3535_v60 = vor.u32 1.1754944e-38, %v3534_v3 }
0x17fd   :  { %3626 = vmatpush.msrb.mxu1 %v8010_v23  ;;  %v3660_v44 = vsel %vm315_vm2, %v6603_v47, 0.0 }
0x17fe   :  { %3661 = vadd.xlane.f32.xlu2 %v3660_v44  ;;  %v3527_v48 = vadd.f32 %v6601_v15, %v3526_v52  ;;  %v8101_v44 = vld [vmem:[%s8817_s2 + $0x63] ss:$0 sm:$0xff] }
0x1800   :  { %v3531_v2 = vsel %vm3530_vm4, %v6601_v15, %v3527_v48  ;;  %v6242_v15 = vld [vmem:[%s8816_s1 + $0x680] sm:$0xff] }
0x1801   :  { %v3536_v23 = vsel %vm3533_vm5, %v3535_v60, %v3531_v2  ;;  %v8106_v48 = vld [vmem:[%s8817_s2 + $0x64] ss:$0 sm:$0xff] }
0x1802   :  { %v3537_v5 = vmul.f32 %v8050_v33, %v3536_v23 }
0x1804   :  { %6229 = vmatmul.msk.f32.vlgmr.msra.gmra.mxu1 %vm315_vm2, %v3466_v11 }
0x1805   :  { %3767 = vmatpush.msra.mxu1 %v3206_v41  ;;  %v6251_v41 = vld [vmem:[%s8816_s1 + $0x6b8] sm:$0xff] }
0x1806   :  { %3898 = vmatpush.msra.mxu3 %v6251_v41  ;;  %v6262_v41 = vld [vmem:[%s8816_s1 + $0x430] sm:$0xff] }
0x180c   :  { %6235 = vmatmul.msk.f32.vlgmr.msrb.gmra.mxu1 %vm315_vm2, %v3537_v5 }
0x1871   :  { %v8068_v61 = vpop.f32.mrf.mxu0  ;;  %v3662_v0 = vpop.xlane.xlu2 %3661 }
0x1872   :  { %6604 = vrcp.f32 %v3662_v0  ;;  %v3674_v13 = vand.u32 2147483648, %v3662_v0  ;;  %v3672_v33 = vand.u32 2147483647, %v3662_v0  ;;  %vm3668_vm7 = vweird.f32 %v3662_v0 }
0x1874   :  { %v3675_v1 = vor.u32 1.1754944e-38, %v3674_v13  ;;  %vm3673_vm9 = vcmp.eq.f32.partialorder %v3672_v33, 8.507059e+37  ;;  %v6250_v13 = vld [vmem:[%s8816_s1 + $0x6b0] sm:$0xff]  ;;  %v6248_v33 = vld [vmem:[%s8816_s1 + $0x6a0] sm:$0xff] }
0x1875   :  { %3899 = vmatpush.msra.mxu3 %v6250_v13  ;;  %v6279_v13 = vld [vmem:[%s8816_s1 + $0x488] sm:$0xff] }
0x1878   :  { %v6605_v38 = vpop.eup %6604 }
0x1879   :  { %v3346_v9 = vpop.f32.mrf.mxu1  ;;  %v3722_v43 = vpop.f32.mrf.mxu0  ;;  %v3664_v10 = vmul.f32 %v6605_v38, %v3662_v0  ;;  %vm3669_vm6 = vweird.f32 %v6605_v38 }
0x187a   :  { %v3725_v25 = vsel %vm315_vm2, %v3722_v43, -inf  ;;  %v3347_v55 = vadd.f32 %v3346_v9, %v8035_v26  ;;  %vm3670_vm8 = vmor %vm3668_vm7, %vm3669_vm6 }
0x187b   :  { %3726 = vmax.xlane.f32.xlu0 %v3725_v25  ;;  %v3665_v28 = vsub.f32 1.0, %v3664_v10 }
0x187c   :  { %v3419_v53 = vadd.f32 %v8033_v36, %v3347_v55 }
0x187d   :  { %v3666_v27 = vmul.f32 %v6605_v38, %v3665_v28 }
0x187f   :  { %v3667_v49 = vadd.f32 %v6605_v38, %v3666_v27  ;;  %v6249_v27 = vld [vmem:[%s8816_s1 + $0x6a8] sm:$0xff] }
0x1880   :  { %3900 = vmatpush.msra.mxu3 %v6249_v27  ;;  %v6285_v27 = vld [vmem:[%s8816_s1 + $0x4a8] sm:$0xff] }
0x1881   :  { %v3487_v4 = vpop.f32.mrf.mxu1  ;;  %v3671_v32 = vsel %vm3670_vm8, %v6605_v38, %v3667_v49  ;;  %v8127_v49 = vld [vmem:[%s8817_s2 + $0x53] ss:$0 sm:$0xff] }
0x1882   :  { %v3490_v19 = vadd.f32 %v3487_v4, %v3419_v53  ;;  %v3676_v26 = vsel %vm3673_vm9, %v3675_v1, %v3671_v32  ;;  %3901 = vmatpush.msra.mxu3 %v6248_v33  ;;  %v6291_v33 = vld [vmem:[%s8816_s1 + $0x4c8] sm:$0xff] }
0x1883   :  { %v3677_v22 = vmul.f32 %v6603_v47, %v3676_v26 }
0x1884   :  { %v3775_v37 = vadd.f32 %v8076_v8, %v3490_v19 }
0x1885   :  { %6238 = vmatmul.msk.f32.vlgmr.msrb.gmra.mxu3 %vm315_vm2, %v3677_v22 }
0x1886   :  { %v3777_v18 = vadd.f32 %v3775_v37, %v7810_v16  ;;  %v6244_v16 = vld [vmem:[%s8816_s1 + $0x690] sm:$0xff] }
0x1887   :  { %3861 = vmatpush.msra.mxu2 %v6244_v16 }
0x1888   :  { %v3779_v36 = vsel %vm63_vm1, %v3777_v18, 0.0  ;;  %v3787_v40 = vmul.f32 %v3777_v18, %v3777_v18 }
0x1889   :  { %3780 = vadd.xlane.f32.xlu1 %v3779_v36  ;;  %3862 = vmatpush.msra.mxu2 %v6243_v50  ;;  %v3628_v32 = vpop.f32.mrf.mxu1 }
0x188a   :  { %v3789_v34 = vsel %vm63_vm1, %v3787_v40, 0.0  ;;  %v3629_v26 = vadd.f32 %v3628_v32, %v8068_v61 }
0x188b   :  { %3790 = vadd.xlane.f32.xlu2 %v3789_v34  ;;  %3863 = vmatpush.msra.mxu2 %v6242_v15 }
0x18ee   :  { %v3727_v54 = vpop.xlane.xlu0 %3726 }
0x18ef   :  { %v3728_v21 = vsub.f32 %v3722_v43, %v3727_v54 }
0x18f1   :  { %v3729_v7 = vmul.f32 1.442695, %v3728_v21 }
0x18f3   :  { %6606 = vpow2.f32 %v3729_v7  ;;  %v8139_v7 = vld [vmem:[%s8817_s2 + $0x54] ss:$0 sm:$0xff] }
0x18f9   :  { %v6607_v35 = vpop.eup %6606 }
0x18fa   :  { %v3731_v58 = vsel %vm315_vm2, %v6607_v35, 0.0 }
0x18fb   :  { %3732 = vadd.xlane.f32.xlu0 %v3731_v58 }
0x18fc   :  { %v3781_v62 = vpop.xlane.xlu1 %3780 }
0x18fd   :  { %v3785_v57 = vmul.f32 %v3781_v62, %v7036_v63 }
0x18fe   :  { %v3791_v42 = vpop.xlane.xlu2 %3790 }
0x18ff   :  { %v3797_v17 = vmul.f32 %v3785_v57, %v3785_v57  ;;  %v3795_v29 = vmul.f32 %v3791_v42, %v7036_v63  ;;  %v3801_v12 = vsub.f32 %v3777_v18, %v3785_v57 }
0x1901   :  { %v3799_v31 = vsub.f32 %v3795_v29, %v3797_v17 }
0x1903   :  { %v3803_v39 = vadd.f32 1e-05, %v3799_v31 }
0x1905   :  { %6608 = vrsqrt.f32 %v3803_v39  ;;  %vm3811_vm11 = vweird.f32 %v3803_v39 }
0x1908   :  { %v3698_v19 = vpop.f32.mrf.mxu3 }
0x1909   :  { %v3701_v22 = vadd.f32 %v3698_v19, %v3629_v26  ;;  %v6290_v19 = vld [vmem:[%s8816_s1 + $0x4c0] sm:$0xff] }
0x190b   :  { %v6609_v46 = vpop.eup %6608 }
0x190c   :  { %v3806_v45 = vmul.f32 %v6609_v46, %v3803_v39  ;;  %vm3812_vm10 = vweird.f32 %v6609_v46 }
0x190d   :  { %vm3813_vm12 = vmor %vm3811_vm11, %vm3812_vm10 }
0x190e   :  { %v3807_v51 = vmul.f32 %v6609_v46, %v3806_v45 }
0x1910   :  { %v3808_v59 = vmul.f32 0.5, %v3807_v51 }
0x1912   :  { %v3809_v52 = vsub.f32 1.5, %v3808_v59 }
0x1914   :  { %v3810_v47 = vmul.f32 %v6609_v46, %v3809_v52 }
0x1916   :  { %v3814_v20 = vsel %vm3813_vm12, %v6609_v46, %v3810_v47 }
0x1917   :  { %v3825_v3 = vmul.f32 %v3814_v20, %v3801_v12  ;;  %v6257_v12 = vld [vmem:[%s8816_s1 + $0x418] sm:$0xff] }
0x1918   :  { %v6263_v20 = vld [vmem:[%s8816_s1 + $0x438] sm:$0xff]  ;;  %3992 = vmatpush.msra.mxu0 %v6257_v12 }
0x1919   :  { %v3829_v11 = vmul.f32 %v8101_v44, %v3825_v3  ;;  %v6269_v3 = vld [vmem:[%s8816_s1 + $0x458] sm:$0xff]  ;;  %4021 = vmatpush.msrb.mxu1 %v6263_v20 }
0x191a   :  { %4050 = vmatpush.msrb.mxu2 %v6269_v3  ;;  %v6299_v3 = vld [vmem:[%s8816_s1 + $0x4f8] sm:$0xff] }
0x191b   :  { %v3833_v30 = vadd.f32 %v8106_v48, %v3829_v11  ;;  %4022 = vmatpush.msrb.mxu1 %v6262_v41  ;;  %v6297_v41 = vld [vmem:[%s8816_s1 + $0x4e8] sm:$0xff] }
0x191d   :  { %6246 = vmatmul.msk.f32.vlgmr.msra.gmra.mxu2 %vm63_vm1, %v3833_v30 }
0x196e   :  { %v3733_v2 = vpop.xlane.xlu0 %3732 }
0x196f   :  { %6610 = vrcp.f32 %v3733_v2  ;;  %v3745_v0 = vand.u32 2147483648, %v3733_v2  ;;  %v3743_v9 = vand.u32 2147483647, %v3733_v2  ;;  %vm3739_vm14 = vweird.f32 %v3733_v2 }
0x1971   :  { %v3746_v10 = vor.u32 1.1754944e-38, %v3745_v0  ;;  %vm3744_vm0 = vcmp.eq.f32.partialorder %v3743_v9, 8.507059e+37  ;;  %v6260_v0 = vld [vmem:[%s8816_s1 + $0x420] sm:$0xff]  ;;  %v6281_v9 = vld [vmem:[%s8816_s1 + $0x498] sm:$0xff] }
0x1975   :  { %v6611_v60 = vpop.eup %6610 }
0x1976   :  { %v3735_v23 = vmul.f32 %v6611_v60, %v3733_v2  ;;  %vm3740_vm13 = vweird.f32 %v6611_v60  ;;  %v6268_v2 = vld [vmem:[%s8816_s1 + $0x450] sm:$0xff] }
0x1977   :  { %vm3741_vm15 = vmor %vm3739_vm14, %vm3740_vm13  ;;  %4051 = vmatpush.msrb.mxu2 %v6268_v2 }
0x1978   :  { %v3736_v5 = vsub.f32 1.0, %v3735_v23  ;;  %v6261_v23 = vld [vmem:[%s8816_s1 + $0x428] sm:$0xff] }
0x1979   :  { %4023 = vmatpush.msrb.mxu1 %v6261_v23 }
0x197a   :  { %v3737_v38 = vmul.f32 %v6611_v60, %v3736_v5  ;;  %v6267_v5 = vld [vmem:[%s8816_s1 + $0x448] sm:$0xff] }
0x197b   :  { %4052 = vmatpush.msrb.mxu2 %v6267_v5  ;;  %4024 = vmatpush.msrb.mxu1 %v6260_v0 }
0x197c   :  { %v3738_v43 = vadd.f32 %v6611_v60, %v3737_v38  ;;  %v6266_v38 = vld [vmem:[%s8816_s1 + $0x440] sm:$0xff] }
0x197d   :  { %4053 = vmatpush.msrb.mxu2 %v6266_v38 }
0x197e   :  { %v3742_v25 = vsel %vm3741_vm15, %v6611_v60, %v3738_v43  ;;  %v6287_v43 = vld [vmem:[%s8816_s1 + $0x4b8] sm:$0xff] }
0x197f   :  { %v3747_v28 = vsel %vm3744_vm0, %v3746_v10, %v3742_v25  ;;  %v6293_v10 = vld [vmem:[%s8816_s1 + $0x4d8] sm:$0xff]  ;;  %v6280_v25 = vld [vmem:[%s8816_s1 + $0x490] sm:$0xff] }
0x1980   :  { %v3748_v55 = vmul.f32 %v6607_v35, %v3747_v28  ;;  %v6286_v28 = vld [vmem:[%s8816_s1 + $0x4b0] sm:$0xff]  ;;  %4163 = vmatpush.msra.mxu2 %v6293_v10 }
0x1982   :  { %6241 = vmatmul.msk.f32.vlgmr.msra.gmra.mxu1 %vm315_vm2, %v3748_v55  ;;  %v6292_v55 = vld [vmem:[%s8816_s1 + $0x4d0] sm:$0xff] }
0x1983   :  { %4135 = vmatpush.msra.mxu1 %v6287_v43  ;;  %4164 = vmatpush.msra.mxu2 %v6292_v55 }
0x1985   :  { %4136 = vmatpush.msra.mxu1 %v6286_v28  ;;  %4165 = vmatpush.msra.mxu2 %v6291_v33 }
0x1987   :  { %4137 = vmatpush.msra.mxu1 %v6285_v27  ;;  %4166 = vmatpush.msra.mxu2 %v6290_v19 }
0x19a0   :  { %v3865_v53 = vpop.f32.mrf.mxu2 }
0x19a1   :  { %v3866_v1 = vadd.f32 %v8127_v49, %v3865_v53 }
0x19a3   :  { %v3871_v4 = vmax.f32 %v3866_v1, 0.0  ;;  %v6278_v1 = vld [vmem:[%s8816_s1 + $0x480] sm:$0xff] }
0x19a5   :  { %6252 = vmatmul.msk.f32.vlgmr.msra.gmra.mxu3 %vm63_vm1, %v3871_v4  ;;  %v6284_v4 = vld [vmem:[%s8816_s1 + $0x4a0] sm:$0xff] }
0x19a6   :  { %4138 = vmatpush.msra.mxu1 %v6284_v4 }
0x19ff   :  { %v3769_v37 = vpop.f32.mrf.mxu1 }
0x1a00   :  { %v3772_v18 = vadd.f32 %v3769_v37, %v3701_v22 }
0x1a02   :  { %v3776_v36 = vadd.f32 %v8076_v8, %v3772_v18 }
0x1a04   :  { %v3778_v40 = vadd.f32 %v3776_v36, %v7941_v6 }
0x1a06   :  { %v3782_v34 = vsel %vm63_vm1, %v3778_v40, 0.0  ;;  %v3788_v54 = vmul.f32 %v3778_v40, %v3778_v40 }
0x1a07   :  { %3783 = vadd.xlane.f32.xlu0 %v3782_v34 }
0x1a08   :  { %v3792_v21 = vsel %vm63_vm1, %v3788_v54, 0.0 }
0x1a09   :  { %3793 = vadd.xlane.f32.xlu1 %v3792_v21 }
0x1a28   :  { %v3903_v61 = vpop.f32.mrf.mxu3 }
0x1a29   :  { %v3904_v24 = vadd.f32 %v8139_v7, %v3903_v61 }
0x1a2b   :  { %v8142_v35 = vadd.f32 %v3904_v24, %v3833_v30  ;;  %v6256_v30 = vld [vmem:[%s8816_s1 + $0x410] sm:$0xff] }
0x1a2c   :  { %3993 = vmatpush.msra.mxu0 %v6256_v30 }
0x1a2d   :  { %v3911_v6 = vsel %vm63_vm1, %v8142_v35, 0.0  ;;  %v3919_v8 = vmul.f32 %v8142_v35, %v8142_v35 }
0x1a2e   :  { %3912 = vadd.xlane.f32.xlu2 %v3911_v6 }
0x1a2f   :  { %v3921_v16 = vsel %vm63_vm1, %v3919_v8, 0.0  ;;  %v6441_v8 = vld [vmem:[%s8817_s2 + $0x65] ss:$0 sm:$0xff] }
0x1a30   :  { %3922 = vadd.xlane.f32.xlu0 %v3921_v16 }
0x1a7a   :  { %v3784_v58 = vpop.xlane.xlu0 %3783 }
0x1a7b   :  { %v3786_v50 = vmul.f32 %v3784_v58, %v7036_v63  ;;  %v6442_v58 = vld [vmem:[%s8817_s2 + $0x66] ss:$0 sm:$0xff] }
0x1a7c   :  { %v3794_v15 = vpop.xlane.xlu1 %3793 }
0x1a7d   :  { %v3798_v62 = vmul.f32 %v3786_v50, %v3786_v50  ;;  %v3796_v57 = vmul.f32 %v3794_v15, %v7036_v63  ;;  %v3802_v59 = vsub.f32 %v3778_v40, %v3786_v50 }
0x1a7f   :  { %v3800_v42 = vsub.f32 %v3796_v57, %v3798_v62  ;;  %v6274_v57 = vld [vmem:[%s8816_s1 + $0x470] sm:$0xff] }
0x1a81   :  { %v3804_v17 = vadd.f32 1e-05, %v3800_v42  ;;  %v6273_v42 = vld [vmem:[%s8816_s1 + $0x468] sm:$0xff] }
0x1a83   :  { %6612 = vrsqrt.f32 %v3804_v17  ;;  %vm3821_vm4 = vweird.f32 %v3804_v17 }
0x1a89   :  { %v6613_v29 = vpop.eup %6612 }
0x1a8a   :  { %v3816_v31 = vmul.f32 %v6613_v29, %v3804_v17  ;;  %vm3822_vm3 = vweird.f32 %v6613_v29  ;;  %v6272_v17 = vld [vmem:[%s8816_s1 + $0x460] sm:$0xff] }
0x1a8b   :  { %vm3823_vm5 = vmor %vm3821_vm4, %vm3822_vm3 }
0x1a8c   :  { %v3817_v39 = vmul.f32 %v6613_v29, %v3816_v31 }
0x1a8e   :  { %v3818_v46 = vmul.f32 0.5, %v3817_v39 }
0x1a90   :  { %v3819_v45 = vsub.f32 1.5, %v3818_v46 }
0x1a92   :  { %v3820_v51 = vmul.f32 %v6613_v29, %v3819_v45 }
0x1a94   :  { %v3824_v52 = vsel %vm3823_vm5, %v6613_v29, %v3820_v51 }
0x1a95   :  { %v3826_v47 = vmul.f32 %v3824_v52, %v3802_v59 }
0x1a97   :  { %v3830_v11 = vmul.f32 %v8101_v44, %v3826_v47  ;;  %v6255_v44 = vld [vmem:[%s8816_s1 + $0x408] sm:$0xff] }
0x1a98   :  { %3994 = vmatpush.msra.mxu0 %v6255_v44 }
0x1a99   :  { %v8171_v60 = vadd.f32 %v8106_v48, %v3830_v11  ;;  %v6254_v48 = vld [vmem:[%s8816_s1 + $0x400] sm:$0xff] }
0x1a9a   :  { %3995 = vmatpush.msra.mxu0 %v6254_v48 }
0x1a9b   :  { %6247 = vmatmul.msk.f32.gmra.mxu2 %vm63_vm1, %v8171_v60 }
0x1a9c   :  { %4107 = vmatpush.msrb.mxu0 %v6281_v9 }
0x1a9e   :  { %4108 = vmatpush.msrb.mxu0 %v6280_v25 }
0x1aa0   :  { %4109 = vmatpush.msrb.mxu0 %v6279_v13  ;;  %v8309_v13 = vld [vmem:[%s8817_s2 + $0x45] sm:$0xf] }
0x1aa1   :  { %v3913_v53 = vpop.xlane.xlu2 %3912  ;;  %v3973_v27 = vperm.slane %v8309_v13, 0  ;;  %v4008_v33 = vperm.slane %v8309_v13, 1  ;;  %v4037_v4 = vperm.slane %v8309_v13, 2 }
0x1aa2   :  { %v3917_v32 = vmul.f32 %v3913_v53, %v7036_v63  ;;  %4110 = vmatpush.msrb.mxu0 %v6278_v1 }
0x1aa3   :  { %v3923_v26 = vpop.xlane.xlu0 %3922 }
0x1aa4   :  { %v3929_v22 = vmul.f32 %v3917_v32, %v3917_v32  ;;  %v3927_v37 = vmul.f32 %v3923_v26, %v7036_v63  ;;  %v3933_v6 = vsub.f32 %v8142_v35, %v3917_v32  ;;  %v6275_v35 = vld [vmem:[%s8816_s1 + $0x478] sm:$0xff] }
0x1aa5   :  { %4079 = vmatpush.msrb.mxu3 %v6275_v35 }
0x1aa6   :  { %v3931_v18 = vsub.f32 %v3927_v37, %v3929_v22 }
0x1aa7   :  { %4080 = vmatpush.msrb.mxu3 %v6274_v57 }
0x1aa8   :  { %v3935_v36 = vadd.f32 1e-05, %v3931_v18 }
0x1aa9   :  { %4081 = vmatpush.msrb.mxu3 %v6273_v42 }
0x1aaa   :  { %6614 = vrsqrt.f32 %v3935_v36  ;;  %vm3943_vm7 = vweird.f32 %v3935_v36 }
0x1aab   :  { %4082 = vmatpush.msrb.mxu3 %v6272_v17 }
0x1aad   :  { %4191 = vmatpush.msra.mxu3 %v6299_v3 }
0x1ab0   :  { %v6615_v40 = vpop.eup %6614 }
0x1ab1   :  { %v3938_v34 = vmul.f32 %v6615_v40, %v3935_v36  ;;  %vm3944_vm6 = vweird.f32 %v6615_v40 }
0x1ab2   :  { %vm3945_vm8 = vmor %vm3943_vm7, %vm3944_vm6 }
0x1ab3   :  { %v3939_v54 = vmul.f32 %v6615_v40, %v3938_v34 }
0x1ab5   :  { %v3940_v21 = vmul.f32 0.5, %v3939_v54 }
0x1ab7   :  { %v3941_v61 = vsub.f32 1.5, %v3940_v21 }
0x1ab9   :  { %v3942_v24 = vmul.f32 %v6615_v40, %v3941_v61 }
0x1abb   :  { %v3946_v16 = vsel %vm3945_vm8, %v6615_v40, %v3942_v24 }
0x1abc   :  { %v3957_v50 = vmul.f32 %v3946_v16, %v3933_v6 }
0x1abe   :  { %v3961_v15 = vmul.f32 %v6441_v8, %v3957_v50 }
0x1ac0   :  { %v8238_v62 = vadd.f32 %v6442_v58, %v3961_v15 }
0x1ac2   :  { %6258 = vmatmul.msk.f32.vlgmr.msra.gmra.mxu0 %vm63_vm1, %v8238_v62  ;;  %6264 = vmatmul.msk.f32.vlgmr.msrb.gmra.mxu1 %vm63_vm1, %v8238_v62 }
0x1ac3   :  { %6270 = vmatmul.msk.f32.vlgmr.msrb.gmra.mxu2 %vm63_vm1, %v8238_v62  ;;  %6302 = vmatpush.xpose.msk.msra.mxu0 %vm63_vm1, %v8238_v62 }
0x1ac4   :  { %6304 = vmatpush.xpose.msk.msrb.mxu1 %vm63_vm1, %v8238_v62  ;;  %6308 = vmatpush.xpose.msk.msrb.mxu2 %vm63_vm1, %v8238_v62 }
0x1b1e   :  { %v3868_v29 = vpop.f32.mrf.mxu2 }
0x1b1f   :  { %v3869_v31 = vadd.f32 %v8127_v49, %v3868_v29 }
0x1b21   :  { %v3872_v39 = vmax.f32 %v3869_v31, 0.0 }
0x1b23   :  { %6253 = vmatmul.msk.f32.gmra.mxu3 %vm63_vm1, %v3872_v39 }
0x1b2b   :  { %6276 = vmatmul.msk.f32.vlgmr.msrb.gmra.mxu3 %vm63_vm1, %v8238_v62 }
0x1b3f   :  { %v3997_v53 = vpop.f32.mrf.mxu0  ;;  %v4026_v1 = vpop.f32.mrf.mxu1 }
0x1b40   :  { %v3998_v19 = vadd.f32 %v3997_v53, %v3973_v27  ;;  %v4027_v26 = vadd.f32 %v4026_v1, %v4008_v33  ;;  %v4066_v53 = vperm.slane %v8309_v13, 3 }
0x1b46   :  { %v4055_v32 = vpop.f32.mrf.mxu2 }
0x1b47   :  { %v4056_v22 = vadd.f32 %v4055_v32, %v4037_v4 }
0x1ba6   :  { %v3906_v46 = vpop.f32.mrf.mxu3 }
0x1ba7   :  { %v3907_v45 = vadd.f32 %v8139_v7, %v3906_v46  ;;  %v6298_v7 = vld [vmem:[%s8816_s1 + $0x4f0] sm:$0xff] }
0x1ba8   :  { %4192 = vmatpush.msra.mxu3 %v6298_v7 }
0x1ba9   :  { %v3910_v51 = vadd.f32 %v3907_v45, %v8171_v60  ;;  %v6296_v60 = vld [vmem:[%s8816_s1 + $0x4e0] sm:$0xff] }
0x1baa   :  { %4193 = vmatpush.msra.mxu3 %v6297_v41 }
0x1bab   :  { %v3914_v59 = vsel %vm63_vm1, %v3910_v51, 0.0  ;;  %v3920_v52 = vmul.f32 %v3910_v51, %v3910_v51 }
0x1bac   :  { %3915 = vadd.xlane.f32.xlu1 %v3914_v59  ;;  %4194 = vmatpush.msra.mxu3 %v6296_v60 }
0x1bad   :  { %v3924_v47 = vsel %vm63_vm1, %v3920_v52, 0.0 }
0x1bae   :  { %3925 = vadd.xlane.f32.xlu2 %v3924_v47  ;;  %v8329_v37 = vpop.f32.mrf.mxu3 }
0x1c1f   :  { %v3916_v12 = vpop.xlane.xlu1 %3915 }
0x1c20   :  { %v3918_v49 = vmul.f32 %v3916_v12, %v7036_v63 }
0x1c21   :  { %v3926_v20 = vpop.xlane.xlu2 %3925 }
0x1c22   :  { %v3930_v11 = vmul.f32 %v3918_v49, %v3918_v49  ;;  %v3928_v30 = vmul.f32 %v3926_v20, %v7036_v63  ;;  %v3934_v43 = vsub.f32 %v3910_v51, %v3918_v49 }
0x1c24   :  { %v3932_v2 = vsub.f32 %v3928_v30, %v3930_v11 }
0x1c26   :  { %v3936_v44 = vadd.f32 1e-05, %v3932_v2 }
0x1c28   :  { %6616 = vrsqrt.f32 %v3936_v44  ;;  %vm3953_vm10 = vweird.f32 %v3936_v44 }
0x1c2e   :  { %v6617_v23 = vpop.eup %6616 }
0x1c2f   :  { %v3948_v5 = vmul.f32 %v6617_v23, %v3936_v44  ;;  %vm3954_vm9 = vweird.f32 %v6617_v23 }
0x1c30   :  { %vm3955_vm11 = vmor %vm3953_vm10, %vm3954_vm9 }
0x1c31   :  { %v3949_v48 = vmul.f32 %v6617_v23, %v3948_v5 }
0x1c33   :  { %v3950_v0 = vmul.f32 0.5, %v3949_v48 }
0x1c35   :  { %v3951_v38 = vsub.f32 1.5, %v3950_v0 }
0x1c37   :  { %v3952_v9 = vmul.f32 %v6617_v23, %v3951_v38 }
0x1c39   :  { %v3956_v10 = vsel %vm3955_vm11, %v6617_v23, %v3952_v9 }
0x1c3a   :  { %v3958_v25 = vmul.f32 %v3956_v10, %v3934_v43 }
0x1c3c   :  { %v3962_v28 = vmul.f32 %v6441_v8, %v3958_v25 }
0x1c3e   :  { %v8286_v55 = vadd.f32 %v6442_v58, %v3962_v28 }
0x1c40   :  { %6259 = vmatmul.msk.f32.gmra.mxu0 %vm63_vm1, %v8286_v55  ;;  %6265 = vmatmul.msk.f32.gmra.mxu1 %vm63_vm1, %v8286_v55 }
0x1c41   :  { %6271 = vmatmul.msk.f32.gmra.mxu2 %vm63_vm1, %v8286_v55  ;;  %6277 = vmatmul.msk.f32.gmra.mxu3 %vm63_vm1, %v8286_v55 }
0x1c48   :  { %6282 = vmatmul.msk.f32.vlgmr.msrb.gmra.mxu0 %vm63_vm1, %v8238_v62  ;;  %6288 = vmatmul.msk.f32.vlgmr.msra.gmra.mxu1 %vm63_vm1, %v8238_v62 }
0x1c49   :  { %6294 = vmatmul.msk.f32.vlgmr.msra.gmra.mxu2 %vm63_vm1, %v8238_v62  ;;  %6300 = vmatmul.msk.f32.vlgmr.msra.gmra.mxu3 %vm63_vm1, %v8238_v62 }
0x1c4a   :  { %6314 = vmatpush.xpose.msk.msra.mxu2 %vm63_vm1, %v8286_v55 }
0x1c50   :  { %6283 = vmatmul.msk.f32.gmra.mxu0 %vm63_vm1, %v8286_v55  ;;  %6289 = vmatmul.msk.f32.gmra.mxu1 %vm63_vm1, %v8286_v55 }
0x1c51   :  { %6295 = vmatmul.msk.f32.gmra.mxu2 %vm63_vm1, %v8286_v55  ;;  %6301 = vmatmul.msk.f32.gmra.mxu3 %vm63_vm1, %v8286_v55 }
0x1c58   :  { %6303 = vmatmul.msk.f32.vlgmr.msra.gmra.mxu0 %vm63_vm1, %v3998_v19  ;;  %6305 = vmatmul.msk.f32.vlgmr.msrb.gmra.mxu1 %vm63_vm1, %v4027_v26  ;;  %v4085_v26 = vadd.f32 %v8329_v37, %v4066_v53 }
0x1c59   :  { %6309 = vmatmul.msk.f32.vlgmr.msrb.gmra.mxu2 %vm63_vm1, %v4056_v22 }
0x1c5a   :  { %6320 = vmatpush.xpose.msk.msrb.mxu2 %vm63_vm1, %v8286_v55 }
0x1cbd   :  { %v4000_v18 = vpop.f32.mrf.mxu0  ;;  %v8331_v36 = vpop.f32.mrf.mxu1 }
0x1cbe   :  { %v4001_v40 = vadd.f32 %v4000_v18, %v3973_v27  ;;  %v4030_v22 = vadd.f32 %v8331_v36, %v4008_v33 }
0x1cc0   :  { %6315 = vmatmul.msk.f32.vlgmr.msra.gmra.mxu2 %vm63_vm1, %v4001_v40 }
0x1cc4   :  { %v4058_v34 = vpop.f32.mrf.mxu2  ;;  %v8334_v54 = vpop.f32.mrf.mxu3 }
0x1cc5   :  { %v4112_v21 = vpop.f32.mrf.mxu0  ;;  %v4140_v61 = vpop.f32.mrf.mxu1  ;;  %v4059_v24 = vadd.f32 %v4058_v34, %v4037_v4 }
0x1cc6   :  { %4314 = vmatpush.msrb.mxu0 %v4140_v61  ;;  %4337 = vmatpush.msra.mxu1 %v4112_v21 }
0x1cc8   :  { %6311 = vmatpush.xpose.msk.msra.mxu0 %vm63_vm1, %v8238_v62  ;;  %6321 = vmatmul.msk.f32.vlgmr.msrb.gmra.mxu2 %vm63_vm1, %v4059_v24 }
0x1ccc   :  { %v4168_v6 = vpop.f32.mrf.mxu2  ;;  %v4196_v8 = vpop.f32.mrf.mxu3 }
0x1ccd   :  { %4407 = vmatpush.msrb.mxu3 %v4168_v6  ;;  %4478 = vmatpush.msrb.mxu1 %v4196_v8  ;;  %v4143_v16 = vpop.f32.mrf.mxu1  ;;  %v8345_v31 = vpop.f32.mrf.mxu0 }
0x1ccf   :  { %6316 = vmatpush.xpose.msk.msra.mxu3 %vm63_vm1, %v8286_v55 }
0x1cd4   :  { %v8341_v58 = vpop.f32.mrf.mxu2  ;;  %v8367_v18 = vpop.f32.mrf.mxu3 }
0x1cd5   :  { %v4269_v50 = vpop.f32.mrf.mxu1  ;;  %v8348_v52 = vpop.f32.mrf.mxu0 }
0x1cd6   :  { %v4272_v15 = vsel %vm315_vm2, %v4269_v50, -inf  ;;  %v4225_v49 = vsel %vm315_vm2, %v8348_v52, -inf }
0x1cd7   :  { %4273 = vmax.xlane.f32.xlu2 %v4272_v15 }
0x1cdc   :  { %v4362_v35 = vpop.f32.mrf.mxu2 }
0x1cdd   :  { %v4365_v57 = vsel %vm315_vm2, %v4362_v35, -inf }
0x1cde   :  { %4366 = vmax.xlane.f32.xlu0 %v4365_v57 }
0x1d43   :  { %v4504_v6 = vpop.f32.mrf.mxu2 }
0x1d44   :  { %v4507_v8 = vsel %vm315_vm2, %v4504_v6, -inf }
0x1d4a   :  { %v4274_v42 = vpop.xlane.xlu2 %4273 }
0x1d4b   :  { %v4275_v17 = vsub.f32 %v4269_v50, %v4274_v42 }
0x1d4d   :  { %v4276_v29 = vmul.f32 1.442695, %v4275_v17 }
0x1d4f   :  { %6618 = vpow2.f32 %v4276_v29 }
0x1d51   :  { %v4367_v39 = vpop.xlane.xlu0 %4366 }
0x1d52   :  { %v4368_v46 = vsub.f32 %v4362_v35, %v4367_v39 }
0x1d54   :  { %v4369_v45 = vmul.f32 1.442695, %v4368_v46 }
0x1d55   :  { %v6619_v51 = vpop.eup %6618 }
0x1d56   :  { %6620 = vpow2.f32 %v4369_v45  ;;  %v4278_v59 = vsel %vm315_vm2, %v6619_v51, 0.0 }
0x1d57   :  { %4279 = vadd.xlane.f32.xlu0 %v4278_v59 }
0x1d5c   :  { %v6621_v47 = vpop.eup %6620 }
0x1d5d   :  { %v4371_v12 = vsel %vm315_vm2, %v6621_v47, 0.0 }
0x1d5e   :  { %4372 = vadd.xlane.f32.xlu1 %v4371_v12  ;;  %v4644_v12 = vpop.f32.mrf.mxu2 }
0x1d5f   :  { %4226 = vmax.xlane.f32.xlu0 %v4225_v49 }
0x1dca   :  { %v4280_v20 = vpop.xlane.xlu0 %4279 }
0x1dcb   :  { %6622 = vrcp.f32 %v4280_v20  ;;  %v4292_v41 = vand.u32 2147483648, %v4280_v20  ;;  %v4290_v60 = vand.u32 2147483647, %v4280_v20  ;;  %vm4286_vm13 = vweird.f32 %v4280_v20 }
0x1dcd   :  { %v4293_v5 = vor.u32 1.1754944e-38, %v4292_v41  ;;  %vm4291_vm15 = vcmp.eq.f32.partialorder %v4290_v60, 8.507059e+37 }
0x1dd1   :  { %v6623_v3 = vpop.eup %6622  ;;  %v4373_v7 = vpop.xlane.xlu1 %4372 }
0x1dd2   :  { %v4282_v11 = vmul.f32 %v6623_v3, %v4280_v20  ;;  %6624 = vrcp.f32 %v4373_v7  ;;  %vm4287_vm12 = vweird.f32 %v6623_v3  ;;  %v4385_v10 = vand.u32 2147483648, %v4373_v7  ;;  %v4227_v33 = vpop.xlane.xlu0 %4226 }
0x1dd3   :  { %vm4288_vm14 = vmor %vm4286_vm13, %vm4287_vm12  ;;  %v4383_v28 = vand.u32 2147483647, %v4373_v7  ;;  %vm4379_vm3 = vweird.f32 %v4373_v7 }
0x1dd4   :  { %v4283_v30 = vsub.f32 1.0, %v4282_v11  ;;  %v4386_v1 = vor.u32 1.1754944e-38, %v4385_v10 }
0x1dd5   :  { %vm4384_vm5 = vcmp.eq.f32.partialorder %v4383_v28, 8.507059e+37 }
0x1dd6   :  { %v4284_v2 = vmul.f32 %v6623_v3, %v4283_v30 }
0x1dd8   :  { %v6625_v44 = vpop.eup %6624  ;;  %v4285_v23 = vadd.f32 %v6623_v3, %v4284_v2 }
0x1dd9   :  { %v4375_v48 = vmul.f32 %v6625_v44, %v4373_v7  ;;  %vm4380_vm0 = vweird.f32 %v6625_v44 }
0x1dda   :  { %v4289_v0 = vsel %vm4288_vm14, %v6623_v3, %v4285_v23  ;;  %vm4381_vm4 = vmor %vm4379_vm3, %vm4380_vm0  ;;  %v4647_v3 = vsel %vm315_vm2, %v4644_v12, -inf }
0x1ddb   :  { %v4294_v38 = vsel %vm4291_vm15, %v4293_v5, %v4289_v0  ;;  %v4376_v9 = vsub.f32 1.0, %v4375_v48 }
0x1ddc   :  { %v4295_v43 = vmul.f32 %v6619_v51, %v4294_v38 }
0x1ddd   :  { %v4377_v25 = vmul.f32 %v6625_v44, %v4376_v9 }
0x1dde   :  { %6306 = vmatmul.msk.f32.vlgmr.msrb.gmra.mxu0 %vm315_vm2, %v4295_v43 }
0x1ddf   :  { %v4378_v27 = vadd.f32 %v6625_v44, %v4377_v25  ;;  %4596 = vmatpush.msrb.mxu0 %v4143_v16 }
0x1de1   :  { %v4382_v4 = vsel %vm4381_vm4, %v6625_v44, %v4378_v27 }
0x1de2   :  { %v4387_v32 = vsel %vm4384_vm5, %v4386_v1, %v4382_v4 }
0x1de3   :  { %v4388_v19 = vmul.f32 %v6621_v47, %v4387_v32 }
0x1de5   :  { %6310 = vmatmul.msk.f32.vlgmr.msrb.gmra.mxu3 %vm315_vm2, %v4388_v19 }
0x1de6   :  { %4689 = vmatpush.msrb.mxu3 %v8341_v58  ;;  %6312 = vmatmul.msk.f32.vlgmr.msra.gmra.mxu0 %vm63_vm1, %v4085_v26  ;;  %v4228_v58 = vsub.f32 %v8348_v52, %v4227_v33 }
0x1de7   :  { %6323 = vmatpush.xpose.msk.msra.mxu0 %vm63_vm1, %v8286_v55 }
0x1de8   :  { %v4229_v15 = vmul.f32 1.442695, %v4228_v58 }
0x1ded   :  { %6317 = vmatmul.msk.f32.vlgmr.msra.gmra.mxu3 %vm63_vm1, %v4030_v22 }
0x1e5b   :  { %v8371_v37 = vpop.f32.mrf.mxu0 }
0x1e63   :  { %v4433_v61 = vpop.f32.mrf.mxu0 }
0x1e64   :  { %v4436_v24 = vsel %vm315_vm2, %v4433_v61, -inf }
0x1e68   :  { %v8369_v40 = vpop.f32.mrf.mxu3 }
0x1e70   :  { %v4551_v34 = vpop.f32.mrf.mxu3 }
0x1e71   :  { %v4554_v21 = vsel %vm315_vm2, %v4551_v34, -inf }
0x1e72   :  { %4555 = vmax.xlane.f32.xlu1 %v4554_v21 }
0x1e7a   :  { %4437 = vmax.xlane.f32.xlu1 %v4436_v24 }
0x1e82   :  { %4508 = vmax.xlane.f32.xlu1 %v4507_v8 }
0x1ee5   :  { %v4556_v36 = vpop.xlane.xlu1 %4555 }
0x1ee6   :  { %v4557_v16 = vsub.f32 %v4551_v34, %v4556_v36 }
0x1ee8   :  { %v4558_v50 = vmul.f32 1.442695, %v4557_v16 }
0x1eea   :  { %6626 = vpow2.f32 %v4558_v50  ;;  %v4088_v50 = vadd.f32 %v8334_v54, %v4066_v53 }
0x1eeb   :  { %6628 = vpow2.f32 %v4229_v15 }
0x1eed   :  { %v4438_v35 = vpop.xlane.xlu1 %4437 }
0x1eee   :  { %v4439_v57 = vsub.f32 %v4433_v61, %v4438_v35 }
0x1ef0   :  { %v6627_v42 = vpop.eup %6626  ;;  %v4440_v17 = vmul.f32 1.442695, %v4439_v57 }
0x1ef1   :  { %v4560_v29 = vsel %vm315_vm2, %v6627_v42, 0.0  ;;  %v8378_v46 = vpop.eup %6628 }
0x1ef2   :  { %6630 = vpow2.f32 %v4440_v17  ;;  %4561 = vadd.xlane.f32.xlu2 %v4560_v29  ;;  %v4231_v47 = vsel %vm315_vm2, %v8378_v46, 0.0 }
0x1ef5   :  { %v4509_v39 = vpop.xlane.xlu1 %4508 }
0x1ef6   :  { %v4510_v45 = vsub.f32 %v4504_v6, %v4509_v39 }
0x1ef8   :  { %v8380_v51 = vpop.eup %6630  ;;  %v4511_v59 = vmul.f32 1.442695, %v4510_v45 }
0x1ef9   :  { %v4442_v52 = vsel %vm315_vm2, %v8380_v51, 0.0 }
0x1efa   :  { %6632 = vpow2.f32 %v4511_v59  ;;  %4443 = vadd.xlane.f32.xlu0 %v4442_v52  ;;  %4232 = vadd.xlane.f32.xlu2 %v4231_v47 }
0x1f00   :  { %v8386_v49 = vpop.eup %6632 }
0x1f01   :  { %v4513_v20 = vsel %vm315_vm2, %v8386_v49, 0.0 }
0x1f02   :  { %4514 = vadd.xlane.f32.xlu1 %v4513_v20  ;;  %4648 = vmax.xlane.f32.xlu2 %v4647_v3 }
0x1f65   :  { %v4562_v7 = vpop.xlane.xlu2 %4561 }
0x1f66   :  { %6634 = vrcp.f32 %v4562_v7  ;;  %v4574_v44 = vand.u32 2147483648, %v4562_v7  ;;  %v4572_v5 = vand.u32 2147483647, %v4562_v7  ;;  %vm4568_vm7 = vweird.f32 %v4562_v7 }
0x1f68   :  { %v4575_v38 = vor.u32 1.1754944e-38, %v4574_v44  ;;  %vm4573_vm9 = vcmp.eq.f32.partialorder %v4572_v5, 8.507059e+37 }
0x1f6c   :  { %v6635_v11 = vpop.eup %6634 }
0x1f6d   :  { %v4564_v30 = vmul.f32 %v6635_v11, %v4562_v7  ;;  %v4233_v41 = vpop.xlane.xlu2 %4232  ;;  %v4444_v2 = vpop.xlane.xlu0 %4443  ;;  %vm4569_vm6 = vweird.f32 %v6635_v11 }
0x1f6e   :  { %6636 = vrcp.f32 %v4233_v41  ;;  %vm4570_vm8 = vmor %vm4568_vm7, %vm4569_vm6  ;;  %v4243_v19 = vand.u32 2147483647, %v4233_v41  ;;  %v4245_v26 = vand.u32 2147483648, %v4233_v41  ;;  %vm4239_vm11 = vweird.f32 %v4233_v41 }
0x1f6f   :  { %v4565_v60 = vsub.f32 1.0, %v4564_v30  ;;  %6638 = vrcp.f32 %v4444_v2  ;;  %v4456_v35 = vand.u32 2147483648, %v4444_v2  ;;  %vm4450_vm15 = vweird.f32 %v4444_v2 }
0x1f70   :  { %vm4244_vm13 = vcmp.eq.f32.partialorder %v4243_v19, 8.507059e+37  ;;  %v4246_v33 = vor.u32 1.1754944e-38, %v4245_v26 }
0x1f71   :  { %v4566_v23 = vmul.f32 %v6635_v11, %v4565_v60  ;;  %v4457_v59 = vor.u32 1.1754944e-38, %v4456_v35  ;;  %v6352_v35 = vld [vmem:[%s8816_s1 + $0x590] sm:$0xff] }
0x1f73   :  { %v4567_v48 = vadd.f32 %v6635_v11, %v4566_v23 }
0x1f74   :  { %v6637_v0 = vpop.eup %6636 }
0x1f75   :  { %v6639_v9 = vpop.eup %6638  ;;  %v4571_v43 = vsel %vm4570_vm8, %v6635_v11, %v4567_v48  ;;  %v4235_v10 = vmul.f32 %v6637_v0, %v4233_v41  ;;  %v4515_v25 = vpop.xlane.xlu1 %4514  ;;  %vm4240_vm10 = vweird.f32 %v6637_v0 }
0x1f76   :  { %v4649_v28 = vpop.xlane.xlu2 %4648  ;;  %v4576_v27 = vsel %vm4573_vm9, %v4575_v38, %v4571_v43  ;;  %v4446_v1 = vmul.f32 %v6639_v9, %v4444_v2  ;;  %6640 = vrcp.f32 %v4515_v25  ;;  %vm4241_vm12 = vmor %vm4239_vm11, %vm4240_vm10  ;;  %vm4451_vm14 = vweird.f32 %v6639_v9  ;;  %v8413_v38 = vld [vmem:[%s8817_s2 + $0x49] ss:$0 sm:$0xff] }
0x1f77   :  { %v4577_v4 = vmul.f32 %v6627_v42, %v4576_v27  ;;  %v4236_v32 = vsub.f32 1.0, %v4235_v10  ;;  %v4650_v34 = vsub.f32 %v4644_v12, %v4649_v28  ;;  %v4454_v42 = vand.u32 2147483647, %v4444_v2  ;;  %vm4452_vm0 = vmor %vm4450_vm15, %vm4451_vm14 }
0x1f78   :  { %v4447_v22 = vsub.f32 1.0, %v4446_v1  ;;  %vm4521_vm5 = vweird.f32 %v4515_v25  ;;  %v4525_v47 = vand.u32 2147483647, %v4515_v25 }
0x1f79   :  { %v4237_v21 = vmul.f32 %v6637_v0, %v4236_v32  ;;  %6318 = vmatmul.msk.f32.vlgmr.msrb.gmra.mxu0 %vm315_vm2, %v4577_v4  ;;  %v4651_v24 = vmul.f32 1.442695, %v4650_v34  ;;  %vm4455_vm3 = vcmp.eq.f32.partialorder %v4454_v42, 8.507059e+37 }
0x1f7a   :  { %v4448_v61 = vmul.f32 %v6639_v9, %v4447_v22  ;;  %vm4526_vm7 = vcmp.eq.f32.partialorder %v4525_v47, 8.507059e+37  ;;  %v6329_v22 = vld [vmem:[%s8816_s1 + $0x518] sm:$0xff] }
0x1f7b   :  { %v4238_v6 = vadd.f32 %v6637_v0, %v4237_v21  ;;  %6642 = vpow2.f32 %v4651_v24  ;;  %4853 = vmatpush.msra.mxu2 %v6329_v22  ;;  %v6328_v21 = vld [vmem:[%s8816_s1 + $0x510] sm:$0xff]  ;;  %v6327_v24 = vld [vmem:[%s8816_s1 + $0x508] sm:$0xff] }
0x1f7c   :  { %v6641_v8 = vpop.eup %6640  ;;  %v4449_v16 = vadd.f32 %v6639_v9, %v4448_v61  ;;  %v6334_v61 = vld [vmem:[%s8816_s1 + $0x530] sm:$0xff] }
0x1f7d   :  { %v4242_v36 = vsel %vm4241_vm12, %v6637_v0, %v4238_v6  ;;  %v4517_v58 = vmul.f32 %v6641_v8, %v4515_v25  ;;  %vm4522_vm4 = vweird.f32 %v6641_v8  ;;  %4854 = vmatpush.msra.mxu2 %v6328_v21  ;;  %v6333_v6 = vld [vmem:[%s8816_s1 + $0x528] sm:$0xff] }
0x1f7e   :  { %v4247_v15 = vsel %vm4244_vm13, %v4246_v33, %v4242_v36  ;;  %v4453_v29 = vsel %vm4452_vm0, %v6639_v9, %v4449_v16  ;;  %vm4523_vm6 = vmor %vm4521_vm5, %vm4522_vm4  ;;  %v6332_v33 = vld [vmem:[%s8816_s1 + $0x520] sm:$0xff]  ;;  %v6341_v36 = vld [vmem:[%s8816_s1 + $0x558] sm:$0xff] }
0x1f7f   :  { %v4248_v57 = vmul.f32 %v8378_v46, %v4247_v15  ;;  %v4518_v17 = vsub.f32 1.0, %v4517_v58  ;;  %v4458_v54 = vsel %vm4455_vm3, %v4457_v59, %v4453_v29  ;;  %v4527_v46 = vand.u32 2147483648, %v4515_v25  ;;  %4855 = vmatpush.msra.mxu2 %v6327_v24  ;;  %v6353_v16 = vld [vmem:[%s8816_s1 + $0x598] sm:$0xff]  ;;  %4911 = vmatpush.msrb.mxu0 %v6341_v36  ;;  %v6340_v15 = vld [vmem:[%s8816_s1 + $0x550] sm:$0xff]  ;;  %v6351_v29 = vld [vmem:[%s8816_s1 + $0x588] sm:$0xff] }
0x1f80   :  { %v4459_v52 = vmul.f32 %v8380_v51, %v4458_v54  ;;  %v6359_v58 = vld [vmem:[%s8816_s1 + $0x5b8] sm:$0xff]  ;;  %v6338_v59 = vld [vmem:[%s8816_s1 + $0x540] sm:$0xff] }
0x1f81   :  { %v4519_v39 = vmul.f32 %v6641_v8, %v4518_v17  ;;  %6307 = vmatmul.msk.f32.vlgmr.msra.gmra.mxu1 %vm315_vm2, %v4248_v57  ;;  %6324 = vmatmul.msk.f32.vlgmr.msra.gmra.mxu0 %vm63_vm1, %v4088_v50  ;;  %v6643_v45 = vpop.eup %6642  ;;  %v4528_v20 = vor.u32 1.1754944e-38, %v4527_v46  ;;  %v6358_v57 = vld [vmem:[%s8816_s1 + $0x5b0] sm:$0xff]  ;;  %v6339_v17 = vld [vmem:[%s8816_s1 + $0x548] sm:$0xff]  ;;  %v6356_v54 = vld [vmem:[%s8816_s1 + $0x5a0] sm:$0xff] }
0x1f82   :  { %4619 = vmatpush.msra.mxu1 %v8345_v31  ;;  %v4653_v13 = vsel %vm315_vm2, %v6643_v45, 0.0  ;;  %4912 = vmatpush.msrb.mxu0 %v6340_v15 }
0x1f83   :  { %4654 = vadd.xlane.f32.xlu2 %v4653_v13  ;;  %v4520_v53 = vadd.f32 %v6641_v8, %v4519_v39  ;;  %v6357_v39 = vld [vmem:[%s8816_s1 + $0x5a8] sm:$0xff]  ;;  %v6350_v13 = vld [vmem:[%s8816_s1 + $0x580] sm:$0xff] }
0x1f84   :  { %4913 = vmatpush.msrb.mxu0 %v6339_v17  ;;  %v6370_v17 = vld [vmem:[%s8816_s1 + $0x5f0] sm:$0xff] }
0x1f85   :  { %v4524_v12 = vsel %vm4523_vm6, %v6641_v8, %v4520_v53  ;;  %v6326_v8 = vld [vmem:[%s8816_s1 + $0x500] sm:$0xff] }
0x1f86   :  { %v4529_v31 = vsel %vm4526_vm7, %v4528_v20, %v4524_v12  ;;  %4856 = vmatpush.msra.mxu2 %v6326_v8  ;;  %4914 = vmatpush.msrb.mxu0 %v6338_v59  ;;  %v6362_v59 = vld [vmem:[%s8816_s1 + $0x5c0] sm:$0xff] }
0x1f87   :  { %v4530_v3 = vmul.f32 %v8386_v49, %v4529_v31 }
0x1f88   :  { %4968 = vmatpush.msrb.mxu2 %v6353_v16 }
0x1f89   :  { %6313 = vmatmul.msk.f32.vlgmr.msrb.gmra.mxu1 %vm315_vm2, %v4459_v52 }
0x1f8a   :  { %4760 = vmatpush.msrb.mxu1 %v8367_v18  ;;  %4969 = vmatpush.msrb.mxu2 %v6352_v35 }
0x1f8c   :  { %4970 = vmatpush.msrb.mxu2 %v6351_v29  ;;  %v6363_v29 = vld [vmem:[%s8816_s1 + $0x5c8] sm:$0xff] }
0x1f8e   :  { %4971 = vmatpush.msrb.mxu2 %v6350_v13  ;;  %v6368_v13 = vld [vmem:[%s8816_s1 + $0x5e0] sm:$0xff] }
0x1f91   :  { %6319 = vmatmul.msk.f32.vlgmr.msra.gmra.mxu1 %vm315_vm2, %v4530_v3 }
0x1ff6   :  { %v8405_v7 = vpop.f32.mrf.mxu0  ;;  %v4655_v11 = vpop.xlane.xlu2 %4654 }
0x1ff7   :  { %6644 = vrcp.f32 %v4655_v11  ;;  %v4667_v23 = vand.u32 2147483648, %v4655_v11  ;;  %v4665_v49 = vand.u32 2147483647, %v4655_v11  ;;  %vm4661_vm9 = vweird.f32 %v4655_v11 }
0x1ff9   :  { %v4668_v9 = vor.u32 1.1754944e-38, %v4667_v23  ;;  %vm4666_vm11 = vcmp.eq.f32.partialorder %v4665_v49, 8.507059e+37 }
0x1ffd   :  { %v6645_v51 = vpop.eup %6644 }
0x1ffe   :  { %v4339_v30 = vpop.f32.mrf.mxu1  ;;  %v4715_v41 = vpop.f32.mrf.mxu0  ;;  %v4657_v2 = vmul.f32 %v6645_v51, %v4655_v11  ;;  %vm4662_vm8 = vweird.f32 %v6645_v51 }
0x1fff   :  { %v4718_v60 = vsel %vm315_vm2, %v4715_v41, -inf  ;;  %v4340_v18 = vadd.f32 %v4339_v30, %v8371_v37  ;;  %vm4663_vm10 = vmor %vm4661_vm9, %vm4662_vm8 }
0x2000   :  { %4719 = vmax.xlane.f32.xlu0 %v4718_v60  ;;  %v4658_v44 = vsub.f32 1.0, %v4657_v2  ;;  %v8495_v60 = vld [vmem:[%s8817_s2 + $0x67] ss:$0 sm:$0xff] }
0x2001   :  { %v4412_v0 = vadd.f32 %v8369_v40, %v4340_v18  ;;  %v8500_v18 = vld [vmem:[%s8817_s2 + $0x68] ss:$0 sm:$0xff] }
0x2002   :  { %v4659_v5 = vmul.f32 %v6645_v51, %v4658_v44 }
0x2004   :  { %v4660_v48 = vadd.f32 %v6645_v51, %v4659_v5 }
0x2006   :  { %v4480_v43 = vpop.f32.mrf.mxu1  ;;  %v4664_v10 = vsel %vm4663_vm10, %v6645_v51, %v4660_v48  ;;  %v6347_v48 = vld [vmem:[%s8816_s1 + $0x578] sm:$0xff] }
0x2007   :  { %v4483_v25 = vadd.f32 %v4480_v43, %v4412_v0  ;;  %v4669_v37 = vsel %vm4666_vm11, %v4668_v9, %v4664_v10  ;;  %v6346_v0 = vld [vmem:[%s8816_s1 + $0x570] sm:$0xff]  ;;  %4940 = vmatpush.msra.mxu1 %v6347_v48  ;;  %v6345_v9 = vld [vmem:[%s8816_s1 + $0x568] sm:$0xff]  ;;  %v6344_v43 = vld [vmem:[%s8816_s1 + $0x560] sm:$0xff] }
0x2008   :  { %v4670_v28 = vmul.f32 %v6643_v45, %v4669_v37 }
0x2009   :  { %v4768_v27 = vadd.f32 %v8413_v38, %v4483_v25  ;;  %4941 = vmatpush.msra.mxu1 %v6346_v0 }
0x200a   :  { %6322 = vmatmul.msk.f32.vlgmr.msrb.gmra.mxu3 %vm315_vm2, %v4670_v28 }
0x200b   :  { %v8417_v1 = vadd.f32 %v4768_v27, %v8238_v62  ;;  %v6335_v62 = vld [vmem:[%s8816_s1 + $0x538] sm:$0xff]  ;;  %4942 = vmatpush.msra.mxu1 %v6345_v9 }
0x200c   :  { %4882 = vmatpush.msra.mxu3 %v6335_v62 }
0x200d   :  { %v4772_v40 = vsel %vm63_vm1, %v8417_v1, 0.0  ;;  %v4780_v4 = vmul.f32 %v8417_v1, %v8417_v1  ;;  %4943 = vmatpush.msra.mxu1 %v6344_v43 }
0x200e   :  { %4773 = vadd.xlane.f32.xlu1 %v4772_v40  ;;  %4883 = vmatpush.msra.mxu3 %v6334_v61  ;;  %v4621_v62 = vpop.f32.mrf.mxu1 }
0x200f   :  { %v4782_v32 = vsel %vm63_vm1, %v4780_v4, 0.0  ;;  %v4622_v21 = vadd.f32 %v4621_v62, %v8405_v7  ;;  %v6365_v7 = vld [vmem:[%s8816_s1 + $0x5d8] sm:$0xff] }
0x2010   :  { %4783 = vadd.xlane.f32.xlu2 %v4782_v32  ;;  %4884 = vmatpush.msra.mxu3 %v6333_v6 }
0x2011   :  { %5024 = vmatpush.msra.mxu0 %v6365_v7 }
0x2012   :  { %4885 = vmatpush.msra.mxu3 %v6332_v33 }
0x2014   :  { %4996 = vmatpush.msrb.mxu3 %v6359_v58 }
0x2016   :  { %4997 = vmatpush.msrb.mxu3 %v6358_v57 }
0x2018   :  { %4998 = vmatpush.msrb.mxu3 %v6357_v39  ;;  %v6369_v39 = vld [vmem:[%s8816_s1 + $0x5e8] sm:$0xff] }
0x201a   :  { %4999 = vmatpush.msrb.mxu3 %v6356_v54 }
0x2073   :  { %v4720_v19 = vpop.xlane.xlu0 %4719 }
0x2074   :  { %v4721_v26 = vsub.f32 %v4715_v41, %v4720_v19 }
0x2076   :  { %v4722_v34 = vmul.f32 1.442695, %v4721_v26 }
0x2078   :  { %6646 = vpow2.f32 %v4722_v34 }
0x207e   :  { %v8458_v50 = vpop.eup %6646 }
0x207f   :  { %v4724_v42 = vsel %vm315_vm2, %v8458_v50, 0.0 }
0x2080   :  { %4725 = vadd.xlane.f32.xlu0 %v4724_v42 }
0x2081   :  { %v4774_v45 = vpop.xlane.xlu1 %4773 }
0x2082   :  { %v4778_v53 = vmul.f32 %v4774_v45, %v7036_v63 }
0x2083   :  { %v4784_v46 = vpop.xlane.xlu2 %4783 }
0x2084   :  { %v4790_v52 = vmul.f32 %v4778_v53, %v4778_v53  ;;  %v4788_v47 = vmul.f32 %v4784_v46, %v7036_v63  ;;  %v4794_v2 = vsub.f32 %v8417_v1, %v4778_v53 }
0x2086   :  { %v4792_v12 = vsub.f32 %v4788_v47, %v4790_v52 }
0x2088   :  { %v4796_v20 = vadd.f32 1e-05, %v4792_v12 }
0x208a   :  { %6648 = vrsqrt.f32 %v4796_v20  ;;  %vm4804_vm13 = vweird.f32 %v4796_v20 }
0x208d   :  { %v4691_v34 = vpop.f32.mrf.mxu3 }
0x208e   :  { %v4694_v61 = vadd.f32 %v4691_v34, %v4622_v21 }
0x2090   :  { %v6649_v31 = vpop.eup %6648 }
0x2091   :  { %v4799_v3 = vmul.f32 %v6649_v31, %v4796_v20  ;;  %vm4805_vm12 = vweird.f32 %v6649_v31 }
0x2092   :  { %vm4806_vm14 = vmor %vm4804_vm13, %vm4805_vm12 }
0x2093   :  { %v4800_v11 = vmul.f32 %v6649_v31, %v4799_v3 }
0x2095   :  { %v4801_v51 = vmul.f32 0.5, %v4800_v11 }
0x2097   :  { %v4802_v30 = vsub.f32 1.5, %v4801_v51 }
0x2099   :  { %v4803_v41 = vmul.f32 %v6649_v31, %v4802_v30 }
0x209b   :  { %v4807_v44 = vsel %vm4806_vm14, %v6649_v31, %v4803_v41  ;;  %v8592_v41 = vld [vmem:[%s8817_s2 + $0x4a] sm:$0xf] }
0x209c   :  { %v4818_v23 = vmul.f32 %v4807_v44, %v4794_v2  ;;  %v4834_v2 = vperm.slane %v8592_v41, 0  ;;  %v4898_v48 = vperm.slane %v8592_v41, 2 }
0x209e   :  { %v4822_v5 = vmul.f32 %v8495_v60, %v4818_v23 }
0x20a0   :  { %v8504_v49 = vadd.f32 %v8500_v18, %v4822_v5 }
0x20a2   :  { %6330 = vmatmul.msk.f32.vlgmr.msra.gmra.mxu2 %vm63_vm1, %v8504_v49  ;;  %6336 = vmatmul.msk.f32.vlgmr.msra.gmra.mxu3 %vm63_vm1, %v8504_v49 }
0x20a3   :  { %6342 = vmatmul.msk.f32.vlgmr.msrb.gmra.mxu0 %vm63_vm1, %v8504_v49  ;;  %6374 = vmatpush.xpose.msk.msra.mxu2 %vm63_vm1, %v7955_v14 }
0x20a4   :  { %6376 = vmatpush.xpose.msk.msra.mxu3 %vm63_vm1, %v7955_v14 }
0x20f3   :  { %v4726_v10 = vpop.xlane.xlu0 %4725 }
0x20f4   :  { %6650 = vrcp.f32 %v4726_v10  ;;  %v4738_v27 = vand.u32 2147483648, %v4726_v10  ;;  %v4736_v40 = vand.u32 2147483647, %v4726_v10  ;;  %vm4732_vm0 = vweird.f32 %v4726_v10 }
0x20f6   :  { %v4739_v32 = vor.u32 1.1754944e-38, %v4738_v27  ;;  %vm4737_vm4 = vcmp.eq.f32.partialorder %v4736_v40, 8.507059e+37 }
0x20fa   :  { %v6651_v25 = vpop.eup %6650 }
0x20fb   :  { %v4728_v37 = vmul.f32 %v6651_v25, %v4726_v10  ;;  %vm4733_vm15 = vweird.f32 %v6651_v25 }
0x20fc   :  { %vm4734_vm3 = vmor %vm4732_vm0, %vm4733_vm15 }
0x20fd   :  { %v4729_v28 = vsub.f32 1.0, %v4728_v37 }
0x20ff   :  { %v4730_v1 = vmul.f32 %v6651_v25, %v4729_v28 }
0x2101   :  { %v4731_v4 = vadd.f32 %v6651_v25, %v4730_v1 }
0x2103   :  { %v4735_v19 = vsel %vm4734_vm3, %v6651_v25, %v4731_v4 }
0x2104   :  { %v4740_v26 = vsel %vm4737_vm4, %v4739_v32, %v4735_v19 }
0x2105   :  { %v4741_v22 = vmul.f32 %v8458_v50, %v4740_v26 }
0x2107   :  { %6325 = vmatmul.msk.f32.vlgmr.msrb.gmra.mxu1 %vm315_vm2, %v4741_v22 }
0x210f   :  { %6348 = vmatmul.msk.f32.vlgmr.msra.gmra.mxu1 %vm63_vm1, %v8504_v49 }
0x2120   :  { %v4916_v0 = vpop.f32.mrf.mxu0 }
0x2121   :  { %v4917_v9 = vadd.f32 %v4916_v0, %v4898_v48 }
0x2125   :  { %v4858_v44 = vpop.f32.mrf.mxu2 }
0x2126   :  { %v4859_v23 = vadd.f32 %v4858_v44, %v4834_v2 }
0x2184   :  { %v4762_v24 = vpop.f32.mrf.mxu1 }
0x2185   :  { %v4765_v6 = vadd.f32 %v4762_v24, %v4694_v61 }
0x2187   :  { %v4769_v8 = vadd.f32 %v8413_v38, %v4765_v6  ;;  %v6371_v38 = vld [vmem:[%s8816_s1 + $0x5f8] sm:$0xff] }
0x2188   :  { %5052 = vmatpush.msrb.mxu1 %v6371_v38 }
0x2189   :  { %v4771_v33 = vadd.f32 %v4769_v8, %v8286_v55  ;;  %v6364_v55 = vld [vmem:[%s8816_s1 + $0x5d0] sm:$0xff] }
0x218a   :  { %5025 = vmatpush.msra.mxu0 %v6364_v55  ;;  %5053 = vmatpush.msrb.mxu1 %v6370_v17 }
0x218b   :  { %v4775_v36 = vsel %vm63_vm1, %v4771_v33, 0.0  ;;  %v4781_v16 = vmul.f32 %v4771_v33, %v4771_v33 }
0x218c   :  { %4776 = vadd.xlane.f32.xlu0 %v4775_v36  ;;  %5026 = vmatpush.msra.mxu0 %v6363_v29  ;;  %v8610_v43 = vpop.f32.mrf.mxu1 }
0x218d   :  { %v4785_v58 = vsel %vm63_vm1, %v4781_v16, 0.0  ;;  %5054 = vmatpush.msrb.mxu1 %v6369_v39 }
0x218e   :  { %4786 = vadd.xlane.f32.xlu1 %v4785_v58  ;;  %5027 = vmatpush.msra.mxu0 %v6362_v59 }
0x218f   :  { %5055 = vmatpush.msrb.mxu1 %v6368_v13 }
0x21ff   :  { %v4777_v50 = vpop.xlane.xlu0 %4776 }
0x2200   :  { %v4779_v15 = vmul.f32 %v4777_v50, %v7036_v63 }
0x2201   :  { %v4787_v35 = vpop.xlane.xlu1 %4786 }
0x2202   :  { %v4791_v57 = vmul.f32 %v4779_v15, %v4779_v15  ;;  %v4789_v42 = vmul.f32 %v4787_v35, %v7036_v63  ;;  %v4795_v31 = vsub.f32 %v4771_v33, %v4779_v15 }
0x2204   :  { %v4793_v45 = vsub.f32 %v4789_v42, %v4791_v57 }
0x2206   :  { %v4797_v54 = vadd.f32 1e-05, %v4793_v45 }
0x2208   :  { %6652 = vrsqrt.f32 %v4797_v54  ;;  %vm4814_vm6 = vweird.f32 %v4797_v54 }
0x220e   :  { %v6653_v53 = vpop.eup %6652 }
0x220f   :  { %v4809_v46 = vmul.f32 %v6653_v53, %v4797_v54  ;;  %vm4815_vm5 = vweird.f32 %v6653_v53 }
0x2210   :  { %vm4816_vm7 = vmor %vm4814_vm6, %vm4815_vm5 }
0x2211   :  { %v4810_v52 = vmul.f32 %v6653_v53, %v4809_v46 }
0x2213   :  { %v4811_v47 = vmul.f32 0.5, %v4810_v52 }
0x2215   :  { %v4812_v12 = vsub.f32 1.5, %v4811_v47 }
0x2217   :  { %v4813_v20 = vmul.f32 %v6653_v53, %v4812_v12 }
0x2219   :  { %v4817_v3 = vsel %vm4816_vm7, %v6653_v53, %v4813_v20 }
0x221a   :  { %v4819_v11 = vmul.f32 %v4817_v3, %v4795_v31 }
0x221c   :  { %v4823_v51 = vmul.f32 %v8495_v60, %v4819_v11  ;;  %v4869_v60 = vperm.slane %v8592_v41, 1 }
0x221e   :  { %v8565_v30 = vadd.f32 %v8500_v18, %v4823_v51  ;;  %v4887_v18 = vpop.f32.mrf.mxu3 }
0x221f   :  { %v4888_v5 = vadd.f32 %v4887_v18, %v4869_v60 }
0x2220   :  { %6331 = vmatmul.msk.f32.gmra.mxu2 %vm63_vm1, %v8565_v30  ;;  %6337 = vmatmul.msk.f32.gmra.mxu3 %vm63_vm1, %v8565_v30 }
0x2221   :  { %6343 = vmatmul.msk.f32.gmra.mxu0 %vm63_vm1, %v8565_v30  ;;  %6349 = vmatmul.msk.f32.gmra.mxu1 %vm63_vm1, %v8565_v30 }
0x2228   :  { %6354 = vmatmul.msk.f32.vlgmr.msrb.gmra.mxu2 %vm63_vm1, %v7955_v14  ;;  %6360 = vmatmul.msk.f32.vlgmr.msrb.gmra.mxu3 %vm63_vm1, %v7955_v14 }
0x2229   :  { %6366 = vmatmul.msk.f32.vlgmr.msra.gmra.mxu0 %vm63_vm1, %v7955_v14  ;;  %6372 = vmatmul.msk.f32.vlgmr.msrb.gmra.mxu1 %vm63_vm1, %v7955_v14 }
0x222a   :  { %6380 = vmatpush.xpose.msk.msrb.mxu2 %vm63_vm1, %v7955_v14 }
0x2230   :  { %6355 = vmatmul.msk.f32.gmra.mxu2 %vm63_vm1, %v7971_v56  ;;  %6361 = vmatmul.msk.f32.gmra.mxu3 %vm63_vm1, %v7971_v56 }
0x2231   :  { %6367 = vmatmul.msk.f32.gmra.mxu0 %vm63_vm1, %v7971_v56  ;;  %6373 = vmatmul.msk.f32.gmra.mxu1 %vm63_vm1, %v7971_v56 }
0x2238   :  { %6375 = vmatmul.msk.f32.vlgmr.msra.gmra.mxu2 %vm63_vm1, %v4859_v23  ;;  %6377 = vmatmul.msk.f32.vlgmr.msra.gmra.mxu3 %vm63_vm1, %v4888_v5  ;;  %v4927_v5 = vperm.slane %v8592_v41, 3 }
0x2239   :  { %6386 = vmatpush.xpose.msk.msra.mxu2 %vm63_vm1, %v7971_v56 }
0x2240   :  { %6381 = vmatmul.msk.f32.vlgmr.msrb.gmra.mxu2 %vm63_vm1, %v4917_v9 }
0x2241   :  { %6392 = vmatpush.xpose.msk.msrb.mxu2 %vm63_vm1, %v7971_v56 }
0x229e   :  { %v4919_v10 = vpop.f32.mrf.mxu0  ;;  %v8612_v25 = vpop.f32.mrf.mxu1 }
0x229f   :  { %v4920_v32 = vadd.f32 %v4919_v10, %v4898_v48  ;;  %v4946_v48 = vadd.f32 %v8610_v43, %v4927_v5 }
0x22a3   :  { %v4861_v37 = vpop.f32.mrf.mxu2  ;;  %v8614_v28 = vpop.f32.mrf.mxu3 }
0x22a4   :  { %v4862_v27 = vadd.f32 %v4861_v37, %v4834_v2  ;;  %v4891_v18 = vadd.f32 %v8614_v28, %v4869_v60 }
0x22a6   :  { %v5029_v1 = vpop.f32.mrf.mxu0  ;;  %6387 = vmatmul.msk.f32.vlgmr.msra.gmra.mxu2 %vm63_vm1, %v4862_v27  ;;  %v5057_v19 = vpop.f32.mrf.mxu1 }
0x22a7   :  { %5268 = vmatpush.msrb.mxu3 %v5029_v1 }
0x22a9   :  { %6388 = vmatpush.xpose.msk.msra.mxu3 %vm63_vm1, %v7971_v56 }
0x22ab   :  { %v4973_v40 = vpop.f32.mrf.mxu2  ;;  %v5001_v4 = vpop.f32.mrf.mxu3 }
0x22ac   :  { %5175 = vmatpush.msrb.mxu0 %v5001_v4  ;;  %5198 = vmatpush.msra.mxu1 %v4973_v40 }
0x22ae   :  { %6383 = vmatpush.xpose.msk.msra.mxu0 %vm63_vm1, %v7955_v14  ;;  %5339 = vmatpush.msrb.mxu1 %v5057_v19  ;;  %v5032_v20 = vpop.f32.mrf.mxu0 }
0x22af   :  { %6393 = vmatmul.msk.f32.vlgmr.msrb.gmra.mxu2 %vm63_vm1, %v4920_v32 }
0x22b3   :  { %v8622_v26 = vpop.f32.mrf.mxu2  ;;  %v5004_v22 = vpop.f32.mrf.mxu3 }
0x22bb   :  { %v8624_v62 = vpop.f32.mrf.mxu2  ;;  %v5130_v34 = vpop.f32.mrf.mxu3 }
0x22bc   :  { %v5133_v21 = vsel %vm315_vm2, %v5130_v34, -inf  ;;  %v5086_v43 = vsel %vm315_vm2, %v8624_v62, -inf }
0x22bd   :  { %5134 = vmax.xlane.f32.xlu1 %v5133_v21 }
0x22c3   :  { %v5223_v61 = vpop.f32.mrf.mxu2 }
0x22c4   :  { %v5226_v24 = vsel %vm315_vm2, %v5223_v61, -inf }
0x22c5   :  { %5227 = vmax.xlane.f32.xlu2 %v5226_v24 }
0x2329   :  { %v8649_v27 = vpop.f32.mrf.mxu2 }
0x2330   :  { %v5135_v6 = vpop.xlane.xlu1 %5134 }
0x2331   :  { %v5136_v14 = vsub.f32 %v5130_v34, %v5135_v6 }
0x2332   :  { %v5505_v1 = vpop.f32.mrf.mxu2 }
0x2333   :  { %v5137_v16 = vmul.f32 1.442695, %v5136_v14 }
0x2338   :  { %v5228_v8 = vpop.xlane.xlu2 %5227 }
0x2339   :  { %v5229_v33 = vsub.f32 %v5223_v61, %v5228_v8 }
0x233b   :  { %v5230_v36 = vmul.f32 1.442695, %v5229_v33 }
0x233d   :  { %6654 = vpow2.f32 %v5230_v36 }
0x233e   :  { %6656 = vpow2.f32 %v5137_v16 }
0x2343   :  { %v6655_v58 = vpop.eup %6654 }
0x2344   :  { %v5232_v50 = vsel %vm315_vm2, %v6655_v58, 0.0  ;;  %v6657_v15 = vpop.eup %6656 }
0x2345   :  { %5233 = vadd.xlane.f32.xlu0 %v5232_v50  ;;  %v5139_v35 = vsel %vm315_vm2, %v6657_v15, 0.0 }
0x234d   :  { %5140 = vadd.xlane.f32.xlu0 %v5139_v35 }
0x23b8   :  { %v5234_v7 = vpop.xlane.xlu0 %5233 }
0x23b9   :  { %6658 = vrcp.f32 %v5234_v7  ;;  %v5246_v17 = vand.u32 2147483648, %v5234_v7  ;;  %v5244_v39 = vand.u32 2147483647, %v5234_v7  ;;  %vm5240_vm9 = vweird.f32 %v5234_v7 }
0x23bb   :  { %v5247_v13 = vor.u32 1.1754944e-38, %v5246_v17  ;;  %vm5245_vm11 = vcmp.eq.f32.partialorder %v5244_v39, 8.507059e+37 }
0x23bf   :  { %v6659_v38 = vpop.eup %6658 }
0x23c0   :  { %v5236_v55 = vmul.f32 %v6659_v38, %v5234_v7  ;;  %v5141_v57 = vpop.xlane.xlu0 %5140  ;;  %vm5241_vm8 = vweird.f32 %v6659_v38 }
0x23c1   :  { %6660 = vrcp.f32 %v5141_v57  ;;  %vm5242_vm10 = vmor %vm5240_vm9, %vm5241_vm8  ;;  %v5153_v12 = vand.u32 2147483648, %v5141_v57  ;;  %v5151_v3 = vand.u32 2147483647, %v5141_v57  ;;  %vm5147_vm13 = vweird.f32 %v5141_v57 }
0x23c2   :  { %v5237_v42 = vsub.f32 1.0, %v5236_v55 }
0x23c3   :  { %v5154_v51 = vor.u32 1.1754944e-38, %v5153_v12  ;;  %vm5152_vm15 = vcmp.eq.f32.partialorder %v5151_v3, 8.507059e+37 }
0x23c4   :  { %v5238_v29 = vmul.f32 %v6659_v38, %v5237_v42 }
0x23c6   :  { %v5239_v45 = vadd.f32 %v6659_v38, %v5238_v29 }
0x23c7   :  { %v6661_v59 = vpop.eup %6660 }
0x23c8   :  { %v5243_v54 = vsel %vm5242_vm10, %v6659_v38, %v5239_v45  ;;  %v5143_v53 = vmul.f32 %v6661_v59, %v5141_v57  ;;  %vm5148_vm12 = vweird.f32 %v6661_v59 }
0x23c9   :  { %v5248_v46 = vsel %vm5245_vm11, %v5247_v13, %v5243_v54  ;;  %vm5149_vm14 = vmor %vm5147_vm13, %vm5148_vm12 }
0x23ca   :  { %v5249_v52 = vmul.f32 %v6655_v58, %v5248_v46  ;;  %v5144_v47 = vsub.f32 1.0, %v5143_v53  ;;  %v5368_v58 = vsel %vm315_vm2, %v8649_v27, -inf }
0x23cc   :  { %v5145_v31 = vmul.f32 %v6661_v59, %v5144_v47  ;;  %6382 = vmatmul.msk.f32.vlgmr.msrb.gmra.mxu3 %vm315_vm2, %v5249_v52 }
0x23cd   :  { %5550 = vmatpush.msrb.mxu3 %v5032_v20 }
0x23ce   :  { %v5146_v11 = vadd.f32 %v6661_v59, %v5145_v31 }
0x23d0   :  { %v5150_v2 = vsel %vm5149_vm14, %v6661_v59, %v5146_v11 }
0x23d1   :  { %v5155_v44 = vsel %vm5152_vm15, %v5154_v51, %v5150_v2  ;;  %v4949_v2 = vadd.f32 %v8612_v25, %v4927_v5 }
0x23d2   :  { %v5156_v23 = vmul.f32 %v6657_v15, %v5155_v44 }
0x23d4   :  { %6378 = vmatmul.msk.f32.vlgmr.msrb.gmra.mxu0 %vm315_vm2, %v5156_v23  ;;  %6389 = vmatmul.msk.f32.vlgmr.msra.gmra.mxu3 %vm63_vm1, %v4891_v18 }
0x23d5   :  { %5457 = vmatpush.msrb.mxu0 %v5004_v22 }
0x23dc   :  { %6384 = vmatmul.msk.f32.vlgmr.msra.gmra.mxu0 %vm63_vm1, %v4946_v48 }
0x23dd   :  { %6395 = vmatpush.xpose.msk.msra.mxu0 %vm63_vm1, %v7971_v56  ;;  %v5508_v56 = vsel %vm315_vm2, %v5505_v1, -inf }
0x244f   :  { %v8643_v0 = vpop.f32.mrf.mxu3 }
0x2451   :  { %v8645_v60 = vpop.f32.mrf.mxu0 }
0x2457   :  { %v5412_v9 = vpop.f32.mrf.mxu3 }
0x2458   :  { %v5415_v10 = vsel %vm315_vm2, %v5412_v9, -inf }
0x2459   :  { %5416 = vmax.xlane.f32.xlu2 %v5415_v10  ;;  %v5294_v37 = vpop.f32.mrf.mxu0 }
0x245a   :  { %v5297_v28 = vsel %vm315_vm2, %v5294_v37, -inf }
0x245b   :  { %5298 = vmax.xlane.f32.xlu0 %v5297_v28 }
0x2461   :  { %5087 = vmax.xlane.f32.xlu2 %v5086_v43 }
0x2469   :  { %5509 = vmax.xlane.f32.xlu2 %v5508_v56 }
0x24cc   :  { %v5417_v40 = vpop.xlane.xlu2 %5416 }
0x24cd   :  { %v5418_v4 = vsub.f32 %v5412_v9, %v5417_v40 }
0x24ce   :  { %v5299_v32 = vpop.xlane.xlu0 %5298 }
0x24cf   :  { %v5419_v19 = vmul.f32 1.442695, %v5418_v4  ;;  %v5300_v22 = vsub.f32 %v5294_v37, %v5299_v32 }
0x24d1   :  { %6662 = vpow2.f32 %v5419_v19  ;;  %v5301_v34 = vmul.f32 1.442695, %v5300_v22 }
0x24d3   :  { %6664 = vpow2.f32 %v5301_v34 }
0x24d4   :  { %v5088_v21 = vpop.xlane.xlu2 %5087 }
0x24d5   :  { %v5089_v24 = vsub.f32 %v8624_v62, %v5088_v21 }
0x24d7   :  { %v6663_v61 = vpop.eup %6662  ;;  %v5090_v14 = vmul.f32 1.442695, %v5089_v24 }
0x24d8   :  { %v5421_v6 = vsel %vm315_vm2, %v6663_v61, 0.0 }
0x24d9   :  { %v8656_v8 = vpop.eup %6664  ;;  %5422 = vadd.xlane.f32.xlu1 %v5421_v6  ;;  %6666 = vpow2.f32 %v5090_v14 }
0x24da   :  { %v5303_v33 = vsel %vm315_vm2, %v8656_v8, 0.0 }
0x24db   :  { %5304 = vadd.xlane.f32.xlu2 %v5303_v33 }
0x24dc   :  { %v5510_v36 = vpop.xlane.xlu2 %5509 }
0x24dd   :  { %v5511_v16 = vsub.f32 %v5505_v1, %v5510_v36 }
0x24df   :  { %v5512_v50 = vmul.f32 1.442695, %v5511_v16  ;;  %v6667_v15 = vpop.eup %6666 }
0x24e0   :  { %v5092_v62 = vsel %vm315_vm2, %v6667_v15, 0.0 }
0x24e1   :  { %5369 = vmax.xlane.f32.xlu1 %v5368_v58  ;;  %6668 = vpow2.f32 %v5512_v50  ;;  %v5060_v58 = vpop.f32.mrf.mxu1 }
0x24e7   :  { %v8663_v35 = vpop.eup %6668 }
0x24e8   :  { %v5514_v7 = vsel %vm315_vm2, %v8663_v35, 0.0 }
0x24e9   :  { %5093 = vadd.xlane.f32.xlu1 %v5092_v62 }
0x24f1   :  { %5515 = vadd.xlane.f32.xlu1 %v5514_v7 }
0x254c   :  { %v5423_v38 = vpop.xlane.xlu1 %5422 }
0x254d   :  { %6670 = vrcp.f32 %v5423_v38  ;;  %v5435_v39 = vand.u32 2147483648, %v5423_v38  ;;  %v5433_v59 = vand.u32 2147483647, %v5423_v38  ;;  %vm5429_vm3 = vweird.f32 %v5423_v38 }
0x254e   :  { %v5305_v42 = vpop.xlane.xlu2 %5304 }
0x254f   :  { %6672 = vrcp.f32 %v5305_v42  ;;  %v5436_v54 = vor.u32 1.1754944e-38, %v5435_v39  ;;  %vm5434_vm5 = vcmp.eq.f32.partialorder %v5433_v59, 8.507059e+37  ;;  %v5317_v56 = vand.u32 2147483648, %v5305_v42 }
0x2550   :  { %vm5311_vm11 = vweird.f32 %v5305_v42  ;;  %v5315_v5 = vand.u32 2147483647, %v5305_v42 }
0x2551   :  { %v5318_v21 = vor.u32 1.1754944e-38, %v5317_v56 }
0x2552   :  { %vm5316_vm14 = vcmp.eq.f32.partialorder %v5315_v5, 8.507059e+37 }
0x2553   :  { %v6671_v55 = vpop.eup %6670 }
0x2554   :  { %v5425_v57 = vmul.f32 %v6671_v55, %v5423_v38  ;;  %v8667_v17 = vpop.xlane.xlu1 %5369  ;;  %vm5430_vm0 = vweird.f32 %v6671_v55 }
0x2555   :  { %vm5431_vm4 = vmor %vm5429_vm3, %vm5430_vm0  ;;  %v6673_v52 = vpop.eup %6672 }
0x2556   :  { %v5426_v29 = vsub.f32 1.0, %v5425_v57  ;;  %v5307_v20 = vmul.f32 %v6673_v52, %v5305_v42  ;;  %vm5312_vm8 = vweird.f32 %v6673_v52 }
0x2557   :  { %vm5313_vm12 = vmor %vm5311_vm11, %vm5312_vm8 }
0x2558   :  { %v5427_v45 = vmul.f32 %v6671_v55, %v5426_v29  ;;  %v5308_v3 = vsub.f32 1.0, %v5307_v20 }
0x255a   :  { %v5428_v13 = vadd.f32 %v6671_v55, %v5427_v45  ;;  %v5309_v23 = vmul.f32 %v6673_v52, %v5308_v3  ;;  %v6400_v3 = vld [vmem:[%s8816_s1 + $0x6d0] sm:$0xff] }
0x255c   :  { %v5432_v53 = vsel %vm5431_vm4, %v6671_v55, %v5428_v13  ;;  %v5094_v46 = vpop.xlane.xlu1 %5093  ;;  %v5310_v43 = vadd.f32 %v6673_v52, %v5309_v23 }
0x255d   :  { %v5437_v47 = vsel %vm5434_vm5, %v5436_v54, %v5432_v53  ;;  %6674 = vrcp.f32 %v5094_v46  ;;  %v5106_v18 = vand.u32 2147483648, %v5094_v46  ;;  %v5104_v9 = vand.u32 2147483647, %v5094_v46 }
0x255e   :  { %v5438_v12 = vmul.f32 %v6663_v61, %v5437_v47  ;;  %vm5100_vm7 = vweird.f32 %v5094_v46  ;;  %v5314_v19 = vsel %vm5313_vm12, %v6673_v52, %v5310_v43 }
0x255f   :  { %v5107_v28 = vor.u32 1.1754944e-38, %v5106_v18  ;;  %vm5105_vm10 = vcmp.eq.f32.partialorder %v5104_v9, 8.507059e+37  ;;  %v5319_v24 = vsel %vm5316_vm14, %v5318_v21, %v5314_v19  ;;  %v8719_v21 = vld [vmem:[%s8817_s2 + $0x69] ss:$0 sm:$0xff] }
0x2560   :  { %6390 = vmatmul.msk.f32.vlgmr.msrb.gmra.mxu0 %vm315_vm2, %v5438_v12  ;;  %v5320_v36 = vmul.f32 %v8656_v8, %v5319_v24  ;;  %v6401_v12 = vld [vmem:[%s8816_s1 + $0x6d8] sm:$0xff]  ;;  %v8724_v24 = vld [vmem:[%s8817_s2 + $0x6a] ss:$0 sm:$0xff] }
0x2561   :  { %5714 = vmatpush.msra.mxu2 %v6401_v12 }
0x2563   :  { %v6675_v31 = vpop.eup %6674  ;;  %5715 = vmatpush.msra.mxu2 %v6400_v3 }
0x2564   :  { %v5096_v11 = vmul.f32 %v6675_v31, %v5094_v46  ;;  %v5516_v51 = vpop.xlane.xlu1 %5515  ;;  %vm5101_vm6 = vweird.f32 %v6675_v31 }
0x2565   :  { %6676 = vrcp.f32 %v5516_v51  ;;  %vm5102_vm9 = vmor %vm5100_vm7, %vm5101_vm6  ;;  %v5528_v32 = vand.u32 2147483648, %v5516_v51  ;;  %v5526_v34 = vand.u32 2147483647, %v5516_v51  ;;  %vm5522_vm15 = vweird.f32 %v5516_v51 }
0x2566   :  { %v5097_v44 = vsub.f32 1.0, %v5096_v11 }
0x2567   :  { %v5529_v6 = vor.u32 1.1754944e-38, %v5528_v32  ;;  %vm5527_vm3 = vcmp.eq.f32.partialorder %v5526_v34, 8.507059e+37 }
0x2568   :  { %v5098_v48 = vmul.f32 %v6675_v31, %v5097_v44  ;;  %6396 = vmatmul.msk.f32.vlgmr.msra.gmra.mxu0 %vm63_vm1, %v4949_v2  ;;  %v6399_v2 = vld [vmem:[%s8816_s1 + $0x6c8] sm:$0xff]  ;;  %v6398_v44 = vld [vmem:[%s8816_s1 + $0x6c0] sm:$0xff] }
0x2569   :  { %5716 = vmatpush.msra.mxu2 %v6399_v2 }
0x256a   :  { %v5099_v10 = vadd.f32 %v6675_v31, %v5098_v48 }
0x256b   :  { %v6677_v37 = vpop.eup %6676  ;;  %5717 = vmatpush.msra.mxu2 %v6398_v44 }
0x256c   :  { %v5103_v1 = vsel %vm5102_vm9, %v6675_v31, %v5099_v10  ;;  %v5518_v41 = vmul.f32 %v6677_v37, %v5516_v51  ;;  %vm5523_vm13 = vweird.f32 %v6677_v37 }
0x256d   :  { %v5108_v25 = vsel %vm5105_vm10, %v5107_v28, %v5103_v1  ;;  %vm5524_vm0 = vmor %vm5522_vm15, %vm5523_vm13 }
0x256e   :  { %v5109_v40 = vmul.f32 %v6667_v15, %v5108_v25  ;;  %v5519_v4 = vsub.f32 1.0, %v5518_v41 }
0x2570   :  { %v5520_v22 = vmul.f32 %v6677_v37, %v5519_v4  ;;  %6379 = vmatmul.msk.f32.vlgmr.msra.gmra.mxu1 %vm315_vm2, %v5109_v40 }
0x2571   :  { %5480 = vmatpush.msra.mxu1 %v8622_v26  ;;  %v5371_v26 = vsub.f32 %v8649_v27, %v8667_v17  ;;  %v8691_v27 = vld [vmem:[%s8817_s2 + $0x4e] ss:$0 sm:$0xff] }
0x2572   :  { %v5521_v61 = vadd.f32 %v6677_v37, %v5520_v22 }
0x2573   :  { %v5372_v15 = vmul.f32 1.442695, %v5371_v26 }
0x2574   :  { %v5525_v33 = vsel %vm5524_vm0, %v6677_v37, %v5521_v61 }
0x2575   :  { %v5530_v14 = vsel %vm5527_vm3, %v5529_v6, %v5525_v33  ;;  %6678 = vpow2.f32 %v5372_v15 }
0x2576   :  { %v5531_v16 = vmul.f32 %v8663_v35, %v5530_v14 }
0x2578   :  { %6385 = vmatmul.msk.f32.vlgmr.msrb.gmra.mxu1 %vm315_vm2, %v5320_v36  ;;  %6394 = vmatmul.msk.f32.vlgmr.msrb.gmra.mxu3 %vm315_vm2, %v5531_v16  ;;  %v6407_v36 = vld [vmem:[%s8816_s1 + $0x6f8] sm:$0xff] }
0x2579   :  { %5621 = vmatpush.msrb.mxu1 %v5060_v58  ;;  %5752 = vmatpush.msra.mxu3 %v6407_v36 }
0x257b   :  { %v6679_v8 = vpop.eup %6678 }
0x257c   :  { %v5374_v35 = vsel %vm315_vm2, %v6679_v8, 0.0 }
0x25dd   :  { %v8682_v50 = vpop.f32.mrf.mxu0 }
0x25e5   :  { %v5576_v62 = vpop.f32.mrf.mxu0 }
0x25e6   :  { %v5579_v7 = vsel %vm315_vm2, %v5576_v62, -inf }
0x25e7   :  { %5580 = vmax.xlane.f32.xlu0 %v5579_v7 }
0x25ed   :  { %v5200_v38 = vpop.f32.mrf.mxu1 }
0x25ee   :  { %v5201_v55 = vadd.f32 %v5200_v38, %v8645_v60 }
0x25ef   :  { %5375 = vadd.xlane.f32.xlu0 %v5374_v35 }
0x25f0   :  { %v5273_v57 = vadd.f32 %v8643_v0, %v5201_v55 }
0x25f5   :  { %v5341_v42 = vpop.f32.mrf.mxu1 }
0x25f6   :  { %v5344_v17 = vadd.f32 %v5341_v42, %v5273_v57 }
0x25f8   :  { %v5629_v29 = vadd.f32 %v8691_v27, %v5344_v17  ;;  %v6406_v17 = vld [vmem:[%s8816_s1 + $0x6f0] sm:$0xff] }
0x25f9   :  { %5753 = vmatpush.msra.mxu3 %v6406_v17 }
0x25fa   :  { %v5631_v39 = vadd.f32 %v5629_v29, %v8504_v49  ;;  %v6405_v29 = vld [vmem:[%s8816_s1 + $0x6e8] sm:$0xff] }
0x25fb   :  { %5754 = vmatpush.msra.mxu3 %v6405_v29 }
0x25fc   :  { %v5633_v45 = vsel %vm63_vm1, %v5631_v39, 0.0  ;;  %v5641_v59 = vmul.f32 %v5631_v39, %v5631_v39 }
0x25fd   :  { %5634 = vadd.xlane.f32.xlu0 %v5633_v45  ;;  %v6449_v45 = vld [vmem:[%s8817_s2 + $0x55] ss:$0 sm:$0xff] }
0x25fe   :  { %v5643_v13 = vsel %vm63_vm1, %v5641_v59, 0.0 }
0x25ff   :  { %5644 = vadd.xlane.f32.xlu1 %v5643_v13 }
0x265a   :  { %v5581_v60 = vpop.xlane.xlu0 %5580 }
0x265b   :  { %v5582_v0 = vsub.f32 %v5576_v62, %v5581_v60 }
0x265d   :  { %v5583_v54 = vmul.f32 1.442695, %v5582_v0 }
0x265f   :  { %6680 = vpow2.f32 %v5583_v54 }
0x2662   :  { %v5376_v53 = vpop.xlane.xlu0 %5375 }
0x2663   :  { %6682 = vrcp.f32 %v5376_v53  ;;  %v5388_v31 = vand.u32 2147483648, %v5376_v53  ;;  %v5386_v51 = vand.u32 2147483647, %v5376_v53  ;;  %vm5382_vm5 = vweird.f32 %v5376_v53 }
0x2665   :  { %v8697_v46 = vpop.eup %6680  ;;  %v5389_v48 = vor.u32 1.1754944e-38, %v5388_v31  ;;  %vm5387_vm7 = vcmp.eq.f32.partialorder %v5386_v51, 8.507059e+37 }
0x2666   :  { %v5585_v52 = vsel %vm315_vm2, %v8697_v46, 0.0 }
0x2667   :  { %5586 = vadd.xlane.f32.xlu2 %v5585_v52 }
0x2669   :  { %v6683_v49 = vpop.eup %6682 }
0x266a   :  { %v5378_v47 = vmul.f32 %v6683_v49, %v5376_v53  ;;  %vm5383_vm4 = vweird.f32 %v6683_v49  ;;  %v5552_v53 = vpop.f32.mrf.mxu3 }
0x266b   :  { %vm5384_vm6 = vmor %vm5382_vm5, %vm5383_vm4 }
0x266c   :  { %v5379_v20 = vsub.f32 1.0, %v5378_v47 }
0x266e   :  { %v5380_v11 = vmul.f32 %v6683_v49, %v5379_v20 }
0x2670   :  { %v5381_v18 = vadd.f32 %v6683_v49, %v5380_v11  ;;  %v5635_v23 = vpop.xlane.xlu0 %5634  ;;  %v6450_v11 = vld [vmem:[%s8817_s2 + $0x56] ss:$0 sm:$0xff] }
0x2671   :  { %v5639_v9 = vmul.f32 %v5635_v23, %v7036_v63 }
0x2672   :  { %v5385_v10 = vsel %vm5384_vm6, %v6683_v49, %v5381_v18  ;;  %v5645_v37 = vpop.xlane.xlu1 %5644 }
0x2673   :  { %v5390_v28 = vsel %vm5387_vm7, %v5389_v48, %v5385_v10  ;;  %v5651_v43 = vmul.f32 %v5639_v9, %v5639_v9  ;;  %v5649_v1 = vmul.f32 %v5645_v37, %v7036_v63  ;;  %v5655_v34 = vsub.f32 %v5631_v39, %v5639_v9  ;;  %v6404_v39 = vld [vmem:[%s8816_s1 + $0x6e0] sm:$0xff] }
0x2674   :  { %v5391_v41 = vmul.f32 %v6679_v8, %v5390_v28  ;;  %5755 = vmatpush.msra.mxu3 %v6404_v39 }
0x2675   :  { %v5653_v56 = vsub.f32 %v5649_v1, %v5651_v43 }
0x2676   :  { %6391 = vmatmul.msk.f32.vlgmr.msra.gmra.mxu1 %vm315_vm2, %v5391_v41 }
0x2677   :  { %v5657_v25 = vadd.f32 1e-05, %v5653_v56 }
0x2679   :  { %6684 = vrsqrt.f32 %v5657_v25  ;;  %vm5665_vm9 = vweird.f32 %v5657_v25 }
0x267f   :  { %v6685_v5 = vpop.eup %6684 }
0x2680   :  { %v5660_v40 = vmul.f32 %v6685_v5, %v5657_v25  ;;  %vm5666_vm8 = vweird.f32 %v6685_v5 }
0x2681   :  { %vm5667_vm10 = vmor %vm5665_vm9, %vm5666_vm8 }
0x2682   :  { %v5661_v4 = vmul.f32 %v6685_v5, %v5660_v40 }
0x2684   :  { %v5662_v32 = vmul.f32 0.5, %v5661_v4 }
0x2686   :  { %v5663_v19 = vsub.f32 1.5, %v5662_v32 }
0x2688   :  { %v5664_v22 = vmul.f32 %v6685_v5, %v5663_v19 }
0x268a   :  { %v5668_v61 = vsel %vm5667_vm10, %v6685_v5, %v5664_v22 }
0x268b   :  { %v5679_v6 = vmul.f32 %v5668_v61, %v5655_v34 }
0x268d   :  { %v5683_v33 = vmul.f32 %v8719_v21, %v5679_v6 }
0x268f   :  { %v5687_v14 = vadd.f32 %v8724_v24, %v5683_v33 }
0x2691   :  { %6402 = vmatmul.msk.f32.vlgmr.msra.gmra.mxu2 %vm63_vm1, %v5687_v14 }
0x26da   :  { %v5587_v16 = vpop.xlane.xlu2 %5586 }
0x26db   :  { %6686 = vrcp.f32 %v5587_v16  ;;  %v5599_v62 = vand.u32 2147483648, %v5587_v16  ;;  %v5597_v8 = vand.u32 2147483647, %v5587_v16  ;;  %vm5593_vm12 = vweird.f32 %v5587_v16 }
0x26dd   :  { %v5600_v35 = vor.u32 1.1754944e-38, %v5599_v62  ;;  %vm5598_vm14 = vcmp.eq.f32.partialorder %v5597_v8, 8.507059e+37 }
0x26e1   :  { %v6687_v58 = vpop.eup %6686 }
0x26e2   :  { %v5589_v26 = vmul.f32 %v6687_v58, %v5587_v16  ;;  %vm5594_vm11 = vweird.f32 %v6687_v58 }
0x26e3   :  { %vm5595_vm13 = vmor %vm5593_vm12, %vm5594_vm11 }
0x26e4   :  { %v5590_v15 = vsub.f32 1.0, %v5589_v26 }
0x26e6   :  { %v5591_v7 = vmul.f32 %v6687_v58, %v5590_v15 }
0x26e8   :  { %v5592_v38 = vadd.f32 %v6687_v58, %v5591_v7 }
0x26ea   :  { %v5596_v55 = vsel %vm5595_vm13, %v6687_v58, %v5592_v38 }
0x26eb   :  { %v5601_v57 = vsel %vm5598_vm14, %v5600_v35, %v5596_v55 }
0x26ec   :  { %v5602_v42 = vmul.f32 %v8697_v46, %v5601_v57 }
0x26ee   :  { %6397 = vmatmul.msk.f32.vlgmr.msrb.gmra.mxu1 %vm315_vm2, %v5602_v42  ;;  %v6451_v42 = vld [vmem:[%s8817_s2 + $0x6b] ss:$0 sm:$0xff] }
0x26f3   :  { %v5482_v0 = vpop.f32.mrf.mxu1 }
0x26f4   :  { %v5483_v54 = vadd.f32 %v5482_v0, %v8682_v50 }
0x26f6   :  { %v5555_v46 = vadd.f32 %v5552_v53, %v5483_v54 }
0x2714   :  { %v5719_v59 = vpop.f32.mrf.mxu2 }
0x2715   :  { %v5720_v13 = vadd.f32 %v6449_v45, %v5719_v59  ;;  %v6452_v59 = vld [vmem:[%s8817_s2 + $0x6c] ss:$0 sm:$0xff] }
0x2717   :  { %v5725_v60 = vmax.f32 %v5720_v13, 0.0 }
0x2719   :  { %6408 = vmatmul.msk.f32.vlgmr.msra.gmra.mxu3 %vm63_vm1, %v5725_v60 }
0x276b   :  { %v5623_v52 = vpop.f32.mrf.mxu1 }
0x276c   :  { %v5626_v49 = vadd.f32 %v5623_v52, %v5555_v46 }
0x276e   :  { %v5630_v47 = vadd.f32 %v8691_v27, %v5626_v49 }
0x2770   :  { %v5632_v12 = vadd.f32 %v5630_v47, %v8565_v30 }
0x2772   :  { %v5636_v20 = vsel %vm63_vm1, %v5632_v12, 0.0  ;;  %v5642_v31 = vmul.f32 %v5632_v12, %v5632_v12 }
0x2773   :  { %5637 = vadd.xlane.f32.xlu2 %v5636_v20 }
0x2774   :  { %v5646_v3 = vsel %vm63_vm1, %v5642_v31, 0.0 }
0x2775   :  { %5647 = vadd.xlane.f32.xlu0 %v5646_v3 }
0x279c   :  { %v5757_v50 = vpop.f32.mrf.mxu3 }
0x279d   :  { %v5758_v51 = vadd.f32 %v6450_v11, %v5757_v50 }
0x279f   :  { %v5763_v2 = vadd.f32 %v5758_v51, %v5687_v14 }
0x27a1   :  { %v5765_v44 = vsel %vm63_vm1, %v5763_v2, 0.0  ;;  %v5773_v18 = vmul.f32 %v5763_v2, %v5763_v2 }
0x27a2   :  { %5766 = vadd.xlane.f32.xlu1 %v5765_v44 }
0x27a3   :  { %v5775_v30 = vsel %vm63_vm1, %v5773_v18, 0.0 }
0x27a4   :  { %5776 = vadd.xlane.f32.xlu0 %v5775_v30 }
0x27e6   :  { %v5638_v27 = vpop.xlane.xlu2 %5637 }
0x27e7   :  { %v5640_v23 = vmul.f32 %v5638_v27, %v7036_v63 }
0x27e8   :  { %v5648_v48 = vpop.xlane.xlu0 %5647 }
0x27e9   :  { %v5652_v9 = vmul.f32 %v5640_v23, %v5640_v23  ;;  %v5650_v10 = vmul.f32 %v5648_v48, %v7036_v63  ;;  %v5656_v40 = vsub.f32 %v5632_v12, %v5640_v23 }
0x27eb   :  { %v5654_v37 = vsub.f32 %v5650_v10, %v5652_v9 }
0x27ed   :  { %v5658_v28 = vadd.f32 1e-05, %v5654_v37 }
0x27ef   :  { %6688 = vrsqrt.f32 %v5658_v28  ;;  %vm5675_vm15 = vweird.f32 %v5658_v28 }
0x27f5   :  { %v6689_v43 = vpop.eup %6688 }
0x27f6   :  { %v5670_v1 = vmul.f32 %v6689_v43, %v5658_v28  ;;  %vm5676_vm2 = vweird.f32 %v6689_v43 }
0x27f7   :  { %vm5677_vm0 = vmor %vm5675_vm15, %vm5676_vm2  ;;  %vm5883_vm2 = vcmask 1043456  }
0x27f8   :  { %v5671_v41 = vmul.f32 %v6689_v43, %v5670_v1 }
0x27fa   :  { %v5672_v56 = vmul.f32 0.5, %v5671_v41 }
0x27fc   :  { %v5673_v25 = vsub.f32 1.5, %v5672_v56 }
0x27fe   :  { %v5674_v5 = vmul.f32 %v6689_v43, %v5673_v25 }
0x2800   :  { %v5678_v4 = vsel %vm5677_vm0, %v6689_v43, %v5674_v5 }
0x2801   :  { %v5680_v32 = vmul.f32 %v5678_v4, %v5656_v40 }
0x2803   :  { %v5684_v19 = vmul.f32 %v8719_v21, %v5680_v32 }
0x2805   :  { %v5688_v22 = vadd.f32 %v8724_v24, %v5684_v19  ;;  %v6413_v19 = vld [vmem:[%s8816_s1 + $0x718] sm:$0xff] }
0x2806   :  { %5907 = vmatpush.msrb.mxu0 %v6413_v19 }
0x2807   :  { %6403 = vmatmul.msk.f32.gmra.mxu2 %vm63_vm1, %v5688_v22 }
0x2815   :  { %v5767_v33 = vpop.xlane.xlu1 %5766 }
0x2816   :  { %v5771_v14 = vmul.f32 %v5767_v33, %v7036_v63 }
0x2817   :  { %v5777_v36 = vpop.xlane.xlu0 %5776 }
0x2818   :  { %v5783_v16 = vmul.f32 %v5771_v14, %v5771_v14  ;;  %v5781_v58 = vmul.f32 %v5777_v36, %v7036_v63  ;;  %v5787_v55 = vsub.f32 %v5763_v2, %v5771_v14  ;;  %v6410_v14 = vld [vmem:[%s8816_s1 + $0x700] sm:$0xff] }
0x281a   :  { %v5785_v26 = vsub.f32 %v5781_v58, %v5783_v16 }
0x281c   :  { %v5789_v15 = vadd.f32 1e-05, %v5785_v26 }
0x281e   :  { %6690 = vrsqrt.f32 %v5789_v15  ;;  %vm5797_vm4 = vweird.f32 %v5789_v15 }
0x2824   :  { %v6691_v21 = vpop.eup %6690 }
0x2825   :  { %v5792_v62 = vmul.f32 %v6691_v21, %v5789_v15  ;;  %vm5798_vm3 = vweird.f32 %v6691_v21 }
0x2826   :  { %vm5799_vm5 = vmor %vm5797_vm4, %vm5798_vm3 }
0x2827   :  { %v5793_v24 = vmul.f32 %v6691_v21, %v5792_v62 }
0x2829   :  { %v5794_v7 = vmul.f32 0.5, %v5793_v24 }
0x282b   :  { %v5795_v8 = vsub.f32 1.5, %v5794_v7 }
0x282d   :  { %v5796_v38 = vmul.f32 %v6691_v21, %v5795_v8 }
0x282f   :  { %v5800_v35 = vsel %vm5799_vm5, %v6691_v21, %v5796_v38 }
0x2830   :  { %v5811_v57 = vmul.f32 %v5800_v35, %v5787_v55 }
0x288a   :  { %v5722_v34 = vpop.f32.mrf.mxu2 }
0x288b   :  { %v5723_v61 = vadd.f32 %v6449_v45, %v5722_v34  ;;  %v5815_v45 = vmul.f32 %v6451_v42, %v5811_v57 }
0x288d   :  { %v5726_v6 = vmax.f32 %v5723_v61, 0.0  ;;  %v8773_v54 = vadd.f32 %v6452_v59, %v5815_v45  ;;  %v6411_v61 = vld [vmem:[%s8816_s1 + $0x708] sm:$0xff] }
0x288f   :  { %6409 = vmatmul.msk.f32.gmra.mxu3 %vm63_vm1, %v5726_v6  ;;  %v5829_v53 = vmul.f32 %v8773_v54, %v8773_v54  ;;  %v5821_v46 = vsel %vm63_vm1, %v8773_v54, 0.0 }
0x2891   :  { %v5831_v52 = vsel %vm63_vm1, %v5829_v53, 0.0 }
0x2912   :  { %v5760_v17 = vpop.f32.mrf.mxu3 }
0x2913   :  { %v5761_v29 = vadd.f32 %v6450_v11, %v5760_v17 }
0x2915   :  { %v5764_v39 = vadd.f32 %v5761_v29, %v5688_v22  ;;  %v6412_v22 = vld [vmem:[%s8816_s1 + $0x710] sm:$0xff] }
0x2916   :  { %5908 = vmatpush.msrb.mxu0 %v6412_v22 }
0x2917   :  { %v5768_v13 = vsel %vm63_vm1, %v5764_v39, 0.0  ;;  %v5774_v60 = vmul.f32 %v5764_v39, %v5764_v39 }
0x2918   :  { %5769 = vadd.xlane.f32.xlu2 %v5768_v13  ;;  %5909 = vmatpush.msrb.mxu0 %v6411_v61  ;;  %v6454_v13 = vld [vmem:[%s8817_s2 + $0x6e] ss:$0 sm:$0xff] }
0x2919   :  { %v5778_v0 = vsel %vm63_vm1, %v5774_v60, 0.0 }
0x291a   :  { %5779 = vadd.xlane.f32.xlu1 %v5778_v0  ;;  %5910 = vmatpush.msrb.mxu0 %v6410_v14 }
0x2920   :  { %5822 = vadd.xlane.f32.xlu2 %v5821_v46 }
0x2922   :  { %5832 = vadd.xlane.f32.xlu1 %v5831_v52 }
0x298b   :  { %v5770_v49 = vpop.xlane.xlu2 %5769 }
0x298c   :  { %v5772_v47 = vmul.f32 %v5770_v49, %v7036_v63 }
0x298d   :  { %v5780_v12 = vpop.xlane.xlu1 %5779 }
0x298e   :  { %v5784_v20 = vmul.f32 %v5772_v47, %v5772_v47  ;;  %v5782_v31 = vmul.f32 %v5780_v12, %v7036_v63  ;;  %v5788_v27 = vsub.f32 %v5764_v39, %v5772_v47  ;;  %v6455_v12 = vld [vmem:[%s8817_s2 + $0x30] ss:$0 sm:$0xff] }
0x2990   :  { %v5786_v3 = vsub.f32 %v5782_v31, %v5784_v20 }
0x2992   :  { %v5790_v11 = vadd.f32 1e-05, %v5786_v3 }
0x2993   :  { %v5823_v1 = vpop.xlane.xlu2 %5822 }
0x2994   :  { %6692 = vrsqrt.f32 %v5790_v11  ;;  %vm5807_vm7 = vweird.f32 %v5790_v11  ;;  %v5827_v41 = vmul.f32 %v5823_v1, %v7036_v63 }
0x2995   :  { %v5833_v56 = vpop.xlane.xlu1 %5832 }
0x2996   :  { %v5839_v25 = vmul.f32 %v5827_v41, %v5827_v41  ;;  %v5837_v5 = vmul.f32 %v5833_v56, %v7036_v63  ;;  %v5843_v57 = vsub.f32 %v8773_v54, %v5827_v41 }
0x2998   :  { %v5841_v40 = vsub.f32 %v5837_v5, %v5839_v25 }
0x299a   :  { %v6693_v50 = vpop.eup %6692  ;;  %v5845_v4 = vadd.f32 1e-05, %v5841_v40 }
0x299b   :  { %v5802_v51 = vmul.f32 %v6693_v50, %v5790_v11  ;;  %vm5808_vm6 = vweird.f32 %v6693_v50 }
0x299c   :  { %vm5809_vm8 = vmor %vm5807_vm7, %vm5808_vm6  ;;  %6694 = vrsqrt.f32 %v5845_v4  ;;  %vm5853_vm10 = vweird.f32 %v5845_v4 }
0x299d   :  { %v5803_v2 = vmul.f32 %v6693_v50, %v5802_v51 }
0x299f   :  { %v5804_v44 = vmul.f32 0.5, %v5803_v2 }
0x29a1   :  { %v5805_v18 = vsub.f32 1.5, %v5804_v44 }
0x29a2   :  { %v6695_v32 = vpop.eup %6694 }
0x29a3   :  { %v5806_v30 = vmul.f32 %v6693_v50, %v5805_v18  ;;  %v5848_v34 = vmul.f32 %v6695_v32, %v5845_v4  ;;  %vm5854_vm9 = vweird.f32 %v6695_v32 }
0x29a4   :  { %vm5855_vm11 = vmor %vm5853_vm10, %vm5854_vm9 }
0x29a5   :  { %v5810_v23 = vsel %vm5809_vm8, %v6693_v50, %v5806_v30  ;;  %v5849_v36 = vmul.f32 %v6695_v32, %v5848_v34 }
0x29a6   :  { %v5812_v48 = vmul.f32 %v5810_v23, %v5788_v27 }
0x29a7   :  { %v5850_v21 = vmul.f32 0.5, %v5849_v36 }
0x29a8   :  { %v5816_v9 = vmul.f32 %v6451_v42, %v5812_v48 }
0x29a9   :  { %v5851_v24 = vsub.f32 1.5, %v5850_v21 }
0x29aa   :  { %v5820_v10 = vadd.f32 %v6452_v59, %v5816_v9 }
0x29ab   :  { %v5852_v7 = vmul.f32 %v6695_v32, %v5851_v24 }
0x29ac   :  { %v5824_v37 = vsel %vm63_vm1, %v5820_v10, 0.0  ;;  %v5830_v28 = vmul.f32 %v5820_v10, %v5820_v10 }
0x29ad   :  { %5825 = vadd.xlane.f32.xlu0 %v5824_v37  ;;  %v5856_v35 = vsel %vm5855_vm11, %v6695_v32, %v5852_v7 }
0x29ae   :  { %v5834_v43 = vsel %vm63_vm1, %v5830_v28, 0.0  ;;  %v5867_v17 = vmul.f32 %v5856_v35, %v5843_v57 }
0x29af   :  { %5835 = vadd.xlane.f32.xlu2 %v5834_v43 }
0x2a20   :  { %v5826_v6 = vpop.xlane.xlu0 %5825 }
0x2a21   :  { %v5828_v33 = vmul.f32 %v5826_v6, %v7036_v63 }
0x2a22   :  { %v5836_v16 = vpop.xlane.xlu2 %5835 }
0x2a23   :  { %v5840_v58 = vmul.f32 %v5828_v33, %v5828_v33  ;;  %v5838_v26 = vmul.f32 %v5836_v16, %v7036_v63  ;;  %v6453_v63 = vld [vmem:[%s8817_s2 + $0x6d] ss:$0 sm:$0xff]  ;;  %v5844_v59 = vsub.f32 %v5820_v10, %v5828_v33 }
0x2a24   :  { %v5871_v45 = vmul.f32 %v6453_v63, %v5867_v17 }
0x2a25   :  { %v5842_v15 = vsub.f32 %v5838_v26, %v5840_v58 }
0x2a26   :  { %v5875_v53 = vadd.f32 %v6454_v13, %v5871_v45 }
0x2a27   :  { %v5846_v62 = vadd.f32 1e-05, %v5842_v15 }
0x2a28   :  { %v5878_v52 = vrot.slane %v5875_v53, 2 }
0x2a29   :  { %6696 = vrsqrt.f32 %v5846_v62  ;;  %vm5863_vm13 = vweird.f32 %v5846_v62 }
0x2a2f   :  { %v6697_v8 = vpop.eup %6696 }
0x2a30   :  { %v5858_v38 = vmul.f32 %v6697_v8, %v5846_v62  ;;  %vm5864_vm12 = vweird.f32 %v6697_v8 }
0x2a31   :  { %vm5865_vm14 = vmor %vm5863_vm13, %vm5864_vm12 }
0x2a32   :  { %v5859_v55 = vmul.f32 %v6697_v8, %v5858_v38 }
0x2a34   :  { %v5860_v42 = vmul.f32 0.5, %v5859_v55 }
0x2a36   :  { %v5861_v29 = vsub.f32 1.5, %v5860_v42 }
0x2a38   :  { %v5862_v39 = vmul.f32 %v6697_v8, %v5861_v29 }
0x2a3a   :  { %v5866_v60 = vsel %vm5865_vm14, %v6697_v8, %v5862_v39 }
0x2a3b   :  { %v5868_v0 = vmul.f32 %v5866_v60, %v5844_v59 }
0x2a3d   :  { %v5872_v54 = vmul.f32 %v6453_v63, %v5868_v0 }
0x2a3f   :  { %v5876_v46 = vadd.f32 %v6454_v13, %v5872_v54 }
0x2a41   :  { %v5881_v49 = vrot.slane %v5876_v46, 6 }
0x2a43   :  { %v5884_v47 = vsel %vm5883_vm2, %v5878_v52, %v5881_v49 }
0x2a44   :  { %6414 = vmatmul.msk.f32.vlgmr.msrb.gmra.mxu0 %vm63_vm1, %v5884_v47 }
0x2ac1   :  { %v5912_v20 = vpop.f32.mrf.mxu0 }
0x2ac2   :  { %v5913_v31 = vadd.f32 %v6455_v12, %v5912_v20 }
0x2ac4   :  { %5915 = vst.msk [vmem:[#allocation2] sm:$0xff] %vm63_vm1, %v5913_v31 }
0x2ac5   :  { %5926 = dma.vmem_to_hbm [thread:$0]  %s5922_s15, 128, %s5924_s18, [#allocation3]  }
0x2ac6   :  { %6722 = dma.done.wait [#allocation3], 128  }
0x2ac7   :  { %6723 = vsyncadd [#allocation3], 4294967168 }
0x2ac8   :  { %5931 = vsyncpa [#allocation3], 1 }

</bundles_post_ra>
